<compile_context>
chip_gen: v5e
topology: v5e:2x2
jax: 0.10.0
libtpu: 0.0.40
codegen_flags: <defaults>
</compile_context>

<pallas_src>
import functools

import jax
import jax.numpy as jnp
from jax import lax
from jax.experimental import pallas as pl
from jax.experimental.pallas import tpu as pltpu

LRELU_SLOPE = 0.1


def get_padding(kernel_size, dilation=1):
    return int((kernel_size * dilation - dilation) / 2)


def _round_up(x, m):
    return ((x + m - 1) // m) * m


# ----------------------------------------------------------------------------
# Fused ResBlock1 kernel: all (conv1, conv2) dilation pairs on one time tile.
# ----------------------------------------------------------------------------
def _resblock1_kernel(x_hbm, w1s_ref, b1s_ref, w2s_ref, b2s_ref, o_ref,
                      xbuf, sem, *, ksize, dils, tt, halo, win, seq_len,
                      compute_dtype):
    """x_hbm   : (B, t_up + 2*halo, C) halo-padded input (zeros outside [0,T)),
                 resident in HBM, streamed in `compute_dtype`.
       w1s/w2s : (n_pairs, K*C, C) flattened conv weights (compute_dtype, VMEM).
       b1s/b2s : (n_pairs, 1, C) biases (f32, VMEM).
       o_ref   : (tt, C) output tile (auto-pipelined, f32).
       xbuf    : (2, win, C) VMEM double buffer for the overlapping window.
       sem     : (2,) DMA semaphores."""
    b = pl.program_id(0)
    i = pl.program_id(1)
    n_t = pl.num_programs(1)

    def copy_for(bb, ii, slot):
        start = pl.multiple_of(ii * tt, 8)           # tt % 8 == 0, halo % 8 == 0
        return pltpu.make_async_copy(
            x_hbm.at[bb, pl.ds(start, win), :], xbuf.at[slot], sem.at[slot])

    # Prime the double buffer at the start of every batch row.  Kept per-row
    # (not per-grid) so the batch axis stays safely megacore-"parallel".
    # TODO(synk): cross-row prefetch with a per-core prime for v7x.
    @pl.when(i == 0)
    def _():
        copy_for(b, i, 0).start()

    # Prefetch the next window before waiting on / computing the current one.
    @pl.when(i + 1 < n_t)
    def _():
        # The clamp only keeps the never-executed false-path addresses
        # in-bounds (defensive); when the branch runs, nxt == i + 1.
        nxt = jnp.minimum(i + 1, n_t - 1)
        copy_for(b, nxt, (i + 1) % 2).start()

    copy_for(b, i, i % 2).wait()

    xw = xbuf[i % 2].astype(jnp.float32)             # (win, C), f32 math
    base = i * tt - halo                             # global pos of window row 0

    cur = xw        # residual-stream window (f32); zero outside [0, seq_len)
    off = 0         # static: cur[r] <-> global position base + off + r
    L = win
    pad2 = get_padding(ksize, 1)

    for j, d in enumerate(dils):                     # unrolled: static shapes
        pad1 = get_padding(ksize, d)
        h = pad1 + pad2

        w1 = w1s_ref[j]
        w2 = w2s_ref[j]
        b1 = b1s_ref[j]
        b2 = b2s_ref[j]

        # leaky_relu in f32 (hoisted out of the tap slicing); cast once to the
        # MXU operand dtype so the concat traffic is also narrow.
        a1 = jnp.where(cur >= 0, cur, LRELU_SLOPE * cur).astype(compute_dtype)

        # conv1 (dilation d): K taps collapsed into one K*C-deep contraction.
        L1 = L - 2 * pad1
        xcat1 = jnp.concatenate(
            [a1[k * d:k * d + L1, :] for k in range(ksize)], axis=-1)
        y1 = lax.dot_general(xcat1, w1, (((1,), (0,)), ((), ())),
                             preferred_element_type=jnp.float32)
        y1 = y1 + b1                                  # f32 bias add

        a2 = jnp.where(y1 >= 0, y1, LRELU_SLOPE * y1)
        # PyTorch zero-pads conv2's input (= lrelu(conv1 out), length T):
        # zero rows whose global position lies outside [0, T).
        pos1 = base + (off + pad1) + lax.broadcasted_iota(jnp.int32, (L1, 1), 0)
        a2 = jnp.where((pos1 >= 0) & (pos1 < seq_len), a2, 0.0)
        a2 = a2.astype(compute_dtype)

        # conv2 (dilation 1).
        L2 = L1 - 2 * pad2
        xcat2 = jnp.concatenate(
            [a2[k:k + L2, :] for k in range(ksize)], axis=-1)
        y2 = lax.dot_general(xcat2, w2, (((1,), (0,)), ((), ())),
                             preferred_element_type=jnp.float32)

        res = cur[h:h + L2, :]                        # raw residual, f32
        nxt_cur = y2 + b2 + res
        # Keep the residual stream exactly zero outside [0, T): the next
        # pair's conv1 zero-padding relies on lrelu(0) == 0.
        pos2 = base + (off + h) + lax.broadcasted_iota(jnp.int32, (L2, 1), 0)
        cur = jnp.where((pos2 >= 0) & (pos2 < seq_len), nxt_cur, 0.0)

        off += h
        L = L2

    o_start = halo - off                              # static, >= 0
    o_ref[...] = cur[o_start:o_start + tt, :].astype(o_ref.dtype)


# ----------------------------------------------------------------------------
# Wrapper: one pallas_call per ResBlock1 forward.
# ----------------------------------------------------------------------------
def resblock1_forward(kparams, x_nct, *, kernel_size=3, dilations=(1, 3, 5),
                      time_tile=1024):
    """kparams = (w1s, b1s, w2s, b2s) from prepare_kernel_params.
    x_nct: (B, C, T) PyTorch layout.  Returns (B, C, T)."""
    w1s, b1s, w2s, b2s = kparams
    compute_dtype = w1s.dtype
    B, C, T = x_nct.shape

    x = jnp.transpose(x_nct, (0, 2, 1))               # -> (B, T, C)

    pad2 = get_padding(kernel_size, 1)
    total_h = sum(get_padding(kernel_size, d) + pad2 for d in dilations)
    halo = _round_up(total_h, 8)                      # sublane-aligned halo

    tt = _round_up(min(int(time_tile), _round_up(T, 8)), 8)
    n_t = pl.cdiv(T, tt)
    t_up = n_t * tt
    win = tt + 2 * halo

    # Single zero pad for the whole ResBlock (was one pad per conv pair);
    # stream the activation in the MXU operand dtype.
    x_pad = jnp.pad(x, ((0, 0), (halo, halo + (t_up - T)), (0, 0)))
    x_pad = x_pad.astype(compute_dtype)

    kern = functools.partial(
        _resblock1_kernel, ksize=kernel_size, dils=tuple(dilations),
        tt=tt, halo=halo, win=win, seq_len=T, compute_dtype=compute_dtype)

    n_pairs = len(dilations)
    itemsize = jnp.dtype(compute_dtype).itemsize
    flops = 2 * B * t_up * n_pairs * 2 * kernel_size * C * C
    bytes_accessed = (x_pad.size * itemsize + B * t_up * C * 4
                      + (w1s.size + w2s.size) * itemsize
                      + (b1s.size + b2s.size) * 4)

    # TODO(synk): pipeline_mode=pl.Buffered(1) on the resident weight/bias
    # specs (constant index_map -> second pipeline buffer is dead weight).
    out = pl.pallas_call(
        kern,
        out_shape=jax.ShapeDtypeStruct((B, t_up, C), jnp.float32),
        grid_spec=pltpu.PrefetchScalarGridSpec(
            num_scalar_prefetch=0,
            grid=(B, n_t),
            in_specs=[
                pl.BlockSpec(memory_space=pl.ANY),                  # x_pad (HBM)
                pl.BlockSpec(w1s.shape, lambda b, i: (0, 0, 0)),    # resident
                pl.BlockSpec(b1s.shape, lambda b, i: (0, 0, 0)),
                pl.BlockSpec(w2s.shape, lambda b, i: (0, 0, 0)),
                pl.BlockSpec(b2s.shape, lambda b, i: (0, 0, 0)),
            ],
            out_specs=pl.BlockSpec((None, tt, C), lambda b, i: (b, i, 0)),
            scratch_shapes=[
                pltpu.VMEM((2, win, C), x_pad.dtype),   # input double buffer
                pltpu.SemaphoreType.DMA((2,)),
            ]),
        compiler_params=pltpu.CompilerParams(
            dimension_semantics=("parallel", "arbitrary"),
            vmem_limit_bytes=40 * 1024 * 1024),
        cost_estimate=pl.CostEstimate(
            flops=flops, transcendentals=0, bytes_accessed=bytes_accessed),
    )(x_pad, w1s, b1s, w2s, b2s)

    out = out[:, :T, :]
    return jnp.transpose(out, (0, 2, 1)).astype(x_nct.dtype)


# ----------------------------------------------------------------------------
# Parameters (weight_norm folds into the effective weight for the forward pass)
# ----------------------------------------------------------------------------
def build_params(key, channels, kernel_size=3, dilation=(1, 3, 5)):
    """PyTorch layout: Conv1d weight (Cout, Cin, K), bias (Cout,)."""
    n = len(dilation)
    keys = jax.random.split(key, 4 * n)
    convs1, convs2 = [], []
    for j in range(n):
        w1 = 0.01 * jax.random.normal(keys[4 * j + 0],
                                      (channels, channels, kernel_size), jnp.float32)
        b1 = 0.01 * jax.random.normal(keys[4 * j + 1], (channels,), jnp.float32)
        w2 = 0.01 * jax.random.normal(keys[4 * j + 2],
                                      (channels, channels, kernel_size), jnp.float32)
        b2 = 0.01 * jax.random.normal(keys[4 * j + 3], (channels,), jnp.float32)
        convs1.append((w1, b1))
        convs2.append((w2, b2))
    return {'convs1': convs1, 'convs2': convs2,
            'kernel_size': kernel_size, 'dilation': tuple(dilation)}


def prepare_kernel_params(params, compute_dtype=jnp.bfloat16):
    """One-time re-layout for the Pallas kernel:
    weights (Cout, Cin, K) -> stacked (n_pairs, K*Cin, Cout) in compute_dtype;
    biases -> stacked (n_pairs, 1, Cout) kept in f32."""
    def flat(w):
        return jnp.transpose(w, (2, 1, 0)).reshape(-1, w.shape[0])
    w1s = jnp.stack([flat(w) for w, _ in params['convs1']]).astype(compute_dtype)
    b1s = jnp.stack([b.reshape(1, -1) for _, b in params['convs1']]).astype(jnp.float32)
    w2s = jnp.stack([flat(w) for w, _ in params['convs2']]).astype(compute_dtype)
    b2s = jnp.stack([b.reshape(1, -1) for _, b in params['convs2']]).astype(jnp.float32)
    return (w1s, b1s, w2s, b2s)


# ----------------------------------------------------------------------------
# Pure-JAX reference (NCT, mirrors the PyTorch module) for correctness check
# ----------------------------------------------------------------------------
def _lrelu(x, s):
    return jnp.where(x >= 0, x, s * x)


def _conv1d_ref(x, w, b, dilation=1, padding=0):
    y = jax.lax.conv_general_dilated(
        x, w, window_strides=(1,), padding=[(padding, padding)],
        rhs_dilation=(dilation,), dimension_numbers=('NCH', 'OIH', 'NCH'),
        precision=jax.lax.Precision.HIGHEST)
    return y + b[None, :, None]


def resblock1_ref(params, x):
    k = params['kernel_size']
    for (w1, b1), (w2, b2), d in zip(params['convs1'], params['convs2'],
                                     params['dilation']):
        xt = _lrelu(x, LRELU_SLOPE)
        xt = _conv1d_ref(xt, w1, b1, dilation=d, padding=get_padding(k, d))
        xt = _lrelu(xt, LRELU_SLOPE)
        xt = _conv1d_ref(xt, w2, b2, dilation=1, padding=get_padding(k, 1))
        x = xt + x
    return x


# ----------------------------------------------------------------------------
if __name__ == "__main__":
    B, C, T = 2, 128, 1000          # C = 128 -> channels lane-dense
    K, DIL = 3, (1, 3, 5)

    key = jax.random.PRNGKey(0)
    kp, kx = jax.random.split(key)
    params = build_params(kp, C, kernel_size=K, dilation=DIL)
    x = jax.random.normal(kx, (B, C, T), jnp.float32)   # PyTorch NCT layout

    y_ref = resblock1_ref(params, x)

    # f32 path: tight check of the (boundary-corrected) kernel semantics.
    # time_tile=256 -> 4 time tiles per row, exercising the double-buffered
    # halo prefetch, the boundary masks on first/last tiles and the T < t_up
    # round-up slice.  (Production default is time_tile=1024.)
    kp_f32 = prepare_kernel_params(params, jnp.float32)
    fwd_f32 = jax.jit(functools.partial(resblock1_forward, kernel_size=K,
                                        dilations=DIL, time_tile=256))
    y_f32 = fwd_f32(kp_f32, x)
    jax.block_until_ready(y_f32)
    assert y_f32.shape == (B, C, T)
    err32 = float(jnp.max(jnp.abs(y_f32 - y_ref)))
    assert bool(jnp.allclose(y_f32, y_ref, rtol=1e-3, atol=1e-4)), \
        f"f32 max|err|={err32}"

    # bf16 MXU-operand path (production default): looser tolerance vs f32 ref.
    kp_bf16 = prepare_kernel_params(params, jnp.bfloat16)
    fwd_bf16 = jax.jit(functools.partial(resblock1_forward, kernel_size=K,
                                         dilations=DIL, time_tile=256))
    y_bf16 = fwd_bf16(kp_bf16, x)
    jax.block_until_ready(y_bf16)
    errbf = float(jnp.max(jnp.abs(y_bf16 - y_ref)))
    assert bool(jnp.allclose(y_bf16, y_ref, rtol=5e-2, atol=5e-2)), \
        f"bf16 max|err|={errbf}"

    print("KERNEL_OK")
</pallas_src>

<mosaic_0001>
module attributes {stable_mosaic.version = 11 : i64} {
  func.func @_resblock1_kernel(%arg0: i32, %arg1: i32, %arg2: memref<2x1056x128xf32, #tpu.memory_space<any>>, %arg3: memref<3x384x128xf32, #tpu.memory_space<vmem>>, %arg4: memref<3x1x128xf32, #tpu.memory_space<vmem>>, %arg5: memref<3x384x128xf32, #tpu.memory_space<vmem>>, %arg6: memref<3x1x128xf32, #tpu.memory_space<vmem>>, %arg7: memref<1x256x128xf32, #tpu.memory_space<vmem>>, %arg8: memref<2x288x128xf32, #tpu.memory_space<vmem>>, %arg9: memref<2x!tpu.dma_semaphore, #tpu.memory_space<semaphore_mem>>) attributes {dimension_semantics = [#tpu.dimension_semantics<parallel>, #tpu.dimension_semantics<arbitrary>], iteration_bounds = array<i64: 2, 4>, scalar_prefetch = 0 : i64, scratch_operands = 2 : i64, tpu.core_type = #tpu.core_type<tc>, window_params = [{}, {pipeline_mode = #tpu.pipeline_mode<synchronous>, transform_indices = @transform_1, window_bounds = array<i64: 3, 384, 128>}, {pipeline_mode = #tpu.pipeline_mode<synchronous>, transform_indices = @transform_2, window_bounds = array<i64: 3, 1, 128>}, {pipeline_mode = #tpu.pipeline_mode<synchronous>, transform_indices = @transform_3, window_bounds = array<i64: 3, 384, 128>}, {pipeline_mode = #tpu.pipeline_mode<synchronous>, transform_indices = @transform_4, window_bounds = array<i64: 3, 1, 128>}, {transform_indices = @transform_5, window_bounds = array<i64: 1, 256, 128>}]} {
    %c0_i32 = arith.constant 0 : i32
    %0 = arith.cmpi eq, %arg1, %c0_i32 : i32
    %1 = arith.extui %0 : i1 to i32
    %c0_i32_0 = arith.constant 0 : i32
    %2 = arith.cmpi ne, %1, %c0_i32_0 : i32
    scf.if %2 {
      %c256_i32_91 = arith.constant 256 : i32
      %224 = arith.muli %arg1, %c256_i32_91 : i32
      %225 = tpu.assume_multiple %224, 8 : i32
      %c0_i32_92 = arith.constant 0 : i32
      %c0_i32_93 = arith.constant 0 : i32
      %c0_i32_94 = arith.constant 0 : i32
      %226 = tpu.memref_slice %arg2[%arg0, %225, %c0_i32_94] : memref<2x1056x128xf32, #tpu.memory_space<any>> -> memref<1x288x128xf32, #tpu.memory_space<any>>
      %227 = tpu.memref_squeeze %226 : memref<1x288x128xf32, #tpu.memory_space<any>> -> memref<288x128xf32, #tpu.memory_space<any>>
      %c0_i32_95 = arith.constant 0 : i32
      %c0_i32_96 = arith.constant 0 : i32
      %228 = tpu.memref_slice %arg8[%c0_i32_92, %c0_i32_95, %c0_i32_96] : memref<2x288x128xf32, #tpu.memory_space<vmem>> -> memref<1x288x128xf32, #tpu.memory_space<vmem>>
      %229 = tpu.memref_squeeze %228 : memref<1x288x128xf32, #tpu.memory_space<vmem>> -> memref<288x128xf32, #tpu.memory_space<vmem>>
      %230 = tpu.memref_slice %arg9[%c0_i32_93] : memref<2x!tpu.dma_semaphore, #tpu.memory_space<semaphore_mem>> -> memref<1x!tpu.dma_semaphore, #tpu.memory_space<semaphore_mem>>
      %231 = tpu.memref_squeeze %230 : memref<1x!tpu.dma_semaphore, #tpu.memory_space<semaphore_mem>> -> memref<!tpu.dma_semaphore, #tpu.memory_space<semaphore_mem>>
      tpu.enqueue_dma source(%227 : memref<288x128xf32, #tpu.memory_space<any>>) target(%229 : memref<288x128xf32, #tpu.memory_space<vmem>>) target_semaphore(%231 : memref<!tpu.dma_semaphore, #tpu.memory_space<semaphore_mem>>)
    } else {
    }
    %c1_i32 = arith.constant 1 : i32
    %3 = arith.addi %arg1, %c1_i32 : i32
    %c4_i32 = arith.constant 4 : i32
    %4 = arith.cmpi slt, %3, %c4_i32 : i32
    %5 = arith.extui %4 : i1 to i32
    %c0_i32_1 = arith.constant 0 : i32
    %6 = arith.cmpi ne, %5, %c0_i32_1 : i32
    scf.if %6 {
      %c1_i32_91 = arith.constant 1 : i32
      %224 = arith.addi %arg1, %c1_i32_91 : i32
      %c3_i32 = arith.constant 3 : i32
      %225 = arith.minsi %224, %c3_i32 : i32
      %c1_i32_92 = arith.constant 1 : i32
      %226 = arith.addi %arg1, %c1_i32_92 : i32
      %c2_i32_93 = arith.constant 2 : i32
      %c0_i32_94 = arith.constant 0 : i32
      %227 = arith.cmpi eq, %c2_i32_93, %c0_i32_94 : i32
      %c1_i32_95 = arith.constant 1 : i32
      %228 = arith.select %227, %c1_i32_95, %c2_i32_93 : i32
      %229 = arith.remsi %226, %228 : i32
      %c0_i32_96 = arith.constant 0 : i32
      %230 = arith.cmpi ne, %229, %c0_i32_96 : i32
      %c0_i32_97 = arith.constant 0 : i32
      %231 = arith.cmpi slt, %229, %c0_i32_97 : i32
      %c0_i32_98 = arith.constant 0 : i32
      %232 = arith.cmpi slt, %228, %c0_i32_98 : i32
      %233 = arith.xori %231, %232 : i1
      %234 = arith.andi %233, %230 : i1
      %235 = arith.addi %229, %228 : i32
      %236 = arith.select %234, %235, %229 : i32
      %c256_i32_99 = arith.constant 256 : i32
      %237 = arith.muli %225, %c256_i32_99 : i32
      %238 = tpu.assume_multiple %237, 8 : i32
      %c0_i32_100 = arith.constant 0 : i32
      %239 = tpu.memref_slice %arg2[%arg0, %238, %c0_i32_100] : memref<2x1056x128xf32, #tpu.memory_space<any>> -> memref<1x288x128xf32, #tpu.memory_space<any>>
      %240 = tpu.memref_squeeze %239 : memref<1x288x128xf32, #tpu.memory_space<any>> -> memref<288x128xf32, #tpu.memory_space<any>>
      %c0_i32_101 = arith.constant 0 : i32
      %c0_i32_102 = arith.constant 0 : i32
      %241 = tpu.memref_slice %arg8[%236, %c0_i32_101, %c0_i32_102] : memref<2x288x128xf32, #tpu.memory_space<vmem>> -> memref<1x288x128xf32, #tpu.memory_space<vmem>>
      %242 = tpu.memref_squeeze %241 : memref<1x288x128xf32, #tpu.memory_space<vmem>> -> memref<288x128xf32, #tpu.memory_space<vmem>>
      %243 = tpu.memref_slice %arg9[%236] : memref<2x!tpu.dma_semaphore, #tpu.memory_space<semaphore_mem>> -> memref<1x!tpu.dma_semaphore, #tpu.memory_space<semaphore_mem>>
      %244 = tpu.memref_squeeze %243 : memref<1x!tpu.dma_semaphore, #tpu.memory_space<semaphore_mem>> -> memref<!tpu.dma_semaphore, #tpu.memory_space<semaphore_mem>>
      tpu.enqueue_dma source(%240 : memref<288x128xf32, #tpu.memory_space<any>>) target(%242 : memref<288x128xf32, #tpu.memory_space<vmem>>) target_semaphore(%244 : memref<!tpu.dma_semaphore, #tpu.memory_space<semaphore_mem>>)
    } else {
    }
    %c2_i32 = arith.constant 2 : i32
    %c0_i32_2 = arith.constant 0 : i32
    %7 = arith.cmpi eq, %c2_i32, %c0_i32_2 : i32
    %c1_i32_3 = arith.constant 1 : i32
    %8 = arith.select %7, %c1_i32_3, %c2_i32 : i32
    %9 = arith.remsi %arg1, %8 : i32
    %c0_i32_4 = arith.constant 0 : i32
    %10 = arith.cmpi ne, %9, %c0_i32_4 : i32
    %c0_i32_5 = arith.constant 0 : i32
    %11 = arith.cmpi slt, %9, %c0_i32_5 : i32
    %c0_i32_6 = arith.constant 0 : i32
    %12 = arith.cmpi slt, %8, %c0_i32_6 : i32
    %13 = arith.xori %11, %12 : i1
    %14 = arith.andi %13, %10 : i1
    %15 = arith.addi %9, %8 : i32
    %16 = arith.select %14, %15, %9 : i32
    %c256_i32 = arith.constant 256 : i32
    %17 = arith.muli %arg1, %c256_i32 : i32
    %18 = tpu.assume_multiple %17, 8 : i32
    %c0_i32_7 = arith.constant 0 : i32
    %19 = tpu.memref_slice %arg2[%arg0, %18, %c0_i32_7] : memref<2x1056x128xf32, #tpu.memory_space<any>> -> memref<1x288x128xf32, #tpu.memory_space<any>>
    %20 = tpu.memref_squeeze %19 : memref<1x288x128xf32, #tpu.memory_space<any>> -> memref<288x128xf32, #tpu.memory_space<any>>
    %c0_i32_8 = arith.constant 0 : i32
    %c0_i32_9 = arith.constant 0 : i32
    %21 = tpu.memref_slice %arg8[%16, %c0_i32_8, %c0_i32_9] : memref<2x288x128xf32, #tpu.memory_space<vmem>> -> memref<1x288x128xf32, #tpu.memory_space<vmem>>
    %22 = tpu.memref_squeeze %21 : memref<1x288x128xf32, #tpu.memory_space<vmem>> -> memref<288x128xf32, #tpu.memory_space<vmem>>
    %23 = tpu.memref_slice %arg9[%16] : memref<2x!tpu.dma_semaphore, #tpu.memory_space<semaphore_mem>> -> memref<1x!tpu.dma_semaphore, #tpu.memory_space<semaphore_mem>>
    %24 = tpu.memref_squeeze %23 : memref<1x!tpu.dma_semaphore, #tpu.memory_space<semaphore_mem>> -> memref<!tpu.dma_semaphore, #tpu.memory_space<semaphore_mem>>
    tpu.wait_dma2 semaphore(%24 : memref<!tpu.dma_semaphore, #tpu.memory_space<semaphore_mem>>) src(%20 : memref<288x128xf32, #tpu.memory_space<any>>) dst(%22 : memref<288x128xf32, #tpu.memory_space<vmem>>)
    %c2_i32_10 = arith.constant 2 : i32
    %c0_i32_11 = arith.constant 0 : i32
    %25 = arith.cmpi eq, %c2_i32_10, %c0_i32_11 : i32
    %c1_i32_12 = arith.constant 1 : i32
    %26 = arith.select %25, %c1_i32_12, %c2_i32_10 : i32
    %27 = arith.remsi %arg1, %26 : i32
    %c0_i32_13 = arith.constant 0 : i32
    %28 = arith.cmpi ne, %27, %c0_i32_13 : i32
    %c0_i32_14 = arith.constant 0 : i32
    %29 = arith.cmpi slt, %27, %c0_i32_14 : i32
    %c0_i32_15 = arith.constant 0 : i32
    %30 = arith.cmpi slt, %26, %c0_i32_15 : i32
    %31 = arith.xori %29, %30 : i1
    %32 = arith.andi %31, %28 : i1
    %33 = arith.addi %27, %26 : i32
    %34 = arith.select %32, %33, %27 : i32
    %35 = arith.index_cast %34 : i32 to index
    %c0 = arith.constant 0 : index
    %c0_16 = arith.constant 0 : index
    %36 = vector.load %arg8[%35, %c0, %c0_16] : memref<2x288x128xf32, #tpu.memory_space<vmem>>, vector<1x288x128xf32>
    %37 = vector.shape_cast %36 : vector<1x288x128xf32> to vector<288x128xf32>
    %c256_i32_17 = arith.constant 256 : i32
    %38 = arith.muli %arg1, %c256_i32_17 : i32
    %c16_i32 = arith.constant 16 : i32
    %39 = arith.subi %38, %c16_i32 : i32
    %c0_18 = arith.constant 0 : index
    %c0_19 = arith.constant 0 : index
    %c0_20 = arith.constant 0 : index
    %40 = vector.load %arg3[%c0_18, %c0_19, %c0_20] : memref<3x384x128xf32, #tpu.memory_space<vmem>>, vector<1x384x128xf32>
    %41 = vector.shape_cast %40 : vector<1x384x128xf32> to vector<384x128xf32>
    %c0_21 = arith.constant 0 : index
    %c0_22 = arith.constant 0 : index
    %c0_23 = arith.constant 0 : index
    %42 = vector.load %arg5[%c0_21, %c0_22, %c0_23] : memref<3x384x128xf32, #tpu.memory_space<vmem>>, vector<1x384x128xf32>
    %43 = vector.shape_cast %42 : vector<1x384x128xf32> to vector<384x128xf32>
    %c0_24 = arith.constant 0 : index
    %c0_25 = arith.constant 0 : index
    %c0_26 = arith.constant 0 : index
    %44 = vector.load %arg4[%c0_24, %c0_25, %c0_26] : memref<3x1x128xf32, #tpu.memory_space<vmem>>, vector<1x1x128xf32>
    %45 = vector.shape_cast %44 : vector<1x1x128xf32> to vector<1x128xf32>
    %c0_27 = arith.constant 0 : index
    %c0_28 = arith.constant 0 : index
    %c0_29 = arith.constant 0 : index
    %46 = vector.load %arg6[%c0_27, %c0_28, %c0_29] : memref<3x1x128xf32, #tpu.memory_space<vmem>>, vector<1x1x128xf32>
    %47 = vector.shape_cast %46 : vector<1x1x128xf32> to vector<1x128xf32>
    %cst = arith.constant 0.000000e+00 : f32
    %48 = vector.broadcast %cst : f32 to vector<288x128xf32>
    %49 = arith.cmpf oge, %37, %48 : vector<288x128xf32>
    %cst_30 = arith.constant 1.000000e-01 : f32
    %50 = vector.broadcast %cst_30 : f32 to vector<288x128xf32>
    %51 = arith.mulf %50, %37 : vector<288x128xf32>
    %52 = arith.select %49, %37, %51 : vector<288x128xi1>, vector<288x128xf32>
    %53 = vector.extract_strided_slice %52 {offsets = [0, 0], sizes = [286, 128], strides = [1, 1]} : vector<288x128xf32> to vector<286x128xf32>
    %54 = vector.extract_strided_slice %52 {offsets = [1, 0], sizes = [286, 128], strides = [1, 1]} : vector<288x128xf32> to vector<286x128xf32>
    %55 = vector.extract_strided_slice %52 {offsets = [2, 0], sizes = [286, 128], strides = [1, 1]} : vector<288x128xf32> to vector<286x128xf32>
    %56 = tpu.concatenate %53, %54, %55 in 1 : vector<286x128xf32>, vector<286x128xf32>, vector<286x128xf32> -> vector<286x384xf32>
    %cst_31 = arith.constant dense<0.000000e+00> : vector<286x128xf32>
    %57 = tpu.matmul %56, %41, %cst_31 {dimension_numbers = #tpu.dot_dimension_numbers<[1], [0], [0], [1], [0, 0, 1, 1], [], []>} : vector<286x384xf32>, vector<384x128xf32>, vector<286x128xf32> -> vector<286x128xf32>
    %58 = vector.broadcast %45 : vector<1x128xf32> to vector<286x128xf32>
    %59 = arith.addf %57, %58 : vector<286x128xf32>
    %cst_32 = arith.constant 0.000000e+00 : f32
    %60 = vector.broadcast %cst_32 : f32 to vector<286x128xf32>
    %61 = arith.cmpf oge, %59, %60 : vector<286x128xf32>
    %cst_33 = arith.constant 1.000000e-01 : f32
    %62 = vector.broadcast %cst_33 : f32 to vector<286x128xf32>
    %63 = arith.mulf %62, %59 : vector<286x128xf32>
    %64 = arith.select %61, %59, %63 : vector<286x128xi1>, vector<286x128xf32>
    %c1_i32_34 = arith.constant 1 : i32
    %65 = arith.addi %39, %c1_i32_34 : i32
    %66 = tpu.iota {dimensions = array<i32: 0>} : vector<286x1xi32>
    %67 = vector.broadcast %65 : i32 to vector<286x1xi32>
    %68 = arith.addi %67, %66 : vector<286x1xi32>
    %c0_i32_35 = arith.constant 0 : i32
    %69 = vector.broadcast %c0_i32_35 : i32 to vector<286x1xi32>
    %70 = arith.cmpi sge, %68, %69 : vector<286x1xi32>
    %c1000_i32 = arith.constant 1000 : i32
    %71 = vector.broadcast %c1000_i32 : i32 to vector<286x1xi32>
    %72 = arith.cmpi slt, %68, %71 : vector<286x1xi32>
    %73 = arith.andi %70, %72 : vector<286x1xi1>
    %cst_36 = arith.constant 0.000000e+00 : f32
    %74 = vector.shape_cast %73 : vector<286x1xi1> to vector<286x1xi1>
    %75 = vector.broadcast %74 : vector<286x1xi1> to vector<286x128xi1>
    %76 = vector.broadcast %cst_36 : f32 to vector<286x128xf32>
    %77 = arith.select %75, %64, %76 : vector<286x128xi1>, vector<286x128xf32>
    %78 = vector.extract_strided_slice %77 {offsets = [0, 0], sizes = [284, 128], strides = [1, 1]} : vector<286x128xf32> to vector<284x128xf32>
    %79 = vector.extract_strided_slice %77 {offsets = [1, 0], sizes = [284, 128], strides = [1, 1]} : vector<286x128xf32> to vector<284x128xf32>
    %80 = vector.extract_strided_slice %77 {offsets = [2, 0], sizes = [284, 128], strides = [1, 1]} : vector<286x128xf32> to vector<284x128xf32>
    %81 = tpu.concatenate %78, %79, %80 in 1 : vector<284x128xf32>, vector<284x128xf32>, vector<284x128xf32> -> vector<284x384xf32>
    %cst_37 = arith.constant dense<0.000000e+00> : vector<284x128xf32>
    %82 = tpu.matmul %81, %43, %cst_37 {dimension_numbers = #tpu.dot_dimension_numbers<[1], [0], [0], [1], [0, 0, 1, 1], [], []>} : vector<284x384xf32>, vector<384x128xf32>, vector<284x128xf32> -> vector<284x128xf32>
    %83 = vector.extract_strided_slice %37 {offsets = [2, 0], sizes = [284, 128], strides = [1, 1]} : vector<288x128xf32> to vector<284x128xf32>
    %84 = vector.broadcast %47 : vector<1x128xf32> to vector<284x128xf32>
    %85 = arith.addf %82, %84 : vector<284x128xf32>
    %86 = arith.addf %85, %83 : vector<284x128xf32>
    %c2_i32_38 = arith.constant 2 : i32
    %87 = arith.addi %39, %c2_i32_38 : i32
    %88 = tpu.iota {dimensions = array<i32: 0>} : vector<284x1xi32>
    %89 = vector.broadcast %87 : i32 to vector<284x1xi32>
    %90 = arith.addi %89, %88 : vector<284x1xi32>
    %c0_i32_39 = arith.constant 0 : i32
    %91 = vector.broadcast %c0_i32_39 : i32 to vector<284x1xi32>
    %92 = arith.cmpi sge, %90, %91 : vector<284x1xi32>
    %c1000_i32_40 = arith.constant 1000 : i32
    %93 = vector.broadcast %c1000_i32_40 : i32 to vector<284x1xi32>
    %94 = arith.cmpi slt, %90, %93 : vector<284x1xi32>
    %95 = arith.andi %92, %94 : vector<284x1xi1>
    %cst_41 = arith.constant 0.000000e+00 : f32
    %96 = vector.shape_cast %95 : vector<284x1xi1> to vector<284x1xi1>
    %97 = vector.broadcast %96 : vector<284x1xi1> to vector<284x128xi1>
    %98 = vector.broadcast %cst_41 : f32 to vector<284x128xf32>
    %99 = arith.select %97, %86, %98 : vector<284x128xi1>, vector<284x128xf32>
    %c1 = arith.constant 1 : index
    %c0_42 = arith.constant 0 : index
    %c0_43 = arith.constant 0 : index
    %100 = vector.load %arg3[%c1, %c0_42, %c0_43] : memref<3x384x128xf32, #tpu.memory_space<vmem>>, vector<1x384x128xf32>
    %101 = vector.shape_cast %100 : vector<1x384x128xf32> to vector<384x128xf32>
    %c1_44 = arith.constant 1 : index
    %c0_45 = arith.constant 0 : index
    %c0_46 = arith.constant 0 : index
    %102 = vector.load %arg5[%c1_44, %c0_45, %c0_46] : memref<3x384x128xf32, #tpu.memory_space<vmem>>, vector<1x384x128xf32>
    %103 = vector.shape_cast %102 : vector<1x384x128xf32> to vector<384x128xf32>
    %c1_47 = arith.constant 1 : index
    %c0_48 = arith.constant 0 : index
    %c0_49 = arith.constant 0 : index
    %104 = vector.load %arg4[%c1_47, %c0_48, %c0_49] : memref<3x1x128xf32, #tpu.memory_space<vmem>>, vector<1x1x128xf32>
    %105 = vector.shape_cast %104 : vector<1x1x128xf32> to vector<1x128xf32>
    %c1_50 = arith.constant 1 : index
    %c0_51 = arith.constant 0 : index
    %c0_52 = arith.constant 0 : index
    %106 = vector.load %arg6[%c1_50, %c0_51, %c0_52] : memref<3x1x128xf32, #tpu.memory_space<vmem>>, vector<1x1x128xf32>
    %107 = vector.shape_cast %106 : vector<1x1x128xf32> to vector<1x128xf32>
    %cst_53 = arith.constant 0.000000e+00 : f32
    %108 = vector.broadcast %cst_53 : f32 to vector<284x128xf32>
    %109 = arith.cmpf oge, %99, %108 : vector<284x128xf32>
    %cst_54 = arith.constant 1.000000e-01 : f32
    %110 = vector.broadcast %cst_54 : f32 to vector<284x128xf32>
    %111 = arith.mulf %110, %99 : vector<284x128xf32>
    %112 = arith.select %109, %99, %111 : vector<284x128xi1>, vector<284x128xf32>
    %113 = vector.extract_strided_slice %112 {offsets = [0, 0], sizes = [278, 128], strides = [1, 1]} : vector<284x128xf32> to vector<278x128xf32>
    %114 = vector.extract_strided_slice %112 {offsets = [3, 0], sizes = [278, 128], strides = [1, 1]} : vector<284x128xf32> to vector<278x128xf32>
    %115 = vector.extract_strided_slice %112 {offsets = [6, 0], sizes = [278, 128], strides = [1, 1]} : vector<284x128xf32> to vector<278x128xf32>
    %116 = tpu.concatenate %113, %114, %115 in 1 : vector<278x128xf32>, vector<278x128xf32>, vector<278x128xf32> -> vector<278x384xf32>
    %cst_55 = arith.constant dense<0.000000e+00> : vector<278x128xf32>
    %117 = tpu.matmul %116, %101, %cst_55 {dimension_numbers = #tpu.dot_dimension_numbers<[1], [0], [0], [1], [0, 0, 1, 1], [], []>} : vector<278x384xf32>, vector<384x128xf32>, vector<278x128xf32> -> vector<278x128xf32>
    %118 = vector.broadcast %105 : vector<1x128xf32> to vector<278x128xf32>
    %119 = arith.addf %117, %118 : vector<278x128xf32>
    %cst_56 = arith.constant 0.000000e+00 : f32
    %120 = vector.broadcast %cst_56 : f32 to vector<278x128xf32>
    %121 = arith.cmpf oge, %119, %120 : vector<278x128xf32>
    %cst_57 = arith.constant 1.000000e-01 : f32
    %122 = vector.broadcast %cst_57 : f32 to vector<278x128xf32>
    %123 = arith.mulf %122, %119 : vector<278x128xf32>
    %124 = arith.select %121, %119, %123 : vector<278x128xi1>, vector<278x128xf32>
    %c5_i32 = arith.constant 5 : i32
    %125 = arith.addi %39, %c5_i32 : i32
    %126 = tpu.iota {dimensions = array<i32: 0>} : vector<278x1xi32>
    %127 = vector.broadcast %125 : i32 to vector<278x1xi32>
    %128 = arith.addi %127, %126 : vector<278x1xi32>
    %c0_i32_58 = arith.constant 0 : i32
    %129 = vector.broadcast %c0_i32_58 : i32 to vector<278x1xi32>
    %130 = arith.cmpi sge, %128, %129 : vector<278x1xi32>
    %c1000_i32_59 = arith.constant 1000 : i32
    %131 = vector.broadcast %c1000_i32_59 : i32 to vector<278x1xi32>
    %132 = arith.cmpi slt, %128, %131 : vector<278x1xi32>
    %133 = arith.andi %130, %132 : vector<278x1xi1>
    %cst_60 = arith.constant 0.000000e+00 : f32
    %134 = vector.shape_cast %133 : vector<278x1xi1> to vector<278x1xi1>
    %135 = vector.broadcast %134 : vector<278x1xi1> to vector<278x128xi1>
    %136 = vector.broadcast %cst_60 : f32 to vector<278x128xf32>
    %137 = arith.select %135, %124, %136 : vector<278x128xi1>, vector<278x128xf32>
    %138 = vector.extract_strided_slice %137 {offsets = [0, 0], sizes = [276, 128], strides = [1, 1]} : vector<278x128xf32> to vector<276x128xf32>
    %139 = vector.extract_strided_slice %137 {offsets = [1, 0], sizes = [276, 128], strides = [1, 1]} : vector<278x128xf32> to vector<276x128xf32>
    %140 = vector.extract_strided_slice %137 {offsets = [2, 0], sizes = [276, 128], strides = [1, 1]} : vector<278x128xf32> to vector<276x128xf32>
    %141 = tpu.concatenate %138, %139, %140 in 1 : vector<276x128xf32>, vector<276x128xf32>, vector<276x128xf32> -> vector<276x384xf32>
    %cst_61 = arith.constant dense<0.000000e+00> : vector<276x128xf32>
    %142 = tpu.matmul %141, %103, %cst_61 {dimension_numbers = #tpu.dot_dimension_numbers<[1], [0], [0], [1], [0, 0, 1, 1], [], []>} : vector<276x384xf32>, vector<384x128xf32>, vector<276x128xf32> -> vector<276x128xf32>
    %143 = vector.extract_strided_slice %99 {offsets = [4, 0], sizes = [276, 128], strides = [1, 1]} : vector<284x128xf32> to vector<276x128xf32>
    %144 = vector.broadcast %107 : vector<1x128xf32> to vector<276x128xf32>
    %145 = arith.addf %142, %144 : vector<276x128xf32>
    %146 = arith.addf %145, %143 : vector<276x128xf32>
    %c6_i32 = arith.constant 6 : i32
    %147 = arith.addi %39, %c6_i32 : i32
    %148 = tpu.iota {dimensions = array<i32: 0>} : vector<276x1xi32>
    %149 = vector.broadcast %147 : i32 to vector<276x1xi32>
    %150 = arith.addi %149, %148 : vector<276x1xi32>
    %c0_i32_62 = arith.constant 0 : i32
    %151 = vector.broadcast %c0_i32_62 : i32 to vector<276x1xi32>
    %152 = arith.cmpi sge, %150, %151 : vector<276x1xi32>
    %c1000_i32_63 = arith.constant 1000 : i32
    %153 = vector.broadcast %c1000_i32_63 : i32 to vector<276x1xi32>
    %154 = arith.cmpi slt, %150, %153 : vector<276x1xi32>
    %155 = arith.andi %152, %154 : vector<276x1xi1>
    %cst_64 = arith.constant 0.000000e+00 : f32
    %156 = vector.shape_cast %155 : vector<276x1xi1> to vector<276x1xi1>
    %157 = vector.broadcast %156 : vector<276x1xi1> to vector<276x128xi1>
    %158 = vector.broadcast %cst_64 : f32 to vector<276x128xf32>
    %159 = arith.select %157, %146, %158 : vector<276x128xi1>, vector<276x128xf32>
    %c2 = arith.constant 2 : index
    %c0_65 = arith.constant 0 : index
    %c0_66 = arith.constant 0 : index
    %160 = vector.load %arg3[%c2, %c0_65, %c0_66] : memref<3x384x128xf32, #tpu.memory_space<vmem>>, vector<1x384x128xf32>
    %161 = vector.shape_cast %160 : vector<1x384x128xf32> to vector<384x128xf32>
    %c2_67 = arith.constant 2 : index
    %c0_68 = arith.constant 0 : index
    %c0_69 = arith.constant 0 : index
    %162 = vector.load %arg5[%c2_67, %c0_68, %c0_69] : memref<3x384x128xf32, #tpu.memory_space<vmem>>, vector<1x384x128xf32>
    %163 = vector.shape_cast %162 : vector<1x384x128xf32> to vector<384x128xf32>
    %c2_70 = arith.constant 2 : index
    %c0_71 = arith.constant 0 : index
    %c0_72 = arith.constant 0 : index
    %164 = vector.load %arg4[%c2_70, %c0_71, %c0_72] : memref<3x1x128xf32, #tpu.memory_space<vmem>>, vector<1x1x128xf32>
    %165 = vector.shape_cast %164 : vector<1x1x128xf32> to vector<1x128xf32>
    %c2_73 = arith.constant 2 : index
    %c0_74 = arith.constant 0 : index
    %c0_75 = arith.constant 0 : index
    %166 = vector.load %arg6[%c2_73, %c0_74, %c0_75] : memref<3x1x128xf32, #tpu.memory_space<vmem>>, vector<1x1x128xf32>
    %167 = vector.shape_cast %166 : vector<1x1x128xf32> to vector<1x128xf32>
    %cst_76 = arith.constant 0.000000e+00 : f32
    %168 = vector.broadcast %cst_76 : f32 to vector<276x128xf32>
    %169 = arith.cmpf oge, %159, %168 : vector<276x128xf32>
    %cst_77 = arith.constant 1.000000e-01 : f32
    %170 = vector.broadcast %cst_77 : f32 to vector<276x128xf32>
    %171 = arith.mulf %170, %159 : vector<276x128xf32>
    %172 = arith.select %169, %159, %171 : vector<276x128xi1>, vector<276x128xf32>
    %173 = vector.extract_strided_slice %172 {offsets = [0, 0], sizes = [266, 128], strides = [1, 1]} : vector<276x128xf32> to vector<266x128xf32>
    %174 = vector.extract_strided_slice %172 {offsets = [5, 0], sizes = [266, 128], strides = [1, 1]} : vector<276x128xf32> to vector<266x128xf32>
    %175 = vector.extract_strided_slice %172 {offsets = [10, 0], sizes = [266, 128], strides = [1, 1]} : vector<276x128xf32> to vector<266x128xf32>
    %176 = tpu.concatenate %173, %174, %175 in 1 : vector<266x128xf32>, vector<266x128xf32>, vector<266x128xf32> -> vector<266x384xf32>
    %cst_78 = arith.constant dense<0.000000e+00> : vector<266x128xf32>
    %177 = tpu.matmul %176, %161, %cst_78 {dimension_numbers = #tpu.dot_dimension_numbers<[1], [0], [0], [1], [0, 0, 1, 1], [], []>} : vector<266x384xf32>, vector<384x128xf32>, vector<266x128xf32> -> vector<266x128xf32>
    %178 = vector.broadcast %165 : vector<1x128xf32> to vector<266x128xf32>
    %179 = arith.addf %177, %178 : vector<266x128xf32>
    %cst_79 = arith.constant 0.000000e+00 : f32
    %180 = vector.broadcast %cst_79 : f32 to vector<266x128xf32>
    %181 = arith.cmpf oge, %179, %180 : vector<266x128xf32>
    %cst_80 = arith.constant 1.000000e-01 : f32
    %182 = vector.broadcast %cst_80 : f32 to vector<266x128xf32>
    %183 = arith.mulf %182, %179 : vector<266x128xf32>
    %184 = arith.select %181, %179, %183 : vector<266x128xi1>, vector<266x128xf32>
    %c11_i32 = arith.constant 11 : i32
    %185 = arith.addi %39, %c11_i32 : i32
    %186 = tpu.iota {dimensions = array<i32: 0>} : vector<266x1xi32>
    %187 = vector.broadcast %185 : i32 to vector<266x1xi32>
    %188 = arith.addi %187, %186 : vector<266x1xi32>
    %c0_i32_81 = arith.constant 0 : i32
    %189 = vector.broadcast %c0_i32_81 : i32 to vector<266x1xi32>
    %190 = arith.cmpi sge, %188, %189 : vector<266x1xi32>
    %c1000_i32_82 = arith.constant 1000 : i32
    %191 = vector.broadcast %c1000_i32_82 : i32 to vector<266x1xi32>
    %192 = arith.cmpi slt, %188, %191 : vector<266x1xi32>
    %193 = arith.andi %190, %192 : vector<266x1xi1>
    %cst_83 = arith.constant 0.000000e+00 : f32
    %194 = vector.shape_cast %193 : vector<266x1xi1> to vector<266x1xi1>
    %195 = vector.broadcast %194 : vector<266x1xi1> to vector<266x128xi1>
    %196 = vector.broadcast %cst_83 : f32 to vector<266x128xf32>
    %197 = arith.select %195, %184, %196 : vector<266x128xi1>, vector<266x128xf32>
    %198 = vector.extract_strided_slice %197 {offsets = [0, 0], sizes = [264, 128], strides = [1, 1]} : vector<266x128xf32> to vector<264x128xf32>
    %199 = vector.extract_strided_slice %197 {offsets = [1, 0], sizes = [264, 128], strides = [1, 1]} : vector<266x128xf32> to vector<264x128xf32>
    %200 = vector.extract_strided_slice %197 {offsets = [2, 0], sizes = [264, 128], strides = [1, 1]} : vector<266x128xf32> to vector<264x128xf32>
    %201 = tpu.concatenate %198, %199, %200 in 1 : vector<264x128xf32>, vector<264x128xf32>, vector<264x128xf32> -> vector<264x384xf32>
    %cst_84 = arith.constant dense<0.000000e+00> : vector<264x128xf32>
    %202 = tpu.matmul %201, %163, %cst_84 {dimension_numbers = #tpu.dot_dimension_numbers<[1], [0], [0], [1], [0, 0, 1, 1], [], []>} : vector<264x384xf32>, vector<384x128xf32>, vector<264x128xf32> -> vector<264x128xf32>
    %203 = vector.extract_strided_slice %159 {offsets = [6, 0], sizes = [264, 128], strides = [1, 1]} : vector<276x128xf32> to vector<264x128xf32>
    %204 = vector.broadcast %167 : vector<1x128xf32> to vector<264x128xf32>
    %205 = arith.addf %202, %204 : vector<264x128xf32>
    %206 = arith.addf %205, %203 : vector<264x128xf32>
    %c12_i32 = arith.constant 12 : i32
    %207 = arith.addi %39, %c12_i32 : i32
    %208 = tpu.iota {dimensions = array<i32: 0>} : vector<264x1xi32>
    %209 = vector.broadcast %207 : i32 to vector<264x1xi32>
    %210 = arith.addi %209, %208 : vector<264x1xi32>
    %c0_i32_85 = arith.constant 0 : i32
    %211 = vector.broadcast %c0_i32_85 : i32 to vector<264x1xi32>
    %212 = arith.cmpi sge, %210, %211 : vector<264x1xi32>
    %c1000_i32_86 = arith.constant 1000 : i32
    %213 = vector.broadcast %c1000_i32_86 : i32 to vector<264x1xi32>
    %214 = arith.cmpi slt, %210, %213 : vector<264x1xi32>
    %215 = arith.andi %212, %214 : vector<264x1xi1>
    %cst_87 = arith.constant 0.000000e+00 : f32
    %216 = vector.shape_cast %215 : vector<264x1xi1> to vector<264x1xi1>
    %217 = vector.broadcast %216 : vector<264x1xi1> to vector<264x128xi1>
    %218 = vector.broadcast %cst_87 : f32 to vector<264x128xf32>
    %219 = arith.select %217, %206, %218 : vector<264x128xi1>, vector<264x128xf32>
    %220 = vector.extract_strided_slice %219 {offsets = [4, 0], sizes = [256, 128], strides = [1, 1]} : vector<264x128xf32> to vector<256x128xf32>
    %c0_88 = arith.constant 0 : index
    %c0_89 = arith.constant 0 : index
    %c0_90 = arith.constant 0 : index
    %221 = vector.load %arg7[%c0_88, %c0_89, %c0_90] : memref<1x256x128xf32, #tpu.memory_space<vmem>>, vector<1x256x128xf32>
    %222 = vector.shape_cast %221 : vector<1x256x128xf32> to vector<256x128xf32>
    %223 = vector.shape_cast %220 : vector<256x128xf32> to vector<1x256x128xf32>
    tpu.vector_store %arg7[%c0_88, %c0_89, %c0_90], %223 {strides = array<i32>} : memref<1x256x128xf32, #tpu.memory_space<vmem>>, vector<1x256x128xf32>,
    return
  }
  func.func @transform_1(%arg0: i32, %arg1: i32) -> (i32, i32, i32) {
    %c0_i32 = arith.constant 0 : i32
    %c0_i32_0 = arith.constant 0 : i32
    %c0_i32_1 = arith.constant 0 : i32
    %c0_i32_2 = arith.constant 0 : i32
    return %c0_i32, %c0_i32_0, %c0_i32_1 : i32, i32, i32
  }
  func.func @transform_2(%arg0: i32, %arg1: i32) -> (i32, i32, i32) {
    %c0_i32 = arith.constant 0 : i32
    %c0_i32_0 = arith.constant 0 : i32
    %c0_i32_1 = arith.constant 0 : i32
    %c0_i32_2 = arith.constant 0 : i32
    return %c0_i32, %c0_i32_0, %c0_i32_1 : i32, i32, i32
  }
  func.func @transform_3(%arg0: i32, %arg1: i32) -> (i32, i32, i32) {
    %c0_i32 = arith.constant 0 : i32
    %c0_i32_0 = arith.constant 0 : i32
    %c0_i32_1 = arith.constant 0 : i32
    %c0_i32_2 = arith.constant 0 : i32
    return %c0_i32, %c0_i32_0, %c0_i32_1 : i32, i32, i32
  }
  func.func @transform_4(%arg0: i32, %arg1: i32) -> (i32, i32, i32) {
    %c0_i32 = arith.constant 0 : i32
    %c0_i32_0 = arith.constant 0 : i32
    %c0_i32_1 = arith.constant 0 : i32
    %c0_i32_2 = arith.constant 0 : i32
    return %c0_i32, %c0_i32_0, %c0_i32_1 : i32, i32, i32
  }
  func.func @transform_5(%arg0: i32, %arg1: i32) -> (i32, i32, i32) {
    %c0_i32 = arith.constant 0 : i32
    %c0_i32_0 = arith.constant 0 : i32
    return %arg0, %arg1, %c0_i32 : i32, i32, i32
  }
}

</mosaic_0001>

<bundles_post_ra>
// kernel: resblock1_forward.1
= control target key start
LH: loop header
LB: loop body
LE: loop exit
PB: predicated region body
PF: predicated region fallthrough
CT: control target
= control target key end

     0   :  { %s7766_s18 = smov 0   ;;  %s7768_s19 = smov 0   ;;  %s13142_s0 = inlined_call_operand.vmem [shape: f32[2,1056,128], index: 0, kind: input, shape index: {}]   ;;  %s13143_s1 = inlined_call_operand.vmem [shape: f32[3,384,128], index: 1, kind: input, shape index: {}]   ;;  %s13144_s2 = inlined_call_operand.vmem [shape: f32[3,1,128], index: 2, kind: input, shape index: {}]   ;;  %s13145_s3 = inlined_call_operand.vmem [shape: f32[3,384,128], index: 3, kind: input, shape index: {}]   ;;  %s13146_s4 = inlined_call_operand.vmem [shape: f32[3,1,128], index: 4, kind: input, shape index: {}]   ;;  %s13147_s5 = inlined_call_operand.vmem [shape: f32[2,1024,128], index: 5, kind: output, shape index: {}]  }
   0x1   :  { %s7770_s20 = smov 0   ;;  %s7772_s21 = smov 0  }
   0x2   :  { %s7774_s22 = smov 0  }
   0x3 LB: > { %s24_s23 = sadd.s32 1, %s7726_s20  ;;  %s27_s24 = sadd.s32 1, %s7730_s21  ;;  %s7734_s22 = sphi %s7774_s22, %s15_s22   ;;  %s7730_s21 = sphi %s7772_s21, %s13854_s21   ;;  %s7726_s20 = sphi %s7770_s20, %s13853_s20   ;;  %s7722_s19 = sphi %s7768_s19, %s13852_s19   ;;  %s7718_s18 = sphi %s7766_s18, %s13851_s18  }
   0x4   : > { %p25_p0 = scmp.ge.s32.totalorder %s24_s23, 4  ;;  %p7253_p1 = scmp.ge.s32.totalorder %s7734_s22, 1 }
   0x5   : > { %p167_p2 = scmp.lt.s32.totalorder %s7734_s22, 9 }
   0x6   : > { %s13856_s23 = smov (%p25_p0, %s24_s23), 0  ;;  %s13858_s24 = smov (!%p25_p0, %s27_s24), %s7730_s21 }
   0x7   : > { %p168_p3 = pnand %p7253_p1, %p167_p2  ;;  %p29_p4 = scmp.ge.s32.totalorder %s13858_s24, 2 }
   0x9   : > { %s13860_s24 = smov (%p29_p4, %s13858_s24), 0  ;;  %171 = sbr.rel (%p168_p3) target bundleno = 2231 (0x8b7), region = 36 }
   0xe   : > { %s7254_s25 = sshll.u32 %s7718_s18, 5  ;;  %p193_p5 = scmp.lt.s32.totalorder %s7722_s19, 1 }
   0xf   : > { %p195_p6 = scmp.lt.s32.totalorder %s7254_s25, 127  ;;  %p7257_p7 = scmp.ne.s32.totalorder %s7718_s18, 0 }
  0x10   : > { %s194_s26 = scalar_select %p193_p5, %s7722_s19, 1 }
  0x11   : > { %s13862_s25 = smov (!%p195_p6, %s7254_s25), 127  ;;  %205 = sbr.rel (%p7257_p7) target bundleno = 61 (0x3d), region = 40 }
  0x12   : > { %s7255_s27 = sshll.u32 %s194_s26, 7  ;;  %s7258_s8 = sshll.u32 (!%p7257_p7), %s7718_s18, 8 }
  0x13   : > { %s198_s28 = sadd.s32 %s7255_s27, %s13862_s25  ;;  %s207_s9 = smul.u32 (!%p7257_p7), 1056, %s7722_s19 }
  0x14   : > { %s7256_s29 = sshll.u32 %s198_s28, 3 }
  0x15   : > { %s7806_s7 = scalar_lea.vmem %s13147_s5, %s7256_s29  ;;  %s208_s10 = sadd.s32 (!%p7257_p7), %s7258_s8, %s207_s9 }
  0x16   : > { %s7814_s13 = scalar_lea.vmem %s13142_s0, %s208_s10 }
  0x17   : > { %v220_v0 = vld [vmem:[%s7814_s13] sm:$0xff]  ;;  %v222_v1 = vld [vmem:[%s7814_s13 + $0x8] sm:$0xff]  ;;  %v224_v2 = vld [vmem:[%s7814_s13 + $0x10] sm:$0xff] }
  0x18   : > { %221 = vst [vmem:[#allocation2] sm:$0xff] %v220_v0  ;;  %v226_v3 = vld [vmem:[%s7814_s13 + $0x18] sm:$0xff]  ;;  %v228_v4 = vld [vmem:[%s7814_s13 + $0x20] sm:$0xff]  ;;  %v230_v5 = vld [vmem:[%s7814_s13 + $0x28] sm:$0xff] }
  0x19   : > { %223 = vst [vmem:[#allocation2 + $0x8] sm:$0xff] %v222_v1  ;;  %v232_v6 = vld [vmem:[%s7814_s13 + $0x30] sm:$0xff]  ;;  %v234_v7 = vld [vmem:[%s7814_s13 + $0x38] sm:$0xff]  ;;  %v236_v8 = vld [vmem:[%s7814_s13 + $0x40] sm:$0xff] }
  0x1a   : > { %225 = vst [vmem:[#allocation2 + $0x10] sm:$0xff] %v224_v2  ;;  %v238_v9 = vld [vmem:[%s7814_s13 + $0x48] sm:$0xff]  ;;  %v240_v10 = vld [vmem:[%s7814_s13 + $0x50] sm:$0xff]  ;;  %v242_v11 = vld [vmem:[%s7814_s13 + $0x58] sm:$0xff] }
  0x1b   : > { %227 = vst [vmem:[#allocation2 + $0x18] sm:$0xff] %v226_v3  ;;  %v244_v12 = vld [vmem:[%s7814_s13 + $0x60] sm:$0xff]  ;;  %v246_v13 = vld [vmem:[%s7814_s13 + $0x68] sm:$0xff]  ;;  %v248_v14 = vld [vmem:[%s7814_s13 + $0x70] sm:$0xff] }
  0x1c   : > { %229 = vst [vmem:[#allocation2 + $0x20] sm:$0xff] %v228_v4  ;;  %v250_v15 = vld [vmem:[%s7814_s13 + $0x78] sm:$0xff]  ;;  %v252_v16 = vld [vmem:[%s7814_s13 + $0x80] sm:$0xff]  ;;  %v254_v17 = vld [vmem:[%s7814_s13 + $0x88] sm:$0xff] }
  0x1d   : > { %231 = vst [vmem:[#allocation2 + $0x28] sm:$0xff] %v230_v5  ;;  %v256_v18 = vld [vmem:[%s7814_s13 + $0x90] sm:$0xff]  ;;  %v258_v19 = vld [vmem:[%s7814_s13 + $0x98] sm:$0xff]  ;;  %v260_v20 = vld [vmem:[%s7814_s13 + $0xa0] sm:$0xff] }
  0x1e   : > { %233 = vst [vmem:[#allocation2 + $0x30] sm:$0xff] %v232_v6  ;;  %v262_v21 = vld [vmem:[%s7814_s13 + $0xa8] sm:$0xff]  ;;  %v264_v22 = vld [vmem:[%s7814_s13 + $0xb0] sm:$0xff]  ;;  %v266_v23 = vld [vmem:[%s7814_s13 + $0xb8] sm:$0xff] }
  0x1f   : > { %235 = vst [vmem:[#allocation2 + $0x38] sm:$0xff] %v234_v7  ;;  %v268_v24 = vld [vmem:[%s7814_s13 + $0xc0] sm:$0xff]  ;;  %v270_v25 = vld [vmem:[%s7814_s13 + $0xc8] sm:$0xff]  ;;  %v272_v26 = vld [vmem:[%s7814_s13 + $0xd0] sm:$0xff] }
  0x20   : > { %237 = vst [vmem:[#allocation2 + $0x40] sm:$0xff] %v236_v8  ;;  %v274_v27 = vld [vmem:[%s7814_s13 + $0xd8] sm:$0xff]  ;;  %v276_v28 = vld [vmem:[%s7814_s13 + $0xe0] sm:$0xff]  ;;  %v278_v29 = vld [vmem:[%s7814_s13 + $0xe8] sm:$0xff] }
  0x21   : > { %239 = vst [vmem:[#allocation2 + $0x48] sm:$0xff] %v238_v9  ;;  %v280_v30 = vld [vmem:[%s7814_s13 + $0xf0] sm:$0xff]  ;;  %v282_v31 = vld [vmem:[%s7814_s13 + $0xf8] sm:$0xff]  ;;  %v284_v32 = vld [vmem:[%s7814_s13 + $0x100] sm:$0xff] }
  0x22   : > { %241 = vst [vmem:[#allocation2 + $0x50] sm:$0xff] %v240_v10  ;;  %v286_v33 = vld [vmem:[%s7814_s13 + $0x108] sm:$0xff]  ;;  %v288_v34 = vld [vmem:[%s7814_s13 + $0x110] sm:$0xff]  ;;  %v290_v35 = vld [vmem:[%s7814_s13 + $0x118] sm:$0xff] }
  0x23   : > { %243 = vst [vmem:[#allocation2 + $0x58] sm:$0xff] %v242_v11 }
  0x24   : > { %245 = vst [vmem:[#allocation2 + $0x60] sm:$0xff] %v244_v12 }
  0x25   : > { %247 = vst [vmem:[#allocation2 + $0x68] sm:$0xff] %v246_v13 }
  0x26   : > { %249 = vst [vmem:[#allocation2 + $0x70] sm:$0xff] %v248_v14 }
  0x27   : > { %251 = vst [vmem:[#allocation2 + $0x78] sm:$0xff] %v250_v15 }
  0x28   : > { %253 = vst [vmem:[#allocation2 + $0x80] sm:$0xff] %v252_v16 }
  0x29   : > { %255 = vst [vmem:[#allocation2 + $0x88] sm:$0xff] %v254_v17 }
  0x2a   : > { %257 = vst [vmem:[#allocation2 + $0x90] sm:$0xff] %v256_v18 }
  0x2b   : > { %259 = vst [vmem:[#allocation2 + $0x98] sm:$0xff] %v258_v19 }
  0x2c   : > { %261 = vst [vmem:[#allocation2 + $0xa0] sm:$0xff] %v260_v20 }
  0x2d   : > { %263 = vst [vmem:[#allocation2 + $0xa8] sm:$0xff] %v262_v21 }
  0x2e   : > { %265 = vst [vmem:[#allocation2 + $0xb0] sm:$0xff] %v264_v22 }
  0x2f   : > { %267 = vst [vmem:[#allocation2 + $0xb8] sm:$0xff] %v266_v23 }
  0x30   : > { %269 = vst [vmem:[#allocation2 + $0xc0] sm:$0xff] %v268_v24 }
  0x31   : > { %271 = vst [vmem:[#allocation2 + $0xc8] sm:$0xff] %v270_v25 }
  0x32   : > { %273 = vst [vmem:[#allocation2 + $0xd0] sm:$0xff] %v272_v26 }
  0x33   : > { %275 = vst [vmem:[#allocation2 + $0xd8] sm:$0xff] %v274_v27 }
  0x34   : > { %277 = vst [vmem:[#allocation2 + $0xe0] sm:$0xff] %v276_v28 }
  0x35   : > { %279 = vst [vmem:[#allocation2 + $0xe8] sm:$0xff] %v278_v29 }
  0x36   : > { %281 = vst [vmem:[#allocation2 + $0xf0] sm:$0xff] %v280_v30 }
  0x37   : > { %283 = vst [vmem:[#allocation2 + $0xf8] sm:$0xff] %v282_v31 }
  0x38   : > { %285 = vst [vmem:[#allocation2 + $0x100] sm:$0xff] %v284_v32 }
  0x39   : > { %287 = vst [vmem:[#allocation2 + $0x108] sm:$0xff] %v286_v33 }
  0x3a   : > { %289 = vst [vmem:[#allocation2 + $0x110] sm:$0xff] %v288_v34 }
  0x3b   : > { %291 = vst [vmem:[#allocation2 + $0x118] sm:$0xff] %v290_v35 }
  0x3c   : > { %297 = vsyncadd [#allocation3], 4608 }
  0x3d PF: > { %s298_s14 = sadd.s32 1, %s7718_s18 }
  0x3e   : > { %p7259_p8 = scmp.ge.s32.totalorder %s298_s14, 4 }
  0x3f   : > { %p303_p9 = scmp.lt.s32.totalorder (!%p7259_p8), %s298_s14, 3  ;;  %p305_p10 = scmp.lt.s32.totalorder (!%p7259_p8), %s298_s14, 0 }
  0x40   : > { %302 = sbr.rel (%p7259_p8) target bundleno = 114 (0x72), region = 63  ;;  %s306_s15 = ssub.s32 (!%p7259_p8), 0, %s298_s14 }
  0x41   : > { %s318_s16 = smul.u32 (!%p7259_p8), 1056, %s7722_s19  ;;  %s7260_s25 = smin.u32 (!%p7259_p8), %s306_s15, %s298_s14 }
  0x42   : > { %s308_s26 = sand.u32 (!%p7259_p8), 1, %s7260_s25  }
  0x43   : > { %s309_s28 = ssub.s32 (!%p7259_p8), 0, %s308_s26 }
  0x45   : > { %s304_s17 = scalar_select %p303_p9, %s298_s14, 3 }
  0x46   : > { %s13864_s28 = smov (!%p305_p10, %s309_s28), %s308_s26 }
  0x47   : > { %s7263_s27 = sshll.u32 %s304_s17, 8  ;;  %p7262_p11 = scmp.lt.s32.totalorder %s13864_s28, 0 }
  0x48   : > { %s319_s29 = sadd.s32 %s7263_s27, %s318_s16  ;;  %s315_s30 = sadd.s32 2, %s13864_s28 }
  0x49   : > { %s7857_s9 = scalar_lea.vmem %s13142_s0, %s319_s29  ;;  %s13866_s30 = smov (!%p7262_p11, %s315_s30), %s13864_s28 }
  0x4a   : > { %s321_s19 = smul.u32 288, %s13866_s30  ;;  %v334_v36 = vld [vmem:[%s7857_s9] sm:$0xff]  ;;  %v336_v37 = vld [vmem:[%s7857_s9 + $0x8] sm:$0xff]  ;;  %v338_v38 = vld [vmem:[%s7857_s9 + $0x10] sm:$0xff]  ;;  %s323_s11 = scalar_lea.sflag [#allocation3], %s13866_s30 }
  0x4b   : > { %v340_v39 = vld [vmem:[%s7857_s9 + $0x18] sm:$0xff]  ;;  %v342_v40 = vld [vmem:[%s7857_s9 + $0x20] sm:$0xff]  ;;  %v344_v41 = vld [vmem:[%s7857_s9 + $0x28] sm:$0xff] }
  0x4c   : > { %s7865_s10 = scalar_lea.vmem [#allocation2], %s321_s19  ;;  %v346_v42 = vld [vmem:[%s7857_s9 + $0x30] sm:$0xff]  ;;  %v348_v43 = vld [vmem:[%s7857_s9 + $0x38] sm:$0xff]  ;;  %v350_v44 = vld [vmem:[%s7857_s9 + $0x40] sm:$0xff] }
  0x4d   : > { %335 = vst [vmem:[%s7865_s10] sm:$0xff] %v334_v36  ;;  %v352_v45 = vld [vmem:[%s7857_s9 + $0x48] sm:$0xff]  ;;  %v354_v46 = vld [vmem:[%s7857_s9 + $0x50] sm:$0xff]  ;;  %v356_v47 = vld [vmem:[%s7857_s9 + $0x58] sm:$0xff] }
  0x4e   : > { %337 = vst [vmem:[%s7865_s10 + $0x8] sm:$0xff] %v336_v37  ;;  %v358_v48 = vld [vmem:[%s7857_s9 + $0x60] sm:$0xff]  ;;  %v360_v49 = vld [vmem:[%s7857_s9 + $0x68] sm:$0xff]  ;;  %v362_v50 = vld [vmem:[%s7857_s9 + $0x70] sm:$0xff] }
  0x4f   : > { %339 = vst [vmem:[%s7865_s10 + $0x10] sm:$0xff] %v338_v38  ;;  %v364_v51 = vld [vmem:[%s7857_s9 + $0x78] sm:$0xff]  ;;  %v366_v52 = vld [vmem:[%s7857_s9 + $0x80] sm:$0xff]  ;;  %v368_v53 = vld [vmem:[%s7857_s9 + $0x88] sm:$0xff] }
  0x50   : > { %341 = vst [vmem:[%s7865_s10 + $0x18] sm:$0xff] %v340_v39  ;;  %v370_v54 = vld [vmem:[%s7857_s9 + $0x90] sm:$0xff]  ;;  %v372_v55 = vld [vmem:[%s7857_s9 + $0x98] sm:$0xff]  ;;  %v374_v56 = vld [vmem:[%s7857_s9 + $0xa0] sm:$0xff] }
  0x51   : > { %343 = vst [vmem:[%s7865_s10 + $0x20] sm:$0xff] %v342_v40  ;;  %v376_v57 = vld [vmem:[%s7857_s9 + $0xa8] sm:$0xff]  ;;  %v378_v58 = vld [vmem:[%s7857_s9 + $0xb0] sm:$0xff]  ;;  %v380_v59 = vld [vmem:[%s7857_s9 + $0xb8] sm:$0xff] }
  0x52   : > { %345 = vst [vmem:[%s7865_s10 + $0x28] sm:$0xff] %v344_v41  ;;  %v382_v60 = vld [vmem:[%s7857_s9 + $0xc0] sm:$0xff]  ;;  %v384_v61 = vld [vmem:[%s7857_s9 + $0xc8] sm:$0xff]  ;;  %v386_v62 = vld [vmem:[%s7857_s9 + $0xd0] sm:$0xff] }
  0x53   : > { %347 = vst [vmem:[%s7865_s10 + $0x30] sm:$0xff] %v346_v42  ;;  %v388_v63 = vld [vmem:[%s7857_s9 + $0xd8] sm:$0xff]  ;;  %v390_v0 = vld [vmem:[%s7857_s9 + $0xe0] sm:$0xff]  ;;  %v392_v1 = vld [vmem:[%s7857_s9 + $0xe8] sm:$0xff] }
  0x54   : > { %349 = vst [vmem:[%s7865_s10 + $0x38] sm:$0xff] %v348_v43  ;;  %v394_v2 = vld [vmem:[%s7857_s9 + $0xf0] sm:$0xff]  ;;  %v396_v3 = vld [vmem:[%s7857_s9 + $0xf8] sm:$0xff]  ;;  %v398_v4 = vld [vmem:[%s7857_s9 + $0x100] sm:$0xff] }
  0x55   : > { %351 = vst [vmem:[%s7865_s10 + $0x40] sm:$0xff] %v350_v44  ;;  %v400_v5 = vld [vmem:[%s7857_s9 + $0x108] sm:$0xff]  ;;  %v402_v6 = vld [vmem:[%s7857_s9 + $0x110] sm:$0xff]  ;;  %v404_v7 = vld [vmem:[%s7857_s9 + $0x118] sm:$0xff] }
  0x56   : > { %353 = vst [vmem:[%s7865_s10 + $0x48] sm:$0xff] %v352_v45 }
  0x57   : > { %355 = vst [vmem:[%s7865_s10 + $0x50] sm:$0xff] %v354_v46 }
  0x58   : > { %357 = vst [vmem:[%s7865_s10 + $0x58] sm:$0xff] %v356_v47 }
  0x59   : > { %359 = vst [vmem:[%s7865_s10 + $0x60] sm:$0xff] %v358_v48 }
  0x5a   : > { %361 = vst [vmem:[%s7865_s10 + $0x68] sm:$0xff] %v360_v49 }
  0x5b   : > { %363 = vst [vmem:[%s7865_s10 + $0x70] sm:$0xff] %v362_v50 }
  0x5c   : > { %365 = vst [vmem:[%s7865_s10 + $0x78] sm:$0xff] %v364_v51 }
  0x5d   : > { %367 = vst [vmem:[%s7865_s10 + $0x80] sm:$0xff] %v366_v52 }
  0x5e   : > { %369 = vst [vmem:[%s7865_s10 + $0x88] sm:$0xff] %v368_v53 }
  0x5f   : > { %371 = vst [vmem:[%s7865_s10 + $0x90] sm:$0xff] %v370_v54 }
  0x60   : > { %373 = vst [vmem:[%s7865_s10 + $0x98] sm:$0xff] %v372_v55 }
  0x61   : > { %375 = vst [vmem:[%s7865_s10 + $0xa0] sm:$0xff] %v374_v56 }
  0x62   : > { %377 = vst [vmem:[%s7865_s10 + $0xa8] sm:$0xff] %v376_v57 }
  0x63   : > { %379 = vst [vmem:[%s7865_s10 + $0xb0] sm:$0xff] %v378_v58 }
  0x64   : > { %381 = vst [vmem:[%s7865_s10 + $0xb8] sm:$0xff] %v380_v59 }
  0x65   : > { %383 = vst [vmem:[%s7865_s10 + $0xc0] sm:$0xff] %v382_v60 }
  0x66   : > { %385 = vst [vmem:[%s7865_s10 + $0xc8] sm:$0xff] %v384_v61 }
  0x67   : > { %387 = vst [vmem:[%s7865_s10 + $0xd0] sm:$0xff] %v386_v62 }
  0x68   : > { %389 = vst [vmem:[%s7865_s10 + $0xd8] sm:$0xff] %v388_v63 }
  0x69   : > { %391 = vst [vmem:[%s7865_s10 + $0xe0] sm:$0xff] %v390_v0 }
  0x6a   : > { %393 = vst [vmem:[%s7865_s10 + $0xe8] sm:$0xff] %v392_v1 }
  0x6b   : > { %395 = vst [vmem:[%s7865_s10 + $0xf0] sm:$0xff] %v394_v2 }
  0x6c   : > { %397 = vst [vmem:[%s7865_s10 + $0xf8] sm:$0xff] %v396_v3 }
  0x6d   : > { %399 = vst [vmem:[%s7865_s10 + $0x100] sm:$0xff] %v398_v4 }
  0x6e   : > { %401 = vst [vmem:[%s7865_s10 + $0x108] sm:$0xff] %v400_v5 }
  0x6f   : > { %403 = vst [vmem:[%s7865_s10 + $0x110] sm:$0xff] %v402_v6 }
  0x70   : > { %405 = vst [vmem:[%s7865_s10 + $0x118] sm:$0xff] %v404_v7 }
  0x71   : > { %411 = vsyncadd %s323_s11, 4608 }
  0x72 PF: > { %p412_p12 = scmp.lt.s32.totalorder %s7718_s18, 0  ;;  %s413_s12 = ssub.s32 0, %s7718_s18 }
  0x73   : > { %s7264_s13 = smin.u32 %s7718_s18, %s413_s12  ;;  %s7941_s14 = sshll.u32 %s7718_s18, 8 }
  0x74   : > { %s415_s15 = sand.u32 1, %s7264_s13  }
  0x75   : > { %s416_s16 = ssub.s32 0, %s415_s15 }
  0x76   : > { %s13868_s16 = smov (!%p412_p12, %s416_s16), %s415_s15 }
  0x77   : > { %p7266_p13 = scmp.lt.s32.totalorder %s13868_s16, 0  ;;  %s422_s17 = sadd.s32 2, %s13868_s16 }
  0x79   : > { %s13870_s17 = smov (!%p7266_p13, %s422_s17), %s13868_s16 }
  0x7a   : > { %s425_s25 = smul.u32 288, %s13870_s17  ;;  %s427_s27 = scalar_lea.sflag [#allocation3], %s13870_s17 }
  0x7c   : > { %s7943_s26 = scalar_lea.vmem [#allocation2], %s425_s25 }
  0x7d   : > { %7714 = dma.done.wait %s427_s27, 4608 }
  0x7e   : > { %7715 = vsyncadd %s427_s27, 4294962688  ;;  %v482_v8 = vld [vmem:[%s13143_s1 + $0x78] sm:$0xff]  ;;  %v481_v9 = vld [vmem:[%s13143_s1 + $0x70] sm:$0xff]  ;;  %vm709_vm2 = vcmask 1046528   ;;  %s1411_s25 = sadd.s32 4294967281, %s7941_s14  ;;  %s2509_s11 = sadd.s32 4294967282, %s7941_s14 }
  0x7f   : > { %v498_v10 = vld [vmem:[%s13143_s1 + $0xf8] sm:$0xff]  ;;  %928 = vmatpush.msra.mxu0 %v482_v8  ;;  %v497_v11 = vld [vmem:[%s13143_s1 + $0xf0] sm:$0xff]  ;;  %v480_v12 = vld [vmem:[%s13143_s1 + $0x68] sm:$0xff]  ;;  %s3697_s13 = sadd.s32 4294967285, %s7941_s14  ;;  %s4731_s9 = sadd.s32 4294967286, %s7941_s14 }
  0x80   : > { %1053 = vmatpush.msra.mxu1 %v498_v10  ;;  %v496_v13 = vld [vmem:[%s13143_s1 + $0xe8] sm:$0xff]  ;;  %7572 = vmatpush.msra.mxu3 %v498_v10  ;;  %v479_v14 = vld [vmem:[%s13143_s1 + $0x60] sm:$0xff]  ;;  %v478_v16 = vld [vmem:[%s13143_s1 + $0x58] sm:$0xff]  ;;  %s6877_s17 = sadd.s32 4294967292, %s7941_s14 }
  0x81   : > { %929 = vmatpush.msra.mxu0 %v481_v9  ;;  %v495_v15 = vld [vmem:[%s13143_s1 + $0xe0] sm:$0xff]  ;;  %v494_v17 = vld [vmem:[%s13143_s1 + $0xd8] sm:$0xff]  ;;  %v477_v18 = vld [vmem:[%s13143_s1 + $0x50] sm:$0xff] }
  0x82   : > { %1054 = vmatpush.msra.mxu1 %v497_v11  ;;  %7573 = vmatpush.msra.mxu3 %v497_v11  ;;  %v493_v19 = vld [vmem:[%s13143_s1 + $0xd0] sm:$0xff]  ;;  %v476_v20 = vld [vmem:[%s13143_s1 + $0x48] sm:$0xff]  ;;  %v7990_v22 = vld [vmem:[%s13143_s1 + $0x178] sm:$0xff] }
  0x83   : > { %930 = vmatpush.msra.mxu0 %v480_v12  ;;  %v492_v21 = vld [vmem:[%s13143_s1 + $0xc8] sm:$0xff]  ;;  %v475_v23 = vld [vmem:[%s13143_s1 + $0x40] sm:$0xff]  ;;  %7588 = vmatpush.msra.mxu2 %v7990_v22  ;;  %v474_v25 = vld [vmem:[%s13143_s1 + $0x38] sm:$0xff] }
  0x84   : > { %1055 = vmatpush.msra.mxu1 %v496_v13  ;;  %7574 = vmatpush.msra.mxu3 %v496_v13  ;;  %v491_v24 = vld [vmem:[%s13143_s1 + $0xc0] sm:$0xff]  ;;  %v473_v26 = vld [vmem:[%s13143_s1 + $0x30] sm:$0xff]  ;;  %v490_v27 = vld [vmem:[%s13143_s1 + $0xb8] sm:$0xff] }
  0x85   : > { %931 = vmatpush.msra.mxu0 %v479_v14  ;;  %v489_v28 = vld [vmem:[%s13143_s1 + $0xb0] sm:$0xff]  ;;  %v431_v29 = vld [vmem:[%s7943_s26] sm:$0xff]  ;;  %v432_v30 = vld [vmem:[%s7943_s26 + $0x8] sm:$0xff] }
  0x86   : > { %1056 = vmatpush.msra.mxu1 %v495_v15  ;;  %7575 = vmatpush.msra.mxu3 %v495_v15  ;;  %v513_v31 = vld [vmem:[%s13143_s1 + $0x170] sm:$0xff]  ;;  %v472_v32 = vld [vmem:[%s13143_s1 + $0x28] sm:$0xff]  ;;  %v601_v34 = vmul.f32 0.1, %v431_v29  ;;  %v602_v35 = vmul.f32 0.1, %v432_v30 }
  0x87   : > { %932 = vmatpush.msra.mxu0 %v478_v16  ;;  %v488_v33 = vld [vmem:[%s13143_s1 + $0xa8] sm:$0xff]  ;;  %7589 = vmatpush.msra.mxu2 %v513_v31  ;;  %vm565_vm0 = vcmp.ge.f32.partialorder %v431_v29, 0.0  ;;  %vm566_vm1 = vcmp.ge.f32.partialorder %v432_v30, 0.0  ;;  %v471_v36 = vld [vmem:[%s13143_s1 + $0x20] sm:$0xff]  ;;  %v470_v38 = vld [vmem:[%s13143_s1 + $0x18] sm:$0xff] }
  0x88   : > { %1057 = vmatpush.msra.mxu1 %v494_v17  ;;  %7576 = vmatpush.msra.mxu3 %v494_v17  ;;  %v487_v37 = vld [vmem:[%s13143_s1 + $0xa0] sm:$0xff]  ;;  %v486_v39 = vld [vmem:[%s13143_s1 + $0x98] sm:$0xff]  ;;  %v8034_v40 = vsel %vm565_vm0, %v431_v29, %v601_v34  ;;  %v8036_v41 = vsel %vm566_vm1, %v432_v30, %v602_v35  ;;  %v433_v42 = vld [vmem:[%s7943_s26 + $0x10] sm:$0xff] }
  0x89   : > { %933 = vmatpush.msra.mxu0 %v477_v18  ;;  %v469_v43 = vld [vmem:[%s13143_s1 + $0x10] sm:$0xff]  ;;  %v710_v45 = vrot.slane %v8034_v40, 1  ;;  %v711_v46 = vrot.slane %v8036_v41, 1  ;;  %v468_v47 = vld [vmem:[%s13143_s1 + $0x8] sm:$0xff]  ;;  %v603_v49 = vmul.f32 0.1, %v433_v42 }
  0x8a   : > { %1058 = vmatpush.msra.mxu1 %v493_v19  ;;  %7577 = vmatpush.msra.mxu3 %v493_v19  ;;  %v485_v44 = vld [vmem:[%s13143_s1 + $0x90] sm:$0xff]  ;;  %v484_v48 = vld [vmem:[%s13143_s1 + $0x88] sm:$0xff]  ;;  %vm567_vm3 = vcmp.ge.f32.partialorder %v433_v42, 0.0  ;;  %v467_v50 = vld [vmem:[%s13143_s1] sm:$0xff] }
  0x8b   : > { %934 = vmatpush.msra.mxu0 %v476_v20  ;;  %v483_v51 = vld [vmem:[%s13143_s1 + $0x80] sm:$0xff]  ;;  %v712_v52 = vsel %vm709_vm2, %v710_v45, %v711_v46  ;;  %v8060_v53 = vsel %vm567_vm3, %v433_v42, %v603_v49  ;;  %v434_v54 = vld [vmem:[%s7943_s26 + $0x18] sm:$0xff]  ;;  %v512_v55 = vld [vmem:[%s13143_s1 + $0x168] sm:$0xff]  ;;  %vm817_vm3 = vcmask 1045504  }
  0x8c   : > { %1059 = vmatpush.msra.mxu1 %v492_v21  ;;  %7578 = vmatpush.msra.mxu3 %v492_v21  ;;  %v713_v56 = vrot.slane %v8060_v53, 1  ;;  %v604_v57 = vmul.f32 0.1, %v434_v54  ;;  %vm568_vm4 = vcmp.ge.f32.partialorder %v434_v54, 0.0  ;;  %v435_v60 = vld [vmem:[%s7943_s26 + $0x20] sm:$0xff]  ;;  %v436_v1 = vld [vmem:[%s7943_s26 + $0x28] sm:$0xff] }
  0x8d   : > { %935 = vmatpush.msra.mxu0 %v475_v23  ;;  %7590 = vmatpush.msra.mxu2 %v512_v55  ;;  %v605_v62 = vmul.f32 0.1, %v435_v60  ;;  %vm569_vm5 = vcmp.ge.f32.partialorder %v435_v60, 0.0  ;;  %v511_v2 = vld [vmem:[%s13143_s1 + $0x160] sm:$0xff]  ;;  %v606_v4 = vmul.f32 0.1, %v436_v1 }
  0x8e   : > { %1060 = vmatpush.msra.mxu1 %v491_v24  ;;  %7579 = vmatpush.msra.mxu3 %v491_v24  ;;  %v714_v58 = vsel %vm709_vm2, %v711_v46, %v713_v56  ;;  %v8070_v59 = vsel %vm568_vm4, %v434_v54, %v604_v57  ;;  %vm570_vm6 = vcmp.ge.f32.partialorder %v436_v1, 0.0  ;;  %v437_v7 = vld [vmem:[%s7943_s26 + $0x30] sm:$0xff]  ;;  %v438_v12 = vld [vmem:[%s7943_s26 + $0x38] sm:$0xff]  ;;  %v439_v17 = vld [vmem:[%s7943_s26 + $0x40] sm:$0xff] }
  0x8f   : > { %936 = vmatpush.msra.mxu0 %v474_v25  ;;  %v715_v61 = vrot.slane %v8070_v59, 1  ;;  %v8076_v0 = vsel %vm569_vm5, %v435_v60, %v605_v62  ;;  %7591 = vmatpush.msra.mxu2 %v511_v2  ;;  %v8085_v6 = vsel %vm570_vm6, %v436_v1, %v606_v4  ;;  %v607_v9 = vmul.f32 0.1, %v437_v7  ;;  %v510_v18 = vld [vmem:[%s13143_s1 + $0x158] sm:$0xff]  ;;  %v440_v23 = vld [vmem:[%s7943_s26 + $0x48] sm:$0xff]  ;;  %v509_v29 = vld [vmem:[%s13143_s1 + $0x150] sm:$0xff] }
  0x90   : > { %1061 = vmatpush.msra.mxu1 %v490_v27  ;;  %7580 = vmatpush.msra.mxu3 %v490_v27  ;;  %v717_v3 = vrot.slane %v8076_v0, 1  ;;  %v719_v8 = vrot.slane %v8085_v6, 1  ;;  %vm571_vm7 = vcmp.ge.f32.partialorder %v437_v7, 0.0  ;;  %v608_v14 = vmul.f32 0.1, %v438_v12  ;;  %v442_v34 = vld [vmem:[%s7943_s26 + $0x58] sm:$0xff] }
  0x91   : > { %937 = vmatpush.msra.mxu0 %v473_v26  ;;  %v716_v63 = vsel %vm709_vm2, %v713_v56, %v715_v61  ;;  %v8091_v11 = vsel %vm571_vm7, %v437_v7, %v607_v9  ;;  %vm572_vm8 = vcmp.ge.f32.partialorder %v438_v12, 0.0  ;;  %7592 = vmatpush.msra.mxu2 %v510_v18  ;;  %v609_v20 = vmul.f32 0.1, %v439_v17  ;;  %v508_v42 = vld [vmem:[%s13143_s1 + $0x148] sm:$0xff]  ;;  %v506_v46 = vld [vmem:[%s13143_s1 + $0x138] sm:$0xff]  ;;  %v447_v56 = vld [vmem:[%s7943_s26 + $0x80] sm:$0xff] }
  0x92   : > { %1062 = vmatpush.msra.mxu1 %v489_v28  ;;  %7581 = vmatpush.msra.mxu3 %v489_v28  ;;  %v718_v5 = vsel %vm709_vm2, %v715_v61, %v717_v3  ;;  %v720_v10 = vsel %vm709_vm2, %v717_v3, %v719_v8  ;;  %v721_v13 = vrot.slane %v8091_v11, 1  ;;  %v8097_v16 = vsel %vm572_vm8, %v438_v12, %v608_v14  ;;  %v441_v28 = vld [vmem:[%s7943_s26 + $0x50] sm:$0xff]  ;;  %v444_v49 = vld [vmem:[%s7943_s26 + $0x68] sm:$0xff]  ;;  %v502_v57 = vld [vmem:[%s13143_s1 + $0x118] sm:$0xff] }
  0x93   : > { %938 = vmatpush.msra.mxu0 %v472_v32  ;;  %v723_v19 = vrot.slane %v8097_v16, 1  ;;  %vm573_vm9 = vcmp.ge.f32.partialorder %v439_v17, 0.0  ;;  %v610_v25 = vmul.f32 0.1, %v440_v23  ;;  %vm574_vm10 = vcmp.ge.f32.partialorder %v440_v23, 0.0  ;;  %7593 = vmatpush.msra.mxu2 %v509_v29  ;;  %v445_v62 = vld [vmem:[%s7943_s26 + $0x70] sm:$0xff] }
  0x94   : > { %1063 = vmatpush.msra.mxu1 %v488_v33  ;;  %7582 = vmatpush.msra.mxu3 %v488_v33  ;;  %v722_v15 = vsel %vm709_vm2, %v719_v8, %v721_v13  ;;  %vm575_vm11 = vcmp.ge.f32.partialorder %v441_v28, 0.0  ;;  %vm576_vm12 = vcmp.ge.f32.partialorder %v442_v34, 0.0  ;;  %v614_v54 = vmul.f32 0.1, %v444_v49  ;;  %v501_v1 = vld [vmem:[%s13143_s1 + $0x110] sm:$0xff]  ;;  %v499_v12 = vld [vmem:[%s13143_s1 + $0x100] sm:$0xff] }
  0x95   : > { %939 = vmatpush.msra.mxu0 %v471_v36  ;;  %v724_v21 = vsel %vm709_vm2, %v721_v13, %v723_v19  ;;  %v8112_v27 = vsel %vm574_vm10, %v440_v23, %v610_v25  ;;  %v612_v36 = vmul.f32 0.1, %v442_v34  ;;  %7594 = vmatpush.msra.mxu2 %v508_v42  ;;  %vm578_vm14 = vcmp.ge.f32.partialorder %v444_v49, 0.0 }
  0x96   : > { %1064 = vmatpush.msra.mxu1 %v487_v37  ;;  %7583 = vmatpush.msra.mxu3 %v487_v37  ;;  %v727_v30 = vrot.slane %v8112_v27, 1  ;;  %v8161_v60 = vsel %vm578_vm14, %v444_v49, %v614_v54  ;;  %v617_v61 = vmul.f32 0.1, %v447_v56  ;;  %vm581_vm15 = vcmp.ge.f32.partialorder %v447_v56, 0.0 }
  0x97   : > { %940 = vmatpush.msra.mxu0 %v470_v38  ;;  %v8127_v38 = vsel %vm576_vm12, %v442_v34, %v612_v36  ;;  %v735_v4 = vrot.slane %v8161_v60, 1  ;;  %vm579_vm1 = vcmp.ge.f32.partialorder %v445_v62, 0.0 }
  0x98   : > { %1065 = vmatpush.msra.mxu1 %v486_v39  ;;  %7584 = vmatpush.msra.mxu3 %v486_v39  ;;  %v443_v39 = vld [vmem:[%s7943_s26 + $0x60] sm:$0xff]  ;;  %v8173_v7 = vsel %vm581_vm15, %v447_v56, %v617_v61 }
  0x99   : > { %941 = vmatpush.msra.mxu0 %v469_v43  ;;  %v507_v43 = vld [vmem:[%s13143_s1 + $0x140] sm:$0xff]  ;;  %v613_v45 = vmul.f32 0.1, %v443_v39  ;;  %vm577_vm13 = vcmp.ge.f32.partialorder %v443_v39, 0.0  ;;  %v849_v9 = vrot.slane %v8173_v7, 2 }
  0x9a   : > { %1066 = vmatpush.msra.mxu1 %v485_v44  ;;  %7585 = vmatpush.msra.mxu3 %v485_v44  ;;  %v731_v44 = vrot.slane %v8127_v38, 1 }
  0x9b   : > { %942 = vmatpush.msra.mxu0 %v468_v47  ;;  %7595 = vmatpush.msra.mxu2 %v507_v43 }
  0x9c   : > { %1067 = vmatpush.msra.mxu1 %v484_v48  ;;  %7586 = vmatpush.msra.mxu3 %v484_v48  ;;  %v8142_v48 = vsel %vm577_vm13, %v443_v39, %v613_v45 }
  0x9d   : > { %943 = vmatpush.msra.mxu0 %v467_v50  ;;  %7596 = vmatpush.msra.mxu2 %v506_v46  ;;  %v505_v50 = vld [vmem:[%s13143_s1 + $0x130] sm:$0xff] }
  0x9e   : > { %1068 = vmatpush.msra.mxu1 %v483_v51  ;;  %944 = vmatmul.f32.vlgmr.msra.gmra.mxu0 %v8034_v40 }
  0x9f   : > { %1069 = vmatmul.f32.vlgmr.msra.gmra.mxu1 %v712_v52  ;;  %1178 = vmatpush.msrb.mxu0 %v7990_v22  ;;  %v8106_v22 = vsel %vm573_vm9, %v439_v17, %v609_v20  ;;  %v733_v52 = vrot.slane %v8142_v48, 1  ;;  %v446_v17 = vld [vmem:[%s7943_s26 + $0x78] sm:$0xff] }
  0xa0   : > { %7587 = vmatpush.msra.mxu3 %v483_v51  ;;  %v725_v24 = vrot.slane %v8106_v22, 1  ;;  %v504_v51 = vld [vmem:[%s13143_s1 + $0x128] sm:$0xff]  ;;  %7597 = vmatpush.msra.mxu2 %v505_v50  ;;  %vm580_vm5 = vcmp.ge.f32.partialorder %v446_v17, 0.0 }
  0xa1   : > { %1179 = vmatpush.msrb.mxu0 %v513_v31  ;;  %v611_v31 = vmul.f32 0.1, %v441_v28  ;;  %v736_v13 = vsel %vm709_vm2, %v733_v52, %v735_v4 }
  0xa2   : > { %v726_v26 = vsel %vm709_vm2, %v723_v19, %v725_v24  ;;  %v728_v32 = vsel %vm709_vm2, %v725_v24, %v727_v30  ;;  %7598 = vmatpush.msra.mxu2 %v504_v51 }
  0xa3   : > { %1180 = vmatpush.msrb.mxu0 %v512_v55  ;;  %v8121_v33 = vsel %vm575_vm11, %v441_v28, %v611_v31  ;;  %v503_v55 = vld [vmem:[%s13143_s1 + $0x120] sm:$0xff] }
  0xa4   : > { %v729_v35 = vrot.slane %v8121_v33, 1  ;;  %7599 = vmatpush.msra.mxu2 %v503_v55 }
  0xa5   : > { %1181 = vmatpush.msrb.mxu0 %v511_v2  ;;  %v500_v2 = vld [vmem:[%s13143_s1 + $0x108] sm:$0xff] }
  0xa6   : > { %947 = vmatmul.f32.gmra.mxu0 %v8036_v41  ;;  %v730_v37 = vsel %vm709_vm2, %v727_v30, %v729_v35  ;;  %v732_v47 = vsel %vm709_vm2, %v729_v35, %v731_v44  ;;  %7600 = vmatpush.msra.mxu2 %v502_v57 }
  0xa7   : > { %1072 = vmatmul.f32.gmra.mxu1 %v714_v58  ;;  %1182 = vmatpush.msrb.mxu0 %v510_v18  ;;  %v734_v58 = vsel %vm709_vm2, %v731_v44, %v733_v52  ;;  %v449_v18 = vld [vmem:[%s7943_s26 + $0x90] sm:$0xff] }
  0xa8   : > { %7601 = vmatpush.msra.mxu2 %v501_v1  ;;  %v619_v19 = vmul.f32 0.1, %v449_v18  ;;  %vm583_vm4 = vcmp.ge.f32.partialorder %v449_v18, 0.0 }
  0xa9   : > { %1183 = vmatpush.msrb.mxu0 %v509_v29  ;;  %v450_v29 = vld [vmem:[%s7943_s26 + $0x98] sm:$0xff] }
  0xaa   : > { %7602 = vmatpush.msra.mxu2 %v500_v2  ;;  %v8192_v23 = vsel %vm583_vm4, %v449_v18, %v619_v19  ;;  %v620_v30 = vmul.f32 0.1, %v450_v29  ;;  %vm584_vm6 = vcmp.ge.f32.partialorder %v450_v29, 0.0 }
  0xab   : > { %1184 = vmatpush.msrb.mxu0 %v508_v42  ;;  %v853_v24 = vrot.slane %v8192_v23, 2  ;;  %v741_v42 = vrot.slane %v8173_v7, 1 }
  0xac   : > { %7603 = vmatpush.msra.mxu2 %v499_v12 }
  0xad   : > { %1185 = vmatpush.msrb.mxu0 %v507_v43 }
  0xae   : > { %950 = vmatmul.f32.gmra.mxu0 %v8060_v53 }
  0xaf   : > { %1075 = vmatmul.f32.gmra.mxu1 %v716_v63  ;;  %1186 = vmatpush.msrb.mxu0 %v506_v46  ;;  %v448_v63 = vld [vmem:[%s7943_s26 + $0x88] sm:$0xff] }
  0xb0   : > { %v618_v3 = vmul.f32 0.1, %v448_v63  ;;  %vm582_vm0 = vcmp.ge.f32.partialorder %v448_v63, 0.0 }
  0xb1   : > { %1187 = vmatpush.msrb.mxu0 %v505_v50 }
  0xb2   : > { %v8175_v8 = vsel %vm582_vm0, %v448_v63, %v618_v3 }
  0xb3   : > { %1188 = vmatpush.msrb.mxu0 %v504_v51  ;;  %v743_v51 = vrot.slane %v8175_v8, 1 }
  0xb5   : > { %1189 = vmatpush.msrb.mxu0 %v503_v55 }
  0xb6   : > { %953 = vmatmul.f32.gmra.mxu0 %v8070_v59 }
  0xb7   : > { %1078 = vmatmul.f32.gmra.mxu1 %v718_v5  ;;  %1190 = vmatpush.msrb.mxu0 %v502_v57  ;;  %v615_v5 = vmul.f32 0.1, %v445_v62 }
  0xb9   : > { %1191 = vmatpush.msrb.mxu0 %v501_v1 }
  0xbb   : > { %1192 = vmatpush.msrb.mxu0 %v500_v2  ;;  %v745_v2 = vrot.slane %v8192_v23, 1 }
  0xbd   : > { %1193 = vmatpush.msrb.mxu0 %v499_v12  ;;  %v746_v12 = vsel %vm709_vm2, %v743_v51, %v745_v2 }
  0xbe   : > { %956 = vmatmul.f32.gmra.mxu0 %v8076_v0 }
  0xbf   : > { %1081 = vmatmul.f32.gmra.mxu1 %v720_v10  ;;  %v851_v10 = vrot.slane %v8175_v8, 2 }
  0xc1   : > { %v852_v14 = vsel %vm817_vm3, %v849_v9, %v851_v10 }
  0xc2   : > { %1242 = vmatmul.f32.vlgmr.msra.gmra.mxu2 %v852_v14  ;;  %v454_v14 = vld [vmem:[%s7943_s26 + $0xb8] sm:$0xff] }
  0xc3   : > { %vm588_vm10 = vcmp.ge.f32.partialorder %v454_v14, 0.0 }
  0xc6   : > { %959 = vmatmul.f32.gmra.mxu0 %v8085_v6 }
  0xc7   : > { %1084 = vmatmul.f32.gmra.mxu1 %v722_v15  ;;  %v8186_v15 = vsel %vm579_vm1, %v445_v62, %v615_v5  ;;  %v453_v62 = vld [vmem:[%s7943_s26 + $0xb0] sm:$0xff] }
  0xc8   : > { %v737_v20 = vrot.slane %v8186_v15, 1  ;;  %v623_v63 = vmul.f32 0.1, %v453_v62  ;;  %vm587_vm9 = vcmp.ge.f32.partialorder %v453_v62, 0.0 }
  0xca   : > { %v738_v25 = vsel %vm709_vm2, %v735_v4, %v737_v20  ;;  %v8230_v1 = vsel %vm587_vm9, %v453_v62, %v623_v63 }
  0xcb   : > { %v753_v3 = vrot.slane %v8230_v1, 1  ;;  %v861_v5 = vrot.slane %v8230_v1, 2 }
  0xce   : > { %962 = vmatmul.f32.gmra.mxu0 %v8091_v11 }
  0xcf   : > { %1087 = vmatmul.f32.gmra.mxu1 %v724_v21  ;;  %v616_v21 = vmul.f32 0.1, %v446_v17 }
  0xd1   : > { %v8197_v28 = vsel %vm580_vm5, %v446_v17, %v616_v21  ;;  %v624_v17 = vmul.f32 0.1, %v454_v14 }
  0xd2   : > { %v739_v31 = vrot.slane %v8197_v28, 1 }
  0xd3   : > { %v8242_v18 = vsel %vm588_vm10, %v454_v14, %v624_v17  ;;  %v459_v17 = vld [vmem:[%s7943_s26 + $0xe0] sm:$0xff] }
  0xd4   : > { %v740_v35 = vsel %vm709_vm2, %v737_v20, %v739_v31  ;;  %v742_v45 = vsel %vm709_vm2, %v739_v31, %v741_v42  ;;  %v755_v20 = vrot.slane %v8242_v18, 1  ;;  %vm593_vm15 = vcmp.ge.f32.partialorder %v459_v17, 0.0 }
  0xd6   : > { %965 = vmatmul.f32.gmra.mxu0 %v8097_v16  ;;  %v756_v21 = vsel %vm709_vm2, %v753_v3, %v755_v20 }
  0xd7   : > { %1090 = vmatmul.f32.gmra.mxu1 %v726_v26  ;;  %v854_v26 = vsel %vm817_vm3, %v851_v10, %v853_v24 }
  0xd8   : > { %1245 = vmatmul.f32.gmra.mxu2 %v854_v26 }
  0xde   : > { %968 = vmatmul.f32.gmra.mxu0 %v8106_v22 }
  0xdf   : > { %1093 = vmatmul.f32.gmra.mxu1 %v728_v32  ;;  %v8202_v32 = vsel %vm584_vm6, %v450_v29, %v620_v30 }
  0xe0   : > { %v855_v34 = vrot.slane %v8202_v32, 2  ;;  %v747_v19 = vrot.slane %v8202_v32, 1 }
  0xe2   : > { %v856_v36 = vsel %vm817_vm3, %v853_v24, %v855_v34  ;;  %v863_v24 = vrot.slane %v8242_v18, 2  ;;  %v748_v26 = vsel %vm709_vm2, %v745_v2, %v747_v19  ;;  %v458_v2 = vld [vmem:[%s7943_s26 + $0xd8] sm:$0xff] }
  0xe3   : > { %1248 = vmatmul.f32.gmra.mxu2 %v856_v36  ;;  %vm592_vm14 = vcmp.ge.f32.partialorder %v458_v2, 0.0 }
  0xe4   : > { %v864_v29 = vsel %vm817_vm3, %v861_v5, %v863_v24 }
  0xe6   : > { %971 = vmatmul.f32.gmra.mxu0 %v8112_v27 }
  0xe7   : > { %1096 = vmatmul.f32.gmra.mxu1 %v730_v37  ;;  %v451_v37 = vld [vmem:[%s7943_s26 + $0xa0] sm:$0xff] }
  0xe8   : > { %v621_v39 = vmul.f32 0.1, %v451_v37  ;;  %vm585_vm7 = vcmp.ge.f32.partialorder %v451_v37, 0.0 }
  0xea   : > { %v8210_v43 = vsel %vm585_vm7, %v451_v37, %v621_v39 }
  0xeb   : > { %v857_v44 = vrot.slane %v8210_v43, 2  ;;  %v749_v52 = vrot.slane %v8210_v43, 1 }
  0xed   : > { %v858_v46 = vsel %vm817_vm3, %v855_v34, %v857_v44  ;;  %v750_v39 = vsel %vm709_vm2, %v747_v19, %v749_v52  ;;  %v629_v19 = vmul.f32 0.1, %v459_v17 }
  0xee   : > { %974 = vmatmul.f32.gmra.mxu0 %v8121_v33  ;;  %1251 = vmatmul.f32.gmra.mxu2 %v858_v46 }
  0xef   : > { %1099 = vmatmul.f32.gmra.mxu1 %v732_v47  ;;  %v452_v47 = vld [vmem:[%s7943_s26 + $0xa8] sm:$0xff] }
  0xf0   : > { %v622_v49 = vmul.f32 0.1, %v452_v47  ;;  %vm586_vm8 = vcmp.ge.f32.partialorder %v452_v47, 0.0 }
  0xf2   : > { %v8217_v50 = vsel %vm586_vm8, %v452_v47, %v622_v49 }
  0xf3   : > { %v751_v54 = vrot.slane %v8217_v50, 1  ;;  %v859_v56 = vrot.slane %v8217_v50, 2 }
  0xf5   : > { %v752_v55 = vsel %vm709_vm2, %v749_v52, %v751_v54  ;;  %v860_v61 = vsel %vm817_vm3, %v857_v44, %v859_v56  ;;  %v754_v4 = vsel %vm709_vm2, %v751_v54, %v753_v3  ;;  %v456_v44 = vld [vmem:[%s7943_s26 + $0xc8] sm:$0xff]  ;;  %v457_v54 = vld [vmem:[%s7943_s26 + $0xd0] sm:$0xff]  ;;  %v628_v3 = vmul.f32 0.1, %v458_v2 }
  0xf6   : > { %977 = vmatmul.f32.gmra.mxu0 %v8127_v38  ;;  %1129 = vmatmul.f32.vlgmr.msra.gmra.mxu3 %v752_v55  ;;  %vm590_vm12 = vcmp.ge.f32.partialorder %v456_v44, 0.0  ;;  %v627_v55 = vmul.f32 0.1, %v457_v54  ;;  %vm591_vm13 = vcmp.ge.f32.partialorder %v457_v54, 0.0 }
  0xf7   : > { %1102 = vmatmul.f32.gmra.mxu1 %v734_v58  ;;  %v744_v58 = vsel %vm709_vm2, %v741_v42, %v743_v51  ;;  %1254 = vmatmul.f32.gmra.mxu2 %v860_v61 }
  0xfe   : > { %980 = vmatmul.f32.gmra.mxu0 %v8142_v48  ;;  %1132 = vmatmul.f32.gmra.mxu3 %v754_v4 }
  0xff   : > { %1105 = vmatmul.f32.gmra.mxu1 %v736_v13  ;;  %v862_v13 = vsel %vm817_vm3, %v859_v56, %v861_v5 }
 0x100   : > { %1257 = vmatmul.f32.gmra.mxu2 %v862_v13 }
 0x106   : > { %983 = vmatmul.f32.gmra.mxu0 %v8161_v60  ;;  %1135 = vmatmul.f32.gmra.mxu3 %v756_v21 }
 0x107   : > { %1108 = vmatmul.f32.gmra.mxu1 %v738_v25 }
 0x108   : > { %1260 = vmatmul.f32.gmra.mxu2 %v864_v29 }
 0x10e   : > { %986 = vmatmul.f32.gmra.mxu0 %v8186_v15 }
 0x10f   : > { %1111 = vmatmul.f32.gmra.mxu1 %v740_v35 }
 0x116   : > { %989 = vmatmul.f32.gmra.mxu0 %v8197_v28 }
 0x117   : > { %1114 = vmatmul.f32.gmra.mxu1 %v742_v45 }
 0x11b   : > { %v8224_v57 = vpop.f32.mrf.mxu0 }
 0x11e   : > { %992 = vmatmul.f32.gmra.mxu0 %v8173_v7  ;;  %v8618_v7 = vstv %s1411_s25  ;;  %s5885_s25 = sadd.s32 4294967291, %s7941_s14 }
 0x11f   : > { %1117 = vmatmul.f32.gmra.mxu1 %v744_v58 }
 0x123   : > { %v8236_v10 = vpop.f32.mrf.mxu0 }
 0x126   : > { %995 = vmatmul.f32.gmra.mxu0 %v8175_v8  ;;  %v455_v8 = vld [vmem:[%s7943_s26 + $0xc0] sm:$0xff] }
 0x127   : > { %1120 = vmatmul.f32.gmra.mxu1 %v746_v12  ;;  %v625_v30 = vmul.f32 0.1, %v455_v8  ;;  %vm589_vm11 = vcmp.ge.f32.partialorder %v455_v8, 0.0 }
 0x129   : > { %v8254_v31 = vsel %vm589_vm11, %v455_v8, %v625_v30  ;;  %v460_v8 = vld [vmem:[%s7943_s26 + $0xe8] sm:$0xff] }
 0x12a   : > { %v757_v34 = vrot.slane %v8254_v31, 1  ;;  %v865_v36 = vrot.slane %v8254_v31, 2  ;;  %v630_v30 = vmul.f32 0.1, %v460_v8  ;;  %vm594_vm0 = vcmp.ge.f32.partialorder %v460_v8, 0.0 }
 0x12b   : > { %v8248_v25 = vpop.f32.mrf.mxu0 }
 0x12c   : > { %v758_v35 = vsel %vm709_vm2, %v755_v20, %v757_v34  ;;  %v866_v42 = vsel %vm817_vm3, %v863_v24, %v865_v36 }
 0x12d   : > { %1138 = vmatmul.f32.gmra.mxu3 %v758_v35  ;;  %1263 = vmatmul.f32.gmra.mxu2 %v866_v42 }
 0x12e   : > { %998 = vmatmul.f32.gmra.mxu0 %v8192_v23  ;;  %v626_v23 = vmul.f32 0.1, %v456_v44 }
 0x12f   : > { %1123 = vmatmul.f32.gmra.mxu1 %v748_v26 }
 0x130   : > { %v8265_v45 = vsel %vm590_vm12, %v456_v44, %v626_v23  ;;  %v461_v44 = vld [vmem:[%s7943_s26 + $0xf0] sm:$0xff] }
 0x131   : > { %v759_v46 = vrot.slane %v8265_v45, 1  ;;  %v867_v49 = vrot.slane %v8265_v45, 2  ;;  %v631_v23 = vmul.f32 0.1, %v461_v44  ;;  %vm595_vm1 = vcmp.ge.f32.partialorder %v461_v44, 0.0 }
 0x133   : > { %v8259_v37 = vpop.f32.mrf.mxu0  ;;  %v760_v47 = vsel %vm709_vm2, %v757_v34, %v759_v46  ;;  %v868_v52 = vsel %vm817_vm3, %v865_v36, %v867_v49 }
 0x135   : > { %1141 = vmatmul.f32.gmra.mxu3 %v760_v47  ;;  %1266 = vmatmul.f32.gmra.mxu2 %v868_v52 }
 0x136   : > { %1001 = vmatmul.f32.gmra.mxu0 %v8202_v32  ;;  %v8275_v32 = vsel %vm591_vm13, %v457_v54, %v627_v55  ;;  %v462_v55 = vld [vmem:[%s7943_s26 + $0xf8] sm:$0xff] }
 0x137   : > { %1126 = vmatmul.f32.gmra.mxu1 %v750_v39  ;;  %v761_v56 = vrot.slane %v8275_v32, 1  ;;  %v869_v61 = vrot.slane %v8275_v32, 2  ;;  %vm596_vm4 = vcmp.ge.f32.partialorder %v462_v55, 0.0 }
 0x139   : > { %v762_v58 = vsel %vm709_vm2, %v759_v46, %v761_v56  ;;  %v870_v63 = vsel %vm817_vm3, %v867_v49, %v869_v61 }
 0x13b   : > { %v8270_v51 = vpop.f32.mrf.mxu0 }
 0x13d   : > { %1144 = vmatmul.f32.gmra.mxu3 %v762_v58  ;;  %1269 = vmatmul.f32.gmra.mxu2 %v870_v63 }
 0x13e   : > { %1004 = vmatmul.f32.gmra.mxu0 %v8210_v43  ;;  %v8285_v43 = vsel %vm592_vm14, %v458_v2, %v628_v3 }
 0x13f   : > { %v763_v4 = vrot.slane %v8285_v43, 1  ;;  %v871_v12 = vrot.slane %v8285_v43, 2 }
 0x141   : > { %v764_v5 = vsel %vm709_vm2, %v761_v56, %v763_v4  ;;  %v872_v14 = vsel %vm817_vm3, %v869_v61, %v871_v12  ;;  %v632_v56 = vmul.f32 0.1, %v462_v55 }
 0x143   : > { %v8280_v62 = vpop.f32.mrf.mxu0 }
 0x145   : > { %1147 = vmatmul.f32.gmra.mxu3 %v764_v5  ;;  %1272 = vmatmul.f32.gmra.mxu2 %v872_v14 }
 0x146   : > { %1007 = vmatmul.f32.gmra.mxu0 %v8217_v50  ;;  %v8295_v50 = vsel %vm593_vm15, %v459_v17, %v629_v19 }
 0x147   : > { %v765_v20 = vrot.slane %v8295_v50, 1  ;;  %v873_v24 = vrot.slane %v8295_v50, 2 }
 0x149   : > { %v766_v21 = vsel %vm709_vm2, %v763_v4, %v765_v20  ;;  %v874_v29 = vsel %vm817_vm3, %v871_v12, %v873_v24  ;;  %v463_v4 = vld [vmem:[%s7943_s26 + $0x100] sm:$0xff] }
 0x14a   : > { %v633_v5 = vmul.f32 0.1, %v463_v4  ;;  %vm597_vm5 = vcmp.ge.f32.partialorder %v463_v4, 0.0 }
 0x14b   : > { %v8290_v13 = vpop.f32.mrf.mxu0 }
 0x14c   : > { %v669_v12 = vsel %vm597_vm5, %v463_v4, %v633_v5  ;;  %v562_v4 = vld [vmem:[%s13145_s3 + $0x178] sm:$0xff] }
 0x14d   : > { %1150 = vmatmul.f32.gmra.mxu3 %v766_v21  ;;  %1275 = vmatmul.f32.gmra.mxu2 %v874_v29  ;;  %v773_v14 = vrot.slane %v669_v12, 1  ;;  %v881_v17 = vrot.slane %v669_v12, 2  ;;  %v464_v21 = vld [vmem:[%s7943_s26 + $0x108] sm:$0xff] }
 0x14e   : > { %1010 = vmatmul.f32.gmra.mxu0 %v8230_v1  ;;  %v8305_v1 = vsel %vm594_vm0, %v460_v8, %v630_v30  ;;  %vm598_vm6 = vcmp.ge.f32.partialorder %v464_v21, 0.0  ;;  %2205 = vmatpush.msrb.mxu1 %v562_v4 }
 0x14f   : > { %v767_v34 = vrot.slane %v8305_v1, 1  ;;  %v875_v36 = vrot.slane %v8305_v1, 2 }
 0x151   : > { %v768_v35 = vsel %vm709_vm2, %v765_v20, %v767_v34  ;;  %v876_v42 = vsel %vm817_vm3, %v873_v24, %v875_v36  ;;  %v634_v24 = vmul.f32 0.1, %v464_v21 }
 0x153   : > { %v8300_v26 = vpop.f32.mrf.mxu0  ;;  %v670_v29 = vsel %vm598_vm6, %v464_v21, %v634_v24  ;;  %v559_v21 = vld [vmem:[%s13145_s3 + $0x160] sm:$0xff]  ;;  %v528_v24 = vld [vmem:[%s13145_s3 + $0x68] sm:$0xff] }
 0x154   : > { %v775_v8 = vrot.slane %v670_v29, 1  ;;  %v883_v30 = vrot.slane %v670_v29, 2 }
 0x155   : > { %1153 = vmatmul.f32.gmra.mxu3 %v768_v35  ;;  %1278 = vmatmul.f32.gmra.mxu2 %v876_v42 }
 0x156   : > { %1013 = vmatmul.f32.gmra.mxu0 %v8242_v18  ;;  %v8315_v18 = vsel %vm595_vm1, %v461_v44, %v631_v23  ;;  %v884_v35 = vsel %vm817_vm3, %v881_v17, %v883_v30 }
 0x157   : > { %v769_v46 = vrot.slane %v8315_v18, 1  ;;  %v877_v49 = vrot.slane %v8315_v18, 2 }
 0x159   : > { %v770_v47 = vsel %vm709_vm2, %v767_v34, %v769_v46  ;;  %v878_v54 = vsel %vm817_vm3, %v875_v36, %v877_v49  ;;  %v465_v36 = vld [vmem:[%s7943_s26 + $0x110] sm:$0xff] }
 0x15a   : > { %v635_v42 = vmul.f32 0.1, %v465_v36  ;;  %vm599_vm7 = vcmp.ge.f32.partialorder %v465_v36, 0.0 }
 0x15b   : > { %v8310_v39 = vpop.f32.mrf.mxu0 }
 0x15c   : > { %v671_v44 = vsel %vm599_vm7, %v465_v36, %v635_v42  ;;  %v527_v36 = vld [vmem:[%s13145_s3 + $0x60] sm:$0xff] }
 0x15d   : > { %1156 = vmatmul.f32.gmra.mxu3 %v770_v47  ;;  %1281 = vmatmul.f32.gmra.mxu2 %v878_v54  ;;  %v777_v23 = vrot.slane %v671_v44, 1  ;;  %v466_v54 = vld [vmem:[%s7943_s26 + $0x118] sm:$0xff] }
 0x15e   : > { %1016 = vmatmul.f32.gmra.mxu0 %v8254_v31  ;;  %v668_v31 = vsel %vm596_vm4, %v462_v55, %v632_v56  ;;  %v636_v55 = vmul.f32 0.1, %v466_v54  ;;  %vm600_vm8 = vcmp.ge.f32.partialorder %v466_v54, 0.0 }
 0x15f   : > { %v771_v58 = vrot.slane %v668_v31, 1  ;;  %v879_v63 = vrot.slane %v668_v31, 2 }
 0x160   : > { %v672_v56 = vsel %vm600_vm8, %v466_v54, %v636_v55  ;;  %v823_v54 = vrot.slane %v8070_v59, 2  ;;  %v525_v55 = vld [vmem:[%s13145_s3 + $0x50] sm:$0xff]  ;;  %v542_v59 = vld [vmem:[%s13145_s3 + $0xd8] sm:$0xff] }
 0x161   : > { %v772_v61 = vsel %vm709_vm2, %v769_v46, %v771_v58  ;;  %v880_v3 = vsel %vm817_vm3, %v877_v49, %v879_v63  ;;  %v882_v20 = vsel %vm817_vm3, %v879_v63, %v881_v17  ;;  %v885_v46 = vrot.slane %v671_v44, 2  ;;  %v560_v17 = vld [vmem:[%s13145_s3 + $0x168] sm:$0xff] }
 0x163   : > { %v8320_v52 = vpop.f32.mrf.mxu0  ;;  %v886_v49 = vsel %vm817_vm3, %v883_v30, %v885_v46  ;;  %v819_v30 = vrot.slane %v8036_v41, 2  ;;  %v821_v41 = vrot.slane %v8060_v53, 2  ;;  %v543_v53 = vld [vmem:[%s13145_s3 + $0xe0] sm:$0xff] }
 0x165   : > { %1159 = vmatmul.f32.gmra.mxu3 %v772_v61  ;;  %1284 = vmatmul.f32.gmra.mxu2 %v880_v3  ;;  %v887_v61 = vrot.slane %v672_v56, 2 }
 0x166   : > { %1019 = vmatmul.f32.gmra.mxu0 %v8265_v45  ;;  %v774_v45 = vsel %vm709_vm2, %v771_v58, %v773_v14  ;;  %v779_v58 = vrot.slane %v672_v56, 1 }
 0x167   : > { %v888_v3 = vsel %vm817_vm3, %v885_v46, %v887_v61 }
 0x16b   : > { %v8326_v2 = vpop.f32.mrf.mxu0 }
 0x16d   : > { %1162 = vmatmul.f32.gmra.mxu3 %v774_v45  ;;  %1287 = vmatmul.f32.gmra.mxu2 %v882_v20 }
 0x16e   : > { %1022 = vmatmul.f32.gmra.mxu0 %v8275_v32  ;;  %v776_v32 = vsel %vm709_vm2, %v773_v14, %v775_v8 }
 0x173   : > { %v8332_v19 = vpop.f32.mrf.mxu0 }
 0x175   : > { %1165 = vmatmul.f32.gmra.mxu3 %v776_v32  ;;  %1290 = vmatmul.f32.gmra.mxu2 %v884_v35  ;;  %v818_v32 = vrot.slane %v8034_v40, 2  ;;  %v558_v35 = vld [vmem:[%s13145_s3 + $0x158] sm:$0xff]  ;;  %v544_v40 = vld [vmem:[%s13145_s3 + $0xe8] sm:$0xff] }
 0x176   : > { %1025 = vmatmul.f32.gmra.mxu0 %v8285_v43  ;;  %v778_v43 = vsel %vm709_vm2, %v775_v8, %v777_v23  ;;  %v545_v8 = vld [vmem:[%s13145_s3 + $0xf0] sm:$0xff] }
 0x17b   : > { %v8338_v34 = vpop.f32.mrf.mxu0 }
 0x17d   : > { %1168 = vmatmul.f32.gmra.mxu3 %v778_v43  ;;  %1293 = vmatmul.f32.gmra.mxu2 %v886_v49  ;;  %v526_v43 = vld [vmem:[%s13145_s3 + $0x58] sm:$0xff]  ;;  %v822_v49 = vsel %vm817_vm3, %v819_v30, %v821_v41 }
 0x17e   : > { %1028 = vmatmul.f32.gmra.mxu0 %v8295_v50  ;;  %v780_v50 = vsel %vm709_vm2, %v777_v23, %v779_v58  ;;  %v557_v23 = vld [vmem:[%s13145_s3 + $0x150] sm:$0xff] }
 0x183   : > { %v8344_v47 = vpop.f32.mrf.mxu0 }
 0x185   : > { %1171 = vmatmul.f32.gmra.mxu3 %v780_v50  ;;  %1296 = vmatmul.f32.gmra.mxu2 %v888_v3  ;;  %v556_v50 = vld [vmem:[%s13145_s3 + $0x148] sm:$0xff] }
 0x186   : > { %1031 = vmatmul.f32.gmra.mxu0 %v8305_v1  ;;  %v561_v1 = vld [vmem:[%s13145_s3 + $0x170] sm:$0xff]  ;;  %v524_v3 = vld [vmem:[%s13145_s3 + $0x48] sm:$0xff] }
 0x187   : > { %2206 = vmatpush.msrb.mxu1 %v561_v1 }
 0x189   : > { %2207 = vmatpush.msrb.mxu1 %v560_v17  ;;  %v555_v17 = vld [vmem:[%s13145_s3 + $0x140] sm:$0xff] }
 0x18b   : > { %v8350_v63 = vpop.f32.mrf.mxu0  ;;  %2208 = vmatpush.msrb.mxu1 %v559_v21 }
 0x18d   : > { %1174 = vmatmul.f32.gmra.mxu3 %v779_v58  ;;  %1299 = vmatmul.f32.gmra.mxu2 %v887_v61  ;;  %v824_v58 = vsel %vm817_vm3, %v821_v41, %v823_v54  ;;  %v825_v61 = vrot.slane %v8076_v0, 2  ;;  %v827_v0 = vrot.slane %v8085_v6, 2  ;;  %v554_v6 = vld [vmem:[%s13145_s3 + $0x138] sm:$0xff] }
 0x18e   : > { %1034 = vmatmul.f32.gmra.mxu0 %v8315_v18  ;;  %v530_v18 = vld [vmem:[%s13145_s3 + $0x78] sm:$0xff]  ;;  %2209 = vmatpush.msrb.mxu1 %v558_v35 }
 0x18f   : > { %1955 = vmatpush.msrb.mxu3 %v530_v18  ;;  %v826_v1 = vsel %vm817_vm3, %v823_v54, %v825_v61  ;;  %v541_v18 = vld [vmem:[%s13145_s3 + $0xd0] sm:$0xff]  ;;  %v828_v21 = vsel %vm817_vm3, %v825_v61, %v827_v0 }
 0x190   : > { %2210 = vmatpush.msrb.mxu1 %v557_v23 }
 0x192   : > { %2211 = vmatpush.msrb.mxu1 %v556_v50  ;;  %v519_v50 = vld [vmem:[%s13145_s3 + $0x20] sm:$0xff] }
 0x193   : > { %v8357_v5 = vpop.f32.mrf.mxu0 }
 0x194   : > { %2212 = vmatpush.msrb.mxu1 %v555_v17  ;;  %v518_v17 = vld [vmem:[%s13145_s3 + $0x18] sm:$0xff] }
 0x196   : > { %1037 = vmatmul.f32.gmra.mxu0 %v668_v31  ;;  %v529_v31 = vld [vmem:[%s13145_s3 + $0x70] sm:$0xff]  ;;  %2213 = vmatpush.msrb.mxu1 %v554_v6 }
 0x197   : > { %1956 = vmatpush.msrb.mxu3 %v529_v31  ;;  %v523_v31 = vld [vmem:[%s13145_s3 + $0x40] sm:$0xff]  ;;  %v517_v6 = vld [vmem:[%s13145_s3 + $0x10] sm:$0xff] }
 0x199   : > { %1957 = vmatpush.msrb.mxu3 %v528_v24  ;;  %v540_v24 = vld [vmem:[%s13145_s3 + $0xc8] sm:$0xff] }
 0x19b   : > { %v8362_v14 = vpop.f32.mrf.mxu0  ;;  %1958 = vmatpush.msrb.mxu3 %v527_v36  ;;  %v831_v36 = vrot.slane %v8097_v16, 2  ;;  %v538_v16 = vld [vmem:[%s13145_s3 + $0xb8] sm:$0xff] }
 0x19d   : > { %1959 = vmatpush.msrb.mxu3 %v526_v43  ;;  %v833_v43 = vrot.slane %v8106_v22, 2  ;;  %v537_v22 = vld [vmem:[%s13145_s3 + $0xb0] sm:$0xff] }
 0x19e   : > { %1040 = vmatmul.f32.gmra.mxu0 %v669_v12  ;;  %v546_v12 = vld [vmem:[%s13145_s3 + $0xf8] sm:$0xff] }
 0x19f   : > { %2080 = vmatpush.msra.mxu0 %v546_v12  ;;  %1960 = vmatpush.msrb.mxu3 %v525_v55  ;;  %v834_v54 = vsel %vm817_vm3, %v831_v36, %v833_v43  ;;  %v552_v55 = vld [vmem:[%s13145_s3 + $0x128] sm:$0xff] }
 0x1a1   : > { %2081 = vmatpush.msra.mxu0 %v545_v8  ;;  %1961 = vmatpush.msrb.mxu3 %v524_v3  ;;  %v829_v8 = vrot.slane %v8091_v11, 2  ;;  %v539_v11 = vld [vmem:[%s13145_s3 + $0xc0] sm:$0xff]  ;;  %v8500_v3 = vpop.f32.mrf.mxu1 }
 0x1a3   : > { %v8367_v45 = vpop.f32.mrf.mxu0  ;;  %2082 = vmatpush.msra.mxu0 %v544_v40  ;;  %1962 = vmatpush.msrb.mxu3 %v523_v31  ;;  %v830_v35 = vsel %vm817_vm3, %v827_v0, %v829_v8  ;;  %v521_v40 = vld [vmem:[%s13145_s3 + $0x30] sm:$0xff]  ;;  %v832_v23 = vsel %vm817_vm3, %v829_v8, %v831_v36  ;;  %v550_v8 = vld [vmem:[%s13145_s3 + $0x118] sm:$0xff] }
 0x1a5   : > { %2083 = vmatpush.msra.mxu0 %v543_v53 }
 0x1a6   : > { %1043 = vmatmul.f32.gmra.mxu0 %v670_v29 }
 0x1a7   : > { %2084 = vmatpush.msra.mxu0 %v542_v59 }
 0x1a9   : > { %2085 = vmatpush.msra.mxu0 %v541_v18  ;;  %v837_v18 = vrot.slane %v8121_v33, 2  ;;  %v839_v33 = vrot.slane %v8127_v38, 2  ;;  %v534_v38 = vld [vmem:[%s13145_s3 + $0x98] sm:$0xff] }
 0x1ab   : > { %v8375_v20 = vpop.f32.mrf.mxu0  ;;  %2086 = vmatpush.msra.mxu0 %v540_v24  ;;  %v8518_v24 = vpop.f32.mrf.mxu1 }
 0x1ad   : > { %2087 = vmatpush.msra.mxu0 %v539_v11  ;;  %v841_v11 = vrot.slane %v8142_v48, 2  ;;  %v533_v48 = vld [vmem:[%s13145_s3 + $0x90] sm:$0xff] }
 0x1ae   : > { %1046 = vmatmul.f32.gmra.mxu0 %v671_v44  ;;  %v820_v44 = vsel %vm817_vm3, %v818_v32, %v819_v30  ;;  %v522_v32 = vld [vmem:[%s13145_s3 + $0x38] sm:$0xff] }
 0x1af   : > { %1963 = vmatpush.msrb.mxu3 %v522_v32  ;;  %2088 = vmatpush.msra.mxu0 %v538_v16  ;;  %v842_v16 = vsel %vm817_vm3, %v839_v33, %v841_v11 }
 0x1b1   : > { %1964 = vmatpush.msrb.mxu3 %v521_v40  ;;  %2089 = vmatpush.msra.mxu0 %v537_v22  ;;  %v516_v40 = vld [vmem:[%s13145_s3 + $0x8] sm:$0xff] }
 0x1b3   : > { %v8386_v29 = vpop.f32.mrf.mxu0  ;;  %v8534_v36 = vpop.f32.mrf.mxu1 }
 0x1b6   : > { %1049 = vmatmul.f32.gmra.mxu0 %v672_v56 }
 0x1bb   : > { %v8399_v42 = vpop.f32.mrf.mxu0 }
 0x1be   : > { %1194 = vmatmul.f32.vlgmr.msrb.gmra.mxu0 %v820_v44  ;;  %v553_v44 = vld [vmem:[%s13145_s3 + $0x130] sm:$0xff] }
 0x1bf   : > { %2214 = vmatpush.msrb.mxu1 %v553_v44  ;;  %v549_v44 = vld [vmem:[%s13145_s3 + $0x110] sm:$0xff] }
 0x1c1   : > { %2215 = vmatpush.msrb.mxu1 %v552_v55  ;;  %v8555_v55 = vpop.f32.mrf.mxu1 }
 0x1c3   : > { %v8412_v46 = vpop.f32.mrf.mxu0 }
 0x1c6   : > { %1197 = vmatmul.f32.gmra.mxu0 %v822_v49  ;;  %v520_v49 = vld [vmem:[%s13145_s3 + $0x28] sm:$0xff] }
 0x1c7   : > { %1965 = vmatpush.msrb.mxu3 %v520_v49  ;;  %v843_v49 = vrot.slane %v8161_v60, 2  ;;  %v532_v60 = vld [vmem:[%s13145_s3 + $0x88] sm:$0xff] }
 0x1c9   : > { %1966 = vmatpush.msrb.mxu3 %v519_v50  ;;  %v548_v50 = vld [vmem:[%s13145_s3 + $0x108] sm:$0xff] }
 0x1cb   : > { %v8422_v56 = vpop.f32.mrf.mxu0  ;;  %1967 = vmatpush.msrb.mxu3 %v518_v17 }
 0x1cd   : > { %1968 = vmatpush.msrb.mxu3 %v517_v6  ;;  %v7317_v6 = vld [vmem:[%s13143_s1 + $0x1e8] sm:$0xff] }
 0x1ce   : > { %1200 = vmatmul.f32.gmra.mxu0 %v824_v58  ;;  %v835_v58 = vrot.slane %v8112_v27, 2  ;;  %v551_v27 = vld [vmem:[%s13145_s3 + $0x120] sm:$0xff] }
 0x1cf   : > { %2216 = vmatpush.msrb.mxu1 %v551_v27  ;;  %1969 = vmatpush.msrb.mxu3 %v516_v40  ;;  %v7335_v27 = vld [vmem:[%s13143_s1 + $0x278] sm:$0xff]  ;;  %v1412_v40 = vlaneseq }
 0x1d0   : > { %v836_v61 = vsel %vm817_vm3, %v833_v43, %v835_v58  ;;  %v838_v31 = vsel %vm817_vm3, %v835_v58, %v837_v18  ;;  %v7319_v43 = vld [vmem:[%s13143_s1 + $0x1f8] sm:$0xff]  ;;  %v844_v58 = vsel %vm817_vm3, %v841_v11, %v843_v49 }
 0x1d1   : > { %2217 = vmatpush.msrb.mxu1 %v550_v8  ;;  %3226 = vmatpush.msrb.mxu2 %v7319_v43  ;;  %v847_v8 = vrot.slane %v8197_v28, 2  ;;  %v7316_v43 = vld [vmem:[%s13143_s1 + $0x1e0] sm:$0xff] }
 0x1d3   : > { %v8435_v4 = vpop.f32.mrf.mxu0  ;;  %2218 = vmatpush.msrb.mxu1 %v549_v44 }
 0x1d5   : > { %2219 = vmatpush.msrb.mxu1 %v548_v50 }
 0x1d6   : > { %1203 = vmatmul.f32.gmra.mxu0 %v826_v1  ;;  %v536_v1 = vld [vmem:[%s13145_s3 + $0xa8] sm:$0xff] }
 0x1d7   : > { %2090 = vmatpush.msra.mxu0 %v536_v1  ;;  %v845_v1 = vrot.slane %v8186_v15, 2  ;;  %v547_v15 = vld [vmem:[%s13145_s3 + $0x100] sm:$0xff] }
 0x1d8   : > { %2220 = vmatpush.msrb.mxu1 %v547_v15 }
 0x1d9   : > { %v846_v17 = vsel %vm817_vm3, %v843_v49, %v845_v1  ;;  %v7334_v49 = vld [vmem:[%s13143_s1 + $0x270] sm:$0xff] }
 0x1db   : > { %v8448_v12 = vpop.f32.mrf.mxu0 }
 0x1de   : > { %1206 = vmatmul.f32.gmra.mxu0 %v828_v21  ;;  %v535_v21 = vld [vmem:[%s13145_s3 + $0xa0] sm:$0xff] }
 0x1df   : > { %2091 = vmatpush.msra.mxu0 %v535_v21  ;;  %v8582_v21 = vpop.f32.mrf.mxu1 }
 0x1e1   : > { %2092 = vmatpush.msra.mxu0 %v534_v38  ;;  %v848_v38 = vsel %vm817_vm3, %v845_v1, %v847_v8 }
 0x1e3   : > { %v8461_v30 = vpop.f32.mrf.mxu0  ;;  %2093 = vmatpush.msra.mxu0 %v533_v48  ;;  %v850_v48 = vsel %vm817_vm3, %v847_v8, %v849_v9 }
 0x1e5   : > { %2094 = vmatpush.msra.mxu0 %v532_v60 }
 0x1e6   : > { %1209 = vmatmul.f32.gmra.mxu0 %v830_v35  ;;  %v840_v35 = vsel %vm817_vm3, %v837_v18, %v839_v33  ;;  %v8584_v33 = vpop.f32.mrf.mxu3 }
 0x1e7   : > { %v8593_v11 = vpop.f32.mrf.mxu1 }
 0x1eb   : > { %v8474_v41 = vpop.f32.mrf.mxu0 }
 0x1ee   : > { %1212 = vmatmul.f32.gmra.mxu0 %v832_v23  ;;  %v8595_v44 = vpop.f32.mrf.mxu3 }
 0x1ef   : > { %v8622_v50 = vpop.f32.mrf.mxu1 }
 0x1f3   : > { %v8484_v53 = vpop.f32.mrf.mxu0 }
 0x1f6   : > { %1215 = vmatmul.f32.gmra.mxu0 %v834_v54  ;;  %v515_v54 = vld [vmem:[%s13145_s3] sm:$0xff] }
 0x1f7   : > { %1970 = vmatpush.msrb.mxu3 %v515_v54  ;;  %v8614_v54 = vshrl.u32 %v1412_v40, 7  ;;  %v8644_v40 = vpop.f32.mrf.mxu1 }
 0x1f9   : > { %3348 = vmatpush.msra.mxu3 %v7335_v27  ;;  %13263 = vst [vmem:[#allocation12_spill] sm:$0xff] %v8614_v54  ;;  %v1450_v9 = vadd.s32 %v8618_v7, %v8614_v54  ;;  %v8628_v27 = vadd.s32 8, %v8614_v54 }
 0x1fb   : > { %v8497_v59 = vpop.f32.mrf.mxu0  ;;  %3349 = vmatpush.msra.mxu3 %v7334_v49  ;;  %vm1486_vm9 = vcmp.ge.s32.totalorder %v1450_v9, 0  ;;  %vm1522_vm10 = vcmp.lt.s32.totalorder %v1450_v9, 1000  ;;  %13264 = vst [vmem:[#allocation13_spill] sm:$0xff] %v8628_v27  ;;  %v1451_v8 = vadd.s32 %v8618_v7, %v8628_v27  ;;  %v7333_v9 = vld [vmem:[%s13143_s1 + $0x268] sm:$0xff] }
 0x1fc   : > { %vm8635_vm12 = vmand %vm1486_vm9, %vm1522_vm10 }
 0x1fd   : > { %vm1487_vm13 = vcmp.ge.s32.totalorder %v1451_v8, 0  ;;  %vm1523_vm14 = vcmp.lt.s32.totalorder %v1451_v8, 1000  ;;  %3350 = vmatpush.msra.mxu3 %v7333_v9  ;;  %v8665_v9 = vadd.s32 24, %v8614_v54 }
 0x1fe   : > { %1218 = vmatmul.f32.gmra.mxu0 %v836_v61  ;;  %v7318_v61 = vld [vmem:[%s13143_s1 + $0x1f0] sm:$0xff]  ;;  %vm1559_vm0 = vmand %vm1487_vm13, %vm1523_vm14 }
 0x1ff   : > { %3227 = vmatpush.msrb.mxu2 %v7318_v61  ;;  %v8625_v61 = vpop.f32.mrf.mxu3  ;;  %13268 = vst [vmem:[#allocation15_spill] sm:$0xff] %v8665_v9 }
 0x201   : > { %3228 = vmatpush.msrb.mxu2 %v7317_v6 }
 0x203   : > { %v8512_v0 = vpop.f32.mrf.mxu0  ;;  %3229 = vmatpush.msrb.mxu2 %v7316_v43 }
 0x206   : > { %1221 = vmatmul.f32.gmra.mxu0 %v838_v31  ;;  %v531_v31 = vld [vmem:[%s13145_s3 + $0x80] sm:$0xff] }
 0x207   : > { %2095 = vmatpush.msra.mxu0 %v531_v31  ;;  %v8649_v43 = vpop.f32.mrf.mxu3 }
 0x20b   : > { %v8527_v32 = vpop.f32.mrf.mxu0 }
 0x20e   : > { %1224 = vmatmul.f32.gmra.mxu0 %v840_v35 }
 0x213   : > { %v8542_v23 = vpop.f32.mrf.mxu0 }
 0x214   : > { %13258 = vst [vmem:[#allocation7_spill] sm:$0xff] %v8542_v23 }
 0x216   : > { %1227 = vmatmul.f32.gmra.mxu0 %v842_v16  ;;  %v8600_v16 = vld [vmem:[%s13144_s2] ss:$0 sm:$0xff] }
 0x217   : > { %v949_v31 = vadd.f32 %v8600_v16, %v8236_v10  ;;  %v8647_v10 = vadd.s32 16, %v8614_v54 }
 0x219   : > { %13267 = vst [vmem:[#allocation14_spill] sm:$0xff] %v8647_v10 }
 0x21b   : > { %v8557_v22 = vpop.f32.mrf.mxu0 }
 0x21c   : > { %13259 = vst [vmem:[#allocation8_spill] sm:$0xff] %v8557_v22 }
 0x21e   : > { %1230 = vmatmul.f32.gmra.mxu0 %v844_v58  ;;  %v946_v58 = vadd.f32 %v8600_v16, %v8224_v57  ;;  %v7315_v57 = vld [vmem:[%s13143_s1 + $0x1d8] sm:$0xff] }
 0x21f   : > { %3230 = vmatpush.msrb.mxu2 %v7315_v57 }
 0x220   : > { %v1071_v60 = vadd.f32 %v8500_v3, %v946_v58  ;;  %v952_v58 = vadd.f32 %v8600_v16, %v8248_v25 }
 0x222   : > { %v1077_v57 = vadd.f32 %v8534_v36, %v952_v58  ;;  %v955_v36 = vadd.f32 %v8600_v16, %v8259_v37  ;;  %v8673_v58 = vpop.f32.mrf.mxu3 }
 0x223   : > { %v8573_v18 = vpop.f32.mrf.mxu0 }
 0x224   : > { %13260 = vst [vmem:[#allocation9_spill] sm:$0xff] %v8573_v18 }
 0x226   : > { %1233 = vmatmul.f32.gmra.mxu0 %v846_v17 }
 0x22b   : > { %v8590_v35 = vpop.f32.mrf.mxu0 }
 0x22c   : > { %13261 = vst [vmem:[#allocation10_spill] sm:$0xff] %v8590_v35 }
 0x22e   : > { %1236 = vmatmul.f32.gmra.mxu0 %v848_v38  ;;  %v1074_v38 = vadd.f32 %v8518_v24, %v949_v31  ;;  %v7314_v24 = vld [vmem:[%s13143_s1 + $0x1d0] sm:$0xff] }
 0x22f   : > { %3231 = vmatpush.msrb.mxu2 %v7314_v24 }
 0x233   : > { %v8602_v28 = vpop.f32.mrf.mxu0 }
 0x234   : > { %13262 = vst [vmem:[#allocation11_spill] sm:$0xff] %v8602_v28 }
 0x236   : > { %1239 = vmatmul.f32.gmra.mxu0 %v850_v48 }
 0x23b   : > { %v1195_v1 = vpop.f32.mrf.mxu0 }
 0x23c   : > { %v1196_v17 = vadd.f32 %v1195_v1, %v1071_v60 }
 0x23e   : > { %v1339_v15 = vmul.f32 0.1, %v1196_v17  ;;  %vm1303_vm11 = vcmp.ge.f32.partialorder %v1196_v17, 0.0 }
 0x240   : > { %v1375_v6 = vsel %vm1303_vm11, %v1196_v17, %v1339_v15  ;;  %v1452_v17 = vadd.s32 %v8618_v7, %v8647_v10 }
 0x241   : > { %7268 = vmatmul.msk.f32.vlgmr.msrb.gmra.mxu3 %vm8635_vm12, %v1375_v6  ;;  %v1666_v1 = vsel %vm8635_vm12, %v1375_v6, 0.0 }
 0x242   : > { %v1738_v15 = vrot.slane %v1666_v1, 1  ;;  %v1845_v8 = vrot.slane %v1666_v1, 2  ;;  %vm1488_vm1 = vcmp.ge.s32.totalorder %v1452_v17, 0  ;;  %vm1524_vm4 = vcmp.lt.s32.totalorder %v1452_v17, 1000 }
 0x243   : > { %v1198_v48 = vpop.f32.mrf.mxu0  ;;  %vm1560_vm6 = vmand %vm1488_vm1, %vm1524_vm4  ;;  %v1453_v1 = vadd.s32 %v8618_v7, %v8665_v9 }
 0x244   : > { %v1199_v49 = vadd.f32 %v1198_v48, %v1074_v38 }
 0x245   : > { %vm1489_vm7 = vcmp.ge.s32.totalorder %v1453_v1, 0  ;;  %vm1525_vm8 = vcmp.lt.s32.totalorder %v1453_v1, 1000 }
 0x246   : > { %vm1304_vm15 = vcmp.ge.f32.partialorder %v1199_v49, 0.0  ;;  %v1340_v60 = vmul.f32 0.1, %v1199_v49  ;;  %vm1561_vm10 = vmand %vm1489_vm7, %vm1525_vm8 }
 0x248   : > { %v1376_v25 = vsel %vm1304_vm15, %v1199_v49, %v1340_v60  ;;  %v8669_v49 = vpop.f32.mrf.mxu1 }
 0x249   : > { %v1667_v31 = vsel %vm1559_vm0, %v1376_v25, 0.0  ;;  %7269 = vmatmul.msk.f32.gmra.mxu3 %vm1559_vm0, %v1376_v25  ;;  %v1080_v25 = vadd.f32 %v8555_v55, %v955_v36  ;;  %v7332_v55 = vld [vmem:[%s13143_s1 + $0x260] sm:$0xff]  ;;  %v958_v36 = vadd.f32 %v8600_v16, %v8270_v51  ;;  %v8699_v51 = vadd.s32 40, %v8614_v54 }
 0x24a   : > { %v1739_v38 = vrot.slane %v1667_v31, 1  ;;  %v1846_v48 = vrot.slane %v1667_v31, 2  ;;  %3351 = vmatpush.msra.mxu3 %v7332_v55 }
 0x24b   : > { %v1201_v28 = vpop.f32.mrf.mxu0  ;;  %13270 = vst [vmem:[#allocation17_spill] sm:$0xff] %v8699_v51 }
 0x24c   : > { %v1202_v3 = vadd.f32 %v1201_v28, %v1077_v57  ;;  %v1740_v6 = vsel %vm709_vm2, %v1738_v15, %v1739_v38  ;;  %v1847_v24 = vsel %vm817_vm3, %v1845_v8, %v1846_v48  ;;  %v7313_v15 = vld [vmem:[%s13143_s1 + $0x1c8] sm:$0xff]  ;;  %v8682_v8 = vadd.s32 32, %v8614_v54 }
 0x24d   : > { %2096 = vmatmul.f32.vlgmr.msra.gmra.mxu0 %v1740_v6  ;;  %2221 = vmatmul.f32.vlgmr.msrb.gmra.mxu1 %v1847_v24 }
 0x24e   : > { %vm1305_vm5 = vcmp.ge.f32.partialorder %v1202_v3, 0.0  ;;  %v1341_v60 = vmul.f32 0.1, %v1202_v3  ;;  %13269 = vst [vmem:[#allocation16_spill] sm:$0xff] %v8682_v8  ;;  %3232 = vmatpush.msrb.mxu2 %v7313_v15 }
 0x250   : > { %v1377_v28 = vsel %vm1305_vm5, %v1202_v3, %v1341_v60  ;;  %v8691_v1 = vpop.f32.mrf.mxu1 }
 0x251   : > { %v1668_v17 = vsel %vm1560_vm6, %v1377_v28, 0.0  ;;  %7270 = vmatmul.msk.f32.gmra.mxu3 %vm1560_vm6, %v1377_v28  ;;  %v8695_v28 = vpop.f32.mrf.mxu3 }
 0x252   : > { %v1741_v57 = vrot.slane %v1668_v17, 1  ;;  %v1848_v31 = vrot.slane %v1668_v17, 2 }
 0x253   : > { %v1204_v37 = vpop.f32.mrf.mxu0 }
 0x254   : > { %v1205_v6 = vadd.f32 %v1204_v37, %v1080_v25  ;;  %v1742_v3 = vsel %vm709_vm2, %v1739_v38, %v1741_v57  ;;  %v1849_v24 = vsel %vm817_vm3, %v1846_v48, %v1848_v31  ;;  %v1454_v38 = vadd.s32 %v8618_v7, %v8682_v8 }
 0x255   : > { %2099 = vmatmul.f32.gmra.mxu0 %v1742_v3  ;;  %2224 = vmatmul.f32.gmra.mxu1 %v1849_v24  ;;  %v1083_v25 = vadd.f32 %v8582_v21, %v958_v36  ;;  %v7312_v36 = vld [vmem:[%s13143_s1 + $0x1c0] sm:$0xff] }
 0x256   : > { %vm1306_vm9 = vcmp.ge.f32.partialorder %v1205_v6, 0.0  ;;  %v1342_v60 = vmul.f32 0.1, %v1205_v6  ;;  %vm1490_vm11 = vcmp.ge.s32.totalorder %v1454_v38, 0  ;;  %vm1526_vm12 = vcmp.lt.s32.totalorder %v1454_v38, 1000  ;;  %3233 = vmatpush.msrb.mxu2 %v7312_v36 }
 0x257   : > { %vm1562_vm14 = vmand %vm1490_vm11, %vm1526_vm12 }
 0x258   : > { %v1378_v48 = vsel %vm1306_vm9, %v1205_v6, %v1342_v60  ;;  %v961_v6 = vadd.f32 %v8600_v16, %v8280_v62  ;;  %v1455_v60 = vadd.s32 %v8618_v7, %v8699_v51 }
 0x259   : > { %v1669_v17 = vsel %vm1561_vm10, %v1378_v48, 0.0  ;;  %7271 = vmatmul.msk.f32.gmra.mxu3 %vm1561_vm10, %v1378_v48  ;;  %v8713_v48 = vpop.f32.mrf.mxu3 }
 0x25a   : > { %v1743_v15 = vrot.slane %v1669_v17, 1  ;;  %v1850_v37 = vrot.slane %v1669_v17, 2  ;;  %vm1491_vm15 = vcmp.ge.s32.totalorder %v1455_v60, 0  ;;  %vm1527_vm0 = vcmp.lt.s32.totalorder %v1455_v60, 1000 }
 0x25b   : > { %v1207_v3 = vpop.f32.mrf.mxu0  ;;  %vm1563_vm4 = vmand %vm1491_vm15, %vm1527_vm0 }
 0x25c   : > { %v1208_v24 = vadd.f32 %v1207_v3, %v1083_v25  ;;  %v1744_v55 = vsel %vm709_vm2, %v1741_v57, %v1743_v15  ;;  %v1851_v35 = vsel %vm817_vm3, %v1848_v31, %v1850_v37  ;;  %v8710_v57 = vpop.f32.mrf.mxu1  ;;  %v8716_v3 = vadd.s32 48, %v8614_v54 }
 0x25d   : > { %2102 = vmatmul.f32.gmra.mxu0 %v1744_v55  ;;  %2227 = vmatmul.f32.gmra.mxu1 %v1851_v35  ;;  %v1086_v35 = vadd.f32 %v8593_v11, %v961_v6  ;;  %v964_v11 = vadd.f32 %v8600_v16, %v8290_v13  ;;  %v7331_v13 = vld [vmem:[%s13143_s1 + $0x258] sm:$0xff] }
 0x25e   : > { %vm1307_vm13 = vcmp.ge.f32.partialorder %v1208_v24, 0.0  ;;  %v1343_v21 = vmul.f32 0.1, %v1208_v24  ;;  %13271 = vst [vmem:[#allocation18_spill] sm:$0xff] %v8716_v3  ;;  %v1456_v60 = vadd.s32 %v8618_v7, %v8716_v3  ;;  %3352 = vmatpush.msra.mxu3 %v7331_v13 }
 0x260   : > { %v1379_v38 = vsel %vm1307_vm13, %v1208_v24, %v1343_v21  ;;  %v7311_v21 = vld [vmem:[%s13143_s1 + $0x1b8] sm:$0xff]  ;;  %vm1492_vm5 = vcmp.ge.s32.totalorder %v1456_v60, 0  ;;  %vm1528_vm6 = vcmp.lt.s32.totalorder %v1456_v60, 1000  ;;  %v7310_v60 = vld [vmem:[%s13143_s1 + $0x1b0] sm:$0xff] }
 0x261   : > { %v1670_v31 = vsel %vm1562_vm14, %v1379_v38, 0.0  ;;  %7272 = vmatmul.msk.f32.gmra.mxu3 %vm1562_vm14, %v1379_v38  ;;  %3234 = vmatpush.msrb.mxu2 %v7311_v21  ;;  %v967_v21 = vadd.f32 %v8600_v16, %v8300_v26  ;;  %vm1564_vm8 = vmand %vm1492_vm5, %vm1528_vm6  ;;  %v8749_v26 = vadd.s32 64, %v8614_v54 }
 0x262   : > { %v1745_v62 = vrot.slane %v1670_v31, 1  ;;  %v1852_v17 = vrot.slane %v1670_v31, 2 }
 0x263   : > { %v1210_v25 = vpop.f32.mrf.mxu0  ;;  %3235 = vmatpush.msrb.mxu2 %v7310_v60  ;;  %13273 = vst [vmem:[#allocation20_spill] sm:$0xff] %v8749_v26 }
 0x264   : > { %v1211_v55 = vadd.f32 %v1210_v25, %v1086_v35  ;;  %v1746_v36 = vsel %vm709_vm2, %v1743_v15, %v1745_v62  ;;  %v1853_v24 = vsel %vm817_vm3, %v1850_v37, %v1852_v17  ;;  %v1089_v37 = vadd.f32 %v8622_v50, %v964_v11  ;;  %v8731_v25 = vpop.f32.mrf.mxu1 }
 0x265   : > { %2105 = vmatmul.f32.gmra.mxu0 %v1746_v36  ;;  %2230 = vmatmul.f32.gmra.mxu1 %v1853_v24  ;;  %v8734_v24 = vadd.s32 56, %v8614_v54 }
 0x266   : > { %vm1308_vm1 = vcmp.ge.f32.partialorder %v1211_v55, 0.0  ;;  %v1344_v6 = vmul.f32 0.1, %v1211_v55 }
 0x267   : > { %13272 = vst [vmem:[#allocation19_spill] sm:$0xff] %v8734_v24 }
 0x268   : > { %v1380_v38 = vsel %vm1308_vm1, %v1211_v55, %v1344_v6  ;;  %v8736_v55 = vpop.f32.mrf.mxu3 }
 0x269   : > { %v1671_v15 = vsel %vm1563_vm4, %v1380_v38, 0.0  ;;  %7273 = vmatmul.msk.f32.gmra.mxu3 %vm1563_vm4, %v1380_v38 }
 0x26a   : > { %v1747_v31 = vrot.slane %v1671_v15, 1  ;;  %v1854_v35 = vrot.slane %v1671_v15, 2  ;;  %v1457_v15 = vadd.s32 %v8618_v7, %v8734_v24 }
 0x26b   : > { %v1213_v36 = vpop.f32.mrf.mxu0 }
 0x26c   : > { %v1214_v6 = vadd.f32 %v1213_v36, %v1089_v37  ;;  %v1748_v50 = vsel %vm709_vm2, %v1745_v62, %v1747_v31  ;;  %v1855_v11 = vsel %vm817_vm3, %v1852_v17, %v1854_v35  ;;  %v1092_v17 = vadd.f32 %v8644_v40, %v967_v21  ;;  %v8753_v23 = vpop.f32.mrf.mxu1 }
 0x26d   : > { %2108 = vmatmul.f32.gmra.mxu0 %v1748_v50  ;;  %2233 = vmatmul.f32.gmra.mxu1 %v1855_v11  ;;  %vm1493_vm9 = vcmp.ge.s32.totalorder %v1457_v15, 0  ;;  %vm1529_vm10 = vcmp.lt.s32.totalorder %v1457_v15, 1000  ;;  %v970_v40 = vadd.f32 %v8600_v16, %v8310_v39 }
 0x26e   : > { %vm1309_vm7 = vcmp.ge.f32.partialorder %v1214_v6, 0.0  ;;  %v1345_v38 = vmul.f32 0.1, %v1214_v6  ;;  %vm1565_vm12 = vmand %vm1493_vm9, %vm1529_vm10 }
 0x270   : > { %v1381_v37 = vsel %vm1309_vm7, %v1214_v6, %v1345_v38  ;;  %v8757_v6 = vpop.f32.mrf.mxu3  ;;  %v1458_v38 = vadd.s32 %v8618_v7, %v8749_v26 }
 0x271   : > { %v1672_v62 = vsel %vm1564_vm8, %v1381_v37, 0.0  ;;  %7274 = vmatmul.msk.f32.gmra.mxu3 %vm1564_vm8, %v1381_v37 }
 0x272   : > { %v1749_v13 = vrot.slane %v1672_v62, 1  ;;  %v1856_v36 = vrot.slane %v1672_v62, 2  ;;  %vm1494_vm13 = vcmp.ge.s32.totalorder %v1458_v38, 0  ;;  %vm1530_vm14 = vcmp.lt.s32.totalorder %v1458_v38, 1000 }
 0x273   : > { %v1216_v50 = vpop.f32.mrf.mxu0  ;;  %vm1566_vm0 = vmand %vm1494_vm13, %vm1530_vm14 }
 0x274   : > { %v1217_v11 = vadd.f32 %v1216_v50, %v1092_v17  ;;  %v1750_v18 = vsel %vm709_vm2, %v1747_v31, %v1749_v13  ;;  %v1857_v22 = vsel %vm817_vm3, %v1854_v35, %v1856_v36  ;;  %v1095_v31 = vadd.f32 %v8669_v49, %v970_v40  ;;  %v7330_v40 = vld [vmem:[%s13143_s1 + $0x250] sm:$0xff] }
 0x275   : > { %2111 = vmatmul.f32.gmra.mxu0 %v1750_v18  ;;  %2236 = vmatmul.f32.gmra.mxu1 %v1857_v22  ;;  %v7309_v22 = vld [vmem:[%s13143_s1 + $0x1a8] sm:$0xff]  ;;  %v8766_v18 = vadd.s32 72, %v8614_v54  ;;  %v973_v49 = vadd.f32 %v8600_v16, %v8320_v52 }
 0x276   : > { %vm1310_vm11 = vcmp.ge.f32.partialorder %v1217_v11, 0.0  ;;  %v1346_v21 = vmul.f32 0.1, %v1217_v11  ;;  %3236 = vmatpush.msrb.mxu2 %v7309_v22  ;;  %3353 = vmatpush.msra.mxu3 %v7330_v40 }
 0x277   : > { %13274 = vst [vmem:[#allocation21_spill] sm:$0xff] %v8766_v18  ;;  %v1459_v38 = vadd.s32 %v8618_v7, %v8766_v18  ;;  %v1098_v52 = vadd.f32 %v8691_v1, %v973_v49  ;;  %v8787_v18 = vpop.f32.mrf.mxu2  ;;  %v976_v1 = vadd.f32 %v8600_v16, %v8326_v2  ;;  %v7308_v49 = vld [vmem:[%s13143_s1 + $0x1a0] sm:$0xff] }
 0x278   : > { %v1382_v60 = vsel %vm1310_vm11, %v1217_v11, %v1346_v21  ;;  %v8775_v21 = vpop.f32.mrf.mxu1  ;;  %3237 = vmatpush.msrb.mxu2 %v7308_v49 }
 0x279   : > { %v1673_v15 = vsel %vm1565_vm12, %v1382_v60, 0.0  ;;  %7275 = vmatmul.msk.f32.gmra.mxu3 %vm1565_vm12, %v1382_v60  ;;  %vm1495_vm1 = vcmp.ge.s32.totalorder %v1459_v38, 0  ;;  %vm1531_vm4 = vcmp.lt.s32.totalorder %v1459_v38, 1000 }
 0x27a   : > { %v1751_v35 = vrot.slane %v1673_v15, 1  ;;  %v1858_v37 = vrot.slane %v1673_v15, 2  ;;  %vm1567_vm6 = vmand %vm1495_vm1, %vm1531_vm4 }
 0x27b   : > { %v1219_v39 = vpop.f32.mrf.mxu0 }
 0x27c   : > { %v1220_v62 = vadd.f32 %v1219_v39, %v1095_v31  ;;  %v1752_v17 = vsel %vm709_vm2, %v1749_v13, %v1751_v35  ;;  %v1859_v50 = vsel %vm817_vm3, %v1856_v36, %v1858_v37  ;;  %v8779_v13 = vpop.f32.mrf.mxu3  ;;  %v8783_v39 = vadd.s32 80, %v8614_v54 }
 0x27d   : > { %2114 = vmatmul.f32.gmra.mxu0 %v1752_v17  ;;  %2239 = vmatmul.f32.gmra.mxu1 %v1859_v50 }
 0x27e   : > { %v1347_v11 = vmul.f32 0.1, %v1220_v62  ;;  %vm1311_vm15 = vcmp.ge.f32.partialorder %v1220_v62, 0.0  ;;  %13275 = vst [vmem:[#allocation22_spill] sm:$0xff] %v8783_v39 }
 0x280   : > { %v1383_v36 = vsel %vm1311_vm15, %v1220_v62, %v1347_v11  ;;  %v1460_v11 = vadd.s32 %v8618_v7, %v8783_v39  ;;  %v8822_v39 = vadd.s32 96, %v8614_v54 }
 0x281   : > { %v1674_v60 = vsel %vm1566_vm0, %v1383_v36, 0.0  ;;  %7276 = vmatmul.msk.f32.gmra.mxu3 %vm1566_vm0, %v1383_v36  ;;  %v1101_v36 = vadd.f32 %v8710_v57, %v976_v1  ;;  %v979_v57 = vadd.f32 %v8600_v16, %v8332_v19 }
 0x282   : > { %v1753_v15 = vrot.slane %v1674_v60, 1  ;;  %v1860_v31 = vrot.slane %v1674_v60, 2  ;;  %vm1496_vm7 = vcmp.ge.s32.totalorder %v1460_v11, 0  ;;  %vm1532_vm8 = vcmp.lt.s32.totalorder %v1460_v11, 1000  ;;  %v7329_v11 = vld [vmem:[%s13143_s1 + $0x248] sm:$0xff]  ;;  %13278 = vst [vmem:[#allocation25_spill] sm:$0xff] %v8822_v39 }
 0x283   : > { %v1222_v22 = vpop.f32.mrf.mxu0  ;;  %vm1568_vm10 = vmand %vm1496_vm7, %vm1532_vm8  ;;  %3354 = vmatpush.msra.mxu3 %v7329_v11  ;;  %v1462_v11 = vadd.s32 %v8618_v7, %v8822_v39 }
 0x284   : > { %v1223_v17 = vadd.f32 %v1222_v22, %v1098_v52  ;;  %v1754_v50 = vsel %vm709_vm2, %v1751_v35, %v1753_v15  ;;  %v1861_v40 = vsel %vm817_vm3, %v1858_v37, %v1860_v31  ;;  %v8796_v37 = vpop.f32.mrf.mxu1  ;;  %v8799_v60 = vpop.f32.mrf.mxu3 }
 0x285   : > { %2117 = vmatmul.f32.gmra.mxu0 %v1754_v50  ;;  %2242 = vmatmul.f32.gmra.mxu1 %v1861_v40  ;;  %13276 = vst [vmem:[#allocation23_spill] sm:$0xff] %v8799_v60  ;;  %v8802_v50 = vadd.s32 88, %v8614_v54  ;;  %vm1498_vm15 = vcmp.ge.s32.totalorder %v1462_v11, 0  ;;  %vm1534_vm0 = vcmp.lt.s32.totalorder %v1462_v11, 1000 }
 0x286   : > { %v1348_v62 = vmul.f32 0.1, %v1223_v17  ;;  %vm1312_vm5 = vcmp.ge.f32.partialorder %v1223_v17, 0.0  ;;  %vm1570_vm4 = vmand %vm1498_vm15, %vm1534_vm0 }
 0x287   : > { %13277 = vst [vmem:[#allocation24_spill] sm:$0xff] %v8802_v50 }
 0x288   : > { %v1384_v35 = vsel %vm1312_vm5, %v1223_v17, %v1348_v62  ;;  %v7307_v62 = vld [vmem:[%s13143_s1 + $0x198] sm:$0xff] }
 0x289   : > { %v1675_v38 = vsel %vm1567_vm6, %v1384_v35, 0.0  ;;  %7277 = vmatmul.msk.f32.gmra.mxu3 %vm1567_vm6, %v1384_v35  ;;  %v8814_v35 = vpop.f32.mrf.mxu2  ;;  %3238 = vmatpush.msrb.mxu2 %v7307_v62 }
 0x28a   : > { %v1755_v2 = vrot.slane %v1675_v38, 1  ;;  %v1862_v52 = vrot.slane %v1675_v38, 2  ;;  %v1104_v38 = vadd.f32 %v8731_v25, %v979_v57  ;;  %v982_v25 = vadd.f32 %v8600_v16, %v8338_v34 }
 0x28b   : > { %v1225_v22 = vpop.f32.mrf.mxu0 }
 0x28c   : > { %v1226_v40 = vadd.f32 %v1225_v22, %v1101_v36  ;;  %v1756_v49 = vsel %vm709_vm2, %v1753_v15, %v1755_v2  ;;  %v1863_v17 = vsel %vm817_vm3, %v1860_v31, %v1862_v52  ;;  %v1461_v15 = vadd.s32 %v8618_v7, %v8802_v50  ;;  %v8824_v60 = vpop.f32.mrf.mxu3 }
 0x28d   : > { %2120 = vmatmul.f32.gmra.mxu0 %v1756_v49  ;;  %2245 = vmatmul.f32.gmra.mxu1 %v1863_v17  ;;  %v8819_v49 = vpop.f32.mrf.mxu1 }
 0x28e   : > { %v1349_v1 = vmul.f32 0.1, %v1226_v40  ;;  %vm1313_vm9 = vcmp.ge.f32.partialorder %v1226_v40, 0.0  ;;  %vm1497_vm11 = vcmp.ge.s32.totalorder %v1461_v15, 0  ;;  %vm1533_vm12 = vcmp.lt.s32.totalorder %v1461_v15, 1000 }
 0x28f   : > { %vm1569_vm14 = vmand %vm1497_vm11, %vm1533_vm12 }
 0x290   : > { %v1385_v31 = vsel %vm1313_vm9, %v1226_v40, %v1349_v1  ;;  %v7306_v1 = vld [vmem:[%s13143_s1 + $0x190] sm:$0xff] }
 0x291   : > { %v1676_v19 = vsel %vm1568_vm10, %v1385_v31, 0.0  ;;  %7278 = vmatmul.msk.f32.gmra.mxu3 %vm1568_vm10, %v1385_v31  ;;  %3239 = vmatpush.msrb.mxu2 %v7306_v1  ;;  %v1107_v31 = vadd.f32 %v8753_v23, %v982_v25  ;;  %v7328_v23 = vld [vmem:[%s13143_s1 + $0x240] sm:$0xff]  ;;  %v985_v25 = vadd.f32 %v8600_v16, %v8344_v47 }
 0x292   : > { %v1757_v36 = vrot.slane %v1676_v19, 1  ;;  %v1864_v22 = vrot.slane %v1676_v19, 2  ;;  %3355 = vmatpush.msra.mxu3 %v7328_v23  ;;  %v8859_v23 = vadd.s32 112, %v8614_v54 }
 0x293   : > { %v1228_v17 = vpop.f32.mrf.mxu0 }
 0x294   : > { %v1229_v50 = vadd.f32 %v1228_v17, %v1104_v38  ;;  %v1758_v62 = vsel %vm709_vm2, %v1755_v2, %v1757_v36  ;;  %v1865_v40 = vsel %vm817_vm3, %v1862_v52, %v1864_v22  ;;  %v8835_v2 = vpop.f32.mrf.mxu2  ;;  %v8839_v17 = vadd.s32 104, %v8614_v54  ;;  %13281 = vst [vmem:[#allocation28_spill] sm:$0xff] %v8859_v23 }
 0x295   : > { %2123 = vmatmul.f32.gmra.mxu0 %v1758_v62  ;;  %2248 = vmatmul.f32.gmra.mxu1 %v1865_v40 }
 0x296   : > { %v1350_v57 = vmul.f32 0.1, %v1229_v50  ;;  %vm1314_vm13 = vcmp.ge.f32.partialorder %v1229_v50, 0.0  ;;  %13279 = vst [vmem:[#allocation26_spill] sm:$0xff] %v8839_v17 }
 0x298   : > { %v1386_v15 = vsel %vm1314_vm13, %v1229_v50, %v1350_v57  ;;  %v1118_v50 = vpop.f32.mrf.mxu1  ;;  %v8848_v57 = vpop.f32.mrf.mxu3 }
 0x299   : > { %v1677_v52 = vsel %vm1569_vm14, %v1386_v15, 0.0  ;;  %7279 = vmatmul.msk.f32.gmra.mxu3 %vm1569_vm14, %v1386_v15  ;;  %13280 = vst [vmem:[#allocation27_spill] sm:$0xff] %v8848_v57 }
 0x29a   : > { %v1759_v19 = vrot.slane %v1677_v52, 1  ;;  %v1866_v34 = vrot.slane %v1677_v52, 2  ;;  %v7305_v52 = vld [vmem:[%s13143_s1 + $0x188] sm:$0xff] }
 0x29b   : > { %v1231_v38 = vpop.f32.mrf.mxu0  ;;  %3240 = vmatpush.msrb.mxu2 %v7305_v52 }
 0x29c   : > { %v1232_v62 = vadd.f32 %v1231_v38, %v1107_v31  ;;  %v1760_v40 = vsel %vm709_vm2, %v1757_v36, %v1759_v19  ;;  %v1867_v1 = vsel %vm817_vm3, %v1864_v22, %v1866_v34  ;;  %v1463_v36 = vadd.s32 %v8618_v7, %v8839_v17 }
 0x29d   : > { %2126 = vmatmul.f32.gmra.mxu0 %v1760_v40  ;;  %2251 = vmatmul.f32.gmra.mxu1 %v1867_v1  ;;  %v1110_v31 = vadd.f32 %v8775_v21, %v985_v25  ;;  %v8856_v40 = vpop.f32.mrf.mxu2  ;;  %v988_v21 = vadd.f32 %v8600_v16, %v8350_v63 }
 0x29e   : > { %v1351_v11 = vmul.f32 0.1, %v1232_v62  ;;  %vm1315_vm1 = vcmp.ge.f32.partialorder %v1232_v62, 0.0  ;;  %vm1499_vm5 = vcmp.ge.s32.totalorder %v1463_v36, 0  ;;  %vm1535_vm6 = vcmp.lt.s32.totalorder %v1463_v36, 1000 }
 0x29f   : > { %vm1571_vm8 = vmand %vm1499_vm5, %vm1535_vm6  ;;  %v1464_v36 = vadd.s32 %v8618_v7, %v8859_v23 }
 0x2a0   : > { %v1387_v22 = vsel %vm1315_vm1, %v1232_v62, %v1351_v11  ;;  %v8867_v52 = vpop.f32.mrf.mxu3 }
 0x2a1   : > { %v1678_v15 = vsel %vm1570_vm4, %v1387_v22, 0.0  ;;  %7280 = vmatmul.msk.f32.gmra.mxu3 %vm1570_vm4, %v1387_v22  ;;  %13282 = vst [vmem:[#allocation29_spill] sm:$0xff] %v8867_v52  ;;  %vm1500_vm9 = vcmp.ge.s32.totalorder %v1464_v36, 0  ;;  %vm1536_vm10 = vcmp.lt.s32.totalorder %v1464_v36, 1000 }
 0x2a2   : > { %v1761_v38 = vrot.slane %v1678_v15, 1  ;;  %v1868_v47 = vrot.slane %v1678_v15, 2  ;;  %v1121_v15 = vpop.f32.mrf.mxu1  ;;  %vm1572_vm12 = vmand %vm1500_vm9, %vm1536_vm10 }
 0x2a3   : > { %v1234_v1 = vpop.f32.mrf.mxu0 }
 0x2a4   : > { %v1235_v62 = vadd.f32 %v1234_v1, %v1110_v31  ;;  %v1762_v11 = vsel %vm709_vm2, %v1759_v19, %v1761_v38  ;;  %v1869_v22 = vsel %vm817_vm3, %v1866_v34, %v1868_v47  ;;  %v1113_v19 = vadd.f32 %v8796_v37, %v988_v21 }
 0x2a5   : > { %2129 = vmatmul.f32.gmra.mxu0 %v1762_v11  ;;  %2254 = vmatmul.f32.gmra.mxu1 %v1869_v22  ;;  %v994_v11 = vadd.f32 %v8600_v16, %v8362_v14  ;;  %v8873_v22 = vadd.s32 120, %v8614_v54  ;;  %v991_v37 = vadd.f32 %v8600_v16, %v8357_v5  ;;  %v997_v21 = vadd.f32 %v8600_v16, %v8367_v45 }
 0x2a6   : > { %v1352_v25 = vmul.f32 0.1, %v1235_v62  ;;  %vm1316_vm7 = vcmp.ge.f32.partialorder %v1235_v62, 0.0 }
 0x2a7   : > { %13283 = vst [vmem:[#allocation30_spill] sm:$0xff] %v8873_v22  ;;  %v1119_v14 = vadd.f32 %v1118_v50, %v994_v11  ;;  %v1465_v36 = vadd.s32 %v8618_v7, %v8873_v22  ;;  %v1116_v50 = vadd.f32 %v8819_v49, %v991_v37  ;;  %v1122_v22 = vadd.f32 %v1121_v15, %v997_v21  ;;  %v7351_v21 = vld [vmem:[%s13143_s1 + $0x2f8] sm:$0xff] }
 0x2a8   : > { %v1388_v17 = vsel %vm1316_vm7, %v1235_v62, %v1352_v25  ;;  %v8877_v25 = vpop.f32.mrf.mxu2  ;;  %v1000_v37 = vadd.f32 %v8600_v16, %v8375_v20 }
 0x2a9   : > { %v1679_v31 = vsel %vm1571_vm8, %v1388_v17, 0.0  ;;  %7281 = vmatmul.msk.f32.gmra.mxu3 %vm1571_vm8, %v1388_v17  ;;  %vm1501_vm13 = vcmp.ge.s32.totalorder %v1465_v36, 0  ;;  %vm1537_vm14 = vcmp.lt.s32.totalorder %v1465_v36, 1000  ;;  %v1247_v15 = vadd.f32 %v8814_v35, %v1122_v22 }
 0x2aa   : > { %v1763_v34 = vrot.slane %v1679_v31, 1  ;;  %v1870_v1 = vrot.slane %v1679_v31, 2  ;;  %v1124_v5 = vpop.f32.mrf.mxu1  ;;  %vm1573_vm0 = vmand %vm1501_vm13, %vm1537_vm14  ;;  %v1003_v36 = vadd.f32 %v8600_v16, %v8386_v29  ;;  %v8929_v29 = vadd.s32 152, %v8614_v54 }
 0x2ab   : > { %v1237_v63 = vpop.f32.mrf.mxu0  ;;  %v1125_v22 = vadd.f32 %v1124_v5, %v1000_v37  ;;  %vm1320_vm8 = vcmp.ge.f32.partialorder %v1247_v15, 0.0 }
 0x2ac   : > { %v1238_v57 = vadd.f32 %v1237_v63, %v1113_v19  ;;  %v1764_v23 = vsel %vm709_vm2, %v1761_v38, %v1763_v34  ;;  %v1871_v62 = vsel %vm817_vm3, %v1868_v47, %v1870_v1  ;;  %v7304_v38 = vld [vmem:[%s13143_s1 + $0x180] sm:$0xff]  ;;  %v8892_v19 = vpop.f32.mrf.mxu3  ;;  %v8895_v63 = vadd.s32 136, %v8614_v54  ;;  %13291 = vst [vmem:[#allocation36_spill] sm:$0xff] %v8929_v29 }
 0x2ad   : > { %2132 = vmatmul.f32.gmra.mxu0 %v1764_v23  ;;  %2257 = vmatmul.f32.gmra.mxu1 %v1871_v62  ;;  %v8889_v23 = vadd.s32 128, %v8614_v54  ;;  %13285 = vst [vmem:[#allocation32_spill] sm:$0xff] %v8892_v19  ;;  %v1244_v62 = vadd.f32 %v8787_v18, %v1119_v14 }
 0x2ae   : > { %v1353_v17 = vmul.f32 0.1, %v1238_v57  ;;  %vm1317_vm11 = vcmp.ge.f32.partialorder %v1238_v57, 0.0  ;;  %3241 = vmatpush.msrb.mxu2 %v7304_v38  ;;  %13286 = vst [vmem:[#allocation33_spill] sm:$0xff] %v8895_v63 }
 0x2af   : > { %13284 = vst [vmem:[#allocation31_spill] sm:$0xff] %v8889_v23  ;;  %v1466_v49 = vadd.s32 %v8618_v7, %v8889_v23  ;;  %v1355_v18 = vmul.f32 0.1, %v1244_v62  ;;  %vm1319_vm1 = vcmp.ge.f32.partialorder %v1244_v62, 0.0 }
 0x2b0   : > { %v1389_v47 = vsel %vm1317_vm11, %v1238_v57, %v1353_v17  ;;  %v8905_v14 = vpop.f32.mrf.mxu2  ;;  %3470 = vmatpush.msra.mxu2 %v7351_v21 }
 0x2b1   : > { %v1680_v31 = vsel %vm1572_vm12, %v1389_v47, 0.0  ;;  %7282 = vmatmul.msk.f32.gmra.mxu3 %vm1572_vm12, %v1389_v47  ;;  %vm1502_vm4 = vcmp.ge.s32.totalorder %v1466_v49, 0  ;;  %vm1538_vm5 = vcmp.lt.s32.totalorder %v1466_v49, 1000 }
 0x2b2   : > { %v1765_v45 = vrot.slane %v1680_v31, 1  ;;  %v1872_v11 = vrot.slane %v1680_v31, 2  ;;  %vm8917_vm6 = vmand %vm1502_vm4, %vm1538_vm5 }
 0x2b3   : > { %v1240_v57 = vpop.f32.mrf.mxu0 }
 0x2b4   : > { %v1241_v17 = vadd.f32 %v1240_v57, %v1116_v50  ;;  %v1766_v38 = vsel %vm709_vm2, %v1763_v34, %v1765_v45  ;;  %v1873_v47 = vsel %vm817_vm3, %v1870_v1, %v1872_v11  ;;  %v1467_v34 = vadd.s32 %v8618_v7, %v8895_v63  ;;  %v7327_v1 = vld [vmem:[%s13143_s1 + $0x238] sm:$0xff]  ;;  %v8924_v49 = vpop.f32.mrf.mxu3 }
 0x2b5   : > { %2135 = vmatmul.f32.gmra.mxu0 %v1766_v38  ;;  %2260 = vmatmul.f32.gmra.mxu1 %v1873_v47  ;;  %v1356_v38 = vmul.f32 0.1, %v1247_v15  ;;  %v1127_v47 = vpop.f32.mrf.mxu1  ;;  %v1391_v63 = vsel %vm1319_vm1, %v1244_v62, %v1355_v18  ;;  %13290 = vst [vmem:[#allocation35_spill] sm:$0xff] %v8924_v49  ;;  %v1250_v62 = vadd.f32 %v8835_v2, %v1125_v22 }
 0x2b6   : > { %v1354_v31 = vmul.f32 0.1, %v1241_v17  ;;  %vm1318_vm15 = vcmp.ge.f32.partialorder %v1241_v17, 0.0  ;;  %3356 = vmatpush.msra.mxu3 %v7327_v1  ;;  %vm1503_vm7 = vcmp.ge.s32.totalorder %v1467_v34, 0  ;;  %vm1539_vm9 = vcmp.lt.s32.totalorder %v1467_v34, 1000 }
 0x2b7   : > { %v1006_v18 = vadd.f32 %v8600_v16, %v8399_v42  ;;  %v1682_v1 = vsel %vm8917_vm6, %v1391_v63, 0.0  ;;  %vm8937_vm10 = vmand %vm1503_vm7, %vm1539_vm9  ;;  %v1469_v42 = vadd.s32 %v8618_v7, %v8929_v29  ;;  %vm1321_vm11 = vcmp.ge.f32.partialorder %v1250_v62, 0.0 }
 0x2b8   : > { %v1390_v20 = vsel %vm1318_vm15, %v1241_v17, %v1354_v31  ;;  %v8922_v17 = vadd.s32 144, %v8614_v54  ;;  %v1128_v31 = vadd.f32 %v1127_v47, %v1003_v36  ;;  %v8946_v2 = vpop.f32.mrf.mxu2  ;;  %v1876_v22 = vrot.slane %v1682_v1, 2 }
 0x2b9   : > { %v1681_v35 = vsel %vm1573_vm0, %v1390_v20, 0.0  ;;  %7283 = vmatmul.msk.f32.gmra.mxu3 %vm1573_vm0, %v1390_v20  ;;  %v8944_v20 = vadd.s32 160, %v8614_v54  ;;  %v1131_v36 = vadd.f32 %v8584_v33, %v1006_v18  ;;  %v8968_v33 = vld [vmem:[%s13146_s4] ss:$0 sm:$0xff]  ;;  %vm1505_vm14 = vcmp.ge.s32.totalorder %v1469_v42, 0 }
 0x2ba   : > { %v1767_v50 = vrot.slane %v1681_v35, 1  ;;  %v1874_v57 = vrot.slane %v1681_v35, 2  ;;  %13289 = vst [vmem:[#allocation34_spill] sm:$0xff] %v8922_v17  ;;  %v1468_v21 = vadd.s32 %v8618_v7, %v8922_v17  ;;  %v1769_v35 = vrot.slane %v1682_v1, 1 }
 0x2bb   : > { %13294 = vst [vmem:[#allocation37_spill] sm:$0xff] %v8944_v20  ;;  %v1253_v34 = vadd.f32 %v8856_v40, %v1128_v31  ;;  %vm1541_vm1 = vcmp.lt.s32.totalorder %v1469_v42, 1000 }
 0x2bc   : > { %v1768_v5 = vsel %vm709_vm2, %v1765_v45, %v1767_v50  ;;  %v1875_v37 = vsel %vm817_vm3, %v1872_v11, %v1874_v57  ;;  %v1392_v45 = vsel %vm1320_vm8, %v1247_v15, %v1356_v38  ;;  %v1357_v15 = vmul.f32 0.1, %v1250_v62  ;;  %vm9018_vm8 = vmand %vm1505_vm14, %vm1541_vm1 }
 0x2bd   : > { %2138 = vmatmul.f32.gmra.mxu0 %v1768_v5  ;;  %2263 = vmatmul.f32.gmra.mxu1 %v1875_v37  ;;  %v8957_v38 = vsel %vm8937_vm10, %v1392_v45, 0.0  ;;  %vm1504_vm12 = vcmp.ge.s32.totalorder %v1468_v21, 0  ;;  %vm1540_vm13 = vcmp.lt.s32.totalorder %v1468_v21, 1000  ;;  %v1770_v23 = vsel %vm709_vm2, %v1767_v50, %v1769_v35  ;;  %v7650_v21 = vld [vmem:[%s7943_s26] sm:$0xff] }
 0x2be   : > { %v8961_v5 = vstv %s2509_s11  ;;  %v1470_v37 = vadd.s32 %v8618_v7, %v8944_v20  ;;  %v1771_v40 = vrot.slane %v8957_v38, 1  ;;  %v1358_v50 = vmul.f32 0.1, %v1253_v34  ;;  %vm8976_vm15 = vmand %vm1504_vm12, %vm1540_vm13 }
 0x2bf   : > { %v1878_v31 = vrot.slane %v8957_v38, 2  ;;  %v1393_v18 = vsel %vm1321_vm11, %v1250_v62, %v1357_v15  ;;  %vm1322_vm0 = vcmp.ge.f32.partialorder %v1253_v34, 0.0  ;;  %v7350_v62 = vld [vmem:[%s13143_s1 + $0x2f0] sm:$0xff]  ;;  %v2366_v15 = vrot.slane %v7650_v21, 2 }
 0x2c0   : > { %vm1506_vm4 = vcmp.ge.s32.totalorder %v1470_v37, 0  ;;  %vm1542_vm5 = vcmp.lt.s32.totalorder %v1470_v37, 1000  ;;  %3471 = vmatpush.msra.mxu2 %v7350_v62  ;;  %v1772_v20 = vsel %vm709_vm2, %v1769_v35, %v1771_v40  ;;  %v9001_v29 = vsel %vm8976_vm15, %v1393_v18, 0.0  ;;  %v9014_v35 = vpop.f32.mrf.mxu2 }
 0x2c1   : > { %7284 = vmatmul.msk.f32.gmra.mxu3 %vm8917_vm6, %v1391_v63  ;;  %v1877_v63 = vsel %vm817_vm3, %v1874_v57, %v1876_v22  ;;  %v1256_v57 = vadd.f32 %v8877_v25, %v1131_v36  ;;  %v7326_v25 = vld [vmem:[%s13143_s1 + $0x230] sm:$0xff]  ;;  %v8992_v36 = vld [vmem:[%s7943_s26 + $0x8] sm:$0xff]  ;;  %v9004_v21 = vadd.s32 168, %v8614_v54  ;;  %v9008_v62 = vsel %vm1322_vm0, %v1253_v34, %v1358_v50  ;;  %vm9051_vm11 = vmand %vm1506_vm4, %vm1542_vm5 }
 0x2c2   : > { %3357 = vmatpush.msra.mxu3 %v7326_v25  ;;  %v1879_v25 = vsel %vm817_vm3, %v1876_v22, %v1878_v31  ;;  %v9011_v11 = vadd.s32 176, %v8614_v54  ;;  %v13301_v22 = vrot.slane %v8992_v36, 2  ;;  %v1773_v52 = vrot.slane %v9001_v29, 1 }
 0x2c3   : > { %13297 = vst [vmem:[#allocation38_spill] sm:$0xff] %v9004_v21  ;;  %v1359_v17 = vmul.f32 0.1, %v1256_v57  ;;  %vm1323_vm9 = vcmp.ge.f32.partialorder %v1256_v57, 0.0 }
 0x2c4   : > { %v1972_v47 = vpop.f32.mrf.mxu3  ;;  %13298 = vst [vmem:[#allocation39_spill] sm:$0xff] %v9011_v11  ;;  %v2368_v34 = vsel %vm817_vm3, %v2366_v15, %v13301_v22  ;;  %v9038_v15 = vadd.s32 %v8618_v7, %v9004_v21  ;;  %v7652_v22 = vld [vmem:[%s7943_s26 + $0x10] sm:$0xff]  ;;  %v1774_v21 = vsel %vm709_vm2, %v1771_v40, %v1773_v52 }
 0x2c5   : > { %2141 = vmatmul.f32.gmra.mxu0 %v1770_v23  ;;  %2266 = vmatmul.f32.gmra.mxu1 %v1877_v63  ;;  %v1009_v23 = vadd.f32 %v8600_v16, %v8412_v46  ;;  %v2511_v63 = vadd.s32 %v8961_v5, %v8614_v54  ;;  %v1973_v46 = vadd.f32 %v8968_v33, %v1972_v47 }
 0x2c6   : > { %vm1507_vm0 = vcmp.ge.s32.totalorder %v9038_v15, 0  ;;  %vm1543_vm4 = vcmp.lt.s32.totalorder %v9038_v15, 1000 }
 0x2c7   : > { %vm2547_vm6 = vcmp.ge.s32.totalorder %v2511_v63, 0  ;;  %vm2583_vm7 = vcmp.lt.s32.totalorder %v2511_v63, 1000  ;;  %v9034_v63 = vsel %vm9018_vm8, %v9008_v62, 0.0 }
 0x2c9   : > { %7285 = vmatmul.msk.f32.gmra.mxu3 %vm8937_vm10, %v1392_v45  ;;  %v1134_v45 = vadd.f32 %v8595_v44, %v1009_v23  ;;  %v1880_v44 = vrot.slane %v9001_v29, 2  ;;  %vm9027_vm10 = vmand %vm2547_vm6, %vm2583_vm7  ;;  %v9042_v29 = vadd.s32 %v8618_v7, %v9011_v11  ;;  %v2369_v11 = vrot.slane %v7652_v22, 2 }
 0x2ca   : > { %v2097_v38 = vpop.f32.mrf.mxu0  ;;  %v2222_v49 = vpop.f32.mrf.mxu1  ;;  %vm4591_vm7 = vcmask 1043456  }
 0x2cb   : > { %v2098_v47 = vadd.f32 %v2097_v38, %v1973_v46  ;;  %v2512_v38 = vadd.s32 %v8961_v5, %v8628_v27  ;;  %v9047_v46 = vsel %vm1323_vm9, %v1256_v57, %v1359_v17  ;;  %v9069_v57 = vadd.s32 184, %v8614_v54 }
 0x2cc   : > { %v1975_v50 = vpop.f32.mrf.mxu3  ;;  %vm1508_vm5 = vcmp.ge.s32.totalorder %v9042_v29, 0  ;;  %vm1544_vm6 = vcmp.lt.s32.totalorder %v9042_v29, 1000 }
 0x2cd   : > { %v2223_v23 = vadd.f32 %v2222_v49, %v2098_v47  ;;  %2144 = vmatmul.f32.gmra.mxu0 %v1772_v20  ;;  %2269 = vmatmul.f32.gmra.mxu1 %v1879_v25  ;;  %v1259_v49 = vadd.f32 %v8905_v14, %v1134_v45  ;;  %v1012_v47 = vadd.f32 %v8600_v16, %v8422_v56  ;;  %vm2548_vm13 = vcmp.ge.s32.totalorder %v2512_v38, 0 }
 0x2ce   : > { %v1881_v14 = vsel %vm817_vm3, %v1878_v31, %v1880_v44  ;;  %v1976_v45 = vadd.f32 %v8968_v33, %v1975_v50  ;;  %13306 = vst [vmem:[#allocation40_spill] sm:$0xff] %v9069_v57  ;;  %vm2584_vm14 = vcmp.lt.s32.totalorder %v2512_v38, 1000  ;;  %v7349_v38 = vld [vmem:[%s13143_s1 + $0x2e8] sm:$0xff] }
 0x2cf   : > { %v2473_v20 = vadd.f32 %v2368_v34, %v2223_v23  ;;  %v1360_v1 = vmul.f32 0.1, %v1259_v49  ;;  %v1137_v50 = vadd.f32 %v8625_v61, %v1012_v47  ;;  %v9083_v23 = vld [vmem:[%s13144_s2] ss:$0 sm:$0xff]  ;;  %v9096_v61 = vld [vmem:[%s7943_s26 + $0x18] sm:$0xff]  ;;  %vm9109_vm1 = vmand %vm2548_vm13, %vm2584_vm14  ;;  %3472 = vmatpush.msra.mxu2 %v7349_v38  ;;  %vm3009_vm13 = vcmask 1044480  }
 0x2d0   : > { %v1015_v42 = vadd.f32 %v9083_v23, %v8435_v4  ;;  %v13308_v4 = vrot.slane %v9034_v63, 1  ;;  %vm3116_vm14 = vcmask 1041408  }
 0x2d1   : > { %7286 = vmatmul.msk.f32.gmra.mxu3 %vm8976_vm15, %v1393_v18  ;;  %v9065_v17 = vsel %vm9027_vm10, %v2473_v20, 0.0  ;;  %v9077_v18 = vsel %vm9051_vm11, %v9047_v46, 0.0  ;;  %v13307_v20 = vrot.slane %v8992_v36, 2  ;;  %vm1324_vm15 = vcmp.ge.f32.partialorder %v1259_v49, 0.0 }
 0x2d2   : > { %v2100_v56 = vpop.f32.mrf.mxu0  ;;  %v2225_v16 = vpop.f32.mrf.mxu1  ;;  %vm2865_vm12 = vcmp.ge.f32.partialorder %v9065_v17, 0.0  ;;  %v2901_v40 = vmul.f32 0.1, %v9065_v17  ;;  %v1776_v36 = vsel %vm709_vm2, %v1773_v52, %v13308_v4  ;;  %v2513_v52 = vadd.s32 %v8961_v5, %v8647_v10 }
 0x2d3   : > { %v2101_v34 = vadd.f32 %v2100_v56, %v1976_v45  ;;  %v2370_v22 = vsel %vm817_vm3, %v13307_v20, %v2369_v11  ;;  %v9093_v45 = vpop.f32.mrf.mxu2  ;;  %v9128_v4 = vadd.s32 192, %v8614_v54  ;;  %v13322_v10 = vrot.slane %v9034_v63, 2 }
 0x2d4   : > { %v1978_v31 = vpop.f32.mrf.mxu3  ;;  %v9091_v37 = vsel %vm2865_vm12, %v9065_v17, %v2901_v40  ;;  %v13309_v40 = vrot.slane %v9034_v63, 2  ;;  %vm2585_vm10 = vcmp.lt.s32.totalorder %v2513_v52, 1000  ;;  %vm9159_vm12 = vmand %vm1507_vm0, %vm1543_vm4 }
 0x2d5   : > { %v2226_v56 = vadd.f32 %v2225_v16, %v2101_v34  ;;  %2147 = vmatmul.f32.gmra.mxu0 %v1774_v21  ;;  %2272 = vmatmul.f32.gmra.mxu1 %v1881_v14  ;;  %v9116_v14 = vadd.s32 %v8618_v7, %v9069_v57  ;;  %13312 = vst [vmem:[#allocation41_spill] sm:$0xff] %v9128_v4  ;;  %v3010_v21 = vrot.slane %v9091_v37, 3 }
 0x2d6   : > { %3242 = vmatmul.f32.vlgmr.msrb.gmra.mxu2 %v9091_v37  ;;  %v1883_v20 = vsel %vm817_vm3, %v1880_v44, %v13309_v40  ;;  %v7325_v44 = vld [vmem:[%s13143_s1 + $0x228] sm:$0xff]  ;;  %v9131_v40 = vadd.f32 %v8946_v2, %v1137_v50  ;;  %v9136_v34 = vsel %vm1324_vm15, %v1259_v49, %v1360_v1  ;;  %v1979_v47 = vadd.f32 %v8968_v33, %v1978_v31 }
 0x2d7   : > { %v2474_v16 = vadd.f32 %v2370_v22, %v2226_v56  ;;  %v1140_v22 = vadd.f32 %v8649_v43, %v1015_v42  ;;  %3358 = vmatpush.msra.mxu3 %v7325_v44  ;;  %v13313_v2 = vrot.slane %v9096_v61, 2  ;;  %v4592_v31 = vrot.slane %v9065_v17, 4 }
 0x2d8   : > { %vm1325_vm0 = vcmp.ge.f32.partialorder %v9131_v40, 0.0  ;;  %vm1545_vm4 = vcmp.lt.s32.totalorder %v9116_v14, 1000 }
 0x2d9   : > { %7287 = vmatmul.msk.f32.gmra.mxu3 %vm9018_vm8, %v9008_v62  ;;  %v2372_v43 = vsel %vm817_vm3, %v2369_v11, %v13313_v2  ;;  %v9149_v49 = vsel %vm9109_vm1, %v2474_v16, 0.0  ;;  %vm2549_vm8 = vcmp.ge.s32.totalorder %v2513_v52, 0  ;;  %vm1509_vm1 = vcmp.ge.s32.totalorder %v9116_v14, 0 }
 0x2da   : > { %v2103_v1 = vpop.f32.mrf.mxu0  ;;  %v2228_v50 = vpop.f32.mrf.mxu1  ;;  %vm2866_vm9 = vcmp.ge.f32.partialorder %v9149_v49, 0.0  ;;  %v2902_v42 = vmul.f32 0.1, %v9149_v49  ;;  %v4593_v19 = vrot.slane %v9149_v49, 4  ;;  %vm9182_vm15 = vmand %vm2549_vm8, %vm2585_vm10 }
 0x2db   : > { %v2104_v62 = vadd.f32 %v2103_v1, %v1979_v47  ;;  %v3117_v47 = vrot.slane %v9091_v37, 6  ;;  %v1361_v1 = vmul.f32 0.1, %v9131_v40  ;;  %vm9244_vm10 = vmand %vm1508_vm5, %vm1544_vm6  ;;  %v13327_v37 = vrot.slane %v9096_v61, 2 }
 0x2dc   : > { %v1981_v16 = vpop.f32.mrf.mxu3  ;;  %v9165_v44 = vsel %vm2866_vm9, %v9149_v49, %v2902_v42  ;;  %v9168_v17 = vsel %vm4591_vm7, %v4592_v31, %v4593_v19  ;;  %v13317_v49 = vrot.slane %v9077_v18, 1  ;;  %v13318_v42 = vrot.slane %v9034_v63, 1 }
 0x2dd   : > { %13316 = vst [vmem:[#allocation42_spill] sm:$0xff] %v9168_v17  ;;  %v2229_v38 = vadd.f32 %v2228_v50, %v2104_v62  ;;  %2150 = vmatmul.f32.gmra.mxu0 %v1776_v36  ;;  %2275 = vmatmul.f32.gmra.mxu1 %v1883_v20  ;;  %v3011_v15 = vrot.slane %v9165_v44, 3  ;;  %v3118_v2 = vrot.slane %v9165_v44, 6  ;;  %v9189_v36 = vsel %vm9159_vm12, %v9136_v34, 0.0  ;;  %v9195_v50 = vpop.f32.mrf.mxu2 }
 0x2de   : > { %3245 = vmatmul.f32.gmra.mxu2 %v9165_v44  ;;  %v1778_v31 = vsel %vm709_vm2, %v13318_v42, %v13317_v49  ;;  %v9193_v20 = vadd.s32 %v8618_v7, %v9128_v4  ;;  %v2514_v44 = vadd.s32 %v8961_v5, %v8665_v9  ;;  %v9206_v42 = vld [vmem:[%s7943_s26 + $0x20] sm:$0xff]  ;;  %v13321_v17 = vrot.slane %v9077_v18, 2 }
 0x2df   : > { %v2475_v62 = vadd.f32 %v2372_v43, %v2229_v38  ;;  %v9200_v52 = vsel %vm3009_vm13, %v3010_v21, %v3011_v15  ;;  %v9203_v49 = vsel %vm3116_vm14, %v3117_v47, %v3118_v2  ;;  %v9218_v43 = vadd.s32 200, %v8614_v54 }
 0x2e0   : > { %v1885_v27 = vsel %vm817_vm3, %v13322_v10, %v13321_v17  ;;  %v1265_v21 = vadd.f32 %v9014_v35, %v1140_v22  ;;  %v1982_v47 = vadd.f32 %v8968_v33, %v1981_v16  ;;  %v1018_v17 = vadd.f32 %v9083_v23, %v8448_v12 }
 0x2e1   : > { %13323 = vst [vmem:[#allocation43_spill] sm:$0xff] %v9218_v43  ;;  %7288 = vmatmul.msk.f32.gmra.mxu3 %vm9051_vm11, %v9047_v46  ;;  %v9227_v10 = vsel %vm9182_vm15, %v2475_v62, 0.0  ;;  %vm2550_vm8 = vcmp.ge.s32.totalorder %v2514_v44, 0  ;;  %vm2586_vm11 = vcmp.lt.s32.totalorder %v2514_v44, 1000  ;;  %v9238_v46 = vsel %vm1325_vm0, %v9131_v40, %v1361_v1 }
 0x2e2   : > { %v2106_v38 = vpop.f32.mrf.mxu0  ;;  %v2231_v56 = vpop.f32.mrf.mxu1  ;;  %vm2867_vm9 = vcmp.ge.f32.partialorder %v9227_v10, 0.0  ;;  %v2903_v35 = vmul.f32 0.1, %v9227_v10  ;;  %v4595_v22 = vrot.slane %v9227_v10, 4  ;;  %v13326_v25 = vrot.slane %v9206_v42, 2  ;;  %vm9275_vm5 = vmand %vm2550_vm8, %vm2586_vm11 }
 0x2e3   : > { %v2107_v16 = vadd.f32 %v2106_v38, %v1982_v47  ;;  %v13180_v40 = vrot.slane %v9189_v36, 2  ;;  %v9264_v61 = vadd.s32 %v8618_v7, %v9218_v43  ;;  %vm1326_vm6 = vcmp.ge.f32.partialorder %v1265_v21, 0.0 }
 0x2e4   : > { %v2374_v62 = vsel %vm817_vm3, %v13327_v37, %v13326_v25  ;;  %v1984_v47 = vpop.f32.mrf.mxu3  ;;  %v9254_v38 = vsel %vm2867_vm9, %v9227_v10, %v2903_v35  ;;  %v9258_v1 = vsel %vm4591_vm7, %v4593_v19, %v4595_v22  ;;  %v1362_v25 = vmul.f32 0.1, %v1265_v21 }
 0x2e5   : > { %13328 = vst [vmem:[#allocation44_spill] sm:$0xff] %v9258_v1  ;;  %v2232_v29 = vadd.f32 %v2231_v56, %v2107_v16  ;;  %2153 = vmatmul.f32.gmra.mxu0 %v1778_v31  ;;  %2278 = vmatmul.f32.gmra.mxu1 %v1885_v27  ;;  %v3013_v63 = vrot.slane %v9254_v38, 3  ;;  %v3120_v9 = vrot.slane %v9254_v38, 6  ;;  %v1143_v10 = vadd.f32 %v8673_v58, %v1018_v17  ;;  %v7324_v16 = vld [vmem:[%s13143_s1 + $0x220] sm:$0xff] }
 0x2e6   : > { %3248 = vmatmul.f32.gmra.mxu2 %v9254_v38  ;;  %v13329_v19 = vrot.slane %v9189_v36, 1  ;;  %v13330_v56 = vrot.slane %v9077_v18, 1  ;;  %v9282_v35 = vsel %vm9244_vm10, %v9238_v46, 0.0  ;;  %v2515_v17 = vadd.s32 %v8961_v5, %v8682_v8  ;;  %v9296_v38 = vld [vmem:[%s7943_s26 + $0x28] sm:$0xff]  ;;  %3359 = vmatpush.msra.mxu3 %v7324_v16 }
 0x2e7   : > { %v2476_v58 = vadd.f32 %v2374_v62, %v2232_v29  ;;  %v9290_v37 = vsel %vm3009_vm13, %v3011_v15, %v3013_v63  ;;  %v9293_v44 = vsel %vm3116_vm14, %v3118_v2, %v3120_v9  ;;  %v13334_v62 = vrot.slane %v9077_v18, 2 }
 0x2e8   : > { %v1780_v31 = vsel %vm709_vm2, %v13330_v56, %v13329_v19  ;;  %13333 = vst [vmem:[#allocation45_spill] sm:$0xff] %v9293_v44  ;;  %vm1510_vm15 = vcmp.ge.s32.totalorder %v9193_v20, 0  ;;  %vm1546_vm0 = vcmp.lt.s32.totalorder %v9193_v20, 1000  ;;  %v9307_v15 = vadd.s32 208, %v8614_v54  ;;  %v9311_v56 = vpop.f32.mrf.mxu2 }
 0x2e9   : > { %v1887_v29 = vsel %vm817_vm3, %v13334_v62, %v13180_v40  ;;  %v1021_v2 = vadd.f32 %v9083_v23, %v8461_v30  ;;  %v1985_v19 = vadd.f32 %v8968_v33, %v1984_v47  ;;  %7289 = vmatmul.msk.f32.gmra.mxu3 %vm9159_vm12, %v9136_v34  ;;  %v9319_v18 = vsel %vm9275_vm5, %v2476_v58, 0.0  ;;  %vm9333_vm12 = vmand %vm1509_vm1, %vm1545_vm4 }
 0x2ea   : > { %13335 = vst [vmem:[#allocation46_spill] sm:$0xff] %v9307_v15  ;;  %v1268_v62 = vadd.f32 %v9093_v45, %v1143_v10  ;;  %v2109_v40 = vpop.f32.mrf.mxu0  ;;  %v2234_v1 = vpop.f32.mrf.mxu1  ;;  %vm2868_vm9 = vcmp.ge.f32.partialorder %v9319_v18, 0.0  ;;  %v2904_v30 = vmul.f32 0.1, %v9319_v18  ;;  %v4597_v47 = vrot.slane %v9319_v18, 4 }
 0x2eb   : > { %v2110_v8 = vadd.f32 %v2109_v40, %v1985_v19  ;;  %vm2551_vm8 = vcmp.ge.s32.totalorder %v2515_v17, 0  ;;  %vm2587_vm11 = vcmp.lt.s32.totalorder %v2515_v17, 1000  ;;  %v9327_v34 = vsel %vm1326_vm6, %v1265_v21, %v1362_v25  ;;  %v7348_v17 = vld [vmem:[%s13143_s1 + $0x2e0] sm:$0xff] }
 0x2ec   : > { %v13338_v11 = vrot.slane %v9296_v38, 2  ;;  %v13339_v10 = vrot.slane %v9206_v42, 2  ;;  %v1987_v40 = vpop.f32.mrf.mxu3  ;;  %v9343_v58 = vsel %vm2868_vm9, %v9319_v18, %v2904_v30  ;;  %v13183_v21 = vrot.slane %v9282_v35, 2  ;;  %vm9360_vm1 = vmand %vm2551_vm8, %vm2587_vm11  ;;  %3473 = vmatpush.msra.mxu2 %v7348_v17 }
 0x2ed   : > { %v9347_v25 = vsel %vm4591_vm7, %v4595_v22, %v4597_v47  ;;  %v1146_v14 = vadd.f32 %v8695_v28, %v1021_v2  ;;  %v2235_v19 = vadd.f32 %v2234_v1, %v2110_v8  ;;  %2156 = vmatmul.f32.gmra.mxu0 %v1780_v31  ;;  %2281 = vmatmul.f32.gmra.mxu1 %v1887_v29  ;;  %v3015_v16 = vrot.slane %v9343_v58, 3  ;;  %vm9422_vm11 = vmand %vm1510_vm15, %vm1546_vm0 }
 0x2ee   : > { %v2376_v27 = vsel %vm817_vm3, %v13339_v10, %v13338_v11  ;;  %13340 = vst [vmem:[#allocation47_spill] sm:$0xff] %v9347_v25  ;;  %v3122_v42 = vrot.slane %v9343_v58, 6  ;;  %v1363_v11 = vmul.f32 0.1, %v1268_v62  ;;  %3251 = vmatmul.f32.gmra.mxu2 %v9343_v58  ;;  %v13341_v18 = vrot.slane %v9282_v35, 1  ;;  %v9385_v58 = vld [vmem:[%s7943_s26 + $0x30] sm:$0xff] }
 0x2ef   : > { %v13342_v30 = vrot.slane %v9189_v36, 1  ;;  %v9367_v28 = vsel %vm9333_vm12, %v9327_v34, 0.0  ;;  %v9371_v1 = vadd.s32 %v8618_v7, %v9307_v15  ;;  %v2477_v31 = vadd.f32 %v2376_v27, %v2235_v19 }
 0x2f0   : > { %v2516_v29 = vadd.s32 %v8961_v5, %v8699_v51  ;;  %v9379_v2 = vsel %vm3009_vm13, %v3013_v63, %v3015_v16  ;;  %v9382_v10 = vsel %vm3116_vm14, %v3120_v9, %v3122_v42  ;;  %v13346_v27 = vrot.slane %v9189_v36, 2 }
 0x2f1   : > { %v1782_v22 = vsel %vm709_vm2, %v13342_v30, %v13341_v18  ;;  %13345 = vst [vmem:[#allocation48_spill] sm:$0xff] %v9382_v10  ;;  %vm1327_vm4 = vcmp.ge.f32.partialorder %v1268_v62, 0.0  ;;  %vm1511_vm5 = vcmp.ge.s32.totalorder %v9264_v61, 0  ;;  %vm1547_vm6 = vcmp.lt.s32.totalorder %v9264_v61, 1000  ;;  %7290 = vmatmul.msk.f32.gmra.mxu3 %vm9244_vm10, %v9238_v46 }
 0x2f2   : > { %v1889_v19 = vsel %vm817_vm3, %v13346_v27, %v13183_v21  ;;  %v9396_v63 = vadd.s32 216, %v8614_v54  ;;  %v1271_v9 = vadd.f32 %v9195_v50, %v1146_v14  ;;  %v1988_v30 = vadd.f32 %v8968_v33, %v1987_v40  ;;  %v2112_v21 = vpop.f32.mrf.mxu0  ;;  %v2237_v18 = vpop.f32.mrf.mxu1 }
 0x2f3   : > { %v9405_v36 = vsel %vm9360_vm1, %v2477_v31, 0.0  ;;  %v1024_v17 = vadd.f32 %v9083_v23, %v8474_v41  ;;  %v9413_v14 = vpop.f32.mrf.mxu2  ;;  %vm2552_vm10 = vcmp.ge.s32.totalorder %v2516_v29, 0  ;;  %vm2588_vm8 = vcmp.lt.s32.totalorder %v2516_v29, 1000  ;;  %v9471_v29 = vld [vmem:[%s7943_s26 + $0x38] sm:$0xff] }
 0x2f4   : > { %13347 = vst [vmem:[#allocation49_spill] sm:$0xff] %v9396_v63  ;;  %vm2869_vm9 = vcmp.ge.f32.partialorder %v9405_v36, 0.0  ;;  %v2905_v50 = vmul.f32 0.1, %v9405_v36  ;;  %v4599_v40 = vrot.slane %v9405_v36, 4  ;;  %v2113_v46 = vadd.f32 %v2112_v21, %v1988_v30  ;;  %v1990_v21 = vpop.f32.mrf.mxu3  ;;  %vm9453_vm15 = vmand %vm2552_vm10, %vm2588_vm8 }
 0x2f5   : > { %v9416_v12 = vsel %vm1327_vm4, %v1268_v62, %v1363_v11  ;;  %v13350_v8 = vrot.slane %v9385_v58, 2  ;;  %v13351_v31 = vrot.slane %v9296_v38, 2  ;;  %v13186_v62 = vrot.slane %v9367_v28, 2  ;;  %2159 = vmatmul.f32.gmra.mxu0 %v1782_v22  ;;  %2284 = vmatmul.f32.gmra.mxu1 %v1889_v19 }
 0x2f6   : > { %v9432_v30 = vsel %vm2869_vm9, %v9405_v36, %v2905_v50  ;;  %v9436_v11 = vsel %vm4591_vm7, %v4597_v47, %v4599_v40  ;;  %v2238_v20 = vadd.f32 %v2237_v18, %v2113_v46  ;;  %v9442_v38 = vadd.s32 %v8618_v7, %v9396_v63 }
 0x2f7   : > { %v2378_v27 = vsel %vm817_vm3, %v13351_v31, %v13350_v8  ;;  %13352 = vst [vmem:[#allocation50_spill] sm:$0xff] %v9436_v11  ;;  %v3017_v25 = vrot.slane %v9432_v30, 3  ;;  %v3124_v51 = vrot.slane %v9432_v30, 6  ;;  %v1364_v8 = vmul.f32 0.1, %v1271_v9  ;;  %3254 = vmatmul.f32.gmra.mxu2 %v9432_v30 }
 0x2f8   : > { %v1149_v36 = vadd.f32 %v8713_v48, %v1024_v17  ;;  %v13353_v47 = vrot.slane %v9367_v28, 1  ;;  %v13354_v18 = vrot.slane %v9282_v35, 1  ;;  %v9460_v50 = vsel %vm9422_vm11, %v9416_v12, 0.0 }
 0x2f9   : > { %v2478_v48 = vadd.f32 %v2378_v27, %v2238_v20  ;;  %v2517_v17 = vadd.s32 %v8961_v5, %v8716_v3  ;;  %v9465_v46 = vsel %vm3009_vm13, %v3015_v16, %v3017_v25  ;;  %v9468_v31 = vsel %vm3116_vm14, %v3122_v42, %v3124_v51  ;;  %7291 = vmatmul.msk.f32.gmra.mxu3 %vm9333_vm12, %v9327_v34  ;;  %vm9506_vm12 = vmand %vm1511_vm5, %vm1547_vm6 }
 0x2fa   : > { %v1784_v22 = vsel %vm709_vm2, %v13354_v18, %v13353_v47  ;;  %13357 = vst [vmem:[#allocation51_spill] sm:$0xff] %v9468_v31  ;;  %v13358_v47 = vrot.slane %v9282_v35, 2  ;;  %vm1328_vm0 = vcmp.ge.f32.partialorder %v1271_v9, 0.0  ;;  %vm1512_vm1 = vcmp.ge.s32.totalorder %v9371_v1, 0  ;;  %v2240_v30 = vpop.f32.mrf.mxu1 }
 0x2fb   : > { %vm1548_vm4 = vcmp.lt.s32.totalorder %v9371_v1, 1000  ;;  %v9482_v16 = vadd.s32 224, %v8614_v54  ;;  %v1027_v42 = vadd.f32 %v9083_v23, %v8484_v53  ;;  %v1991_v27 = vadd.f32 %v8968_v33, %v1990_v21 }
 0x2fc   : > { %v1891_v18 = vsel %vm817_vm3, %v13358_v47, %v13186_v62  ;;  %v9492_v35 = vsel %vm9453_vm15, %v2478_v48, 0.0  ;;  %v1274_v47 = vadd.f32 %v9311_v56, %v1149_v36  ;;  %v2115_v62 = vpop.f32.mrf.mxu0  ;;  %vm2553_vm10 = vcmp.ge.s32.totalorder %v2517_v17, 0 }
 0x2fd   : > { %13359 = vst [vmem:[#allocation52_spill] sm:$0xff] %v9482_v16  ;;  %vm2870_vm9 = vcmp.ge.f32.partialorder %v9492_v35, 0.0  ;;  %v2906_v53 = vmul.f32 0.1, %v9492_v35  ;;  %v4601_v21 = vrot.slane %v9492_v35, 4  ;;  %v2116_v11 = vadd.f32 %v2115_v62, %v1991_v27  ;;  %v1993_v62 = vpop.f32.mrf.mxu3  ;;  %v9523_v27 = vpop.f32.mrf.mxu2  ;;  %2162 = vmatmul.f32.gmra.mxu0 %v1784_v22  ;;  %2287 = vmatmul.f32.gmra.mxu1 %v1891_v18 }
 0x2fe   : > { %vm2589_vm8 = vcmp.lt.s32.totalorder %v2517_v17, 1000  ;;  %v9500_v34 = vsel %vm1328_vm0, %v1271_v9, %v1364_v8  ;;  %v13362_v45 = vrot.slane %v9471_v29, 2  ;;  %v13363_v36 = vrot.slane %v9385_v58, 2  ;;  %v7323_v17 = vld [vmem:[%s13143_s1 + $0x218] sm:$0xff] }
 0x2ff   : > { %v9516_v48 = vsel %vm2870_vm9, %v9492_v35, %v2906_v53  ;;  %v13187_v9 = vrot.slane %v9460_v50, 2  ;;  %v9520_v8 = vsel %vm4591_vm7, %v4599_v40, %v4601_v21  ;;  %v1152_v61 = vadd.f32 %v8736_v55, %v1027_v42  ;;  %vm9535_vm5 = vmand %vm2553_vm10, %vm2589_vm8  ;;  %v7347_v42 = vld [vmem:[%s13143_s1 + $0x2d8] sm:$0xff]  ;;  %3360 = vmatpush.msra.mxu3 %v7323_v17 }
 0x300   : > { %v2380_v19 = vsel %vm817_vm3, %v13363_v36, %v13362_v45  ;;  %13364 = vst [vmem:[#allocation53_spill] sm:$0xff] %v9520_v8  ;;  %v2241_v20 = vadd.f32 %v2240_v30, %v2116_v11  ;;  %v3019_v58 = vrot.slane %v9516_v48, 3  ;;  %v3126_v45 = vrot.slane %v9516_v48, 6  ;;  %3257 = vmatmul.f32.gmra.mxu2 %v9516_v48  ;;  %vm9598_vm8 = vmand %vm1512_vm1, %vm1548_vm4 }
 0x301   : > { %v1365_v36 = vmul.f32 0.1, %v1274_v47  ;;  %v13365_v35 = vrot.slane %v9460_v50, 1  ;;  %v13366_v40 = vrot.slane %v9367_v28, 1  ;;  %v9542_v11 = vsel %vm9506_vm12, %v9500_v34, 0.0  ;;  %3474 = vmatpush.msra.mxu2 %v7347_v42  ;;  %7292 = vmatmul.msk.f32.gmra.mxu3 %vm9422_vm11, %v9416_v12 }
 0x302   : > { %v9546_v22 = vadd.s32 %v8618_v7, %v9482_v16  ;;  %v2479_v30 = vadd.f32 %v2380_v19, %v2241_v20  ;;  %v2518_v18 = vadd.s32 %v8961_v5, %v8734_v24  ;;  %v9557_v48 = vsel %vm3009_vm13, %v3017_v25, %v3019_v58 }
 0x303   : > { %v1786_v53 = vsel %vm709_vm2, %v13366_v40, %v13365_v35  ;;  %v9560_v35 = vsel %vm3116_vm14, %v3124_v51, %v3126_v45  ;;  %v9563_v40 = vld [vmem:[%s7943_s26 + $0x40] sm:$0xff]  ;;  %v13370_v19 = vrot.slane %v9367_v28, 2  ;;  %vm1329_vm6 = vcmp.ge.f32.partialorder %v1274_v47, 0.0 }
 0x304   : > { %13369 = vst [vmem:[#allocation54_spill] sm:$0xff] %v9560_v35  ;;  %vm1513_vm15 = vcmp.ge.s32.totalorder %v9442_v38, 0  ;;  %vm1549_vm0 = vcmp.lt.s32.totalorder %v9442_v38, 1000  ;;  %v9574_v51 = vadd.s32 232, %v8614_v54  ;;  %v1277_v25 = vadd.f32 %v9413_v14, %v1152_v61  ;;  %v2118_v42 = vpop.f32.mrf.mxu0 }
 0x305   : > { %v1893_v8 = vsel %vm817_vm3, %v13370_v19, %v13187_v9  ;;  %v1994_v20 = vadd.f32 %v8968_v33, %v1993_v62  ;;  %v9583_v28 = vsel %vm9535_vm5, %v2479_v30, 0.0  ;;  %v1030_v17 = vadd.f32 %v9083_v23, %v8497_v59  ;;  %v2243_v9 = vpop.f32.mrf.mxu1  ;;  %2165 = vmatmul.f32.gmra.mxu0 %v1786_v53 }
 0x306   : > { %13371 = vst [vmem:[#allocation55_spill] sm:$0xff] %v9574_v51  ;;  %vm2871_vm9 = vcmp.ge.f32.partialorder %v9583_v28, 0.0  ;;  %v2907_v14 = vmul.f32 0.1, %v9583_v28  ;;  %v4603_v62 = vrot.slane %v9583_v28, 4  ;;  %vm2554_vm10 = vcmp.ge.s32.totalorder %v2518_v18, 0  ;;  %2290 = vmatmul.f32.gmra.mxu1 %v1893_v8 }
 0x307   : > { %v2119_v61 = vadd.f32 %v2118_v42, %v1994_v20  ;;  %vm2590_vm11 = vcmp.lt.s32.totalorder %v2518_v18, 1000  ;;  %v9592_v12 = vsel %vm1329_vm6, %v1274_v47, %v1365_v36  ;;  %v13374_v41 = vrot.slane %v9563_v40, 2  ;;  %v1996_v20 = vpop.f32.mrf.mxu3  ;;  %v9647_v18 = vld [vmem:[%s7943_s26 + $0x48] sm:$0xff] }
 0x308   : > { %v13375_v55 = vrot.slane %v9471_v29, 2  ;;  %v9608_v42 = vsel %vm2871_vm9, %v9583_v28, %v2907_v14  ;;  %v13190_v47 = vrot.slane %v9542_v11, 2  ;;  %v9612_v36 = vsel %vm4591_vm7, %v4601_v21, %v4603_v62  ;;  %vm9629_vm1 = vmand %vm2554_vm10, %vm2590_vm11 }
 0x309   : > { %13376 = vst [vmem:[#allocation56_spill] sm:$0xff] %v9612_v36  ;;  %v2244_v1 = vadd.f32 %v2243_v9, %v2119_v61  ;;  %v3021_v19 = vrot.slane %v9608_v42, 3  ;;  %v3128_v24 = vrot.slane %v9608_v42, 6  ;;  %v9618_v29 = vadd.s32 %v8618_v7, %v9574_v51  ;;  %3260 = vmatmul.f32.gmra.mxu2 %v9608_v42  ;;  %7293 = vmatmul.msk.f32.gmra.mxu3 %vm9506_vm12, %v9500_v34  ;;  %vm9682_vm12 = vmand %vm1513_vm15, %vm1549_vm0 }
 0x30a   : > { %v2382_v30 = vsel %vm817_vm3, %v13375_v55, %v13374_v41  ;;  %v1366_v41 = vmul.f32 0.1, %v1277_v25  ;;  %v1155_v28 = vadd.f32 %v8757_v6, %v1030_v17  ;;  %v13377_v21 = vrot.slane %v9542_v11, 1  ;;  %v1282_v6 = vpop.f32.mrf.mxu2 }
 0x30b   : > { %v13378_v9 = vrot.slane %v9460_v50, 1  ;;  %v9636_v14 = vsel %vm9598_vm8, %v9592_v12, 0.0  ;;  %v2480_v17 = vadd.f32 %v2382_v30, %v2244_v1  ;;  %v2519_v61 = vadd.s32 %v8961_v5, %v8749_v26 }
 0x30c   : > { %v9641_v55 = vsel %vm3009_vm13, %v3019_v58, %v3021_v19  ;;  %v9644_v42 = vsel %vm3116_vm14, %v3126_v45, %v3128_v24  ;;  %vm1330_vm4 = vcmp.ge.f32.partialorder %v1277_v25, 0.0  ;;  %vm1514_vm5 = vcmp.ge.s32.totalorder %v9546_v22, 0 }
 0x30d   : > { %v1788_v53 = vsel %vm709_vm2, %v13378_v9, %v13377_v21  ;;  %13381 = vst [vmem:[#allocation57_spill] sm:$0xff] %v9644_v42  ;;  %v13382_v9 = vrot.slane %v9460_v50, 2  ;;  %vm1550_vm6 = vcmp.lt.s32.totalorder %v9546_v22, 1000  ;;  %v9658_v58 = vadd.s32 240, %v8614_v54  ;;  %v2246_v21 = vpop.f32.mrf.mxu1 }
 0x30e   : > { %v1033_v45 = vadd.f32 %v9083_v23, %v8512_v0  ;;  %v1997_v30 = vadd.f32 %v8968_v33, %v1996_v20  ;;  %v9668_v50 = vsel %vm9629_vm1, %v2480_v17, 0.0  ;;  %vm2555_vm10 = vcmp.ge.s32.totalorder %v2519_v61, 0  ;;  %2168 = vmatmul.f32.gmra.mxu0 %v1788_v53  ;;  %v13391_v53 = vld [vmem:[#allocation21_spill] sm:$0xff] }
 0x30f   : > { %v1895_v36 = vsel %vm817_vm3, %v13382_v9, %v13190_v47  ;;  %13383 = vst [vmem:[#allocation58_spill] sm:$0xff] %v9658_v58  ;;  %v1280_v9 = vadd.f32 %v9523_v27, %v1155_v28  ;;  %v2121_v47 = vpop.f32.mrf.mxu0  ;;  %vm2872_vm9 = vcmp.ge.f32.partialorder %v9668_v50, 0.0  ;;  %v2908_v0 = vmul.f32 0.1, %v9668_v50 }
 0x310   : > { %v4605_v20 = vrot.slane %v9668_v50, 4  ;;  %v2122_v26 = vadd.f32 %v2121_v47, %v1997_v30  ;;  %vm2591_vm11 = vcmp.lt.s32.totalorder %v2519_v61, 1000  ;;  %v9676_v34 = vsel %vm1330_vm4, %v1277_v25, %v1366_v41  ;;  %v1999_v47 = vpop.f32.mrf.mxu3  ;;  %2293 = vmatmul.f32.gmra.mxu1 %v1895_v36  ;;  %v7322_v61 = vld [vmem:[%s13143_s1 + $0x210] sm:$0xff] }
 0x311   : > { %v13386_v27 = vrot.slane %v9647_v18, 2  ;;  %v13387_v28 = vrot.slane %v9563_v40, 2  ;;  %v9692_v17 = vsel %vm2872_vm9, %v9668_v50, %v2908_v0  ;;  %v1158_v38 = vadd.f32 %v8779_v13, %v1033_v45  ;;  %vm9706_vm15 = vmand %vm2555_vm10, %vm2591_vm11  ;;  %3361 = vmatpush.msra.mxu3 %v7322_v61 }
 0x312   : > { %v9696_v41 = vsel %vm4591_vm7, %v4603_v62, %v4605_v20  ;;  %v2247_v30 = vadd.f32 %v2246_v21, %v2122_v26  ;;  %v3023_v1 = vrot.slane %v9692_v17, 3  ;;  %v3130_v40 = vrot.slane %v9692_v17, 6  ;;  %3263 = vmatmul.f32.gmra.mxu2 %v9692_v17  ;;  %v7346_v21 = vld [vmem:[%s13143_s1 + $0x2d0] sm:$0xff]  ;;  %7294 = vmatmul.msk.f32.gmra.mxu3 %vm9598_vm8, %v9592_v12  ;;  %vm9769_vm8 = vmand %vm1514_vm5, %vm1550_vm6 }
 0x313   : > { %v2384_v8 = vsel %vm817_vm3, %v13387_v28, %v13386_v27  ;;  %13388 = vst [vmem:[#allocation59_spill] sm:$0xff] %v9696_v41  ;;  %v1367_v27 = vmul.f32 0.1, %v1280_v9  ;;  %v1036_v50 = vadd.f32 %v9083_v23, %v8527_v32  ;;  %v9713_v26 = vsel %vm9682_vm12, %v9676_v34, 0.0  ;;  %v9734_v28 = vld [vmem:[%s7943_s26 + $0x50] sm:$0xff]  ;;  %3475 = vmatpush.msra.mxu2 %v7346_v21 }
 0x314   : > { %v9717_v13 = vadd.s32 %v8618_v7, %v9658_v58  ;;  %v2481_v36 = vadd.f32 %v2384_v8, %v2247_v30  ;;  %v2520_v32 = vadd.s32 %v8961_v5, %v13391_v53  ;;  %v9728_v45 = vsel %vm3009_vm13, %v3021_v19, %v3023_v1  ;;  %v1285_v8 = vpop.f32.mrf.mxu2 }
 0x315   : > { %v9731_v0 = vsel %vm3116_vm14, %v3128_v24, %v3130_v40  ;;  %v13393_v17 = vrot.slane %v9636_v14, 1  ;;  %v13394_v30 = vrot.slane %v9542_v11, 1  ;;  %v13395_v41 = vrot.slane %v9636_v14, 2 }
 0x316   : > { %13392 = vst [vmem:[#allocation60_spill] sm:$0xff] %v9731_v0  ;;  %v13396_v53 = vrot.slane %v9542_v11, 2  ;;  %vm1331_vm0 = vcmp.ge.f32.partialorder %v1280_v9, 0.0  ;;  %vm1515_vm1 = vcmp.ge.s32.totalorder %v9618_v29, 0  ;;  %vm1551_vm4 = vcmp.lt.s32.totalorder %v9618_v29, 1000  ;;  %v2249_v0 = vpop.f32.mrf.mxu1 }
 0x317   : > { %v1790_v25 = vsel %vm709_vm2, %v13394_v30, %v13393_v17  ;;  %v1283_v24 = vadd.f32 %v1282_v6, %v1158_v38  ;;  %v2000_v3 = vadd.f32 %v8968_v33, %v1999_v47  ;;  %v9755_v11 = vsel %vm9706_vm15, %v2481_v36, 0.0  ;;  %v2124_v30 = vpop.f32.mrf.mxu0 }
 0x318   : > { %v1897_v19 = vsel %vm817_vm3, %v13396_v53, %v13395_v41  ;;  %v13195_v41 = vrot.slane %v9713_v26, 1  ;;  %v13397_v53 = vld [vmem:[#allocation23_spill] sm:$0xff]  ;;  %vm2873_vm9 = vcmp.ge.f32.partialorder %v9755_v11, 0.0  ;;  %v2909_v6 = vmul.f32 0.1, %v9755_v11  ;;  %2171 = vmatmul.f32.gmra.mxu0 %v1790_v25 }
 0x319   : > { %v1161_v17 = vadd.f32 %v13397_v53, %v1036_v50  ;;  %v4607_v47 = vrot.slane %v9755_v11, 4  ;;  %v2125_v38 = vadd.f32 %v2124_v30, %v2000_v3  ;;  %vm2556_vm10 = vcmp.ge.s32.totalorder %v2520_v32, 0  ;;  %v2002_v3 = vpop.f32.mrf.mxu3  ;;  %2296 = vmatmul.f32.gmra.mxu1 %v1897_v19 }
 0x31a   : > { %vm2592_vm11 = vcmp.lt.s32.totalorder %v2520_v32, 1000  ;;  %v9763_v12 = vsel %vm1331_vm0, %v1280_v9, %v1367_v27  ;;  %v13400_v50 = vrot.slane %v9734_v28, 2  ;;  %v13401_v62 = vrot.slane %v9647_v18, 2  ;;  %7295 = vmatmul.msk.f32.gmra.mxu3 %vm9682_vm12, %v9676_v34 }
 0x31b   : > { %v9779_v61 = vsel %vm2873_vm9, %v9755_v11, %v2909_v6  ;;  %v13196_v9 = vrot.slane %v9713_v26, 2  ;;  %v9783_v27 = vsel %vm4591_vm7, %v4605_v20, %v4607_v47  ;;  %v2250_v22 = vadd.f32 %v2249_v0, %v2125_v38  ;;  %vm2628_vm15 = vmand %vm2556_vm10, %vm2592_vm11  ;;  %v13403_v0 = vld [vmem:[#allocation22_spill] sm:$0xff] }
 0x31c   : > { %v2386_v36 = vsel %vm817_vm3, %v13401_v62, %v13400_v50  ;;  %13402 = vst [vmem:[#allocation23_spill] sm:$0xff] %v9783_v27  ;;  %v3025_v21 = vrot.slane %v9779_v61, 3  ;;  %v3132_v53 = vrot.slane %v9779_v61, 6  ;;  %vm1516_vm5 = vcmp.ge.s32.totalorder %v9717_v13, 0  ;;  %3266 = vmatmul.f32.gmra.mxu2 %v9779_v61  ;;  %v1288_v56 = vpop.f32.mrf.mxu2  ;;  %vm9840_vm11 = vmand %vm1515_vm1, %vm1551_vm4 }
 0x31d   : > { %vm1552_vm6 = vcmp.lt.s32.totalorder %v9717_v13, 1000  ;;  %v1368_v18 = vmul.f32 0.1, %v1283_v24  ;;  %v1286_v11 = vadd.f32 %v1285_v8, %v1161_v17  ;;  %v9795_v20 = vsel %vm9769_vm8, %v9763_v12, 0.0  ;;  %v9806_v17 = vld [vmem:[%s7943_s26 + $0x58] sm:$0xff] }
 0x31e   : > { %vm1332_vm0 = vcmp.ge.f32.partialorder %v1283_v24, 0.0  ;;  %v2482_v25 = vadd.f32 %v2386_v36, %v2250_v22  ;;  %v2521_v19 = vadd.s32 %v8961_v5, %v13403_v0  ;;  %v9800_v30 = vsel %vm3009_vm13, %v3023_v1, %v3025_v21 }
 0x31f   : > { %v9803_v8 = vsel %vm3116_vm14, %v3130_v40, %v3132_v53  ;;  %v13197_v32 = vrot.slane %v9806_v17, 2  ;;  %v13405_v6 = vrot.slane %v9636_v14, 1  ;;  %v13406_v50 = vrot.slane %v9636_v14, 2 }
 0x320   : > { %13404 = vst [vmem:[#allocation61_spill] sm:$0xff] %v9803_v8  ;;  %v9820_v62 = vadd.s32 248, %v8614_v54  ;;  %v2003_v40 = vadd.f32 %v8968_v33, %v2002_v3  ;;  %v9826_v36 = vsel %vm2628_vm15, %v2482_v25, 0.0  ;;  %v1369_v3 = vmul.f32 0.1, %v1286_v11  ;;  %vm9914_vm15 = vmand %vm1516_vm5, %vm1552_vm6 }
 0x321   : > { %v1792_v38 = vsel %vm709_vm2, %v13405_v6, %v13195_v41  ;;  %v1899_v1 = vsel %vm817_vm3, %v13406_v50, %v13196_v9  ;;  %v2127_v6 = vpop.f32.mrf.mxu0  ;;  %v2252_v41 = vpop.f32.mrf.mxu1  ;;  %vm2874_vm9 = vcmp.ge.f32.partialorder %v9826_v36, 0.0  ;;  %v2910_v14 = vmul.f32 0.1, %v9826_v36  ;;  %v13410_v9 = vld [vmem:[#allocation7_spill] sm:$0xff] }
 0x322   : > { %13407 = vst [vmem:[#allocation62_spill] sm:$0xff] %v9820_v62  ;;  %v9833_v50 = vsel %vm1332_vm0, %v1283_v24, %v1368_v18  ;;  %v4609_v33 = vrot.slane %v9826_v36, 4  ;;  %v2128_v34 = vadd.f32 %v2127_v6, %v2003_v40  ;;  %vm2557_vm12 = vcmp.ge.s32.totalorder %v2521_v19, 0  ;;  %v2005_v40 = vpop.f32.mrf.mxu3  ;;  %2174 = vmatmul.f32.gmra.mxu0 %v1792_v38  ;;  %2299 = vmatmul.f32.gmra.mxu1 %v1899_v1 }
 0x323   : > { %vm2593_vm10 = vcmp.lt.s32.totalorder %v2521_v19, 1000  ;;  %v1039_v22 = vadd.f32 %v9083_v23, %v13410_v9  ;;  %v13411_v24 = vrot.slane %v9734_v28, 2  ;;  %v9852_v6 = vsel %vm2874_vm9, %v9826_v36, %v2910_v14  ;;  %7296 = vmatmul.msk.f32.gmra.mxu3 %vm9769_vm8, %v9763_v12 }
 0x324   : > { %v9855_v61 = vsel %vm4591_vm7, %v4607_v47, %v4609_v33  ;;  %v2253_v29 = vadd.f32 %v2252_v41, %v2128_v34  ;;  %v3027_v27 = vrot.slane %v9852_v6, 3  ;;  %v3134_v9 = vrot.slane %v9852_v6, 6  ;;  %3269 = vmatmul.f32.gmra.mxu2 %v9852_v6  ;;  %vm9867_vm4 = vmand %vm2557_vm12, %vm2593_vm10  ;;  %v13418_v34 = vld [vmem:[#allocation24_spill] sm:$0xff] }
 0x325   : > { %v2388_v18 = vsel %vm817_vm3, %v13411_v24, %v13197_v32  ;;  %13412 = vst [vmem:[#allocation7_spill] sm:$0xff] %v9855_v61  ;;  %vm1333_vm1 = vcmp.ge.f32.partialorder %v1286_v11, 0.0  ;;  %v13413_v28 = vrot.slane %v9795_v20, 1  ;;  %v13414_v24 = vrot.slane %v9713_v26, 1  ;;  %v7321_v6 = vld [vmem:[%s13143_s1 + $0x208] sm:$0xff] }
 0x326   : > { %v9874_v47 = vsel %vm9840_vm11, %v9833_v50, 0.0  ;;  %v9878_v38 = vadd.s32 %v8618_v7, %v9820_v62  ;;  %v9881_v1 = vadd.s32 256, %v8614_v54  ;;  %v2483_v14 = vadd.f32 %v2388_v18, %v2253_v29  ;;  %v9899_v18 = vld [vmem:[%s7943_s26 + $0x60] sm:$0xff]  ;;  %3362 = vmatpush.msra.mxu3 %v7321_v6 }
 0x327   : > { %v1794_v36 = vsel %vm709_vm2, %v13414_v24, %v13413_v28  ;;  %v2522_v19 = vadd.s32 %v8961_v5, %v13418_v34  ;;  %v7345_v28 = vld [vmem:[%s13143_s1 + $0x2c8] sm:$0xff]  ;;  %v9892_v24 = vsel %vm3009_vm13, %v3025_v21, %v3027_v27  ;;  %v9895_v32 = vsel %vm3116_vm14, %v3132_v53, %v3134_v9 }
 0x328   : > { %13417 = vst [vmem:[#allocation63_spill] sm:$0xff] %v9881_v1  ;;  %v1164_v61 = vadd.f32 %v8824_v60, %v1039_v22  ;;  %v13198_v29 = vrot.slane %v9899_v18, 2  ;;  %v13420_v34 = vrot.slane %v9795_v20, 2  ;;  %v13421_v0 = vrot.slane %v9713_v26, 2  ;;  %3476 = vmatpush.msra.mxu2 %v7345_v28  ;;  %v9921_v60 = vld [vmem:[%s13146_s4] ss:$0 sm:$0xff] }
 0x329   : > { %13419 = vst [vmem:[#allocation64_spill] sm:$0xff] %v9895_v32  ;;  %v9908_v42 = vsel %vm1333_vm1, %v1286_v11, %v1369_v3  ;;  %v2006_v26 = vadd.f32 %v9921_v60, %v2005_v40  ;;  %v2737_v13 = vsel %vm9867_vm4, %v2483_v14, 0.0  ;;  %v9931_v11 = vadd.s32 264, %v8614_v54  ;;  %v2255_v22 = vpop.f32.mrf.mxu1  ;;  %v1291_v32 = vpop.f32.mrf.mxu2 }
 0x32a   : > { %v1901_v8 = vsel %vm817_vm3, %v13421_v0, %v13420_v34  ;;  %v2130_v0 = vpop.f32.mrf.mxu0  ;;  %vm2875_vm5 = vcmp.ge.f32.partialorder %v2737_v13, 0.0  ;;  %v2911_v3 = vmul.f32 0.1, %v2737_v13  ;;  %v4611_v6 = vrot.slane %v2737_v13, 4  ;;  %v2008_v28 = vpop.f32.mrf.mxu3  ;;  %2177 = vmatmul.f32.gmra.mxu0 %v1794_v36 }
 0x32b   : > { %13424 = vst [vmem:[#allocation65_spill] sm:$0xff] %v9931_v11  ;;  %v2131_v40 = vadd.f32 %v2130_v0, %v2006_v26  ;;  %vm2558_vm6 = vcmp.ge.s32.totalorder %v2522_v19, 0  ;;  %vm2594_vm0 = vcmp.lt.s32.totalorder %v2522_v19, 1000  ;;  %v9937_v12 = vsel %vm9914_vm15, %v9908_v42, 0.0  ;;  %v13427_v26 = vld [vmem:[#allocation8_spill] sm:$0xff]  ;;  %2302 = vmatmul.f32.gmra.mxu1 %v1901_v8  ;;  %7297 = vmatmul.msk.f32.gmra.mxu3 %vm9840_vm11, %v9833_v50 }
 0x32c   : > { %v1289_v59 = vadd.f32 %v1288_v56, %v1164_v61  ;;  %v13425_v41 = vrot.slane %v9806_v17, 2  ;;  %v9944_v53 = vsel %vm2875_vm5, %v2737_v13, %v2911_v3  ;;  %v9947_v34 = vsel %vm4591_vm7, %v4609_v33, %v4611_v6  ;;  %vm9956_vm8 = vmand %vm2558_vm6, %vm2594_vm0 }
 0x32d   : > { %13426 = vst [vmem:[#allocation66_spill] sm:$0xff] %v9947_v34  ;;  %v1042_v0 = vadd.f32 %v9083_v23, %v13427_v26  ;;  %v2256_v35 = vadd.f32 %v2255_v22, %v2131_v40  ;;  %v3029_v61 = vrot.slane %v9944_v53, 3  ;;  %v3136_v17 = vrot.slane %v9944_v53, 6  ;;  %3272 = vmatmul.f32.gmra.mxu2 %v9944_v53  ;;  %v9979_v22 = vld [vmem:[%s7943_s26 + $0x68] sm:$0xff]  ;;  %v13435_v34 = vld [vmem:[#allocation27_spill] sm:$0xff] }
 0x32e   : > { %v2390_v14 = vsel %vm817_vm3, %v13425_v41, %v13198_v29  ;;  %vm1517_vm9 = vcmp.ge.s32.totalorder %v9878_v38, 0  ;;  %vm1553_vm12 = vcmp.lt.s32.totalorder %v9878_v38, 1000  ;;  %v9964_v33 = vadd.s32 %v8618_v7, %v9881_v1 }
 0x32f   : > { %v9968_v8 = vadd.s32 %v8618_v7, %v9931_v11  ;;  %v2484_v36 = vadd.f32 %v2390_v14, %v2256_v35  ;;  %v2523_v19 = vadd.s32 %v8961_v5, %v8822_v39  ;;  %v9973_v13 = vsel %vm3009_vm13, %v3027_v27, %v3029_v61  ;;  %vm10025_vm11 = vmand %vm1517_vm9, %vm1553_vm12 }
 0x330   : > { %v9976_v53 = vsel %vm3116_vm14, %v3134_v9, %v3136_v17  ;;  %v13431_v40 = vrot.slane %v9874_v47, 1  ;;  %v13432_v41 = vrot.slane %v9795_v20, 1  ;;  %v13433_v35 = vrot.slane %v9874_v47, 2 }
 0x331   : > { %13430 = vst [vmem:[#allocation8_spill] sm:$0xff] %v9976_v53  ;;  %v13434_v14 = vrot.slane %v9795_v20, 2  ;;  %v1370_v9 = vmul.f32 0.1, %v1289_v59  ;;  %v1167_v39 = vadd.f32 %v13435_v34, %v1042_v0  ;;  %v2009_v53 = vadd.f32 %v9921_v60, %v2008_v28  ;;  %v1294_v38 = vpop.f32.mrf.mxu2 }
 0x332   : > { %v1796_v26 = vsel %vm709_vm2, %v13432_v41, %v13431_v40  ;;  %v10000_v40 = vsel %vm9956_vm8, %v2484_v36, 0.0  ;;  %v13436_v41 = vld [vmem:[#allocation9_spill] sm:$0xff]  ;;  %v2133_v3 = vpop.f32.mrf.mxu0  ;;  %vm2559_vm1 = vcmp.ge.s32.totalorder %v2523_v19, 0  ;;  %vm2595_vm4 = vcmp.lt.s32.totalorder %v2523_v19, 1000  ;;  %v2011_v56 = vpop.f32.mrf.mxu3  ;;  %v7320_v19 = vld [vmem:[%s13143_s1 + $0x200] sm:$0xff] }
 0x333   : > { %v1903_v27 = vsel %vm817_vm3, %v13434_v14, %v13433_v35  ;;  %v1045_v20 = vadd.f32 %v9083_v23, %v13436_v41  ;;  %v2258_v35 = vpop.f32.mrf.mxu1  ;;  %vm2876_vm10 = vcmp.ge.f32.partialorder %v10000_v40, 0.0  ;;  %v2912_v14 = vmul.f32 0.1, %v10000_v40  ;;  %2180 = vmatmul.f32.gmra.mxu0 %v1796_v26  ;;  %vm10033_vm6 = vmand %vm2559_vm1, %vm2595_vm4  ;;  %3363 = vmatpush.msra.mxu3 %v7320_v19 }
 0x334   : > { %v4613_v34 = vrot.slane %v10000_v40, 4  ;;  %v2134_v28 = vadd.f32 %v2133_v3, %v2009_v53  ;;  %vm1334_vm5 = vcmp.ge.f32.partialorder %v1289_v59, 0.0  ;;  %v13437_v50 = vrot.slane %v9979_v22, 2  ;;  %2305 = vmatmul.f32.gmra.mxu1 %v1903_v27  ;;  %v13445_v27 = vld [vmem:[#allocation26_spill] sm:$0xff]  ;;  %7298 = vmatmul.msk.f32.gmra.mxu3 %vm9914_vm15, %v9908_v42 }
 0x335   : > { %v13438_v25 = vrot.slane %v9899_v18, 2  ;;  %v10013_v23 = vsel %vm2876_vm10, %v10000_v40, %v2912_v14  ;;  %v13201_v36 = vrot.slane %v9937_v12, 2  ;;  %v1292_v29 = vadd.f32 %v1291_v32, %v1167_v39  ;;  %v13442_v14 = vld [vmem:[#allocation29_spill] sm:$0xff] }
 0x336   : > { %v10017_v41 = vsel %vm4591_vm7, %v4611_v6, %v4613_v34  ;;  %v2259_v53 = vadd.f32 %v2258_v35, %v2134_v28  ;;  %v3031_v3 = vrot.slane %v10013_v23, 3  ;;  %v3138_v18 = vrot.slane %v10013_v23, 6  ;;  %3275 = vmatmul.f32.gmra.mxu2 %v10013_v23  ;;  %v7344_v35 = vld [vmem:[%s13143_s1 + $0x2c0] sm:$0xff]  ;;  %v10057_v28 = vld [vmem:[%s7943_s26 + $0x70] sm:$0xff] }
 0x337   : > { %v2392_v0 = vsel %vm817_vm3, %v13438_v25, %v13437_v50  ;;  %13439 = vst [vmem:[#allocation27_spill] sm:$0xff] %v10017_v41  ;;  %v1170_v6 = vadd.f32 %v13442_v14, %v1045_v20  ;;  %v10038_v32 = vsel %vm1334_vm5, %v1289_v59, %v1370_v9  ;;  %vm1518_vm0 = vcmp.ge.s32.totalorder %v9964_v33, 0  ;;  %3477 = vmatpush.msra.mxu2 %v7344_v35 }
 0x338   : > { %vm1554_vm8 = vcmp.lt.s32.totalorder %v9964_v33, 1000  ;;  %v2485_v26 = vadd.f32 %v2392_v0, %v2259_v53  ;;  %v2524_v20 = vadd.s32 %v8961_v5, %v13445_v27  ;;  %v10051_v59 = vsel %vm3009_vm13, %v3029_v61, %v3031_v3 }
 0x339   : > { %v10054_v9 = vsel %vm3116_vm14, %v3136_v17, %v3138_v18  ;;  %v13447_v25 = vrot.slane %v9937_v12, 1  ;;  %v13448_v0 = vrot.slane %v9874_v47, 1  ;;  %v13449_v53 = vrot.slane %v9874_v47, 2  ;;  %vm10110_vm5 = vmand %vm1518_vm0, %vm1554_vm8  ;;  %v1297_v40 = vpop.f32.mrf.mxu2 }
 0x33a   : > { %13446 = vst [vmem:[#allocation9_spill] sm:$0xff] %v10054_v9  ;;  %vm1519_vm9 = vcmp.ge.s32.totalorder %v9968_v8, 0  ;;  %vm1555_vm12 = vcmp.lt.s32.totalorder %v9968_v8, 1000  ;;  %v10073_v17 = vadd.s32 272, %v8614_v54  ;;  %v1371_v14 = vmul.f32 0.1, %v1292_v29  ;;  %v2136_v35 = vpop.f32.mrf.mxu0 }
 0x33b   : > { %v1798_v23 = vsel %vm709_vm2, %v13448_v0, %v13447_v25  ;;  %v1905_v61 = vsel %vm817_vm3, %v13449_v53, %v13201_v36  ;;  %v2012_v50 = vadd.f32 %v9921_v60, %v2011_v56  ;;  %v10081_v47 = vsel %vm10033_vm6, %v2485_v26, 0.0  ;;  %v2261_v0 = vpop.f32.mrf.mxu1  ;;  %v2014_v36 = vpop.f32.mrf.mxu3 }
 0x33c   : > { %v10086_v25 = vsel %vm10025_vm11, %v10038_v32, 0.0  ;;  %v1295_v19 = vadd.f32 %v1294_v38, %v1170_v6  ;;  %vm2877_vm10 = vcmp.ge.f32.partialorder %v10081_v47, 0.0  ;;  %v2913_v56 = vmul.f32 0.1, %v10081_v47  ;;  %2183 = vmatmul.f32.gmra.mxu0 %v1798_v23  ;;  %2308 = vmatmul.f32.gmra.mxu1 %v1905_v61  ;;  %v7667_v23 = vld [vmem:[%s13144_s2] ss:$0 sm:$0xff] }
 0x33d   : > { %v4615_v53 = vrot.slane %v10081_v47, 4  ;;  %v2137_v21 = vadd.f32 %v2136_v35, %v2012_v50  ;;  %vm2560_vm15 = vcmp.ge.s32.totalorder %v2524_v20, 0  ;;  %vm2596_vm1 = vcmp.lt.s32.totalorder %v2524_v20, 1000  ;;  %v13455_v61 = vld [vmem:[#allocation10_spill] sm:$0xff]  ;;  %7299 = vmatmul.msk.f32.gmra.mxu3 %vm10025_vm11, %v10038_v32 }
 0x33e   : > { %vm1335_vm4 = vcmp.ge.f32.partialorder %v1292_v29, 0.0  ;;  %v13450_v42 = vrot.slane %v10057_v28, 2  ;;  %v13451_v39 = vrot.slane %v9979_v22, 2  ;;  %v10097_v6 = vsel %vm2877_vm10, %v10081_v47, %v2913_v56  ;;  %vm2632_vm6 = vmand %vm2560_vm15, %vm2596_vm1 }
 0x33f   : > { %v13202_v38 = vrot.slane %v10086_v25, 1  ;;  %v10101_v41 = vsel %vm4591_vm7, %v4613_v34, %v4615_v53  ;;  %v2262_v27 = vadd.f32 %v2261_v0, %v2137_v21  ;;  %v3033_v50 = vrot.slane %v10097_v6, 3  ;;  %3278 = vmatmul.f32.gmra.mxu2 %v10097_v6  ;;  %vm10167_vm15 = vmand %vm1519_vm9, %vm1555_vm12 }
 0x340   : > { %v2394_v26 = vsel %vm817_vm3, %v13451_v39, %v13450_v42  ;;  %13452 = vst [vmem:[#allocation29_spill] sm:$0xff] %v10101_v41  ;;  %v3140_v35 = vrot.slane %v10097_v6, 6  ;;  %v1372_v34 = vmul.f32 0.1, %v1295_v19  ;;  %v1048_v0 = vadd.f32 %v7667_v23, %v13455_v61  ;;  %v13456_v42 = vld [vmem:[#allocation28_spill] sm:$0xff]  ;;  %v10135_v6 = vld [vmem:[%s7943_s26 + $0x78] sm:$0xff] }
 0x341   : > { %v1407_v56 = vsel %vm1335_vm4, %v1292_v29, %v1371_v14  ;;  %v10124_v33 = vadd.s32 %v8618_v7, %v10073_v17  ;;  %v2486_v21 = vadd.f32 %v2394_v26, %v2262_v27  ;;  %v2525_v39 = vadd.s32 %v8961_v5, %v13456_v42 }
 0x342   : > { %v10129_v22 = vsel %vm3009_vm13, %v3031_v3, %v3033_v50  ;;  %v10132_v61 = vsel %vm3116_vm14, %v3138_v18, %v3140_v35  ;;  %v13458_v29 = vrot.slane %v9937_v12, 1  ;;  %vm1336_vm0 = vcmp.ge.f32.partialorder %v1295_v19, 0.0 }
 0x343   : > { %13457 = vst [vmem:[#allocation10_spill] sm:$0xff] %v10132_v61  ;;  %v10144_v27 = vadd.s32 280, %v8614_v54  ;;  %v2015_v3 = vadd.f32 %v9921_v60, %v2014_v36  ;;  %v13459_v18 = vrot.slane %v10086_v25, 2  ;;  %v13460_v26 = vrot.slane %v9937_v12, 2  ;;  %v2139_v54 = vpop.f32.mrf.mxu0  ;;  %v2264_v61 = vpop.f32.mrf.mxu1 }
 0x344   : > { %v1800_v14 = vsel %vm709_vm2, %v13458_v29, %v13202_v38  ;;  %v2740_v41 = vsel %vm2632_vm6, %v2486_v21, 0.0  ;;  %v10157_v29 = vsel %vm10110_vm5, %v1407_v56, 0.0  ;;  %v13461_v38 = vld [vmem:[#allocation32_spill] sm:$0xff]  ;;  %vm2561_vm11 = vcmp.ge.s32.totalorder %v2525_v39, 0 }
 0x345   : > { %v1907_v20 = vsel %vm817_vm3, %v13460_v26, %v13459_v18  ;;  %v1173_v42 = vadd.f32 %v13461_v38, %v1048_v0  ;;  %vm2878_vm8 = vcmp.ge.f32.partialorder %v2740_v41, 0.0  ;;  %v2914_v36 = vmul.f32 0.1, %v2740_v41  ;;  %2186 = vmatmul.f32.gmra.mxu0 %v1800_v14  ;;  %v13471_v14 = vld [vmem:[#allocation11_spill] sm:$0xff]  ;;  %7300 = vmatmul.msk.f32.gmra.mxu3 %vm10110_vm5, %v1407_v56 }
 0x346   : > { %v4617_v9 = vrot.slane %v2740_v41, 4  ;;  %v2140_v32 = vadd.f32 %v2139_v54, %v2015_v3  ;;  %vm2597_vm10 = vcmp.lt.s32.totalorder %v2525_v39, 1000  ;;  %v10161_v12 = vsel %vm1336_vm0, %v1295_v19, %v1372_v34  ;;  %v2017_v54 = vpop.f32.mrf.mxu3  ;;  %2311 = vmatmul.f32.gmra.mxu1 %v1907_v20 }
 0x347   : > { %v13464_v38 = vrot.slane %v10135_v6, 2  ;;  %v13465_v0 = vrot.slane %v10057_v28, 2  ;;  %v2950_v3 = vsel %vm2878_vm8, %v2740_v41, %v2914_v36  ;;  %v13206_v26 = vrot.slane %v10157_v29, 1  ;;  %vm10183_vm9 = vmand %vm2561_vm11, %vm2597_vm10  ;;  %v13474_v28 = vld [vmem:[#allocation35_spill] sm:$0xff] }
 0x348   : > { %v10178_v19 = vsel %vm4591_vm7, %v4615_v53, %v4617_v9  ;;  %v2265_v34 = vadd.f32 %v2264_v61, %v2140_v32  ;;  %v3035_v8 = vrot.slane %v2950_v3, 3  ;;  %v3142_v31 = vrot.slane %v2950_v3, 6  ;;  %3281 = vmatmul.f32.gmra.mxu2 %v2950_v3  ;;  %v13469_v61 = vld [vmem:[#allocation30_spill] sm:$0xff] }
 0x349   : > { %v2396_v18 = vsel %vm817_vm3, %v13465_v0, %v13464_v38  ;;  %13466 = vst [vmem:[#allocation32_spill] sm:$0xff] %v10178_v19  ;;  %v13205_v10 = vrot.slane %v10157_v29, 2  ;;  %v1298_v44 = vadd.f32 %v1297_v40, %v1173_v42  ;;  %v10190_v41 = vsel %vm10167_vm15, %v10161_v12, 0.0  ;;  %v10203_v40 = vld [vmem:[%s7943_s26 + $0x80] sm:$0xff] }
 0x34a   : > { %vm1520_vm12 = vcmp.ge.s32.totalorder %v10124_v33, 0  ;;  %v2487_v53 = vadd.f32 %v2396_v18, %v2265_v34  ;;  %v2526_v20 = vadd.s32 %v8961_v5, %v13469_v61  ;;  %v10196_v42 = vsel %vm3009_vm13, %v3033_v50, %v3035_v8  ;;  %v7343_v34 = vld [vmem:[%s13143_s1 + $0x2b8] sm:$0xff]  ;;  %v1300_v61 = vpop.f32.mrf.mxu2 }
 0x34b   : > { %v10199_v39 = vsel %vm3116_vm14, %v3140_v35, %v3142_v31  ;;  %v1051_v36 = vadd.f32 %v7667_v23, %v13471_v14  ;;  %v2397_v32 = vrot.slane %v10203_v40, 2  ;;  %vm1556_vm1 = vcmp.lt.s32.totalorder %v10124_v33, 1000  ;;  %v2267_v3 = vpop.f32.mrf.mxu1  ;;  %3478 = vmatpush.msra.mxu2 %v7343_v34  ;;  %v7670_v34 = vld [vmem:[%s7943_s26 + $0x88] sm:$0xff] }
 0x34c   : > { %13470 = vst [vmem:[#allocation67_spill] sm:$0xff] %v10199_v39  ;;  %v10209_v38 = vadd.s32 %v8618_v7, %v10144_v27  ;;  %v2018_v0 = vadd.f32 %v9921_v60, %v2017_v54  ;;  %v13472_v50 = vrot.slane %v10086_v25, 1  ;;  %v13473_v23 = vrot.slane %v10086_v25, 2  ;;  %v2142_v54 = vpop.f32.mrf.mxu0  ;;  %vm10271_vm11 = vmand %vm1520_vm12, %vm1556_vm1 }
 0x34d   : > { %v10226_v7 = vsel %vm10183_vm9, %v2487_v53, 0.0  ;;  %v1373_v14 = vmul.f32 0.1, %v1298_v44  ;;  %vm2562_vm5 = vcmp.ge.s32.totalorder %v2526_v20, 0  ;;  %vm2598_vm6 = vcmp.lt.s32.totalorder %v2526_v20, 1000  ;;  %7301 = vmatmul.msk.f32.gmra.mxu3 %vm10167_vm15, %v10161_v12 }
 0x34e   : > { %v1802_v35 = vsel %vm709_vm2, %v13472_v50, %v13206_v26  ;;  %v1909_v18 = vsel %vm817_vm3, %v13473_v23, %v13205_v10  ;;  %vm2879_vm4 = vcmp.ge.f32.partialorder %v10226_v7, 0.0  ;;  %v2915_v47 = vmul.f32 0.1, %v10226_v7  ;;  %v2020_v26 = vpop.f32.mrf.mxu3  ;;  %vm10248_vm8 = vmand %vm2562_vm5, %vm2598_vm6 }
 0x34f   : > { %v4619_v25 = vrot.slane %v10226_v7, 4  ;;  %v2143_v50 = vadd.f32 %v2142_v54, %v2018_v0  ;;  %v1176_v53 = vadd.f32 %v13474_v28, %v1051_v36  ;;  %v13475_v23 = vrot.slane %v10135_v6, 2  ;;  %2189 = vmatmul.f32.gmra.mxu0 %v1802_v35  ;;  %2314 = vmatmul.f32.gmra.mxu1 %v1909_v18  ;;  %v7367_v35 = vld [vmem:[%s13145_s3 + $0x1f8] sm:$0xff] }
 0x350   : > { %v2951_v56 = vsel %vm2879_vm4, %v10226_v7, %v2915_v47  ;;  %vm1337_vm0 = vcmp.ge.f32.partialorder %v1298_v44, 0.0  ;;  %v1910_v36 = vrot.slane %v10190_v41, 2  ;;  %v7383_v18 = vld [vmem:[%s13145_s3 + $0x278] sm:$0xff]  ;;  %vm1521_vm10 = vcmp.ge.s32.totalorder %v10209_v38, 0  ;;  %4190 = vmatpush.msrb.mxu3 %v7367_v35 }
 0x351   : > { %v2398_v10 = vsel %vm817_vm3, %v13475_v23, %v2397_v32  ;;  %v10243_v19 = vsel %vm4591_vm7, %v4617_v9, %v4619_v25  ;;  %v2268_v39 = vadd.f32 %v2267_v3, %v2143_v50  ;;  %v3037_v0 = vrot.slane %v2951_v56, 3  ;;  %3284 = vmatmul.f32.gmra.mxu2 %v2951_v56  ;;  %v13479_v9 = vld [vmem:[#allocation31_spill] sm:$0xff]  ;;  %4312 = vmatpush.msrb.mxu0 %v7383_v18 }
 0x352   : > { %13476 = vst [vmem:[#allocation11_spill] sm:$0xff] %v10243_v19  ;;  %v3144_v54 = vrot.slane %v2951_v56, 6  ;;  %v2527_v47 = vadd.s32 %v8961_v5, %v13479_v9  ;;  %v1301_v56 = vadd.f32 %v1300_v61, %v1176_v53  ;;  %vm1557_vm9 = vcmp.lt.s32.totalorder %v10209_v38, 1000  ;;  %v13505_v9 = vld [vmem:[#allocation39_spill] sm:$0xff] }
 0x353   : > { %v2488_v7 = vadd.f32 %v2398_v10, %v2268_v39  ;;  %v10261_v3 = vsel %vm3009_vm13, %v3035_v8, %v3037_v0  ;;  %v2399_v10 = vrot.slane %v7670_v34, 2  ;;  %v1409_v39 = vsel %vm1337_vm0, %v1298_v44, %v1373_v14  ;;  %v2270_v28 = vpop.f32.mrf.mxu1  ;;  %vm10319_vm6 = vmand %vm1521_vm10, %vm1557_vm9 }
 0x354   : > { %v10264_v20 = vsel %vm3116_vm14, %v3142_v31, %v3144_v54  ;;  %v2021_v8 = vadd.f32 %v9921_v60, %v2020_v26  ;;  %v13482_v44 = vrot.slane %v10190_v41, 1  ;;  %v13483_v31 = vrot.slane %v10157_v29, 1  ;;  %v2145_v14 = vpop.f32.mrf.mxu0 }
 0x355   : > { %v2742_v61 = vsel %vm10248_vm8, %v2488_v7, 0.0  ;;  %v13484_v26 = vrot.slane %v10157_v29, 2  ;;  %v10295_v35 = vsel %vm10271_vm11, %v1409_v39, 0.0  ;;  %vm2563_vm12 = vcmp.ge.s32.totalorder %v2527_v47, 0  ;;  %7302 = vmatmul.msk.f32.gmra.mxu3 %vm10271_vm11, %v1409_v39 }
 0x356   : > { %v1804_v33 = vsel %vm709_vm2, %v13483_v31, %v13482_v44  ;;  %vm2880_vm15 = vcmp.ge.f32.partialorder %v2742_v61, 0.0  ;;  %v2916_v12 = vmul.f32 0.1, %v2742_v61  ;;  %v4621_v53 = vrot.slane %v2742_v61, 4  ;;  %v2023_v18 = vpop.f32.mrf.mxu3 }
 0x357   : > { %v1911_v21 = vsel %vm817_vm3, %v13484_v26, %v1910_v36  ;;  %v2146_v23 = vadd.f32 %v2145_v14, %v2021_v8  ;;  %vm2599_vm1 = vcmp.lt.s32.totalorder %v2527_v47, 1000  ;;  %v1374_v6 = vmul.f32 0.1, %v1301_v56  ;;  %2192 = vmatmul.f32.gmra.mxu0 %v1804_v33  ;;  %v13486_v26 = vld [vmem:[#allocation33_spill] sm:$0xff] }
 0x358   : > { %v2400_v7 = vsel %vm817_vm3, %v2397_v32, %v2399_v10  ;;  %v2952_v34 = vsel %vm2880_vm15, %v2742_v61, %v2916_v12  ;;  %v10301_v29 = vsel %vm4591_vm7, %v4619_v25, %v4621_v53  ;;  %2317 = vmatmul.f32.gmra.mxu1 %v1911_v21  ;;  %vm1338_vm4 = vcmp.ge.f32.partialorder %v1301_v56, 0.0  ;;  %vm2635_vm5 = vmand %vm2563_vm12, %vm2599_vm1 }
 0x359   : > { %13485 = vst [vmem:[#allocation35_spill] sm:$0xff] %v10301_v29  ;;  %v2271_v44 = vadd.f32 %v2270_v28, %v2146_v23  ;;  %v3039_v8 = vrot.slane %v2952_v34, 3  ;;  %v3146_v31 = vrot.slane %v2952_v34, 6  ;;  %3287 = vmatmul.f32.gmra.mxu2 %v2952_v34  ;;  %v1805_v14 = vrot.slane %v10295_v35, 1  ;;  %v7671_v28 = vld [vmem:[%s7943_s26 + $0x90] sm:$0xff]  ;;  %v13493_v29 = vld [vmem:[#allocation34_spill] sm:$0xff] }
 0x35a   : > { %v2528_v32 = vadd.s32 %v8961_v5, %v13486_v26  ;;  %v1912_v33 = vrot.slane %v10295_v35, 2  ;;  %v2401_v21 = vrot.slane %v7671_v28, 2  ;;  %v1410_v12 = vsel %vm1338_vm4, %v1301_v56, %v1374_v6 }
 0x35b   : > { %v2489_v40 = vadd.f32 %v2400_v7, %v2271_v44  ;;  %v10308_v61 = vsel %vm3009_vm13, %v3037_v0, %v3039_v8  ;;  %v10311_v25 = vsel %vm3116_vm14, %v3144_v54, %v3146_v31  ;;  %v2024_v23 = vadd.f32 %v9921_v60, %v2023_v18  ;;  %v2273_v7 = vpop.f32.mrf.mxu1 }
 0x35c   : > { %v2148_v54 = vpop.f32.mrf.mxu0  ;;  %v13489_v35 = vrot.slane %v10190_v41, 1  ;;  %v10331_v44 = vsel %vm10319_vm6, %v1410_v12, 0.0  ;;  %vm2564_vm8 = vcmp.ge.s32.totalorder %v2528_v32, 0  ;;  %vm2600_vm10 = vcmp.lt.s32.totalorder %v2528_v32, 1000 }
 0x35d   : > { %v2743_v0 = vsel %vm2635_vm5, %v2489_v40, 0.0  ;;  %v2149_v38 = vadd.f32 %v2148_v54, %v2024_v23  ;;  %v2402_v50 = vsel %vm817_vm3, %v2399_v10, %v2401_v21  ;;  %v1913_v18 = vsel %vm817_vm3, %v1910_v36, %v1912_v33  ;;  %vm10341_vm11 = vmand %vm2564_vm8, %vm2600_vm10  ;;  %7303 = vmatmul.msk.f32.gmra.mxu3 %vm10319_vm6, %v1410_v12 }
 0x35e   : > { %v1806_v56 = vsel %vm709_vm2, %v13489_v35, %v1805_v14  ;;  %vm2881_vm0 = vcmp.ge.f32.partialorder %v2743_v0, 0.0  ;;  %v2917_v6 = vmul.f32 0.1, %v2743_v0  ;;  %v4623_v34 = vrot.slane %v2743_v0, 4  ;;  %v2026_v39 = vpop.f32.mrf.mxu3 }
 0x35f   : > { %v2274_v35 = vadd.f32 %v2273_v7, %v2149_v38  ;;  %2195 = vmatmul.f32.gmra.mxu0 %v1806_v56  ;;  %v2529_v36 = vadd.s32 %v8961_v5, %v13493_v29  ;;  %v7382_v7 = vld [vmem:[%s13145_s3 + $0x270] sm:$0xff]  ;;  %v1914_v38 = vrot.slane %v10331_v44, 2 }
 0x360   : > { %v2953_v40 = vsel %vm2881_vm0, %v2743_v0, %v2917_v6  ;;  %v10338_v28 = vsel %vm4591_vm7, %v4621_v53, %v4623_v34  ;;  %2320 = vmatmul.f32.gmra.mxu1 %v1913_v18  ;;  %v7342_v53 = vld [vmem:[%s13143_s1 + $0x2b0] sm:$0xff]  ;;  %4313 = vmatpush.msrb.mxu0 %v7382_v7 }
 0x361   : > { %13490 = vst [vmem:[#allocation68_spill] sm:$0xff] %v10338_v28  ;;  %v3041_v23 = vrot.slane %v2953_v40, 3  ;;  %v3148_v54 = vrot.slane %v2953_v40, 6  ;;  %3290 = vmatmul.f32.gmra.mxu2 %v2953_v40  ;;  %v2490_v41 = vadd.f32 %v2402_v50, %v2274_v35  ;;  %v7366_v0 = vld [vmem:[%s13145_s3 + $0x1f0] sm:$0xff]  ;;  %v7672_v50 = vld [vmem:[%s7943_s26 + $0x98] sm:$0xff]  ;;  %v2027_v40 = vadd.f32 %v9921_v60, %v2026_v39  ;;  %v10365_v35 = vpop.f32.mrf.mxu2 }
 0x362   : > { %v2403_v18 = vrot.slane %v7672_v50, 2  ;;  %3479 = vmatpush.msra.mxu2 %v7342_v53  ;;  %4191 = vmatpush.msrb.mxu3 %v7366_v0  ;;  %v13494_v53 = vrot.slane %v10331_v44, 1  ;;  %vm2565_vm15 = vcmp.ge.s32.totalorder %v2529_v36, 0  ;;  %vm2601_vm12 = vcmp.lt.s32.totalorder %v2529_v36, 1000 }
 0x363   : > { %v10357_v56 = vsel %vm3009_vm13, %v3039_v8, %v3041_v23  ;;  %v10360_v6 = vsel %vm3116_vm14, %v3146_v31, %v3148_v54  ;;  %v2744_v8 = vsel %vm10341_vm11, %v2490_v41, 0.0  ;;  %v2276_v31 = vpop.f32.mrf.mxu1  ;;  %v1915_v47 = vsel %vm817_vm3, %v1912_v33, %v1914_v38  ;;  %vm2637_vm1 = vmand %vm2565_vm15, %vm2601_vm12 }
 0x364   : > { %v2151_v32 = vpop.f32.mrf.mxu0  ;;  %vm2882_vm9 = vcmp.ge.f32.partialorder %v2744_v8, 0.0  ;;  %v2918_v28 = vmul.f32 0.1, %v2744_v8  ;;  %v4625_v19 = vrot.slane %v2744_v8, 4  ;;  %v1808_v0 = vsel %vm709_vm2, %v1805_v14, %v13494_v53 }
 0x365   : > { %v2152_v29 = vadd.f32 %v2151_v32, %v2027_v40  ;;  %v2404_v39 = vsel %vm817_vm3, %v2401_v21, %v2403_v18  ;;  %v13496_v40 = vld [vmem:[#allocation36_spill] sm:$0xff]  ;;  %3364 = vmatmul.f32.vlgmr.msra.gmra.mxu3 %v9200_v52  ;;  %v13498_v52 = vrot.slane %v10331_v44, 1 }
 0x366   : > { %v2029_v12 = vpop.f32.mrf.mxu3  ;;  %v2954_v10 = vsel %vm2882_vm9, %v2744_v8, %v2918_v28  ;;  %v10377_v41 = vsel %vm4591_vm7, %v4623_v34, %v4625_v19  ;;  %v2530_v36 = vadd.s32 %v8961_v5, %v13496_v40  ;;  %v7673_v28 = vld [vmem:[%s7943_s26 + $0xa0] sm:$0xff]  ;;  %v7381_v44 = vld [vmem:[%s13145_s3 + $0x268] sm:$0xff]  ;;  %v13502_v40 = vld [vmem:[#allocation38_spill] sm:$0xff] }
 0x367   : > { %13495 = vst [vmem:[#allocation69_spill] sm:$0xff] %v10377_v41  ;;  %v2277_v7 = vadd.f32 %v2276_v31, %v2152_v29  ;;  %2198 = vmatmul.f32.gmra.mxu0 %v1808_v0  ;;  %v3043_v32 = vrot.slane %v2954_v10, 3  ;;  %v3150_v50 = vrot.slane %v2954_v10, 6  ;;  %v2405_v34 = vrot.slane %v7673_v28, 2 }
 0x368   : > { %2323 = vmatmul.f32.gmra.mxu1 %v1915_v47  ;;  %v2030_v29 = vadd.f32 %v9921_v60, %v2029_v12  ;;  %vm2566_vm5 = vcmp.ge.s32.totalorder %v2530_v36, 0  ;;  %vm2602_vm6 = vcmp.lt.s32.totalorder %v2530_v36, 1000  ;;  %4314 = vmatpush.msrb.mxu0 %v7381_v44  ;;  %v2532_v26 = vadd.s32 %v8961_v5, %v13502_v40 }
 0x369   : > { %3293 = vmatmul.f32.gmra.mxu2 %v2954_v10  ;;  %v2491_v14 = vadd.f32 %v2404_v39, %v2277_v7  ;;  %v10382_v21 = vsel %vm3009_vm13, %v3041_v23, %v3043_v32  ;;  %v10385_v33 = vsel %vm3116_vm14, %v3148_v54, %v3150_v50  ;;  %v10389_v8 = vpop.f32.mrf.mxu2  ;;  %v2406_v23 = vsel %vm817_vm3, %v2403_v18, %v2405_v34  ;;  %vm2638_vm0 = vmand %vm2566_vm5, %vm2602_vm6  ;;  %v7341_v18 = vld [vmem:[%s13143_s1 + $0x2a8] sm:$0xff] }
 0x36a   : > { %3480 = vmatpush.msra.mxu2 %v7341_v18  ;;  %vm2568_vm12 = vcmp.ge.s32.totalorder %v2532_v26, 0 }
 0x36b   : > { %v2745_v31 = vsel %vm2637_vm1, %v2491_v14, 0.0  ;;  %v2279_v0 = vpop.f32.mrf.mxu1  ;;  %vm2604_vm1 = vcmp.lt.s32.totalorder %v2532_v26, 1000  ;;  %v7340_v26 = vld [vmem:[%s13143_s1 + $0x2a0] sm:$0xff] }
 0x36c   : > { %v2154_v53 = vpop.f32.mrf.mxu0  ;;  %vm2883_vm4 = vcmp.ge.f32.partialorder %v2745_v31, 0.0  ;;  %v2919_v39 = vmul.f32 0.1, %v2745_v31  ;;  %v4627_v47 = vrot.slane %v2745_v31, 4  ;;  %3481 = vmatpush.msra.mxu2 %v7340_v26 }
 0x36d   : > { %v2155_v10 = vadd.f32 %v2154_v53, %v2030_v29  ;;  %v13499_v53 = vld [vmem:[#allocation37_spill] sm:$0xff]  ;;  %3367 = vmatmul.f32.gmra.mxu3 %v9290_v37 }
 0x36e   : > { %v2032_v54 = vpop.f32.mrf.mxu3  ;;  %v2955_v7 = vsel %vm2883_vm4, %v2745_v31, %v2919_v39  ;;  %v10394_v12 = vsel %vm4591_vm7, %v4625_v19, %v4627_v47  ;;  %v2531_v36 = vadd.s32 %v8961_v5, %v13499_v53  ;;  %v7365_v19 = vld [vmem:[%s13145_s3 + $0x1e8] sm:$0xff]  ;;  %vm2640_vm4 = vmand %vm2568_vm12, %vm2604_vm1 }
 0x36f   : > { %13497 = vst [vmem:[#allocation70_spill] sm:$0xff] %v10394_v12  ;;  %v2280_v28 = vadd.f32 %v2279_v0, %v2155_v10  ;;  %2201 = vmatmul.f32.gmra.mxu0 %v13498_v52  ;;  %v3045_v14 = vrot.slane %v2955_v7, 3  ;;  %v3152_v41 = vrot.slane %v2955_v7, 6  ;;  %v7674_v0 = vld [vmem:[%s7943_s26 + $0xa8] sm:$0xff]  ;;  %4192 = vmatpush.msrb.mxu3 %v7365_v19  ;;  %v2033_v10 = vadd.f32 %v9921_v60, %v2032_v54 }
 0x370   : > { %2326 = vmatmul.f32.gmra.mxu1 %v1914_v38  ;;  %v2407_v39 = vrot.slane %v7674_v0, 2  ;;  %vm2567_vm10 = vcmp.ge.s32.totalorder %v2531_v36, 0  ;;  %vm2603_vm11 = vcmp.lt.s32.totalorder %v2531_v36, 1000 }
 0x371   : > { %3296 = vmatmul.f32.gmra.mxu2 %v2955_v7  ;;  %v2492_v29 = vadd.f32 %v2406_v23, %v2280_v28  ;;  %v10410_v38 = vsel %vm3009_vm13, %v3043_v32, %v3045_v14  ;;  %v10413_v31 = vsel %vm3116_vm14, %v3150_v50, %v3152_v41  ;;  %v10417_v23 = vpop.f32.mrf.mxu2  ;;  %vm2639_vm9 = vmand %vm2567_vm10, %vm2603_vm11 }
 0x372   : > { %13500 = vst [vmem:[#allocation71_spill] sm:$0xff] %v10413_v31  ;;  %v2408_v50 = vsel %vm817_vm3, %v2405_v34, %v2407_v39  ;;  %v7675_v34 = vld [vmem:[%s7943_s26 + $0xb0] sm:$0xff] }
 0x373   : > { %v2746_v7 = vsel %vm2638_vm0, %v2492_v29, 0.0  ;;  %v2282_v52 = vpop.f32.mrf.mxu1 }
 0x374   : > { %v2157_v28 = vpop.f32.mrf.mxu0  ;;  %vm2884_vm8 = vcmp.ge.f32.partialorder %v2746_v7, 0.0  ;;  %v2920_v32 = vmul.f32 0.1, %v2746_v7  ;;  %v4629_v12 = vrot.slane %v2746_v7, 4 }
 0x375   : > { %v2158_v53 = vadd.f32 %v2157_v28, %v2033_v10  ;;  %3370 = vmatmul.f32.gmra.mxu3 %v9379_v2 }
 0x376   : > { %v2035_v18 = vpop.f32.mrf.mxu3  ;;  %v2956_v19 = vsel %vm2884_vm8, %v2746_v7, %v2920_v32  ;;  %v10422_v54 = vsel %vm4591_vm7, %v4627_v47, %v4629_v12  ;;  %v2409_v7 = vrot.slane %v7675_v34, 2 }
 0x377   : > { %13501 = vst [vmem:[#allocation72_spill] sm:$0xff] %v10422_v54  ;;  %v2283_v0 = vadd.f32 %v2282_v52, %v2158_v53  ;;  %v3047_v37 = vrot.slane %v2956_v19, 3  ;;  %v3154_v29 = vrot.slane %v2956_v19, 6  ;;  %v2036_v47 = vadd.f32 %v9921_v60, %v2035_v18 }
 0x379   : > { %3299 = vmatmul.f32.gmra.mxu2 %v2956_v19  ;;  %v2493_v44 = vadd.f32 %v2408_v50, %v2283_v0  ;;  %v10427_v10 = vsel %vm3009_vm13, %v3045_v14, %v3047_v37  ;;  %v10430_v36 = vsel %vm3116_vm14, %v3152_v41, %v3154_v29  ;;  %v10434_v28 = vpop.f32.mrf.mxu2  ;;  %v2410_v41 = vsel %vm817_vm3, %v2407_v39, %v2409_v7  ;;  %v7364_v39 = vld [vmem:[%s13145_s3 + $0x1e0] sm:$0xff] }
 0x37a   : > { %13503 = vst [vmem:[#allocation73_spill] sm:$0xff] %v10430_v36  ;;  %v2533_v36 = vadd.s32 %v8961_v5, %v13505_v9  ;;  %4193 = vmatpush.msrb.mxu3 %v7364_v39 }
 0x37b   : > { %v2747_v53 = vsel %vm2639_vm9, %v2493_v44, 0.0  ;;  %v2285_v32 = vpop.f32.mrf.mxu1 }
 0x37c   : > { %v2160_v52 = vpop.f32.mrf.mxu0  ;;  %vm2885_vm15 = vcmp.ge.f32.partialorder %v2747_v53, 0.0  ;;  %v2921_v50 = vmul.f32 0.1, %v2747_v53  ;;  %v4631_v19 = vrot.slane %v2747_v53, 4  ;;  %vm2569_vm6 = vcmp.ge.s32.totalorder %v2533_v36, 0 }
 0x37d   : > { %v2161_v0 = vadd.f32 %v2160_v52, %v2036_v47  ;;  %3373 = vmatmul.f32.gmra.mxu3 %v9465_v46  ;;  %vm2605_vm0 = vcmp.lt.s32.totalorder %v2533_v36, 1000 }
 0x37e   : > { %v2038_v14 = vpop.f32.mrf.mxu3  ;;  %v2957_v34 = vsel %vm2885_vm15, %v2747_v53, %v2921_v50  ;;  %v10439_v18 = vsel %vm4591_vm7, %v4629_v12, %v4631_v19  ;;  %v7676_v53 = vld [vmem:[%s7943_s26 + $0xb8] sm:$0xff]  ;;  %vm2641_vm8 = vmand %vm2569_vm6, %vm2605_vm0 }
 0x37f   : > { %13504 = vst [vmem:[#allocation74_spill] sm:$0xff] %v10439_v18  ;;  %v2286_v54 = vadd.f32 %v2285_v32, %v2161_v0  ;;  %v3049_v40 = vrot.slane %v2957_v34, 3  ;;  %v3156_v2 = vrot.slane %v2957_v34, 6  ;;  %v2411_v52 = vrot.slane %v7676_v53, 2 }
 0x381   : > { %3302 = vmatmul.f32.gmra.mxu2 %v2957_v34  ;;  %v2494_v44 = vadd.f32 %v2410_v41, %v2286_v54  ;;  %v10450_v12 = vsel %vm3009_vm13, %v3047_v37, %v3049_v40  ;;  %v10453_v47 = vsel %vm3116_vm14, %v3154_v29, %v3156_v2  ;;  %v2039_v54 = vadd.f32 %v9921_v60, %v2038_v14  ;;  %v10457_v32 = vpop.f32.mrf.mxu2  ;;  %v7380_v37 = vld [vmem:[%s13145_s3 + $0x260] sm:$0xff] }
 0x382   : > { %13506 = vst [vmem:[#allocation75_spill] sm:$0xff] %v10453_v47  ;;  %4315 = vmatpush.msrb.mxu0 %v7380_v37  ;;  %v2412_v14 = vsel %vm817_vm3, %v2409_v7, %v2411_v52  ;;  %v7677_v7 = vld [vmem:[%s7943_s26 + $0xc0] sm:$0xff] }
 0x383   : > { %v2748_v50 = vsel %vm2640_vm4, %v2494_v44, 0.0  ;;  %v2288_v41 = vpop.f32.mrf.mxu1 }
 0x384   : > { %v2163_v0 = vpop.f32.mrf.mxu0  ;;  %vm2886_vm5 = vcmp.ge.f32.partialorder %v2748_v50, 0.0  ;;  %v2922_v34 = vmul.f32 0.1, %v2748_v50  ;;  %v4633_v29 = vrot.slane %v2748_v50, 4 }
 0x385   : > { %v2164_v18 = vadd.f32 %v2163_v0, %v2039_v54  ;;  %v2534_v54 = vadd.s32 %v8961_v5, %v9069_v57  ;;  %3376 = vmatmul.f32.gmra.mxu3 %v9557_v48 }
 0x386   : > { %v2041_v26 = vpop.f32.mrf.mxu3  ;;  %v2958_v39 = vsel %vm2886_vm5, %v2748_v50, %v2922_v34  ;;  %v10465_v46 = vsel %vm4591_vm7, %v4631_v19, %v4633_v29  ;;  %v2413_v50 = vrot.slane %v7677_v7, 2 }
 0x387   : > { %13507 = vst [vmem:[#allocation76_spill] sm:$0xff] %v10465_v46  ;;  %v2289_v44 = vadd.f32 %v2288_v41, %v2164_v18  ;;  %v3051_v53 = vrot.slane %v2958_v39, 3  ;;  %v3158_v9 = vrot.slane %v2958_v39, 6  ;;  %v2042_v19 = vadd.f32 %v9921_v60, %v2041_v26 }
 0x388   : > { %vm2570_vm11 = vcmp.ge.s32.totalorder %v2534_v54, 0  ;;  %vm2606_vm9 = vcmp.lt.s32.totalorder %v2534_v54, 1000  ;;  %v7339_v54 = vld [vmem:[%s13143_s1 + $0x298] sm:$0xff] }
 0x389   : > { %3305 = vmatmul.f32.gmra.mxu2 %v2958_v39  ;;  %v2495_v47 = vadd.f32 %v2412_v14, %v2289_v44  ;;  %v10470_v0 = vsel %vm3009_vm13, %v3049_v40, %v3051_v53  ;;  %v10473_v36 = vsel %vm3116_vm14, %v3156_v2, %v3158_v9  ;;  %v10477_v34 = vpop.f32.mrf.mxu2  ;;  %v2414_v40 = vsel %vm817_vm3, %v2411_v52, %v2413_v50  ;;  %vm2642_vm15 = vmand %vm2570_vm11, %vm2606_vm9 }
 0x38a   : > { %13508 = vst [vmem:[#allocation77_spill] sm:$0xff] %v10473_v36  ;;  %v2535_v36 = vadd.s32 %v8961_v5, %v9128_v4  ;;  %3482 = vmatpush.msra.mxu2 %v7339_v54 }
 0x38b   : > { %v2749_v18 = vsel %vm2641_vm8, %v2495_v47, 0.0  ;;  %v2291_v37 = vpop.f32.mrf.mxu1 }
 0x38c   : > { %v2166_v41 = vpop.f32.mrf.mxu0  ;;  %vm2887_vm10 = vcmp.ge.f32.partialorder %v2749_v18, 0.0  ;;  %v2923_v14 = vmul.f32 0.1, %v2749_v18  ;;  %v4635_v39 = vrot.slane %v2749_v18, 4  ;;  %vm2571_vm1 = vcmp.ge.s32.totalorder %v2535_v36, 0 }
 0x38d   : > { %v2167_v44 = vadd.f32 %v2166_v41, %v2042_v19  ;;  %3379 = vmatmul.f32.gmra.mxu3 %v9641_v55  ;;  %vm2607_vm4 = vcmp.lt.s32.totalorder %v2535_v36, 1000  ;;  %v7379_v36 = vld [vmem:[%s13145_s3 + $0x258] sm:$0xff] }
 0x38e   : > { %v2044_v2 = vpop.f32.mrf.mxu3  ;;  %v2959_v7 = vsel %vm2887_vm10, %v2749_v18, %v2923_v14  ;;  %v10482_v26 = vsel %vm4591_vm7, %v4633_v29, %v4635_v39  ;;  %v7678_v29 = vld [vmem:[%s7943_s26 + $0xc8] sm:$0xff]  ;;  %vm2643_vm5 = vmand %vm2571_vm1, %vm2607_vm4  ;;  %4316 = vmatpush.msrb.mxu0 %v7379_v36 }
 0x38f   : > { %13509 = vst [vmem:[#allocation78_spill] sm:$0xff] %v10482_v26  ;;  %v2292_v46 = vadd.f32 %v2291_v37, %v2167_v44  ;;  %v3053_v57 = vrot.slane %v2959_v7, 3  ;;  %v3160_v48 = vrot.slane %v2959_v7, 6  ;;  %v2415_v18 = vrot.slane %v7678_v29, 2 }
 0x390   : > { %v2045_v41 = vadd.f32 %v9921_v60, %v2044_v2 }
 0x391   : > { %3308 = vmatmul.f32.gmra.mxu2 %v2959_v7  ;;  %v2496_v47 = vadd.f32 %v2414_v40, %v2292_v46  ;;  %v10490_v52 = vsel %vm3009_vm13, %v3051_v53, %v3053_v57  ;;  %v10493_v19 = vsel %vm3116_vm14, %v3158_v9, %v3160_v48  ;;  %v10497_v37 = vpop.f32.mrf.mxu2  ;;  %v7363_v53 = vld [vmem:[%s13145_s3 + $0x1d8] sm:$0xff]  ;;  %v2416_v2 = vsel %vm817_vm3, %v2413_v50, %v2415_v18 }
 0x392   : > { %13510 = vst [vmem:[#allocation79_spill] sm:$0xff] %v10493_v19  ;;  %4194 = vmatpush.msrb.mxu3 %v7363_v53 }
 0x393   : > { %v2750_v46 = vsel %vm2642_vm15, %v2496_v47, 0.0  ;;  %v2294_v44 = vpop.f32.mrf.mxu1 }
 0x394   : > { %v2169_v14 = vpop.f32.mrf.mxu0  ;;  %vm2888_vm12 = vcmp.ge.f32.partialorder %v2750_v46, 0.0  ;;  %v2924_v40 = vmul.f32 0.1, %v2750_v46  ;;  %v4637_v9 = vrot.slane %v2750_v46, 4 }
 0x395   : > { %v2170_v7 = vadd.f32 %v2169_v14, %v2045_v41  ;;  %v2536_v41 = vadd.s32 %v8961_v5, %v9218_v43  ;;  %3382 = vmatmul.f32.gmra.mxu3 %v9728_v45  ;;  %v2537_v43 = vadd.s32 %v8961_v5, %v9307_v15 }
 0x396   : > { %v2047_v54 = vpop.f32.mrf.mxu3  ;;  %v2960_v29 = vsel %vm2888_vm12, %v2750_v46, %v2924_v40  ;;  %v10505_v55 = vsel %vm4591_vm7, %v4635_v39, %v4637_v9  ;;  %v7679_v39 = vld [vmem:[%s7943_s26 + $0xd0] sm:$0xff] }
 0x397   : > { %13511 = vst [vmem:[#allocation80_spill] sm:$0xff] %v10505_v55  ;;  %v2295_v47 = vadd.f32 %v2294_v44, %v2170_v7  ;;  %v3055_v26 = vrot.slane %v2960_v29, 3  ;;  %v3162_v4 = vrot.slane %v2960_v29, 6  ;;  %v2417_v14 = vrot.slane %v7679_v39, 2 }
 0x398   : > { %v2048_v44 = vadd.f32 %v9921_v60, %v2047_v54  ;;  %vm2572_vm0 = vcmp.ge.s32.totalorder %v2536_v41, 0  ;;  %vm2608_vm8 = vcmp.lt.s32.totalorder %v2536_v41, 1000  ;;  %vm2573_vm9 = vcmp.ge.s32.totalorder %v2537_v43, 0 }
 0x399   : > { %3311 = vmatmul.f32.gmra.mxu2 %v2960_v29  ;;  %v2497_v19 = vadd.f32 %v2416_v2, %v2295_v47  ;;  %v10513_v50 = vsel %vm3009_vm13, %v3053_v57, %v3055_v26  ;;  %v10516_v46 = vsel %vm3116_vm14, %v3160_v48, %v3162_v4  ;;  %v10520_v40 = vpop.f32.mrf.mxu2  ;;  %v2418_v48 = vsel %vm817_vm3, %v2415_v18, %v2417_v14  ;;  %vm2644_vm10 = vmand %vm2572_vm0, %vm2608_vm8  ;;  %v7680_v18 = vld [vmem:[%s7943_s26 + $0xd8] sm:$0xff] }
 0x39a   : > { %13512 = vst [vmem:[#allocation81_spill] sm:$0xff] %v10516_v46  ;;  %vm2609_vm15 = vcmp.lt.s32.totalorder %v2537_v43, 1000  ;;  %v7362_v43 = vld [vmem:[%s13145_s3 + $0x1d0] sm:$0xff] }
 0x39b   : > { %v2751_v53 = vsel %vm2643_vm5, %v2497_v19, 0.0  ;;  %v2297_v2 = vpop.f32.mrf.mxu1  ;;  %vm2645_vm12 = vmand %vm2573_vm9, %vm2609_vm15  ;;  %4195 = vmatpush.msrb.mxu3 %v7362_v43 }
 0x39c   : > { %v2172_v7 = vpop.f32.mrf.mxu0  ;;  %vm2889_vm6 = vcmp.ge.f32.partialorder %v2751_v53, 0.0  ;;  %v2925_v29 = vmul.f32 0.1, %v2751_v53  ;;  %v4639_v47 = vrot.slane %v2751_v53, 4 }
 0x39d   : > { %v2173_v57 = vadd.f32 %v2172_v7, %v2048_v44  ;;  %3385 = vmatmul.f32.gmra.mxu3 %v9800_v30 }
 0x39e   : > { %v2050_v39 = vpop.f32.mrf.mxu3  ;;  %v2961_v36 = vsel %vm2889_vm6, %v2751_v53, %v2925_v29  ;;  %v10525_v60 = vsel %vm4591_vm7, %v4637_v9, %v4639_v47  ;;  %v2419_v53 = vrot.slane %v7680_v18, 2  ;;  %v10539_v9 = vld [vmem:[%s13146_s4] ss:$0 sm:$0xff] }
 0x39f   : > { %13513 = vst [vmem:[#allocation82_spill] sm:$0xff] %v10525_v60  ;;  %v2298_v54 = vadd.f32 %v2297_v2, %v2173_v57  ;;  %v3057_v55 = vrot.slane %v2961_v36, 3  ;;  %v3164_v45 = vrot.slane %v2961_v36, 6  ;;  %v2051_v7 = vadd.f32 %v10539_v9, %v2050_v39 }
 0x3a0   : > { %v2420_v39 = vsel %vm817_vm3, %v2417_v14, %v2419_v53  ;;  %v7378_v14 = vld [vmem:[%s13145_s3 + $0x250] sm:$0xff] }
 0x3a1   : > { %3314 = vmatmul.f32.gmra.mxu2 %v2961_v36  ;;  %v2498_v19 = vadd.f32 %v2418_v48, %v2298_v54  ;;  %v10530_v44 = vsel %vm3009_vm13, %v3055_v26, %v3057_v55  ;;  %v10533_v41 = vsel %vm3116_vm14, %v3162_v4, %v3164_v45  ;;  %v10542_v2 = vpop.f32.mrf.mxu2  ;;  %v7338_v4 = vld [vmem:[%s13143_s1 + $0x290] sm:$0xff]  ;;  %4317 = vmatpush.msrb.mxu0 %v7378_v14 }
 0x3a2   : > { %13514 = vst [vmem:[#allocation83_spill] sm:$0xff] %v10533_v41  ;;  %3483 = vmatpush.msra.mxu2 %v7338_v4 }
 0x3a3   : > { %v2752_v29 = vsel %vm2644_vm10, %v2498_v19, 0.0  ;;  %v2300_v26 = vpop.f32.mrf.mxu1 }
 0x3a4   : > { %v2175_v57 = vpop.f32.mrf.mxu0  ;;  %vm2890_vm11 = vcmp.ge.f32.partialorder %v2752_v29, 0.0  ;;  %v2926_v48 = vmul.f32 0.1, %v2752_v29  ;;  %v4641_v36 = vrot.slane %v2752_v29, 4 }
 0x3a5   : > { %v2176_v54 = vadd.f32 %v2175_v57, %v2051_v7  ;;  %v2538_v7 = vadd.s32 %v8961_v5, %v9396_v63  ;;  %3388 = vmatmul.f32.gmra.mxu3 %v9892_v24 }
 0x3a6   : > { %v2053_v18 = vpop.f32.mrf.mxu3  ;;  %v2962_v60 = vsel %vm2890_vm11, %v2752_v29, %v2926_v48  ;;  %v10550_v30 = vsel %vm4591_vm7, %v4639_v47, %v4641_v36 }
 0x3a7   : > { %13515 = vst [vmem:[#allocation84_spill] sm:$0xff] %v10550_v30  ;;  %v2301_v19 = vadd.f32 %v2300_v26, %v2176_v54  ;;  %v3059_v15 = vrot.slane %v2962_v60, 3  ;;  %v3166_v41 = vrot.slane %v2962_v60, 6  ;;  %v2054_v26 = vadd.f32 %v10539_v9, %v2053_v18 }
 0x3a8   : > { %vm2574_vm4 = vcmp.ge.s32.totalorder %v2538_v7, 0  ;;  %vm2610_vm5 = vcmp.lt.s32.totalorder %v2538_v7, 1000 }
 0x3a9   : > { %3317 = vmatmul.f32.gmra.mxu2 %v2962_v60  ;;  %v2499_v46 = vadd.f32 %v2420_v39, %v2301_v19  ;;  %v10561_v47 = vsel %vm3009_vm13, %v3057_v55, %v3059_v15  ;;  %v10564_v29 = vsel %vm3116_vm14, %v3164_v45, %v3166_v41  ;;  %v7682_v60 = vld [vmem:[%s7943_s26 + $0xe0] sm:$0xff]  ;;  %v10568_v48 = vpop.f32.mrf.mxu2  ;;  %vm2646_vm6 = vmand %vm2574_vm4, %vm2610_vm5 }
 0x3aa   : > { %13516 = vst [vmem:[#allocation85_spill] sm:$0xff] %v10564_v29  ;;  %v2421_v57 = vrot.slane %v7682_v60, 2  ;;  %v2539_v29 = vadd.s32 %v8961_v5, %v9482_v16 }
 0x3ab   : > { %v2753_v4 = vsel %vm2645_vm12, %v2499_v46, 0.0  ;;  %v2303_v39 = vpop.f32.mrf.mxu1 }
 0x3ac   : > { %v2178_v54 = vpop.f32.mrf.mxu0  ;;  %vm2891_vm1 = vcmp.ge.f32.partialorder %v2753_v4, 0.0  ;;  %v2927_v19 = vmul.f32 0.1, %v2753_v4  ;;  %v4643_v55 = vrot.slane %v2753_v4, 4  ;;  %v2422_v45 = vsel %vm817_vm3, %v2419_v53, %v2421_v57  ;;  %v7683_v53 = vld [vmem:[%s7943_s26 + $0xe8] sm:$0xff] }
 0x3ad   : > { %v2179_v30 = vadd.f32 %v2178_v54, %v2054_v26  ;;  %3391 = vmatmul.f32.gmra.mxu3 %v9973_v13  ;;  %vm2575_vm8 = vcmp.ge.s32.totalorder %v2539_v29, 0  ;;  %vm2611_vm10 = vcmp.lt.s32.totalorder %v2539_v29, 1000  ;;  %v7337_v29 = vld [vmem:[%s13143_s1 + $0x288] sm:$0xff] }
 0x3ae   : > { %v2056_v43 = vpop.f32.mrf.mxu3  ;;  %v2963_v14 = vsel %vm2891_vm1, %v2753_v4, %v2927_v19  ;;  %v10573_v18 = vsel %vm4591_vm7, %v4641_v36, %v4643_v55  ;;  %v2423_v4 = vrot.slane %v7683_v53, 2  ;;  %vm2647_vm11 = vmand %vm2575_vm8, %vm2611_vm10  ;;  %3484 = vmatpush.msra.mxu2 %v7337_v29 }
 0x3af   : > { %13517 = vst [vmem:[#allocation86_spill] sm:$0xff] %v10573_v18  ;;  %v2304_v60 = vadd.f32 %v2303_v39, %v2179_v30  ;;  %v3061_v63 = vrot.slane %v2963_v14, 3  ;;  %v3168_v24 = vrot.slane %v2963_v14, 6  ;;  %v2057_v36 = vadd.f32 %v10539_v9, %v2056_v43 }
 0x3b1   : > { %3320 = vmatmul.f32.gmra.mxu2 %v2963_v14  ;;  %v2500_v46 = vadd.f32 %v2422_v45, %v2304_v60  ;;  %v10578_v26 = vsel %vm3009_vm13, %v3059_v15, %v3061_v63  ;;  %v10581_v7 = vsel %vm3116_vm14, %v3166_v41, %v3168_v24  ;;  %v10585_v54 = vpop.f32.mrf.mxu2  ;;  %v2424_v15 = vsel %vm817_vm3, %v2421_v57, %v2423_v4  ;;  %v7361_v57 = vld [vmem:[%s13145_s3 + $0x1c8] sm:$0xff] }
 0x3b2   : > { %13518 = vst [vmem:[#allocation87_spill] sm:$0xff] %v10581_v7  ;;  %v2540_v7 = vadd.s32 %v8961_v5, %v9574_v51  ;;  %4196 = vmatpush.msrb.mxu3 %v7361_v57 }
 0x3b3   : > { %v2754_v30 = vsel %vm2646_vm6, %v2500_v46, 0.0  ;;  %v2306_v19 = vpop.f32.mrf.mxu1 }
 0x3b4   : > { %v2181_v39 = vpop.f32.mrf.mxu0  ;;  %vm2892_vm0 = vcmp.ge.f32.partialorder %v2754_v30, 0.0  ;;  %v2928_v45 = vmul.f32 0.1, %v2754_v30  ;;  %v4645_v14 = vrot.slane %v2754_v30, 4  ;;  %vm2576_vm15 = vcmp.ge.s32.totalorder %v2540_v7, 0 }
 0x3b5   : > { %v2182_v60 = vadd.f32 %v2181_v39, %v2057_v36  ;;  %3394 = vmatmul.f32.gmra.mxu3 %v10051_v59  ;;  %vm2612_vm12 = vcmp.lt.s32.totalorder %v2540_v7, 1000 }
 0x3b6   : > { %v2059_v41 = vpop.f32.mrf.mxu3  ;;  %v2964_v53 = vsel %vm2892_vm0, %v2754_v30, %v2928_v45  ;;  %v10590_v43 = vsel %vm4591_vm7, %v4643_v55, %v4645_v14  ;;  %v7377_v55 = vld [vmem:[%s13145_s3 + $0x248] sm:$0xff]  ;;  %v7684_v30 = vld [vmem:[%s7943_s26 + $0xf0] sm:$0xff]  ;;  %vm2648_vm1 = vmand %vm2576_vm15, %vm2612_vm12 }
 0x3b7   : > { %13519 = vst [vmem:[#allocation88_spill] sm:$0xff] %v10590_v43  ;;  %v2307_v18 = vadd.f32 %v2306_v19, %v2182_v60  ;;  %v3063_v16 = vrot.slane %v2964_v53, 3  ;;  %v3170_v13 = vrot.slane %v2964_v53, 6  ;;  %v2425_v39 = vrot.slane %v7684_v30, 2  ;;  %4318 = vmatpush.msrb.mxu0 %v7377_v55 }
 0x3b8   : > { %v2060_v19 = vadd.f32 %v10539_v9, %v2059_v41 }
 0x3b9   : > { %3323 = vmatmul.f32.gmra.mxu2 %v2964_v53  ;;  %v2501_v46 = vadd.f32 %v2424_v15, %v2307_v18  ;;  %v10604_v36 = vsel %vm3009_vm13, %v3061_v63, %v3063_v16  ;;  %v10607_v18 = vsel %vm3116_vm14, %v3168_v24, %v3170_v13  ;;  %v10611_v45 = vpop.f32.mrf.mxu2  ;;  %v2426_v24 = vsel %vm817_vm3, %v2423_v4, %v2425_v39  ;;  %v7685_v4 = vld [vmem:[%s7943_s26 + $0xf8] sm:$0xff] }
 0x3ba   : > { %13520 = vst [vmem:[#allocation89_spill] sm:$0xff] %v10607_v18  ;;  %v2541_v18 = vadd.s32 %v8961_v5, %v9658_v58 }
 0x3bb   : > { %v2755_v60 = vsel %vm2647_vm11, %v2501_v46, 0.0  ;;  %v2309_v53 = vpop.f32.mrf.mxu1 }
 0x3bc   : > { %v2184_v15 = vpop.f32.mrf.mxu0  ;;  %vm2893_vm9 = vcmp.ge.f32.partialorder %v2755_v60, 0.0  ;;  %v2929_v63 = vmul.f32 0.1, %v2755_v60  ;;  %v4647_v43 = vrot.slane %v2755_v60, 4  ;;  %vm2577_vm5 = vcmp.ge.s32.totalorder %v2541_v18, 0 }
 0x3bd   : > { %v2185_v51 = vadd.f32 %v2184_v15, %v2060_v19  ;;  %3397 = vmatmul.f32.gmra.mxu3 %v10129_v22  ;;  %vm2613_vm6 = vcmp.lt.s32.totalorder %v2541_v18, 1000  ;;  %v7336_v18 = vld [vmem:[%s13143_s1 + $0x280] sm:$0xff] }
 0x3be   : > { %v2062_v29 = vpop.f32.mrf.mxu3  ;;  %v2965_v57 = vsel %vm2893_vm9, %v2755_v60, %v2929_v63  ;;  %v10616_v41 = vsel %vm4591_vm7, %v4645_v14, %v4647_v43  ;;  %v2427_v60 = vrot.slane %v7685_v4, 2  ;;  %vm2649_vm0 = vmand %vm2577_vm5, %vm2613_vm6  ;;  %3485 = vmatpush.msra.mxu2 %v7336_v18 }
 0x3bf   : > { %13521 = vst [vmem:[#allocation90_spill] sm:$0xff] %v10616_v41  ;;  %v2310_v30 = vadd.f32 %v2309_v53, %v2185_v51  ;;  %v3065_v59 = vrot.slane %v2965_v57, 3  ;;  %v3172_v46 = vrot.slane %v2965_v57, 6  ;;  %v2063_v14 = vadd.f32 %v10539_v9, %v2062_v29 }
 0x3c1   : > { %3326 = vmatmul.f32.gmra.mxu2 %v2965_v57  ;;  %v2502_v55 = vadd.f32 %v2426_v24, %v2310_v30  ;;  %v10621_v19 = vsel %vm3009_vm13, %v3063_v16, %v3065_v59  ;;  %v10624_v7 = vsel %vm3116_vm14, %v3170_v13, %v3172_v46  ;;  %v2428_v16 = vsel %vm817_vm3, %v2425_v39, %v2427_v60  ;;  %v7360_v39 = vld [vmem:[%s13145_s3 + $0x1c0] sm:$0xff] }
 0x3c2   : > { %13522 = vst [vmem:[#allocation91_spill] sm:$0xff] %v10624_v7  ;;  %v10628_v15 = vpop.f32.mrf.mxu2  ;;  %v2542_v7 = vadd.s32 %v8961_v5, %v9820_v62  ;;  %4197 = vmatpush.msrb.mxu3 %v7360_v39 }
 0x3c3   : > { %v2756_v51 = vsel %vm2648_vm1, %v2502_v55, 0.0  ;;  %v2312_v63 = vpop.f32.mrf.mxu1 }
 0x3c4   : > { %v2187_v53 = vpop.f32.mrf.mxu0  ;;  %vm2894_vm4 = vcmp.ge.f32.partialorder %v2756_v51, 0.0  ;;  %v2930_v24 = vmul.f32 0.1, %v2756_v51  ;;  %v4649_v57 = vrot.slane %v2756_v51, 4  ;;  %vm2578_vm10 = vcmp.ge.s32.totalorder %v2542_v7, 0 }
 0x3c5   : > { %v2188_v30 = vadd.f32 %v2187_v53, %v2063_v14  ;;  %3400 = vmatmul.f32.gmra.mxu3 %v10196_v42  ;;  %vm2614_vm11 = vcmp.lt.s32.totalorder %v2542_v7, 1000 }
 0x3c6   : > { %v2065_v13 = vpop.f32.mrf.mxu3  ;;  %v2966_v4 = vsel %vm2894_vm4, %v2756_v51, %v2930_v24  ;;  %v10633_v29 = vsel %vm4591_vm7, %v4647_v43, %v4649_v57  ;;  %v7686_v51 = vld [vmem:[%s7943_s26 + $0x100] sm:$0xff]  ;;  %vm2650_vm9 = vmand %vm2578_vm10, %vm2614_vm11 }
 0x3c7   : > { %13523 = vst [vmem:[#allocation92_spill] sm:$0xff] %v10633_v29  ;;  %v2313_v41 = vadd.f32 %v2312_v63, %v2188_v30  ;;  %v3067_v58 = vrot.slane %v2966_v4, 3  ;;  %v3174_v22 = vrot.slane %v2966_v4, 6  ;;  %v2429_v53 = vrot.slane %v7686_v51, 2 }
 0x3c9   : > { %3329 = vmatmul.f32.gmra.mxu2 %v2966_v4  ;;  %v2503_v55 = vadd.f32 %v2428_v16, %v2313_v41  ;;  %v10644_v43 = vsel %vm3009_vm13, %v3065_v59, %v3067_v58  ;;  %v10647_v14 = vsel %vm3116_vm14, %v3172_v46, %v3174_v22  ;;  %v2066_v41 = vadd.f32 %v10539_v9, %v2065_v13  ;;  %v7376_v59 = vld [vmem:[%s13145_s3 + $0x240] sm:$0xff]  ;;  %v7399_v46 = vld [vmem:[%s13145_s3 + $0x2f8] sm:$0xff] }
 0x3ca   : > { %13524 = vst [vmem:[#allocation93_spill] sm:$0xff] %v10647_v14  ;;  %4319 = vmatpush.msrb.mxu0 %v7376_v59  ;;  %4434 = vmatpush.msra.mxu1 %v7399_v46  ;;  %v2430_v42 = vsel %vm817_vm3, %v2427_v60, %v2429_v53  ;;  %v7687_v60 = vld [vmem:[%s7943_s26 + $0x108] sm:$0xff] }
 0x3cb   : > { %v10651_v63 = vpop.f32.mrf.mxu2  ;;  %v2757_v24 = vsel %vm2649_vm0, %v2503_v55, 0.0 }
 0x3cc   : > { %v2190_v30 = vpop.f32.mrf.mxu0  ;;  %v2315_v16 = vpop.f32.mrf.mxu1  ;;  %vm2895_vm8 = vcmp.ge.f32.partialorder %v2757_v24, 0.0  ;;  %v2931_v4 = vmul.f32 0.1, %v2757_v24  ;;  %v4651_v18 = vrot.slane %v2757_v24, 4 }
 0x3cd   : > { %v2191_v39 = vadd.f32 %v2190_v30, %v2066_v41  ;;  %v2543_v41 = vadd.s32 %v8961_v5, %v9881_v1  ;;  %3403 = vmatmul.f32.gmra.mxu3 %v10261_v3 }
 0x3ce   : > { %v2068_v13 = vpop.f32.mrf.mxu3  ;;  %v2967_v55 = vsel %vm2895_vm8, %v2757_v24, %v2931_v4  ;;  %v10662_v51 = vsel %vm4591_vm7, %v4649_v57, %v4651_v18  ;;  %v2431_v24 = vrot.slane %v7687_v60, 2 }
 0x3cf   : > { %13525 = vst [vmem:[#allocation94_spill] sm:$0xff] %v10662_v51  ;;  %v2316_v29 = vadd.f32 %v2315_v16, %v2191_v39  ;;  %v3069_v62 = vrot.slane %v2967_v55, 3  ;;  %v3176_v14 = vrot.slane %v2967_v55, 6  ;;  %v2069_v57 = vadd.f32 %v10539_v9, %v2068_v13 }
 0x3d0   : > { %vm2579_vm12 = vcmp.ge.s32.totalorder %v2543_v41, 0  ;;  %vm2615_vm1 = vcmp.lt.s32.totalorder %v2543_v41, 1000  ;;  %v2544_v41 = vadd.s32 %v8961_v5, %v9931_v11 }
 0x3d1   : > { %3332 = vmatmul.f32.gmra.mxu2 %v2967_v55  ;;  %v2504_v31 = vadd.f32 %v2430_v42, %v2316_v29  ;;  %v10667_v7 = vsel %vm3009_vm13, %v3067_v58, %v3069_v62  ;;  %v10670_v30 = vsel %vm3116_vm14, %v3174_v22, %v3176_v14  ;;  %v2432_v58 = vsel %vm817_vm3, %v2429_v53, %v2431_v24  ;;  %vm2651_vm4 = vmand %vm2579_vm12, %vm2615_vm1 }
 0x3d2   : > { %13526 = vst [vmem:[#allocation95_spill] sm:$0xff] %v10670_v30  ;;  %vm2580_vm6 = vcmp.ge.s32.totalorder %v2544_v41, 0  ;;  %vm2616_vm0 = vcmp.lt.s32.totalorder %v2544_v41, 1000 }
 0x3d3   : > { %v2758_v16 = vsel %vm2650_vm9, %v2504_v31, 0.0  ;;  %v7359_v31 = vld [vmem:[%s13145_s3 + $0x1b8] sm:$0xff]  ;;  %vm2652_vm8 = vmand %vm2580_vm6, %vm2616_vm0 }
 0x3d4   : > { %v10674_v4 = vpop.f32.mrf.mxu2  ;;  %v2193_v59 = vpop.f32.mrf.mxu0  ;;  %vm2896_vm15 = vcmp.ge.f32.partialorder %v2758_v16, 0.0  ;;  %v2932_v46 = vmul.f32 0.1, %v2758_v16  ;;  %v4653_v39 = vrot.slane %v2758_v16, 4  ;;  %4198 = vmatpush.msrb.mxu3 %v7359_v31 }
 0x3d5   : > { %v2318_v29 = vpop.f32.mrf.mxu1  ;;  %v2194_v42 = vadd.f32 %v2193_v59, %v2069_v57  ;;  %3406 = vmatmul.f32.gmra.mxu3 %v10308_v61 }
 0x3d6   : > { %v2071_v22 = vpop.f32.mrf.mxu3  ;;  %v2968_v55 = vsel %vm2896_vm15, %v2758_v16, %v2932_v46  ;;  %v10679_v13 = vsel %vm4591_vm7, %v4651_v18, %v4653_v39  ;;  %v7688_v16 = vld [vmem:[%s7943_s26 + $0x110] sm:$0xff] }
 0x3d7   : > { %13527 = vst [vmem:[#allocation96_spill] sm:$0xff] %v10679_v13  ;;  %v2319_v60 = vadd.f32 %v2318_v29, %v2194_v42  ;;  %v3071_v51 = vrot.slane %v2968_v55, 3  ;;  %v3178_v3 = vrot.slane %v2968_v55, 6  ;;  %v2433_v59 = vrot.slane %v7688_v16, 2 }
 0x3d8   : > { %v2072_v29 = vadd.f32 %v10539_v9, %v2071_v22 }
 0x3d9   : > { %3335 = vmatmul.f32.gmra.mxu2 %v2968_v55  ;;  %v2505_v57 = vadd.f32 %v2432_v58, %v2319_v60  ;;  %v10687_v53 = vsel %vm3009_vm13, %v3069_v62, %v3071_v51  ;;  %v10690_v18 = vsel %vm3116_vm14, %v3176_v14, %v3178_v3  ;;  %v7375_v62 = vld [vmem:[%s13145_s3 + $0x238] sm:$0xff]  ;;  %v7398_v14 = vld [vmem:[%s13145_s3 + $0x2f0] sm:$0xff]  ;;  %v2434_v61 = vsel %vm817_vm3, %v2431_v24, %v2433_v59 }
 0x3da   : > { %13528 = vst [vmem:[#allocation97_spill] sm:$0xff] %v10690_v18  ;;  %4320 = vmatpush.msrb.mxu0 %v7375_v62  ;;  %4435 = vmatpush.msra.mxu1 %v7398_v14  ;;  %v7689_v24 = vld [vmem:[%s7943_s26 + $0x118] sm:$0xff] }
 0x3db   : > { %v2759_v42 = vsel %vm2651_vm4, %v2505_v57, 0.0 }
 0x3dc   : > { %v10694_v46 = vpop.f32.mrf.mxu2  ;;  %v2196_v58 = vpop.f32.mrf.mxu0  ;;  %vm2897_vm5 = vcmp.ge.f32.partialorder %v2759_v42, 0.0  ;;  %v2933_v60 = vmul.f32 0.1, %v2759_v42  ;;  %v4655_v31 = vrot.slane %v2759_v42, 4 }
 0x3dd   : > { %v2321_v55 = vpop.f32.mrf.mxu1  ;;  %v2197_v16 = vadd.f32 %v2196_v58, %v2072_v29  ;;  %v2545_v29 = vadd.s32 %v8961_v5, %v10073_v17  ;;  %3409 = vmatmul.f32.gmra.mxu3 %v10357_v56 }
 0x3de   : > { %v2074_v22 = vpop.f32.mrf.mxu3  ;;  %v2969_v57 = vsel %vm2897_vm5, %v2759_v42, %v2933_v60  ;;  %v10705_v13 = vsel %vm4591_vm7, %v4653_v39, %v4655_v31  ;;  %v2435_v42 = vrot.slane %v7689_v24, 2 }
 0x3df   : > { %13529 = vst [vmem:[#allocation98_spill] sm:$0xff] %v10705_v13  ;;  %v2322_v11 = vadd.f32 %v2321_v55, %v2197_v16  ;;  %v3073_v1 = vrot.slane %v2969_v57, 3  ;;  %v3180_v18 = vrot.slane %v2969_v57, 6  ;;  %v2075_v39 = vadd.f32 %v10539_v9, %v2074_v22 }
 0x3e0   : > { %vm2581_vm11 = vcmp.ge.s32.totalorder %v2545_v29, 0  ;;  %vm2617_vm9 = vcmp.lt.s32.totalorder %v2545_v29, 1000  ;;  %v2436_v16 = vsel %vm817_vm3, %v2433_v59, %v2435_v42  ;;  %v2546_v59 = vadd.s32 %v8961_v5, %v10144_v27  ;;  %v7358_v5 = vld [vmem:[%s13145_s3 + $0x1b0] sm:$0xff] }
 0x3e1   : > { %3338 = vmatmul.f32.gmra.mxu2 %v2969_v57  ;;  %v2506_v30 = vadd.f32 %v2434_v61, %v2322_v11  ;;  %v10710_v41 = vsel %vm3009_vm13, %v3071_v51, %v3073_v1  ;;  %v10713_v58 = vsel %vm3116_vm14, %v3178_v3, %v3180_v18  ;;  %vm2653_vm15 = vmand %vm2581_vm11, %vm2617_vm9  ;;  %4199 = vmatpush.msrb.mxu3 %v7358_v5 }
 0x3e2   : > { %vm2582_vm1 = vcmp.ge.s32.totalorder %v2546_v59, 0  ;;  %vm2618_vm4 = vcmp.lt.s32.totalorder %v2546_v59, 1000 }
 0x3e3   : > { %v10720_v55 = vsel %vm2652_vm8, %v2506_v30, 0.0  ;;  %vm2654_vm5 = vmand %vm2582_vm1, %vm2618_vm4 }
 0x3e4   : > { %v10717_v60 = vpop.f32.mrf.mxu2  ;;  %13530 = vst [vmem:[#allocation99_spill] sm:$0xff] %v10720_v55  ;;  %v2199_v11 = vpop.f32.mrf.mxu0  ;;  %vm2898_vm10 = vcmp.ge.f32.partialorder %v10720_v55, 0.0  ;;  %v2934_v51 = vmul.f32 0.1, %v10720_v55  ;;  %v13229_v14 = vrot.slane %v10720_v55, 4 }
 0x3e5   : > { %v2324_v62 = vpop.f32.mrf.mxu1  ;;  %v2200_v3 = vadd.f32 %v2199_v11, %v2075_v39  ;;  %v10735_v39 = vld [vmem:[%s13144_s2 + $0x1] ss:$0 sm:$0xff]  ;;  %3412 = vmatmul.f32.gmra.mxu3 %v10382_v21 }
 0x3e6   : > { %v2077_v61 = vpop.f32.mrf.mxu3  ;;  %v2970_v22 = vsel %vm2898_vm10, %v10720_v55, %v2934_v51  ;;  %v10730_v56 = vsel %vm4591_vm7, %v4655_v31, %v13229_v14  ;;  %v7374_v55 = vld [vmem:[%s13145_s3 + $0x230] sm:$0xff] }
 0x3e7   : > { %13531 = vst [vmem:[#allocation100_spill] sm:$0xff] %v10730_v56  ;;  %v2325_v30 = vadd.f32 %v2324_v62, %v2200_v3  ;;  %v3075_v57 = vrot.slane %v2970_v22, 3  ;;  %v3182_v24 = vrot.slane %v2970_v22, 6  ;;  %v2078_v62 = vadd.f32 %v10539_v9, %v2077_v61  ;;  %4321 = vmatpush.msrb.mxu0 %v7374_v55 }
 0x3e8   : > { %v3247_v55 = vadd.f32 %v10735_v39, %v10389_v8  ;;  %v7357_v8 = vld [vmem:[%s13145_s3 + $0x1a8] sm:$0xff] }
 0x3e9   : > { %3341 = vmatmul.f32.gmra.mxu2 %v2970_v22  ;;  %v2507_v29 = vadd.f32 %v2436_v16, %v2325_v30  ;;  %v10740_v11 = vsel %vm3009_vm13, %v3073_v1, %v3075_v57  ;;  %v10743_v31 = vsel %vm3116_vm14, %v3180_v18, %v3182_v24  ;;  %v3244_v1 = vadd.f32 %v10735_v39, %v10365_v35  ;;  %v7397_v35 = vld [vmem:[%s13145_s3 + $0x2e8] sm:$0xff] }
 0x3ea   : > { %4436 = vmatpush.msra.mxu1 %v7397_v35  ;;  %4200 = vmatpush.msrb.mxu3 %v7357_v8 }
 0x3eb   : > { %v10749_v3 = vsel %vm2653_vm15, %v2507_v29, 0.0 }
 0x3ec   : > { %v10746_v51 = vpop.f32.mrf.mxu2  ;;  %13532 = vst [vmem:[#allocation101_spill] sm:$0xff] %v10749_v3  ;;  %v2202_v22 = vpop.f32.mrf.mxu0  ;;  %vm2899_vm12 = vcmp.ge.f32.partialorder %v10749_v3, 0.0  ;;  %v2935_v16 = vmul.f32 0.1, %v10749_v3 }
 0x3ed   : > { %v2203_v27 = vadd.f32 %v2202_v22, %v2078_v62  ;;  %v2327_v9 = vpop.f32.mrf.mxu1  ;;  %3415 = vmatmul.f32.gmra.mxu3 %v10410_v38 }
 0x3ee   : > { %v3365_v21 = vpop.f32.mrf.mxu3  ;;  %v2971_v18 = vsel %vm2899_vm12, %v10749_v3, %v2935_v16 }
 0x3ef   : > { %v2328_v61 = vadd.f32 %v2327_v9, %v2203_v27  ;;  %v10759_v30 = vadd.f32 %v3365_v21, %v3244_v1  ;;  %v3077_v29 = vrot.slane %v2971_v18, 3  ;;  %v3184_v14 = vrot.slane %v2971_v18, 6 }
 0x3f1   : > { %3344 = vmatmul.f32.gmra.mxu2 %v2971_v18  ;;  %v2508_v59 = vadd.f32 %v2435_v42, %v2328_v61  ;;  %v10768_v62 = vsel %vm3009_vm13, %v3075_v57, %v3077_v29  ;;  %v10771_v22 = vsel %vm3116_vm14, %v3182_v24, %v3184_v14  ;;  %v3250_v61 = vadd.f32 %v10735_v39, %v10417_v23 }
 0x3f2   : > { %v3253_v23 = vadd.f32 %v10735_v39, %v10434_v28  ;;  %v13535_v28 = vld [vmem:[#allocation51_spill] sm:$0xff] }
 0x3f3   : > { %v2762_v16 = vsel %vm2654_vm5, %v2508_v59, 0.0 }
 0x3f4   : > { %v10773_v5 = vpop.f32.mrf.mxu2  ;;  %vm2900_vm6 = vcmp.ge.f32.partialorder %v2762_v16, 0.0  ;;  %v2936_v1 = vmul.f32 0.1, %v2762_v16 }
 0x3f5   : > { %3418 = vmatmul.f32.gmra.mxu3 %v10427_v10  ;;  %v7396_v10 = vld [vmem:[%s13145_s3 + $0x2e0] sm:$0xff] }
 0x3f6   : > { %v3368_v27 = vpop.f32.mrf.mxu3  ;;  %v2972_v9 = vsel %vm2900_vm6, %v2762_v16, %v2936_v1  ;;  %4437 = vmatpush.msra.mxu1 %v7396_v10 }
 0x3f7   : > { %v10778_v42 = vadd.f32 %v3368_v27, %v3247_v55  ;;  %v3079_v21 = vrot.slane %v2972_v9, 3  ;;  %v3186_v57 = vrot.slane %v2972_v9, 6  ;;  %v13534_v55 = vld [vmem:[#allocation48_spill] sm:$0xff]  ;;  %v7356_v9 = vld [vmem:[%s13145_s3 + $0x1a0] sm:$0xff] }
 0x3f8   : > { %4201 = vmatpush.msrb.mxu3 %v7356_v9 }
 0x3f9   : > { %3486 = vmatmul.f32.vlgmr.msra.gmra.mxu2 %v9203_v49  ;;  %v10782_v24 = vsel %vm3009_vm13, %v3077_v29, %v3079_v21  ;;  %v10785_v18 = vsel %vm3116_vm14, %v3184_v14, %v3186_v57  ;;  %v13533_v29 = vld [vmem:[#allocation45_spill] sm:$0xff]  ;;  %v7373_v14 = vld [vmem:[%s13145_s3 + $0x228] sm:$0xff]  ;;  %v3256_v21 = vadd.f32 %v10735_v39, %v10457_v32  ;;  %v3259_v32 = vadd.f32 %v10735_v39, %v10477_v34  ;;  %v7355_v34 = vld [vmem:[%s13145_s3 + $0x198] sm:$0xff] }
 0x3fa   : > { %4322 = vmatpush.msrb.mxu0 %v7373_v14  ;;  %v13536_v14 = vld [vmem:[#allocation54_spill] sm:$0xff]  ;;  %4202 = vmatpush.msrb.mxu3 %v7355_v34 }
 0x3fc   : > { %v10787_v38 = vpop.f32.mrf.mxu2 }
 0x3fd   : > { %3421 = vmatmul.f32.gmra.mxu3 %v10450_v12 }
 0x3fe   : > { %v3371_v35 = vpop.f32.mrf.mxu3 }
 0x3ff   : > { %v10795_v49 = vadd.f32 %v3371_v35, %v3250_v61  ;;  %v7395_v61 = vld [vmem:[%s13145_s3 + $0x2d8] sm:$0xff] }
 0x400   : > { %4438 = vmatpush.msra.mxu1 %v7395_v61 }
 0x401   : > { %3489 = vmatmul.f32.gmra.mxu2 %v13533_v29 }
 0x404   : > { %v10804_v59 = vpop.f32.mrf.mxu2 }
 0x405   : > { %3424 = vmatmul.f32.gmra.mxu3 %v10470_v0  ;;  %v7372_v0 = vld [vmem:[%s13145_s3 + $0x220] sm:$0xff] }
 0x406   : > { %v3374_v16 = vpop.f32.mrf.mxu3  ;;  %4323 = vmatpush.msrb.mxu0 %v7372_v0  ;;  %v13538_v0 = vld [vmem:[#allocation60_spill] sm:$0xff] }
 0x407   : > { %v10809_v1 = vadd.f32 %v3374_v16, %v3253_v23 }
 0x409   : > { %3492 = vmatmul.f32.gmra.mxu2 %v13534_v55  ;;  %v13537_v55 = vld [vmem:[#allocation57_spill] sm:$0xff] }
 0x40c   : > { %v10812_v27 = vpop.f32.mrf.mxu2 }
 0x40d   : > { %3427 = vmatmul.f32.gmra.mxu3 %v10490_v52  ;;  %v3262_v52 = vadd.f32 %v10735_v39, %v10497_v37  ;;  %v7394_v37 = vld [vmem:[%s13145_s3 + $0x2d0] sm:$0xff] }
 0x40e   : > { %v3377_v12 = vpop.f32.mrf.mxu3  ;;  %4439 = vmatpush.msra.mxu1 %v7394_v37 }
 0x40f   : > { %v10820_v57 = vadd.f32 %v3377_v12, %v3256_v21  ;;  %v3265_v21 = vadd.f32 %v10735_v39, %v10520_v40  ;;  %v7354_v40 = vld [vmem:[%s13145_s3 + $0x190] sm:$0xff] }
 0x410   : > { %4203 = vmatpush.msrb.mxu3 %v7354_v40  ;;  %v7369_v40 = vld [vmem:[%s13145_s3 + $0x208] sm:$0xff] }
 0x411   : > { %3495 = vmatmul.f32.gmra.mxu2 %v13535_v28 }
 0x414   : > { %v10823_v8 = vpop.f32.mrf.mxu2 }
 0x415   : > { %3430 = vmatmul.f32.gmra.mxu3 %v10513_v50  ;;  %v7371_v50 = vld [vmem:[%s13145_s3 + $0x218] sm:$0xff] }
 0x416   : > { %v3380_v35 = vpop.f32.mrf.mxu3  ;;  %4324 = vmatpush.msrb.mxu0 %v7371_v50  ;;  %v7393_v50 = vld [vmem:[%s13145_s3 + $0x2c8] sm:$0xff] }
 0x417   : > { %v10834_v29 = vadd.f32 %v3380_v35, %v3259_v32  ;;  %4440 = vmatpush.msra.mxu1 %v7393_v50 }
 0x419   : > { %3498 = vmatmul.f32.gmra.mxu2 %v13536_v14  ;;  %v13539_v14 = vld [vmem:[#allocation61_spill] sm:$0xff] }
 0x41c   : > { %v10837_v10 = vpop.f32.mrf.mxu2 }
 0x41d   : > { %3433 = vmatmul.f32.gmra.mxu3 %v10530_v44  ;;  %v3268_v44 = vadd.f32 %v10735_v39, %v10542_v2  ;;  %v7370_v2 = vld [vmem:[%s13145_s3 + $0x210] sm:$0xff] }
 0x41e   : > { %v3383_v23 = vpop.f32.mrf.mxu3  ;;  %4325 = vmatpush.msrb.mxu0 %v7370_v2 }
 0x41f   : > { %v10842_v16 = vadd.f32 %v3383_v23, %v3262_v52 }
 0x420   : > { %4326 = vmatpush.msrb.mxu0 %v7369_v40 }
 0x421   : > { %3501 = vmatmul.f32.gmra.mxu2 %v13537_v55  ;;  %v13540_v55 = vld [vmem:[#allocation64_spill] sm:$0xff] }
 0x424   : > { %v10848_v9 = vpop.f32.mrf.mxu2 }
 0x425   : > { %3436 = vmatmul.f32.gmra.mxu3 %v10561_v47  ;;  %v3271_v47 = vadd.f32 %v10735_v39, %v10568_v48  ;;  %v3274_v48 = vadd.f32 %v10735_v39, %v10585_v54  ;;  %v13542_v54 = vld [vmem:[#allocation9_spill] sm:$0xff] }
 0x426   : > { %v3386_v12 = vpop.f32.mrf.mxu3 }
 0x427   : > { %v10859_v28 = vadd.f32 %v3386_v12, %v3265_v21  ;;  %v13541_v12 = vld [vmem:[#allocation8_spill] sm:$0xff] }
 0x429   : > { %3504 = vmatmul.f32.gmra.mxu2 %v13538_v0  ;;  %v7353_v0 = vld [vmem:[%s13145_s3 + $0x188] sm:$0xff] }
 0x42a   : > { %4204 = vmatpush.msrb.mxu3 %v7353_v0 }
 0x42c   : > { %v10862_v61 = vpop.f32.mrf.mxu2 }
 0x42d   : > { %3439 = vmatmul.f32.gmra.mxu3 %v10578_v26 }
 0x42e   : > { %v3389_v32 = vpop.f32.mrf.mxu3 }
 0x42f   : > { %v10867_v35 = vadd.f32 %v3389_v32, %v3268_v44 }
 0x431   : > { %3507 = vmatmul.f32.gmra.mxu2 %v13539_v14 }
 0x434   : > { %v10873_v52 = vpop.f32.mrf.mxu2 }
 0x435   : > { %3442 = vmatmul.f32.gmra.mxu3 %v10604_v36  ;;  %v3277_v36 = vadd.f32 %v10735_v39, %v10611_v45  ;;  %v3280_v45 = vadd.f32 %v10735_v39, %v10628_v15  ;;  %v13544_v15 = vld [vmem:[#allocation67_spill] sm:$0xff] }
 0x436   : > { %v3392_v23 = vpop.f32.mrf.mxu3 }
 0x437   : > { %v10878_v34 = vadd.f32 %v3392_v23, %v3271_v47  ;;  %v7392_v47 = vld [vmem:[%s13145_s3 + $0x2c0] sm:$0xff] }
 0x438   : > { %4441 = vmatpush.msra.mxu1 %v7392_v47  ;;  %v7388_v47 = vld [vmem:[%s13145_s3 + $0x2a0] sm:$0xff] }
 0x439   : > { %3510 = vmatmul.f32.gmra.mxu2 %v13540_v55  ;;  %v13543_v55 = vld [vmem:[#allocation10_spill] sm:$0xff] }
 0x43c   : > { %v10887_v37 = vpop.f32.mrf.mxu2 }
 0x43d   : > { %3445 = vmatmul.f32.gmra.mxu3 %v10621_v19 }
 0x43e   : > { %v3395_v26 = vpop.f32.mrf.mxu3 }
 0x43f   : > { %v10892_v21 = vadd.f32 %v3395_v26, %v3274_v48  ;;  %v7352_v48 = vld [vmem:[%s13145_s3 + $0x180] sm:$0xff]  ;;  %v3283_v26 = vadd.f32 %v10735_v39, %v10651_v63 }
 0x440   : > { %4205 = vmatpush.msrb.mxu3 %v7352_v48 }
 0x441   : > { %3513 = vmatmul.f32.gmra.mxu2 %v13541_v12 }
 0x444   : > { %v10898_v44 = vpop.f32.mrf.mxu2 }
 0x445   : > { %3448 = vmatmul.f32.gmra.mxu3 %v10644_v43 }
 0x446   : > { %v3398_v32 = vpop.f32.mrf.mxu3 }
 0x447   : > { %v10903_v14 = vadd.f32 %v3398_v32, %v3277_v36  ;;  %v7391_v36 = vld [vmem:[%s13145_s3 + $0x2b8] sm:$0xff] }
 0x448   : > { %4442 = vmatpush.msra.mxu1 %v7391_v36  ;;  %v7484_v36 = vld [vmem:[%s13143_s1 + $0x478] sm:$0xff] }
 0x449   : > { %3516 = vmatmul.f32.gmra.mxu2 %v13542_v54  ;;  %v7390_v54 = vld [vmem:[%s13145_s3 + $0x2b0] sm:$0xff] }
 0x44a   : > { %4443 = vmatpush.msra.mxu1 %v7390_v54 }
 0x44c   : > { %v10912_v23 = vpop.f32.mrf.mxu2 }
 0x44d   : > { %3451 = vmatmul.f32.gmra.mxu3 %v10667_v7  ;;  %v3286_v7 = vadd.f32 %v10735_v39, %v10674_v4  ;;  %v7368_v4 = vld [vmem:[%s13145_s3 + $0x200] sm:$0xff] }
 0x44e   : > { %v3401_v19 = vpop.f32.mrf.mxu3  ;;  %4327 = vmatpush.msrb.mxu0 %v7368_v4 }
 0x44f   : > { %v10917_v2 = vadd.f32 %v3401_v19, %v3280_v45  ;;  %v7387_v45 = vld [vmem:[%s13145_s3 + $0x298] sm:$0xff] }
 0x450   : > { %5664 = vmatpush.msra.mxu0 %v7484_v36 }
 0x451   : > { %3519 = vmatmul.f32.gmra.mxu2 %v13543_v55  ;;  %v7452_v55 = vld [vmem:[%s13143_s1 + $0x378] sm:$0xff] }
 0x452   : > { %5426 = vmatpush.msrb.mxu2 %v7452_v55 }
 0x454   : > { %v10920_v50 = vpop.f32.mrf.mxu2 }
 0x455   : > { %3454 = vmatmul.f32.gmra.mxu3 %v10687_v53  ;;  %v7389_v53 = vld [vmem:[%s13145_s3 + $0x2a8] sm:$0xff] }
 0x456   : > { %v3404_v43 = vpop.f32.mrf.mxu3  ;;  %4444 = vmatpush.msra.mxu1 %v7389_v53 }
 0x457   : > { %v10928_v12 = vadd.f32 %v3404_v43, %v3283_v26  ;;  %v7385_v26 = vld [vmem:[%s13145_s3 + $0x288] sm:$0xff] }
 0x458   : > { %4445 = vmatpush.msra.mxu1 %v7388_v47  ;;  %v11002_v47 = vstv %s3697_s13 }
 0x459   : > { %3522 = vmatmul.f32.gmra.mxu2 %v13544_v15  ;;  %v7384_v15 = vld [vmem:[%s13145_s3 + $0x280] sm:$0xff] }
 0x45a   : > { %4446 = vmatpush.msra.mxu1 %v7387_v45 }
 0x45c   : > { %v10931_v0 = vpop.f32.mrf.mxu2 }
 0x45d   : > { %3457 = vmatmul.f32.gmra.mxu3 %v10710_v41  ;;  %v7468_v41 = vld [vmem:[%s13143_s1 + $0x3f8] sm:$0xff] }
 0x45e   : > { %v3407_v32 = vpop.f32.mrf.mxu3  ;;  %5545 = vmatpush.msra.mxu3 %v7468_v41 }
 0x45f   : > { %v10939_v63 = vadd.f32 %v3407_v32, %v3286_v7  ;;  %v3292_v7 = vadd.f32 %v10735_v39, %v10717_v60  ;;  %v7451_v60 = vld [vmem:[%s13143_s1 + $0x370] sm:$0xff] }
 0x460   : > { %5427 = vmatpush.msrb.mxu2 %v7451_v60  ;;  %v7450_v60 = vld [vmem:[%s13143_s1 + $0x368] sm:$0xff] }
 0x461   : > { %3525 = vmatmul.f32.gmra.mxu2 %v10264_v20  ;;  %v3289_v20 = vadd.f32 %v10735_v39, %v10694_v46  ;;  %v7386_v46 = vld [vmem:[%s13145_s3 + $0x290] sm:$0xff] }
 0x462   : > { %4447 = vmatpush.msra.mxu1 %v7386_v46  ;;  %5428 = vmatpush.msrb.mxu2 %v7450_v60 }
 0x464   : > { %v10951_v40 = vpop.f32.mrf.mxu2  ;;  %4448 = vmatpush.msra.mxu1 %v7385_v26 }
 0x465   : > { %3460 = vmatmul.f32.gmra.mxu3 %v10740_v11  ;;  %v3295_v11 = vadd.f32 %v10735_v39, %v10746_v51 }
 0x466   : > { %v3410_v19 = vpop.f32.mrf.mxu3  ;;  %4449 = vmatpush.msra.mxu1 %v7384_v15  ;;  %v7483_v15 = vld [vmem:[%s13143_s1 + $0x470] sm:$0xff] }
 0x467   : > { %v10968_v48 = vadd.f32 %v3410_v19, %v3289_v20  ;;  %v3298_v19 = vadd.f32 %v10735_v39, %v10773_v5  ;;  %5665 = vmatpush.msra.mxu0 %v7483_v15 }
 0x469   : > { %3528 = vmatmul.f32.gmra.mxu2 %v10311_v25 }
 0x46c   : > { %v10977_v43 = vpop.f32.mrf.mxu2 }
 0x46d   : > { %3463 = vmatmul.f32.gmra.mxu3 %v10768_v62  ;;  %v13545_v62 = vld [vmem:[#allocation12_spill] sm:$0xff] }
 0x46e   : > { %v3413_v25 = vpop.f32.mrf.mxu3  ;;  %v3699_v51 = vadd.s32 %v11002_v47, %v13545_v62 }
 0x46f   : > { %v10988_v32 = vadd.f32 %v3413_v25, %v3292_v7  ;;  %v3301_v25 = vadd.f32 %v10735_v39, %v10787_v38 }
 0x470   : > { %vm3734_vm13 = vcmp.ge.s32.totalorder %v3699_v51, 0  ;;  %vm3769_vm8 = vcmp.lt.s32.totalorder %v3699_v51, 1000 }
 0x471   : > { %3531 = vmatmul.f32.gmra.mxu2 %v10360_v6  ;;  %v7467_v6 = vld [vmem:[%s13143_s1 + $0x3f0] sm:$0xff]  ;;  %vm3804_vm10 = vmand %vm3734_vm13, %vm3769_vm8 }
 0x472   : > { %5546 = vmatpush.msra.mxu3 %v7467_v6 }
 0x474   : > { %v10991_v54 = vpop.f32.mrf.mxu2 }
 0x475   : > { %3466 = vmatmul.f32.gmra.mxu3 %v10782_v24  ;;  %v13547_v24 = vld [vmem:[#allocation71_spill] sm:$0xff] }
 0x476   : > { %v3416_v53 = vpop.f32.mrf.mxu3 }
 0x477   : > { %v11000_v4 = vadd.f32 %v3416_v53, %v3295_v11  ;;  %v13552_v53 = vld [vmem:[#allocation15_spill] sm:$0xff] }
 0x479   : > { %3534 = vmatmul.f32.gmra.mxu2 %v10385_v33  ;;  %v13546_v33 = vld [vmem:[#allocation13_spill] sm:$0xff] }
 0x47a   : > { %v3700_v26 = vadd.s32 %v11002_v47, %v13546_v33 }
 0x47c   : > { %v3487_v20 = vpop.f32.mrf.mxu2  ;;  %vm3735_vm11 = vcmp.ge.s32.totalorder %v3700_v26, 0  ;;  %vm3770_vm9 = vcmp.lt.s32.totalorder %v3700_v26, 1000 }
 0x47d   : > { %v3488_v45 = vadd.f32 %v3487_v20, %v10759_v30  ;;  %vm11025_vm12 = vmand %vm3735_vm11, %vm3770_vm9  ;;  %v13550_v20 = vld [vmem:[#allocation14_spill] sm:$0xff] }
 0x47e   : > { %v3419_v41 = vpop.f32.mrf.mxu3 }
 0x47f   : > { %v3627_v55 = vmul.f32 0.1, %v3488_v45  ;;  %vm3592_vm0 = vcmp.ge.f32.partialorder %v3488_v45, 0.0  ;;  %v11014_v46 = vadd.f32 %v3419_v41, %v3298_v19  ;;  %v7466_v19 = vld [vmem:[%s13143_s1 + $0x3e8] sm:$0xff] }
 0x480   : > { %5547 = vmatpush.msra.mxu3 %v7466_v19 }
 0x481   : > { %3537 = vmatmul.f32.gmra.mxu2 %v13547_v24  ;;  %v3662_v30 = vsel %vm3592_vm0, %v3488_v45, %v3627_v55  ;;  %v13551_v45 = vld [vmem:[#allocation73_spill] sm:$0xff] }
 0x482   : > { %7402 = vmatmul.msk.f32.vlgmr.msrb.gmra.mxu3 %vm3804_vm10, %v3662_v30  ;;  %v3909_v6 = vsel %vm3804_vm10, %v3662_v30, 0.0 }
 0x483   : > { %v3979_v41 = vrot.slane %v3909_v6, 1  ;;  %v4083_v26 = vrot.slane %v3909_v6, 2 }
 0x484   : > { %v3490_v5 = vpop.f32.mrf.mxu2 }
 0x485   : > { %v3491_v7 = vadd.f32 %v3490_v5, %v10778_v42  ;;  %v3701_v42 = vadd.s32 %v11002_v47, %v13550_v20 }
 0x486   : > { %v3422_v11 = vpop.f32.mrf.mxu3 }
 0x487   : > { %v3628_v36 = vmul.f32 0.1, %v3491_v7  ;;  %vm3593_vm15 = vcmp.ge.f32.partialorder %v3491_v7, 0.0  ;;  %v11032_v51 = vadd.f32 %v3422_v11, %v3301_v25  ;;  %vm3736_vm1 = vcmp.ge.s32.totalorder %v3701_v42, 0 }
 0x488   : > { %vm3771_vm4 = vcmp.lt.s32.totalorder %v3701_v42, 1000  ;;  %v3702_v42 = vadd.s32 %v11002_v47, %v13552_v53 }
 0x489   : > { %3540 = vmatmul.f32.gmra.mxu2 %v13551_v45  ;;  %v3663_v38 = vsel %vm3593_vm15, %v3491_v7, %v3628_v36  ;;  %v3304_v36 = vadd.f32 %v10735_v39, %v10804_v59  ;;  %vm3806_vm6 = vmand %vm3736_vm1, %vm3771_vm4  ;;  %v13553_v45 = vld [vmem:[#allocation75_spill] sm:$0xff] }
 0x48a   : > { %v3910_v55 = vsel %vm11025_vm12, %v3663_v38, 0.0  ;;  %7403 = vmatmul.msk.f32.gmra.mxu3 %vm11025_vm12, %v3663_v38  ;;  %v7482_v38 = vld [vmem:[%s13143_s1 + $0x468] sm:$0xff]  ;;  %vm3737_vm13 = vcmp.ge.s32.totalorder %v3702_v42, 0  ;;  %vm3772_vm0 = vcmp.lt.s32.totalorder %v3702_v42, 1000 }
 0x48b   : > { %v3980_v15 = vrot.slane %v3910_v55, 1  ;;  %v4084_v24 = vrot.slane %v3910_v55, 2  ;;  %5666 = vmatpush.msra.mxu0 %v7482_v38  ;;  %vm3807_vm10 = vmand %vm3737_vm13, %vm3772_vm0 }
 0x48c   : > { %v3493_v30 = vpop.f32.mrf.mxu2 }
 0x48d   : > { %v3494_v5 = vadd.f32 %v3493_v30, %v10795_v49  ;;  %v3981_v7 = vsel %vm709_vm2, %v3979_v41, %v3980_v15  ;;  %v4085_v25 = vsel %vm817_vm3, %v4083_v26, %v4084_v24 }
 0x48e   : > { %4328 = vmatmul.f32.vlgmr.msrb.gmra.mxu0 %v3981_v7  ;;  %4450 = vmatmul.f32.vlgmr.msra.gmra.mxu1 %v4085_v25  ;;  %v3425_v60 = vpop.f32.mrf.mxu3 }
 0x48f   : > { %v3629_v11 = vmul.f32 0.1, %v3494_v5  ;;  %vm3594_vm5 = vcmp.ge.f32.partialorder %v3494_v5, 0.0  ;;  %v11049_v6 = vadd.f32 %v3425_v60, %v3304_v36  ;;  %v13554_v60 = vld [vmem:[#allocation16_spill] sm:$0xff] }
 0x490   : > { %v3703_v42 = vadd.s32 %v11002_v47, %v13554_v60 }
 0x491   : > { %3543 = vmatmul.f32.gmra.mxu2 %v13553_v45  ;;  %v3664_v49 = vsel %vm3594_vm5, %v3494_v5, %v3629_v11  ;;  %v3307_v5 = vadd.f32 %v10735_v39, %v10812_v27  ;;  %v13555_v45 = vld [vmem:[#allocation77_spill] sm:$0xff]  ;;  %v7465_v27 = vld [vmem:[%s13143_s1 + $0x3e0] sm:$0xff] }
 0x492   : > { %v3911_v19 = vsel %vm3806_vm6, %v3664_v49, 0.0  ;;  %7404 = vmatmul.msk.f32.gmra.mxu3 %vm3806_vm6, %v3664_v49  ;;  %vm3738_vm11 = vcmp.ge.s32.totalorder %v3703_v42, 0  ;;  %vm3773_vm9 = vcmp.lt.s32.totalorder %v3703_v42, 1000 }
 0x493   : > { %v3982_v59 = vrot.slane %v3911_v19, 1  ;;  %v4086_v55 = vrot.slane %v3911_v19, 2  ;;  %5548 = vmatpush.msra.mxu3 %v7465_v27  ;;  %vm3808_vm12 = vmand %vm3738_vm11, %vm3773_vm9 }
 0x494   : > { %v3496_v41 = vpop.f32.mrf.mxu2 }
 0x495   : > { %v3497_v26 = vadd.f32 %v3496_v41, %v10809_v1  ;;  %v3983_v30 = vsel %vm709_vm2, %v3980_v15, %v3982_v59  ;;  %v4087_v7 = vsel %vm817_vm3, %v4084_v24, %v4086_v55  ;;  %v7449_v15 = vld [vmem:[%s13143_s1 + $0x360] sm:$0xff] }
 0x496   : > { %4331 = vmatmul.f32.gmra.mxu0 %v3983_v30  ;;  %4453 = vmatmul.f32.gmra.mxu1 %v4087_v7  ;;  %v3428_v36 = vpop.f32.mrf.mxu3  ;;  %v3310_v7 = vadd.f32 %v10735_v39, %v10823_v8 }
 0x497   : > { %v3630_v25 = vmul.f32 0.1, %v3497_v26  ;;  %vm3595_vm8 = vcmp.ge.f32.partialorder %v3497_v26, 0.0  ;;  %v11062_v11 = vadd.f32 %v3428_v36, %v3307_v5  ;;  %5429 = vmatpush.msrb.mxu2 %v7449_v15 }
 0x499   : > { %3546 = vmatmul.f32.gmra.mxu2 %v13555_v45  ;;  %v3665_v1 = vsel %vm3595_vm8, %v3497_v26, %v3630_v25  ;;  %v13556_v45 = vld [vmem:[#allocation17_spill] sm:$0xff] }
 0x49a   : > { %v3912_v24 = vsel %vm3807_vm10, %v3665_v1, 0.0  ;;  %7405 = vmatmul.msk.f32.gmra.mxu3 %vm3807_vm10, %v3665_v1  ;;  %v3704_v42 = vadd.s32 %v11002_v47, %v13556_v45  ;;  %v13557_v1 = vld [vmem:[#allocation79_spill] sm:$0xff] }
 0x49b   : > { %v3984_v49 = vrot.slane %v3912_v24, 1  ;;  %v4088_v38 = vrot.slane %v3912_v24, 2 }
 0x49c   : > { %v3499_v19 = vpop.f32.mrf.mxu2  ;;  %vm3739_vm1 = vcmp.ge.s32.totalorder %v3704_v42, 0  ;;  %vm3774_vm4 = vcmp.lt.s32.totalorder %v3704_v42, 1000 }
 0x49d   : > { %v3500_v41 = vadd.f32 %v3499_v19, %v10820_v57  ;;  %v3985_v26 = vsel %vm709_vm2, %v3982_v59, %v3984_v49  ;;  %v4089_v30 = vsel %vm817_vm3, %v4086_v55, %v4088_v38  ;;  %v7481_v59 = vld [vmem:[%s13143_s1 + $0x460] sm:$0xff]  ;;  %vm3809_vm6 = vmand %vm3739_vm1, %vm3774_vm4 }
 0x49e   : > { %4334 = vmatmul.f32.gmra.mxu0 %v3985_v26  ;;  %4456 = vmatmul.f32.gmra.mxu1 %v4089_v30  ;;  %v3431_v25 = vpop.f32.mrf.mxu3 }
 0x49f   : > { %v3631_v5 = vmul.f32 0.1, %v3500_v41  ;;  %vm3596_vm15 = vcmp.ge.f32.partialorder %v3500_v41, 0.0  ;;  %v11078_v36 = vadd.f32 %v3431_v25, %v3310_v7  ;;  %5667 = vmatpush.msra.mxu0 %v7481_v59  ;;  %v13558_v25 = vld [vmem:[#allocation18_spill] sm:$0xff] }
 0x4a0   : > { %v3705_v42 = vadd.s32 %v11002_v47, %v13558_v25 }
 0x4a1   : > { %3549 = vmatmul.f32.gmra.mxu2 %v13557_v1  ;;  %v3666_v57 = vsel %vm3596_vm15, %v3500_v41, %v3631_v5  ;;  %v3313_v41 = vadd.f32 %v10735_v39, %v10837_v10  ;;  %v13559_v1 = vld [vmem:[#allocation81_spill] sm:$0xff] }
 0x4a2   : > { %v3913_v55 = vsel %vm3808_vm12, %v3666_v57, 0.0  ;;  %7406 = vmatmul.msk.f32.gmra.mxu3 %vm3808_vm12, %v3666_v57  ;;  %vm3740_vm13 = vcmp.ge.s32.totalorder %v3705_v42, 0  ;;  %vm3775_vm0 = vcmp.lt.s32.totalorder %v3705_v42, 1000 }
 0x4a3   : > { %v3986_v8 = vrot.slane %v3913_v55, 1  ;;  %v4090_v15 = vrot.slane %v3913_v55, 2  ;;  %vm3810_vm10 = vmand %vm3740_vm13, %vm3775_vm0 }
 0x4a4   : > { %v3502_v27 = vpop.f32.mrf.mxu2 }
 0x4a5   : > { %v3503_v24 = vadd.f32 %v3502_v27, %v10834_v29  ;;  %v3987_v19 = vsel %vm709_vm2, %v3984_v49, %v3986_v8  ;;  %v4091_v26 = vsel %vm817_vm3, %v4088_v38, %v4090_v15  ;;  %v7448_v49 = vld [vmem:[%s13143_s1 + $0x358] sm:$0xff] }
 0x4a6   : > { %4337 = vmatmul.f32.gmra.mxu0 %v3987_v19  ;;  %4459 = vmatmul.f32.gmra.mxu1 %v4091_v26  ;;  %v3434_v7 = vpop.f32.mrf.mxu3 }
 0x4a7   : > { %v3632_v30 = vmul.f32 0.1, %v3503_v24  ;;  %vm3597_vm5 = vcmp.ge.f32.partialorder %v3503_v24, 0.0  ;;  %v11091_v5 = vadd.f32 %v3434_v7, %v3313_v41  ;;  %5430 = vmatpush.msrb.mxu2 %v7448_v49 }
 0x4a9   : > { %3552 = vmatmul.f32.gmra.mxu2 %v13559_v1  ;;  %v3667_v29 = vsel %vm3597_vm5, %v3503_v24, %v3632_v30  ;;  %v3316_v24 = vadd.f32 %v10735_v39, %v10848_v9  ;;  %v7464_v30 = vld [vmem:[%s13143_s1 + $0x3d8] sm:$0xff] }
 0x4aa   : > { %v3914_v38 = vsel %vm3809_vm6, %v3667_v29, 0.0  ;;  %7407 = vmatmul.msk.f32.gmra.mxu3 %vm3809_vm6, %v3667_v29 }
 0x4ab   : > { %v3988_v10 = vrot.slane %v3914_v38, 1  ;;  %v4092_v57 = vrot.slane %v3914_v38, 2  ;;  %5549 = vmatpush.msra.mxu3 %v7464_v30 }
 0x4ac   : > { %v3505_v59 = vpop.f32.mrf.mxu2 }
 0x4ad   : > { %v3506_v55 = vadd.f32 %v3505_v59, %v10842_v16  ;;  %v3989_v27 = vsel %vm709_vm2, %v3986_v8, %v3988_v10  ;;  %v4093_v19 = vsel %vm817_vm3, %v4090_v15, %v4092_v57  ;;  %v13560_v16 = vld [vmem:[#allocation19_spill] sm:$0xff] }
 0x4ae   : > { %4340 = vmatmul.f32.gmra.mxu0 %v3989_v27  ;;  %4462 = vmatmul.f32.gmra.mxu1 %v4093_v19  ;;  %v3437_v41 = vpop.f32.mrf.mxu3  ;;  %v3706_v8 = vadd.s32 %v11002_v47, %v13560_v16  ;;  %v13561_v15 = vld [vmem:[#allocation83_spill] sm:$0xff]  ;;  %v3319_v19 = vadd.f32 %v10735_v39, %v10862_v61 }
 0x4af   : > { %v3633_v26 = vmul.f32 0.1, %v3506_v55  ;;  %vm3598_vm8 = vcmp.ge.f32.partialorder %v3506_v55, 0.0  ;;  %v11107_v7 = vadd.f32 %v3437_v41, %v3316_v24 }
 0x4b0   : > { %vm3741_vm11 = vcmp.ge.s32.totalorder %v3706_v8, 0  ;;  %vm3776_vm9 = vcmp.lt.s32.totalorder %v3706_v8, 1000 }
 0x4b1   : > { %3555 = vmatmul.f32.gmra.mxu2 %v13561_v15  ;;  %v3668_v42 = vsel %vm3598_vm8, %v3506_v55, %v3633_v26  ;;  %vm3811_vm12 = vmand %vm3741_vm11, %vm3776_vm9  ;;  %v7480_v26 = vld [vmem:[%s13143_s1 + $0x458] sm:$0xff] }
 0x4b2   : > { %v3915_v9 = vsel %vm3810_vm10, %v3668_v42, 0.0  ;;  %7408 = vmatmul.msk.f32.gmra.mxu3 %vm3810_vm10, %v3668_v42  ;;  %5668 = vmatpush.msra.mxu0 %v7480_v26 }
 0x4b3   : > { %v3990_v1 = vrot.slane %v3915_v9, 1  ;;  %v4094_v29 = vrot.slane %v3915_v9, 2 }
 0x4b4   : > { %v3508_v49 = vpop.f32.mrf.mxu2 }
 0x4b5   : > { %v3509_v38 = vadd.f32 %v3508_v49, %v10859_v28  ;;  %v3991_v59 = vsel %vm709_vm2, %v3988_v10, %v3990_v1  ;;  %v4095_v27 = vsel %vm817_vm3, %v4092_v57, %v4094_v29  ;;  %v13562_v28 = vld [vmem:[#allocation20_spill] sm:$0xff]  ;;  %v13563_v57 = vld [vmem:[#allocation85_spill] sm:$0xff] }
 0x4b6   : > { %4343 = vmatmul.f32.gmra.mxu0 %v3991_v59  ;;  %4465 = vmatmul.f32.gmra.mxu1 %v4095_v27  ;;  %v3440_v55 = vpop.f32.mrf.mxu3  ;;  %v3707_v10 = vadd.s32 %v11002_v47, %v13562_v28  ;;  %v3322_v27 = vadd.f32 %v10735_v39, %v10873_v52  ;;  %v13565_v52 = vld [vmem:[#allocation87_spill] sm:$0xff] }
 0x4b7   : > { %v3634_v24 = vmul.f32 0.1, %v3509_v38  ;;  %vm3599_vm15 = vcmp.ge.f32.partialorder %v3509_v38, 0.0  ;;  %v11120_v41 = vadd.f32 %v3440_v55, %v3319_v19 }
 0x4b8   : > { %vm3742_vm1 = vcmp.ge.s32.totalorder %v3707_v10, 0  ;;  %vm3777_vm4 = vcmp.lt.s32.totalorder %v3707_v10, 1000 }
 0x4b9   : > { %3558 = vmatmul.f32.gmra.mxu2 %v13563_v57  ;;  %v3669_v30 = vsel %vm3599_vm15, %v3509_v38, %v3634_v24  ;;  %vm3812_vm6 = vmand %vm3742_vm1, %vm3777_vm4  ;;  %v7447_v24 = vld [vmem:[%s13143_s1 + $0x350] sm:$0xff] }
 0x4ba   : > { %v3916_v61 = vsel %vm3811_vm12, %v3669_v30, 0.0  ;;  %7409 = vmatmul.msk.f32.gmra.mxu3 %vm3811_vm12, %v3669_v30  ;;  %5431 = vmatpush.msrb.mxu2 %v7447_v24 }
 0x4bb   : > { %v3992_v8 = vrot.slane %v3916_v61, 1  ;;  %v4096_v15 = vrot.slane %v3916_v61, 2 }
 0x4bc   : > { %v3511_v42 = vpop.f32.mrf.mxu2 }
 0x4bd   : > { %v3512_v9 = vadd.f32 %v3511_v42, %v10867_v35  ;;  %v3993_v49 = vsel %vm709_vm2, %v3990_v1, %v3992_v8  ;;  %v4097_v59 = vsel %vm817_vm3, %v4094_v29, %v4096_v15  ;;  %v7463_v35 = vld [vmem:[%s13143_s1 + $0x3d0] sm:$0xff] }
 0x4be   : > { %4346 = vmatmul.f32.gmra.mxu0 %v3993_v49  ;;  %4468 = vmatmul.f32.gmra.mxu1 %v4097_v59  ;;  %v3443_v38 = vpop.f32.mrf.mxu3  ;;  %v13564_v29 = vld [vmem:[#allocation21_spill] sm:$0xff] }
 0x4bf   : > { %v3635_v19 = vmul.f32 0.1, %v3512_v9  ;;  %vm3600_vm5 = vcmp.ge.f32.partialorder %v3512_v9, 0.0  ;;  %v11136_v1 = vadd.f32 %v3443_v38, %v3322_v27  ;;  %v3708_v55 = vadd.s32 %v11002_v47, %v13564_v29  ;;  %5550 = vmatpush.msra.mxu3 %v7463_v35 }
 0x4c0   : > { %v3325_v27 = vadd.f32 %v10735_v39, %v10887_v37 }
 0x4c1   : > { %3561 = vmatmul.f32.gmra.mxu2 %v13565_v52  ;;  %v3670_v26 = vsel %vm3600_vm5, %v3512_v9, %v3635_v19  ;;  %vm3743_vm13 = vcmp.ge.s32.totalorder %v3708_v55, 0  ;;  %vm3778_vm0 = vcmp.lt.s32.totalorder %v3708_v55, 1000  ;;  %v7479_v19 = vld [vmem:[%s13143_s1 + $0x450] sm:$0xff] }
 0x4c2   : > { %v3917_v10 = vsel %vm3812_vm6, %v3670_v26, 0.0  ;;  %7410 = vmatmul.msk.f32.gmra.mxu3 %vm3812_vm6, %v3670_v26  ;;  %vm3813_vm10 = vmand %vm3743_vm13, %vm3778_vm0  ;;  %5669 = vmatpush.msra.mxu0 %v7479_v19 }
 0x4c3   : > { %v3994_v57 = vrot.slane %v3917_v10, 1  ;;  %v4098_v30 = vrot.slane %v3917_v10, 2 }
 0x4c4   : > { %v3514_v61 = vpop.f32.mrf.mxu2 }
 0x4c5   : > { %v3515_v42 = vadd.f32 %v3514_v61, %v10878_v34  ;;  %v3995_v49 = vsel %vm709_vm2, %v3992_v8, %v3994_v57  ;;  %v4099_v59 = vsel %vm817_vm3, %v4096_v15, %v4098_v30  ;;  %v13566_v34 = vld [vmem:[#allocation22_spill] sm:$0xff]  ;;  %v13567_v15 = vld [vmem:[#allocation89_spill] sm:$0xff] }
 0x4c6   : > { %4349 = vmatmul.f32.gmra.mxu0 %v3995_v49  ;;  %4471 = vmatmul.f32.gmra.mxu1 %v4099_v59  ;;  %v3446_v9 = vpop.f32.mrf.mxu3  ;;  %v3709_v8 = vadd.s32 %v11002_v47, %v13566_v34  ;;  %v3328_v59 = vadd.f32 %v10735_v39, %v10898_v44  ;;  %v13569_v44 = vld [vmem:[#allocation91_spill] sm:$0xff] }
 0x4c7   : > { %v3636_v38 = vmul.f32 0.1, %v3515_v42  ;;  %vm3601_vm8 = vcmp.ge.f32.partialorder %v3515_v42, 0.0  ;;  %v11149_v24 = vadd.f32 %v3446_v9, %v3325_v27 }
 0x4c8   : > { %vm3744_vm11 = vcmp.ge.s32.totalorder %v3709_v8, 0  ;;  %vm3779_vm9 = vcmp.lt.s32.totalorder %v3709_v8, 1000 }
 0x4c9   : > { %3564 = vmatmul.f32.gmra.mxu2 %v13567_v15  ;;  %v3671_v35 = vsel %vm3601_vm8, %v3515_v42, %v3636_v38  ;;  %vm3814_vm12 = vmand %vm3744_vm11, %vm3779_vm9  ;;  %v7446_v38 = vld [vmem:[%s13143_s1 + $0x348] sm:$0xff] }
 0x4ca   : > { %v3918_v37 = vsel %vm3813_vm10, %v3671_v35, 0.0  ;;  %7411 = vmatmul.msk.f32.gmra.mxu3 %vm3813_vm10, %v3671_v35  ;;  %5432 = vmatpush.msrb.mxu2 %v7446_v38 }
 0x4cb   : > { %v3996_v55 = vrot.slane %v3918_v37, 1  ;;  %v4100_v52 = vrot.slane %v3918_v37, 2 }
 0x4cc   : > { %v3517_v26 = vpop.f32.mrf.mxu2 }
 0x4cd   : > { %v3518_v10 = vadd.f32 %v3517_v26, %v10892_v21  ;;  %v3997_v61 = vsel %vm709_vm2, %v3994_v57, %v3996_v55  ;;  %v4101_v49 = vsel %vm817_vm3, %v4098_v30, %v4100_v52  ;;  %v7462_v21 = vld [vmem:[%s13143_s1 + $0x3c8] sm:$0xff] }
 0x4ce   : > { %4352 = vmatmul.f32.gmra.mxu0 %v3997_v61  ;;  %4474 = vmatmul.f32.gmra.mxu1 %v4101_v49  ;;  %v3449_v42 = vpop.f32.mrf.mxu3  ;;  %v13568_v30 = vld [vmem:[#allocation24_spill] sm:$0xff] }
 0x4cf   : > { %v3637_v27 = vmul.f32 0.1, %v3518_v10  ;;  %vm3602_vm15 = vcmp.ge.f32.partialorder %v3518_v10, 0.0  ;;  %v11165_v57 = vadd.f32 %v3449_v42, %v3328_v59  ;;  %v3710_v9 = vadd.s32 %v11002_v47, %v13568_v30  ;;  %5551 = vmatpush.msra.mxu3 %v7462_v21 }
 0x4d0   : > { %v3331_v59 = vadd.f32 %v10735_v39, %v10912_v23 }
 0x4d1   : > { %3567 = vmatmul.f32.gmra.mxu2 %v13569_v44  ;;  %v3672_v19 = vsel %vm3602_vm15, %v3518_v10, %v3637_v27  ;;  %vm3745_vm1 = vcmp.ge.s32.totalorder %v3710_v9, 0  ;;  %vm3780_vm4 = vcmp.lt.s32.totalorder %v3710_v9, 1000  ;;  %v7478_v27 = vld [vmem:[%s13143_s1 + $0x448] sm:$0xff] }
 0x4d2   : > { %v3919_v8 = vsel %vm3814_vm12, %v3672_v19, 0.0  ;;  %7412 = vmatmul.msk.f32.gmra.mxu3 %vm3814_vm12, %v3672_v19  ;;  %vm3815_vm6 = vmand %vm3745_vm1, %vm3780_vm4  ;;  %5670 = vmatpush.msra.mxu0 %v7478_v27 }
 0x4d3   : > { %v3998_v15 = vrot.slane %v3919_v8, 1  ;;  %v4102_v35 = vrot.slane %v3919_v8, 2 }
 0x4d4   : > { %v3520_v37 = vpop.f32.mrf.mxu2 }
 0x4d5   : > { %v3521_v26 = vadd.f32 %v3520_v37, %v10903_v14  ;;  %v3999_v61 = vsel %vm709_vm2, %v3996_v55, %v3998_v15  ;;  %v4103_v49 = vsel %vm817_vm3, %v4100_v52, %v4102_v35  ;;  %v13570_v14 = vld [vmem:[#allocation25_spill] sm:$0xff] }
 0x4d6   : > { %4355 = vmatmul.f32.gmra.mxu0 %v3999_v61  ;;  %4477 = vmatmul.f32.gmra.mxu1 %v4103_v49  ;;  %v3452_v10 = vpop.f32.mrf.mxu3  ;;  %v3711_v55 = vadd.s32 %v11002_v47, %v13570_v14  ;;  %v13571_v52 = vld [vmem:[#allocation93_spill] sm:$0xff]  ;;  %v3334_v49 = vadd.f32 %v10735_v39, %v10920_v50  ;;  %v7461_v39 = vld [vmem:[%s13143_s1 + $0x3c0] sm:$0xff] }
 0x4d7   : > { %v3638_v42 = vmul.f32 0.1, %v3521_v26  ;;  %vm3603_vm5 = vcmp.ge.f32.partialorder %v3521_v26, 0.0  ;;  %v11178_v38 = vadd.f32 %v3452_v10, %v3331_v59  ;;  %5552 = vmatpush.msra.mxu3 %v7461_v39  ;;  %v7442_v39 = vld [vmem:[%s13143_s1 + $0x328] sm:$0xff] }
 0x4d8   : > { %vm3746_vm13 = vcmp.ge.s32.totalorder %v3711_v55, 0  ;;  %vm3781_vm0 = vcmp.lt.s32.totalorder %v3711_v55, 1000 }
 0x4d9   : > { %3570 = vmatmul.f32.gmra.mxu2 %v13571_v52  ;;  %v3673_v21 = vsel %vm3603_vm5, %v3521_v26, %v3638_v42  ;;  %vm3816_vm10 = vmand %vm3746_vm13, %vm3781_vm0  ;;  %v7445_v42 = vld [vmem:[%s13143_s1 + $0x340] sm:$0xff] }
 0x4da   : > { %v3920_v23 = vsel %vm3815_vm6, %v3673_v21, 0.0  ;;  %7413 = vmatmul.msk.f32.gmra.mxu3 %vm3815_vm6, %v3673_v21  ;;  %5433 = vmatpush.msrb.mxu2 %v7445_v42  ;;  %v13575_v42 = vld [vmem:[#allocation97_spill] sm:$0xff] }
 0x4db   : > { %v4000_v9 = vrot.slane %v3920_v23, 1  ;;  %v4104_v44 = vrot.slane %v3920_v23, 2 }
 0x4dc   : > { %v3523_v19 = vpop.f32.mrf.mxu2 }
 0x4dd   : > { %v3524_v8 = vadd.f32 %v3523_v19, %v10917_v2  ;;  %v4001_v37 = vsel %vm709_vm2, %v3998_v15, %v4000_v9  ;;  %v4105_v61 = vsel %vm817_vm3, %v4102_v35, %v4104_v44  ;;  %v13572_v2 = vld [vmem:[#allocation26_spill] sm:$0xff]  ;;  %v13573_v35 = vld [vmem:[#allocation95_spill] sm:$0xff] }
 0x4de   : > { %4358 = vmatmul.f32.gmra.mxu0 %v4001_v37  ;;  %4480 = vmatmul.f32.gmra.mxu1 %v4105_v61  ;;  %v3455_v26 = vpop.f32.mrf.mxu3  ;;  %v3712_v15 = vadd.s32 %v11002_v47, %v13572_v2 }
 0x4df   : > { %v3639_v59 = vmul.f32 0.1, %v3524_v8  ;;  %vm3604_vm8 = vcmp.ge.f32.partialorder %v3524_v8, 0.0  ;;  %v11191_v10 = vadd.f32 %v3455_v26, %v3334_v49  ;;  %v7444_v49 = vld [vmem:[%s13143_s1 + $0x338] sm:$0xff] }
 0x4e0   : > { %vm3747_vm11 = vcmp.ge.s32.totalorder %v3712_v15, 0  ;;  %vm3782_vm9 = vcmp.lt.s32.totalorder %v3712_v15, 1000  ;;  %5434 = vmatpush.msrb.mxu2 %v7444_v49 }
 0x4e1   : > { %3573 = vmatmul.f32.gmra.mxu2 %v13573_v35  ;;  %v3674_v27 = vsel %vm3604_vm8, %v3524_v8, %v3639_v59  ;;  %v11205_v8 = vld [vmem:[%s13144_s2 + $0x1] ss:$0 sm:$0xff]  ;;  %vm3817_vm12 = vmand %vm3747_vm11, %vm3782_vm9 }
 0x4e2   : > { %v3921_v50 = vsel %vm3816_vm10, %v3674_v27, 0.0  ;;  %7414 = vmatmul.msk.f32.gmra.mxu3 %vm3816_vm10, %v3674_v27  ;;  %v3337_v61 = vadd.f32 %v11205_v8, %v10931_v0  ;;  %v7443_v0 = vld [vmem:[%s13143_s1 + $0x330] sm:$0xff]  ;;  %v7477_v35 = vld [vmem:[%s13143_s1 + $0x440] sm:$0xff] }
 0x4e3   : > { %v4002_v55 = vrot.slane %v3921_v50, 1  ;;  %v4106_v52 = vrot.slane %v3921_v50, 2  ;;  %5435 = vmatpush.msrb.mxu2 %v7443_v0  ;;  %5671 = vmatpush.msra.mxu0 %v7477_v35 }
 0x4e4   : > { %v3526_v21 = vpop.f32.mrf.mxu2 }
 0x4e5   : > { %v3527_v23 = vadd.f32 %v3526_v21, %v10928_v12  ;;  %v4003_v19 = vsel %vm709_vm2, %v4000_v9, %v4002_v55  ;;  %v4107_v37 = vsel %vm817_vm3, %v4104_v44, %v4106_v52  ;;  %v13574_v44 = vld [vmem:[#allocation28_spill] sm:$0xff]  ;;  %5436 = vmatpush.msrb.mxu2 %v7442_v39  ;;  %v7500_v39 = vld [vmem:[%s13145_s3 + $0x378] sm:$0xff] }
 0x4e6   : > { %4361 = vmatmul.f32.gmra.mxu0 %v4003_v19  ;;  %4483 = vmatmul.f32.gmra.mxu1 %v4107_v37  ;;  %v3458_v12 = vpop.f32.mrf.mxu3  ;;  %v3713_v26 = vadd.s32 %v11002_v47, %v13574_v44 }
 0x4e7   : > { %v3640_v59 = vmul.f32 0.1, %v3527_v23  ;;  %vm3605_vm15 = vcmp.ge.f32.partialorder %v3527_v23, 0.0  ;;  %v11212_v9 = vadd.f32 %v3458_v12, %v3337_v61  ;;  %6362 = vmatpush.msrb.mxu1 %v7500_v39 }
 0x4e8   : > { %vm3748_vm1 = vcmp.ge.s32.totalorder %v3713_v26, 0  ;;  %vm3783_vm4 = vcmp.lt.s32.totalorder %v3713_v26, 1000  ;;  %v7440_v26 = vld [vmem:[%s13143_s1 + $0x318] sm:$0xff] }
 0x4e9   : > { %3576 = vmatmul.f32.gmra.mxu2 %v13575_v42  ;;  %v3675_v15 = vsel %vm3605_vm15, %v3527_v23, %v3640_v59  ;;  %v7441_v23 = vld [vmem:[%s13143_s1 + $0x320] sm:$0xff]  ;;  %v3340_v59 = vadd.f32 %v11205_v8, %v10951_v40  ;;  %vm3818_vm6 = vmand %vm3748_vm1, %vm3783_vm4  ;;  %v7439_v40 = vld [vmem:[%s13143_s1 + $0x310] sm:$0xff] }
 0x4ea   : > { %v3922_v27 = vsel %vm3817_vm12, %v3675_v15, 0.0  ;;  %7415 = vmatmul.msk.f32.gmra.mxu3 %vm3817_vm12, %v3675_v15  ;;  %5437 = vmatpush.msrb.mxu2 %v7441_v23 }
 0x4eb   : > { %v4004_v50 = vrot.slane %v3922_v27, 1  ;;  %v4108_v21 = vrot.slane %v3922_v27, 2 }
 0x4ec   : > { %v3529_v19 = vpop.f32.mrf.mxu2  ;;  %5438 = vmatpush.msrb.mxu2 %v7440_v26 }
 0x4ed   : > { %v3530_v37 = vadd.f32 %v3529_v19, %v10939_v63  ;;  %v4005_v61 = vsel %vm709_vm2, %v4002_v55, %v4004_v50  ;;  %v4109_v49 = vsel %vm817_vm3, %v4106_v52, %v4108_v21  ;;  %v13576_v63 = vld [vmem:[#allocation30_spill] sm:$0xff] }
 0x4ee   : > { %4364 = vmatmul.f32.gmra.mxu0 %v4005_v61  ;;  %4486 = vmatmul.f32.gmra.mxu1 %v4109_v49  ;;  %v3461_v0 = vpop.f32.mrf.mxu3  ;;  %v3714_v55 = vadd.s32 %v11002_v47, %v13576_v63  ;;  %v7460_v19 = vld [vmem:[%s13143_s1 + $0x3b8] sm:$0xff] }
 0x4ef   : > { %v3641_v12 = vmul.f32 0.1, %v3530_v37  ;;  %vm3606_vm5 = vcmp.ge.f32.partialorder %v3530_v37, 0.0  ;;  %v11237_v42 = vadd.f32 %v3461_v0, %v3340_v59  ;;  %5439 = vmatpush.msrb.mxu2 %v7439_v40  ;;  %5553 = vmatpush.msra.mxu3 %v7460_v19  ;;  %v3343_v59 = vadd.f32 %v11205_v8, %v10977_v43  ;;  %v7476_v43 = vld [vmem:[%s13143_s1 + $0x438] sm:$0xff] }
 0x4f0   : > { %vm3749_vm13 = vcmp.ge.s32.totalorder %v3714_v55, 0  ;;  %vm3784_vm0 = vcmp.lt.s32.totalorder %v3714_v55, 1000  ;;  %5672 = vmatpush.msra.mxu0 %v7476_v43 }
 0x4f1   : > { %3579 = vmatmul.f32.gmra.mxu2 %v10713_v58  ;;  %v3676_v52 = vsel %vm3606_vm5, %v3530_v37, %v3641_v12  ;;  %v7438_v58 = vld [vmem:[%s13143_s1 + $0x308] sm:$0xff]  ;;  %vm3819_vm10 = vmand %vm3749_vm13, %vm3784_vm0 }
 0x4f2   : > { %v3923_v15 = vsel %vm3818_vm6, %v3676_v52, 0.0  ;;  %7416 = vmatmul.msk.f32.gmra.mxu3 %vm3818_vm6, %v3676_v52  ;;  %5440 = vmatpush.msrb.mxu2 %v7438_v58 }
 0x4f3   : > { %v4006_v35 = vrot.slane %v3923_v15, 1  ;;  %v4110_v27 = vrot.slane %v3923_v15, 2 }
 0x4f4   : > { %v3532_v23 = vpop.f32.mrf.mxu2 }
 0x4f5   : > { %v3533_v37 = vadd.f32 %v3532_v23, %v10968_v48  ;;  %v4007_v61 = vsel %vm709_vm2, %v4004_v50, %v4006_v35  ;;  %v4111_v49 = vsel %vm817_vm3, %v4108_v21, %v4110_v27  ;;  %v7437_v48 = vld [vmem:[%s13143_s1 + $0x300] sm:$0xff] }
 0x4f6   : > { %4367 = vmatmul.f32.gmra.mxu0 %v4007_v61  ;;  %4489 = vmatmul.f32.gmra.mxu1 %v4111_v49  ;;  %v3464_v0 = vpop.f32.mrf.mxu3  ;;  %v13577_v21 = vld [vmem:[#allocation31_spill] sm:$0xff] }
 0x4f7   : > { %v3642_v12 = vmul.f32 0.1, %v3533_v37  ;;  %vm3607_vm8 = vcmp.ge.f32.partialorder %v3533_v37, 0.0  ;;  %v11263_v50 = vadd.f32 %v3464_v0, %v3343_v59  ;;  %v3715_v26 = vadd.s32 %v11002_v47, %v13577_v21  ;;  %5441 = vmatpush.msrb.mxu2 %v7437_v48  ;;  %v13578_v59 = vld [vmem:[#allocation33_spill] sm:$0xff] }
 0x4f9   : > { %3582 = vmatmul.f32.gmra.mxu2 %v10743_v31  ;;  %v3677_v52 = vsel %vm3607_vm8, %v3533_v37, %v3642_v12  ;;  %vm3750_vm11 = vcmp.ge.s32.totalorder %v3715_v26, 0  ;;  %vm3785_vm9 = vcmp.lt.s32.totalorder %v3715_v26, 1000  ;;  %v3346_v31 = vadd.f32 %v11205_v8, %v10991_v54  ;;  %v11285_v54 = vld [vmem:[%s13146_s4 + $0x1] ss:$0 sm:$0xff] }
 0x4fa   : > { %v3924_v55 = vsel %vm3819_vm10, %v3677_v52, 0.0  ;;  %7417 = vmatmul.msk.f32.gmra.mxu3 %vm3819_vm10, %v3677_v52  ;;  %vm3820_vm12 = vmand %vm3750_vm11, %vm3785_vm9  ;;  %v3716_v12 = vadd.s32 %v11002_v47, %v13578_v59  ;;  %v11287_v8 = vstv %s4731_s9 }
 0x4fb   : > { %v4008_v40 = vrot.slane %v3924_v55, 1  ;;  %v4112_v15 = vrot.slane %v3924_v55, 2 }
 0x4fc   : > { %v3535_v39 = vpop.f32.mrf.mxu2  ;;  %vm3751_vm1 = vcmp.ge.s32.totalorder %v3716_v12, 0  ;;  %vm3786_vm4 = vcmp.lt.s32.totalorder %v3716_v12, 1000 }
 0x4fd   : > { %v3536_v19 = vadd.f32 %v3535_v39, %v10988_v32  ;;  %v4009_v23 = vsel %vm709_vm2, %v4006_v35, %v4008_v40  ;;  %v4113_v58 = vsel %vm817_vm3, %v4110_v27, %v4112_v15  ;;  %v4733_v39 = vadd.s32 %v11287_v8, %v13545_v62  ;;  %vm11294_vm6 = vmand %vm3751_vm1, %vm3786_vm4 }
 0x4fe   : > { %4370 = vmatmul.f32.gmra.mxu0 %v4009_v23  ;;  %4492 = vmatmul.f32.gmra.mxu1 %v4113_v58  ;;  %v3467_v61 = vpop.f32.mrf.mxu3  ;;  %v13581_v58 = vld [vmem:[#allocation34_spill] sm:$0xff] }
 0x4ff   : > { %v3643_v37 = vmul.f32 0.1, %v3536_v19  ;;  %vm3608_vm15 = vcmp.ge.f32.partialorder %v3536_v19, 0.0  ;;  %v11276_v49 = vadd.f32 %v3467_v61, %v3346_v31  ;;  %vm4768_vm13 = vcmp.ge.s32.totalorder %v4733_v39, 0 }
 0x500   : > { %vm4803_vm0 = vcmp.lt.s32.totalorder %v4733_v39, 1000  ;;  %v4734_v39 = vadd.s32 %v11287_v8, %v13546_v33  ;;  %v4736_v33 = vadd.s32 %v11287_v8, %v13552_v53 }
 0x501   : > { %3585 = vmatmul.f32.gmra.mxu2 %v10771_v22  ;;  %v3678_v32 = vsel %vm3608_vm15, %v3536_v19, %v3643_v37  ;;  %vm4838_vm11 = vmand %vm4768_vm13, %vm4803_vm0 }
 0x502   : > { %v3925_v35 = vsel %vm3820_vm12, %v3678_v32, 0.0  ;;  %7418 = vmatmul.msk.f32.gmra.mxu3 %vm3820_vm12, %v3678_v32  ;;  %vm4769_vm4 = vcmp.ge.s32.totalorder %v4734_v39, 0 }
 0x503   : > { %v4010_v27 = vrot.slane %v3925_v35, 1  ;;  %v4114_v0 = vrot.slane %v3925_v35, 2 }
 0x504   : > { %v3538_v48 = vpop.f32.mrf.mxu2 }
 0x505   : > { %v3539_v26 = vadd.f32 %v3538_v48, %v11000_v4  ;;  %v4011_v22 = vsel %vm709_vm2, %v4008_v40, %v4010_v27  ;;  %v4115_v43 = vsel %vm817_vm3, %v4112_v15, %v4114_v0  ;;  %v3717_v4 = vadd.s32 %v11002_v47, %v13581_v58  ;;  %v7499_v40 = vld [vmem:[%s13145_s3 + $0x370] sm:$0xff] }
 0x506   : > { %4373 = vmatmul.f32.gmra.mxu0 %v4011_v22  ;;  %4495 = vmatmul.f32.gmra.mxu1 %v4115_v43  ;;  %v4207_v55 = vpop.f32.mrf.mxu3  ;;  %v7459_v15 = vld [vmem:[%s13143_s1 + $0x3b0] sm:$0xff] }
 0x507   : > { %v3644_v52 = vmul.f32 0.1, %v3539_v26  ;;  %vm3609_vm5 = vcmp.ge.f32.partialorder %v3539_v26, 0.0  ;;  %v4208_v23 = vadd.f32 %v11285_v54, %v4207_v55  ;;  %6363 = vmatpush.msrb.mxu1 %v7499_v40  ;;  %5554 = vmatpush.msra.mxu3 %v7459_v15  ;;  %vm3752_vm8 = vcmp.ge.s32.totalorder %v3717_v4, 0  ;;  %v7475_v15 = vld [vmem:[%s13143_s1 + $0x430] sm:$0xff] }
 0x508   : > { %vm3787_vm10 = vcmp.lt.s32.totalorder %v3717_v4, 1000  ;;  %5673 = vmatpush.msra.mxu0 %v7475_v15 }
 0x509   : > { %3588 = vmatmul.f32.gmra.mxu2 %v10785_v18  ;;  %v3679_v31 = vsel %vm3609_vm5, %v3539_v26, %v3644_v52  ;;  %v13582_v52 = vld [vmem:[#allocation36_spill] sm:$0xff]  ;;  %vm11319_vm15 = vmand %vm3752_vm8, %vm3787_vm10  ;;  %vm4804_vm5 = vcmp.lt.s32.totalorder %v4734_v39, 1000  ;;  %vm5219_vm10 = vcmask 1042432  }
 0x50a   : > { %v3926_v37 = vsel %vm11294_vm6, %v3679_v31, 0.0  ;;  %7419 = vmatmul.msk.f32.gmra.mxu3 %vm11294_vm6, %v3679_v31  ;;  %v3718_v55 = vadd.s32 %v11002_v47, %v13582_v52  ;;  %vm4839_vm8 = vmand %vm4769_vm4, %vm4804_vm5 }
 0x50b   : > { %v4329_v61 = vpop.f32.mrf.mxu0  ;;  %v4451_v12 = vpop.f32.mrf.mxu1  ;;  %v4012_v32 = vrot.slane %v3926_v37, 1  ;;  %v4116_v35 = vrot.slane %v3926_v37, 2 }
 0x50c   : > { %v4330_v48 = vadd.f32 %v4329_v61, %v4208_v23  ;;  %v3541_v22 = vpop.f32.mrf.mxu2  ;;  %vm3753_vm12 = vcmp.ge.s32.totalorder %v3718_v55, 0  ;;  %vm3788_vm1 = vcmp.lt.s32.totalorder %v3718_v55, 1000  ;;  %v7458_v55 = vld [vmem:[%s13143_s1 + $0x3a8] sm:$0xff] }
 0x50d   : > { %v3542_v18 = vadd.f32 %v3541_v22, %v11014_v46  ;;  %v4013_v26 = vsel %vm709_vm2, %v4010_v27, %v4012_v32  ;;  %v4117_v43 = vsel %vm817_vm3, %v4114_v0, %v4116_v35  ;;  %v13585_v46 = vld [vmem:[#allocation42_spill] sm:$0xff]  ;;  %vm11346_vm13 = vmand %vm3753_vm12, %vm3788_vm1  ;;  %5555 = vmatpush.msra.mxu3 %v7458_v55 }
 0x50e   : > { %v4452_v40 = vadd.f32 %v4451_v12, %v4330_v48  ;;  %4376 = vmatmul.f32.gmra.mxu0 %v4013_v26  ;;  %4498 = vmatmul.f32.gmra.mxu1 %v4117_v43  ;;  %v4210_v23 = vpop.f32.mrf.mxu3 }
 0x50f   : > { %v3645_v19 = vmul.f32 0.1, %v3542_v18  ;;  %vm3610_vm9 = vcmp.ge.f32.partialorder %v3542_v18, 0.0  ;;  %v4211_v0 = vadd.f32 %v11285_v54, %v4210_v23 }
 0x510   : > { %v4696_v27 = vadd.f32 %v13585_v46, %v4452_v40  ;;  %v4735_v46 = vadd.s32 %v11287_v8, %v13550_v20 }
 0x511   : > { %v3680_v31 = vsel %vm3610_vm9, %v3542_v18, %v3645_v19  ;;  %v13586_v18 = vld [vmem:[#allocation37_spill] sm:$0xff] }
 0x512   : > { %v11328_v37 = vsel %vm4838_vm11, %v4696_v27, 0.0  ;;  %v3927_v61 = vsel %vm11319_vm15, %v3680_v31, 0.0  ;;  %7420 = vmatmul.msk.f32.gmra.mxu3 %vm11319_vm15, %v3680_v31  ;;  %v3719_v19 = vadd.s32 %v11002_v47, %v13586_v18  ;;  %vm4770_vm15 = vcmp.ge.s32.totalorder %v4735_v46, 0 }
 0x513   : > { %v5115_v12 = vmul.f32 0.1, %v11328_v37  ;;  %v4332_v48 = vpop.f32.mrf.mxu0  ;;  %v4454_v22 = vpop.f32.mrf.mxu1  ;;  %v4014_v26 = vrot.slane %v3927_v61, 1  ;;  %v4118_v43 = vrot.slane %v3927_v61, 2  ;;  %vm5080_vm6 = vcmp.ge.f32.partialorder %v11328_v37, 0.0 }
 0x514   : > { %v4333_v40 = vadd.f32 %v4332_v48, %v4211_v0  ;;  %v3544_v23 = vpop.f32.mrf.mxu2  ;;  %vm3754_vm11 = vcmp.ge.s32.totalorder %v3719_v19, 0  ;;  %vm3789_vm9 = vcmp.lt.s32.totalorder %v3719_v19, 1000  ;;  %vm4805_vm12 = vcmp.lt.s32.totalorder %v4735_v46, 1000  ;;  %v7474_v19 = vld [vmem:[%s13143_s1 + $0x428] sm:$0xff] }
 0x515   : > { %v3545_v27 = vadd.f32 %v3544_v23, %v11032_v51  ;;  %v4015_v15 = vsel %vm709_vm2, %v4012_v32, %v4014_v26  ;;  %v4119_v61 = vsel %vm817_vm3, %v4116_v35, %v4118_v43  ;;  %v5150_v0 = vsel %vm5080_vm6, %v11328_v37, %v5115_v12  ;;  %v13589_v51 = vld [vmem:[#allocation44_spill] sm:$0xff]  ;;  %vm11382_vm4 = vmand %vm3754_vm11, %vm3789_vm9  ;;  %5674 = vmatpush.msra.mxu0 %v7474_v19 }
 0x516   : > { %v4455_v48 = vadd.f32 %v4454_v22, %v4333_v40  ;;  %4379 = vmatmul.f32.gmra.mxu0 %v4015_v15  ;;  %4501 = vmatmul.f32.gmra.mxu1 %v4119_v61  ;;  %v4213_v20 = vpop.f32.mrf.mxu3  ;;  %v7498_v12 = vld [vmem:[%s13145_s3 + $0x368] sm:$0xff]  ;;  %v5220_v13 = vrot.slane %v5150_v0, 5  ;;  %vm4840_vm6 = vmand %vm4770_vm15, %vm4805_vm12  ;;  %vm4806_vm11 = vcmp.lt.s32.totalorder %v4736_v33, 1000 }
 0x517   : > { %v3646_v31 = vmul.f32 0.1, %v3545_v27  ;;  %5442 = vmatmul.f32.vlgmr.msrb.gmra.mxu2 %v5150_v0  ;;  %vm3611_vm0 = vcmp.ge.f32.partialorder %v3545_v27, 0.0  ;;  %v4214_v35 = vadd.f32 %v11285_v54, %v4213_v20  ;;  %6364 = vmatpush.msrb.mxu1 %v7498_v12  ;;  %v13590_v20 = vld [vmem:[#allocation38_spill] sm:$0xff] }
 0x518   : > { %v4697_v32 = vadd.f32 %v13589_v51, %v4455_v48  ;;  %v11366_v23 = vadd.s32 %v11002_v47, %v13590_v20 }
 0x519   : > { %v3681_v22 = vsel %vm3611_vm0, %v3545_v27, %v3646_v31  ;;  %v6744_v31 = vrot.slane %v11328_v37, 6 }
 0x51a   : > { %v3928_v39 = vsel %vm11346_vm13, %v3681_v22, 0.0  ;;  %v11362_v40 = vsel %vm4839_vm8, %v4697_v32, 0.0  ;;  %7421 = vmatmul.msk.f32.gmra.mxu3 %vm11346_vm13, %v3681_v22  ;;  %vm3755_vm13 = vcmp.ge.s32.totalorder %v11366_v23, 0  ;;  %vm3790_vm0 = vcmp.lt.s32.totalorder %v11366_v23, 1000  ;;  %v7497_v23 = vld [vmem:[%s13145_s3 + $0x360] sm:$0xff] }
 0x51b   : > { %v4335_v15 = vpop.f32.mrf.mxu0  ;;  %v4457_v61 = vpop.f32.mrf.mxu1  ;;  %v4016_v48 = vrot.slane %v3928_v39, 1  ;;  %v4120_v51 = vrot.slane %v3928_v39, 2  ;;  %vm5081_vm1 = vcmp.ge.f32.partialorder %v11362_v40, 0.0  ;;  %v5116_v27 = vmul.f32 0.1, %v11362_v40  ;;  %vm11428_vm15 = vmand %vm3755_vm13, %vm3790_vm0  ;;  %6365 = vmatpush.msrb.mxu1 %v7497_v23 }
 0x51c   : > { %v4336_v12 = vadd.f32 %v4335_v15, %v4214_v35  ;;  %v3547_v55 = vpop.f32.mrf.mxu2  ;;  %v6745_v32 = vrot.slane %v11362_v40, 6  ;;  %vm4771_vm8 = vcmp.ge.s32.totalorder %v4736_v33, 0 }
 0x51d   : > { %v3548_v62 = vadd.f32 %v3547_v55, %v11049_v6  ;;  %v4017_v39 = vsel %vm709_vm2, %v4014_v26, %v4016_v48  ;;  %v4121_v3 = vsel %vm817_vm3, %v4118_v43, %v4120_v51  ;;  %v5151_v56 = vsel %vm5081_vm1, %v11362_v40, %v5116_v27  ;;  %v13594_v43 = vld [vmem:[#allocation47_spill] sm:$0xff]  ;;  %vm4841_vm1 = vmand %vm4771_vm8, %vm4806_vm11 }
 0x51e   : > { %v4458_v37 = vadd.f32 %v4457_v61, %v4336_v12  ;;  %4382 = vmatmul.f32.gmra.mxu0 %v4017_v39  ;;  %4504 = vmatmul.f32.gmra.mxu1 %v4121_v3  ;;  %v5221_v35 = vrot.slane %v5151_v56, 5  ;;  %v11387_v22 = vsel %vm3116_vm14, %v6744_v31, %v6745_v32  ;;  %v4216_v26 = vpop.f32.mrf.mxu3  ;;  %v13595_v27 = vld [vmem:[#allocation39_spill] sm:$0xff] }
 0x51f   : > { %13593 = vst [vmem:[#allocation45_spill] sm:$0xff] %v11387_v22  ;;  %v3647_v6 = vmul.f32 0.1, %v3548_v62  ;;  %5445 = vmatmul.f32.gmra.mxu2 %v5151_v56  ;;  %vm3612_vm5 = vcmp.ge.f32.partialorder %v3548_v62, 0.0  ;;  %v4217_v3 = vadd.f32 %v11285_v54, %v4216_v26  ;;  %v11409_v31 = vadd.s32 %v11002_v47, %v13595_v27 }
 0x520   : > { %v4698_v0 = vadd.f32 %v13594_v43, %v4458_v37  ;;  %v11397_v40 = vsel %vm5219_vm10, %v5220_v13, %v5221_v35  ;;  %v5322_v37 = vrot.slane %v5151_v56, 2 }
 0x521   : > { %v3682_v15 = vsel %vm3612_vm5, %v3548_v62, %v3647_v6  ;;  %vm3791_vm5 = vcmp.lt.s32.totalorder %v11409_v31, 1000 }
 0x522   : > { %v11403_v46 = vsel %vm11382_vm4, %v3682_v15, 0.0  ;;  %v11405_v61 = vsel %vm4840_vm6, %v4698_v0, 0.0  ;;  %7422 = vmatmul.msk.f32.gmra.mxu3 %vm11382_vm4, %v3682_v15  ;;  %v4737_v0 = vadd.s32 %v11287_v8, %v13554_v60  ;;  %vm3756_vm4 = vcmp.ge.s32.totalorder %v11409_v31, 0  ;;  %v7473_v31 = vld [vmem:[%s13143_s1 + $0x420] sm:$0xff] }
 0x523   : > { %v4338_v13 = vpop.f32.mrf.mxu0  ;;  %v4460_v12 = vpop.f32.mrf.mxu1  ;;  %v4018_v62 = vrot.slane %v11403_v46, 1  ;;  %v4122_v55 = vrot.slane %v11403_v46, 2  ;;  %vm5082_vm9 = vcmp.ge.f32.partialorder %v11405_v61, 0.0  ;;  %v5117_v39 = vmul.f32 0.1, %v11405_v61  ;;  %vm11474_vm8 = vmand %vm3756_vm4, %vm3791_vm5  ;;  %5675 = vmatpush.msra.mxu0 %v7473_v31 }
 0x524   : > { %v4339_v6 = vadd.f32 %v4338_v13, %v4217_v3  ;;  %v3550_v26 = vpop.f32.mrf.mxu2  ;;  %v6747_v43 = vrot.slane %v11405_v61, 6  ;;  %vm4772_vm6 = vcmp.ge.s32.totalorder %v4737_v0, 0  ;;  %vm4807_vm13 = vcmp.lt.s32.totalorder %v4737_v0, 1000 }
 0x525   : > { %v3551_v19 = vadd.f32 %v3550_v26, %v11062_v11  ;;  %v4019_v22 = vsel %vm709_vm2, %v4016_v48, %v4018_v62  ;;  %v4123_v46 = vsel %vm817_vm3, %v4120_v51, %v4122_v55  ;;  %v5152_v53 = vsel %vm5082_vm9, %v11405_v61, %v5117_v39  ;;  %vm4842_vm9 = vmand %vm4772_vm6, %vm4807_vm13 }
 0x526   : > { %v4461_v27 = vadd.f32 %v4460_v12, %v4339_v6  ;;  %4385 = vmatmul.f32.gmra.mxu0 %v4019_v22  ;;  %4507 = vmatmul.f32.gmra.mxu1 %v4123_v46  ;;  %v5223_v56 = vrot.slane %v5152_v53, 5  ;;  %v5323_v3 = vrot.slane %v5152_v53, 2  ;;  %v11433_v11 = vsel %vm3116_vm14, %v6745_v32, %v6747_v43  ;;  %v4219_v51 = vpop.f32.mrf.mxu3  ;;  %v13599_v22 = vld [vmem:[#allocation50_spill] sm:$0xff]  ;;  %v7457_v32 = vld [vmem:[%s13143_s1 + $0x3a0] sm:$0xff] }
 0x527   : > { %13598 = vst [vmem:[#allocation48_spill] sm:$0xff] %v11433_v11  ;;  %v3648_v48 = vmul.f32 0.1, %v3551_v19  ;;  %5448 = vmatmul.f32.gmra.mxu2 %v5152_v53  ;;  %vm3613_vm12 = vcmp.ge.f32.partialorder %v3551_v19, 0.0  ;;  %v4220_v61 = vadd.f32 %v11285_v54, %v4219_v51  ;;  %5556 = vmatpush.msra.mxu3 %v7457_v32  ;;  %v13600_v51 = vld [vmem:[#allocation40_spill] sm:$0xff]  ;;  %v4739_v31 = vadd.s32 %v11287_v8, %v13558_v25 }
 0x528   : > { %v4699_v15 = vadd.f32 %v13599_v22, %v4461_v27  ;;  %v11446_v13 = vsel %vm5219_vm10, %v5221_v35, %v5223_v56  ;;  %v11449_v53 = vsel %vm817_vm3, %v5322_v37, %v5323_v3  ;;  %v3722_v22 = vadd.s32 %v11002_v47, %v13600_v51 }
 0x529   : > { %v3683_v33 = vsel %vm3613_vm12, %v3551_v19, %v3648_v48 }
 0x52a   : > { %v3930_v27 = vsel %vm11428_vm15, %v3683_v33, 0.0  ;;  %v11455_v12 = vsel %vm4841_vm1, %v4699_v15, 0.0  ;;  %7423 = vmatmul.msk.f32.gmra.mxu3 %vm11428_vm15, %v3683_v33  ;;  %v4738_v15 = vadd.s32 %v11287_v8, %v13556_v45  ;;  %vm3757_vm15 = vcmp.ge.s32.totalorder %v3722_v22, 0 }
 0x52b   : > { %v4341_v39 = vpop.f32.mrf.mxu0  ;;  %v4463_v35 = vpop.f32.mrf.mxu1  ;;  %v4020_v6 = vrot.slane %v3930_v27, 1  ;;  %v4124_v26 = vrot.slane %v3930_v27, 2  ;;  %vm5083_vm0 = vcmp.ge.f32.partialorder %v11455_v12, 0.0  ;;  %v5118_v37 = vmul.f32 0.1, %v11455_v12 }
 0x52c   : > { %v4342_v19 = vadd.f32 %v4341_v39, %v4220_v61  ;;  %v3553_v46 = vpop.f32.mrf.mxu2  ;;  %v6749_v48 = vrot.slane %v11455_v12, 6  ;;  %vm3792_vm12 = vcmp.lt.s32.totalorder %v3722_v22, 1000  ;;  %vm4773_vm1 = vcmp.ge.s32.totalorder %v4738_v15, 0  ;;  %v7496_v22 = vld [vmem:[%s13145_s3 + $0x358] sm:$0xff] }
 0x52d   : > { %v3554_v23 = vadd.f32 %v3553_v46, %v11078_v36  ;;  %v4021_v32 = vsel %vm709_vm2, %v4018_v62, %v4020_v6  ;;  %v4125_v27 = vsel %vm817_vm3, %v4122_v55, %v4124_v26  ;;  %v5153_v61 = vsel %vm5083_vm0, %v11455_v12, %v5118_v37  ;;  %v13604_v12 = vld [vmem:[#allocation53_spill] sm:$0xff]  ;;  %vm11517_vm6 = vmand %vm3757_vm15, %vm3792_vm12  ;;  %6366 = vmatpush.msrb.mxu1 %v7496_v22 }
 0x52e   : > { %v4464_v39 = vadd.f32 %v4463_v35, %v4342_v19  ;;  %4388 = vmatmul.f32.gmra.mxu0 %v4021_v32  ;;  %4510 = vmatmul.f32.gmra.mxu1 %v4125_v27  ;;  %v5225_v4 = vrot.slane %v5153_v61, 5  ;;  %v5325_v33 = vrot.slane %v5153_v61, 2  ;;  %v11479_v36 = vsel %vm3116_vm14, %v6747_v43, %v6749_v48  ;;  %v4222_v55 = vpop.f32.mrf.mxu3 }
 0x52f   : > { %13603 = vst [vmem:[#allocation51_spill] sm:$0xff] %v11479_v36  ;;  %v3649_v62 = vmul.f32 0.1, %v3554_v23  ;;  %5451 = vmatmul.f32.gmra.mxu2 %v5153_v61  ;;  %vm3614_vm11 = vcmp.ge.f32.partialorder %v3554_v23, 0.0  ;;  %v4223_v37 = vadd.f32 %v11285_v54, %v4222_v55  ;;  %vm4808_vm4 = vcmp.lt.s32.totalorder %v4738_v15, 1000 }
 0x530   : > { %v4700_v35 = vadd.f32 %v13604_v12, %v4464_v39  ;;  %v11489_v19 = vsel %vm5219_vm10, %v5223_v56, %v5225_v4  ;;  %v11492_v43 = vsel %vm817_vm3, %v5323_v3, %v5325_v33  ;;  %v13605_v12 = vld [vmem:[#allocation41_spill] sm:$0xff]  ;;  %vm4843_vm0 = vmand %vm4773_vm1, %vm4808_vm4  ;;  %vm4809_vm15 = vcmp.lt.s32.totalorder %v4739_v31, 1000 }
 0x531   : > { %v3684_v46 = vsel %vm3614_vm11, %v3554_v23, %v3649_v62  ;;  %v4740_v22 = vadd.s32 %v11287_v8, %v13560_v16 }
 0x532   : > { %v11496_v0 = vsel %vm11474_vm8, %v3684_v46, 0.0  ;;  %v11498_v32 = vsel %vm4842_vm9, %v4700_v35, 0.0  ;;  %7424 = vmatmul.msk.f32.gmra.mxu3 %vm11474_vm8, %v3684_v46  ;;  %v3723_v35 = vadd.s32 %v11002_v47, %v13605_v12  ;;  %vm4774_vm9 = vcmp.ge.s32.totalorder %v4739_v31, 0 }
 0x533   : > { %v4344_v27 = vpop.f32.mrf.mxu0  ;;  %v4466_v61 = vpop.f32.mrf.mxu1  ;;  %v4022_v56 = vrot.slane %v11496_v0, 1  ;;  %v4126_v39 = vrot.slane %v11496_v0, 2  ;;  %vm5084_vm5 = vcmp.ge.f32.partialorder %v11498_v32, 0.0  ;;  %v5119_v3 = vmul.f32 0.1, %v11498_v32 }
 0x534   : > { %v4345_v23 = vadd.f32 %v4344_v27, %v4223_v37  ;;  %v3556_v62 = vpop.f32.mrf.mxu2  ;;  %v6751_v55 = vrot.slane %v11498_v32, 6  ;;  %vm3758_vm8 = vcmp.ge.s32.totalorder %v3723_v35, 0  ;;  %vm3793_vm11 = vcmp.lt.s32.totalorder %v3723_v35, 1000  ;;  %v7472_v35 = vld [vmem:[%s13143_s1 + $0x418] sm:$0xff] }
 0x535   : > { %v3557_v36 = vadd.f32 %v3556_v62, %v11091_v5  ;;  %v4023_v0 = vsel %vm709_vm2, %v4020_v6, %v4022_v56  ;;  %v4127_v45 = vsel %vm817_vm3, %v4124_v26, %v4126_v39  ;;  %v5154_v37 = vsel %vm5084_vm5, %v11498_v32, %v5119_v3  ;;  %v13609_v26 = vld [vmem:[#allocation56_spill] sm:$0xff]  ;;  %vm11559_vm1 = vmand %vm3758_vm8, %vm3793_vm11  ;;  %5676 = vmatpush.msra.mxu0 %v7472_v35 }
 0x536   : > { %v4467_v27 = vadd.f32 %v4466_v61, %v4345_v23  ;;  %4391 = vmatmul.f32.gmra.mxu0 %v4023_v0  ;;  %4513 = vmatmul.f32.gmra.mxu1 %v4127_v45  ;;  %v5227_v11 = vrot.slane %v5154_v37, 5  ;;  %v5327_v46 = vrot.slane %v5154_v37, 2  ;;  %v11522_v25 = vsel %vm3116_vm14, %v6749_v48, %v6751_v55  ;;  %v4225_v6 = vpop.f32.mrf.mxu3  ;;  %v7456_v48 = vld [vmem:[%s13143_s1 + $0x398] sm:$0xff]  ;;  %vm4844_vm5 = vmand %vm4774_vm9, %vm4809_vm15 }
 0x537   : > { %13608 = vst [vmem:[#allocation54_spill] sm:$0xff] %v11522_v25  ;;  %v3650_v5 = vmul.f32 0.1, %v3557_v36  ;;  %5454 = vmatmul.f32.gmra.mxu2 %v5154_v37  ;;  %vm3615_vm13 = vcmp.ge.f32.partialorder %v3557_v36, 0.0  ;;  %v4226_v32 = vadd.f32 %v11285_v54, %v4225_v6  ;;  %5557 = vmatpush.msra.mxu3 %v7456_v48  ;;  %vm4810_vm8 = vcmp.lt.s32.totalorder %v4740_v22, 1000 }
 0x538   : > { %v4701_v45 = vadd.f32 %v13609_v26, %v4467_v27  ;;  %v11535_v61 = vsel %vm5219_vm10, %v5225_v4, %v5227_v11  ;;  %v11538_v3 = vsel %vm817_vm3, %v5325_v33, %v5327_v46  ;;  %v13610_v26 = vld [vmem:[#allocation43_spill] sm:$0xff] }
 0x539   : > { %v3685_v15 = vsel %vm3615_vm13, %v3557_v36, %v3650_v5 }
 0x53a   : > { %v3932_v23 = vsel %vm11517_vm6, %v3685_v15, 0.0  ;;  %v11542_v62 = vsel %vm4843_vm0, %v4701_v45, 0.0  ;;  %7425 = vmatmul.msk.f32.gmra.mxu3 %vm11517_vm6, %v3685_v15  ;;  %v3724_v45 = vadd.s32 %v11002_v47, %v13610_v26  ;;  %vm4775_vm0 = vcmp.ge.s32.totalorder %v4740_v22, 0 }
 0x53b   : > { %v4347_v0 = vpop.f32.mrf.mxu0  ;;  %v4469_v37 = vpop.f32.mrf.mxu1  ;;  %v4024_v27 = vrot.slane %v3932_v23, 1  ;;  %v4128_v4 = vrot.slane %v3932_v23, 2  ;;  %vm5085_vm12 = vcmp.ge.f32.partialorder %v11542_v62, 0.0  ;;  %v5120_v33 = vmul.f32 0.1, %v11542_v62 }
 0x53c   : > { %v4348_v36 = vadd.f32 %v4347_v0, %v4226_v32  ;;  %v3559_v5 = vpop.f32.mrf.mxu2  ;;  %v6753_v6 = vrot.slane %v11542_v62, 6  ;;  %vm3759_vm6 = vcmp.ge.s32.totalorder %v3724_v45, 0  ;;  %vm3794_vm13 = vcmp.lt.s32.totalorder %v3724_v45, 1000  ;;  %v7495_v45 = vld [vmem:[%s13145_s3 + $0x350] sm:$0xff] }
 0x53d   : > { %v3560_v48 = vadd.f32 %v3559_v5, %v11107_v7  ;;  %v4025_v23 = vsel %vm709_vm2, %v4022_v56, %v4024_v27  ;;  %v4129_v25 = vsel %vm817_vm3, %v4126_v39, %v4128_v4  ;;  %v5155_v32 = vsel %vm5085_vm12, %v11542_v62, %v5120_v33  ;;  %v13614_v39 = vld [vmem:[#allocation59_spill] sm:$0xff]  ;;  %vm11602_vm9 = vmand %vm3759_vm6, %vm3794_vm13  ;;  %6367 = vmatpush.msrb.mxu1 %v7495_v45 }
 0x53e   : > { %v4470_v0 = vadd.f32 %v4469_v37, %v4348_v36  ;;  %4394 = vmatmul.f32.gmra.mxu0 %v4025_v23  ;;  %4516 = vmatmul.f32.gmra.mxu1 %v4129_v25  ;;  %v5229_v60 = vrot.slane %v5155_v32, 5  ;;  %v5329_v15 = vrot.slane %v5155_v32, 2  ;;  %v11564_v16 = vsel %vm3116_vm14, %v6751_v55, %v6753_v6  ;;  %v4228_v56 = vpop.f32.mrf.mxu3  ;;  %vm4845_vm12 = vmand %vm4775_vm0, %vm4810_vm8 }
 0x53f   : > { %13613 = vst [vmem:[#allocation57_spill] sm:$0xff] %v11564_v16  ;;  %v3651_v7 = vmul.f32 0.1, %v3560_v48  ;;  %5457 = vmatmul.f32.gmra.mxu2 %v5155_v32  ;;  %vm3616_vm4 = vcmp.ge.f32.partialorder %v3560_v48, 0.0  ;;  %v4229_v62 = vadd.f32 %v11285_v54, %v4228_v56  ;;  %v13615_v56 = vld [vmem:[#allocation46_spill] sm:$0xff]  ;;  %v4742_v45 = vadd.s32 %v11287_v8, %v13564_v29 }
 0x540   : > { %v4702_v25 = vadd.f32 %v13614_v39, %v4470_v0  ;;  %v11574_v37 = vsel %vm5219_vm10, %v5227_v11, %v5229_v60  ;;  %v11577_v55 = vsel %vm817_vm3, %v5327_v46, %v5329_v15  ;;  %v3725_v39 = vadd.s32 %v11002_v47, %v13615_v56 }
 0x541   : > { %v3686_v33 = vsel %vm3616_vm4, %v3560_v48, %v3651_v7 }
 0x542   : > { %v11581_v31 = vsel %vm11559_vm1, %v3686_v33, 0.0  ;;  %v11583_v36 = vsel %vm4844_vm5, %v4702_v25, 0.0  ;;  %7426 = vmatmul.msk.f32.gmra.mxu3 %vm11559_vm1, %v3686_v33  ;;  %v4741_v25 = vadd.s32 %v11287_v8, %v13562_v28  ;;  %vm3760_vm1 = vcmp.ge.s32.totalorder %v3725_v39, 0 }
 0x543   : > { %v4350_v5 = vpop.f32.mrf.mxu0  ;;  %v4472_v23 = vpop.f32.mrf.mxu1  ;;  %v4026_v11 = vrot.slane %v11581_v31, 1  ;;  %v4130_v32 = vrot.slane %v11581_v31, 2  ;;  %vm5086_vm11 = vcmp.ge.f32.partialorder %v11583_v36, 0.0  ;;  %v5121_v46 = vmul.f32 0.1, %v11583_v36 }
 0x544   : > { %v4351_v48 = vadd.f32 %v4350_v5, %v4229_v62  ;;  %v3562_v0 = vpop.f32.mrf.mxu2  ;;  %v6755_v7 = vrot.slane %v11583_v36, 6  ;;  %vm3795_vm4 = vcmp.lt.s32.totalorder %v3725_v39, 1000  ;;  %vm4776_vm5 = vcmp.ge.s32.totalorder %v4741_v25, 0  ;;  %v7471_v39 = vld [vmem:[%s13143_s1 + $0x410] sm:$0xff] }
 0x545   : > { %v3563_v35 = vadd.f32 %v3562_v0, %v11120_v41  ;;  %v4027_v31 = vsel %vm709_vm2, %v4024_v27, %v4026_v11  ;;  %v4131_v16 = vsel %vm817_vm3, %v4128_v4, %v4130_v32  ;;  %v5156_v62 = vsel %vm5086_vm11, %v11583_v36, %v5121_v46  ;;  %v13619_v4 = vld [vmem:[#allocation23_spill] sm:$0xff]  ;;  %vm11644_vm0 = vmand %vm3760_vm1, %vm3795_vm4  ;;  %5677 = vmatpush.msra.mxu0 %v7471_v39 }
 0x546   : > { %v4473_v5 = vadd.f32 %v4472_v23, %v4351_v48  ;;  %4397 = vmatmul.f32.gmra.mxu0 %v4027_v31  ;;  %4519 = vmatmul.f32.gmra.mxu1 %v4131_v16  ;;  %v5231_v26 = vrot.slane %v5156_v62, 5  ;;  %v5331_v33 = vrot.slane %v5156_v62, 2  ;;  %v11607_v28 = vsel %vm3116_vm14, %v6753_v6, %v6755_v7  ;;  %v4231_v27 = vpop.f32.mrf.mxu3  ;;  %v7455_v6 = vld [vmem:[%s13143_s1 + $0x390] sm:$0xff] }
 0x547   : > { %13618 = vst [vmem:[#allocation60_spill] sm:$0xff] %v11607_v28  ;;  %v3652_v41 = vmul.f32 0.1, %v3563_v35  ;;  %5460 = vmatmul.f32.gmra.mxu2 %v5156_v62  ;;  %vm3617_vm15 = vcmp.ge.f32.partialorder %v3563_v35, 0.0  ;;  %v4232_v36 = vadd.f32 %v11285_v54, %v4231_v27  ;;  %5558 = vmatpush.msra.mxu3 %v7455_v6  ;;  %vm4811_vm6 = vcmp.lt.s32.totalorder %v4741_v25, 1000 }
 0x548   : > { %v4703_v16 = vadd.f32 %v13619_v4, %v4473_v5  ;;  %v11620_v23 = vsel %vm5219_vm10, %v5229_v60, %v5231_v26  ;;  %v11623_v46 = vsel %vm817_vm3, %v5329_v15, %v5331_v33  ;;  %v13620_v4 = vld [vmem:[#allocation49_spill] sm:$0xff]  ;;  %vm4846_vm11 = vmand %vm4776_vm5, %vm4811_vm6  ;;  %vm4812_vm1 = vcmp.lt.s32.totalorder %v4742_v45, 1000 }
 0x549   : > { %v3687_v22 = vsel %vm3617_vm15, %v3563_v35, %v3652_v41 }
 0x54a   : > { %v3934_v48 = vsel %vm11602_vm9, %v3687_v22, 0.0  ;;  %v11627_v0 = vsel %vm4845_vm12, %v4703_v16, 0.0  ;;  %7427 = vmatmul.msk.f32.gmra.mxu3 %vm11602_vm9, %v3687_v22  ;;  %v3726_v16 = vadd.s32 %v11002_v47, %v13620_v4  ;;  %vm4777_vm12 = vcmp.ge.s32.totalorder %v4742_v45, 0 }
 0x54b   : > { %v4353_v31 = vpop.f32.mrf.mxu0  ;;  %v4475_v62 = vpop.f32.mrf.mxu1  ;;  %v4028_v5 = vrot.slane %v3934_v48, 1  ;;  %v4132_v60 = vrot.slane %v3934_v48, 2  ;;  %vm5087_vm13 = vcmp.ge.f32.partialorder %v11627_v0, 0.0  ;;  %v5122_v15 = vmul.f32 0.1, %v11627_v0 }
 0x54c   : > { %v4354_v35 = vadd.f32 %v4353_v31, %v4232_v36  ;;  %v3565_v41 = vpop.f32.mrf.mxu2  ;;  %v6757_v27 = vrot.slane %v11627_v0, 6  ;;  %vm3761_vm9 = vcmp.ge.s32.totalorder %v3726_v16, 0  ;;  %vm3796_vm15 = vcmp.lt.s32.totalorder %v3726_v16, 1000  ;;  %v7494_v16 = vld [vmem:[%s13145_s3 + $0x348] sm:$0xff] }
 0x54d   : > { %v3566_v6 = vadd.f32 %v3565_v41, %v11136_v1  ;;  %v4029_v48 = vsel %vm709_vm2, %v4026_v11, %v4028_v5  ;;  %v4133_v28 = vsel %vm817_vm3, %v4130_v32, %v4132_v60  ;;  %v5157_v36 = vsel %vm5087_vm13, %v11627_v0, %v5122_v15  ;;  %v13624_v32 = vld [vmem:[#allocation7_spill] sm:$0xff]  ;;  %vm11683_vm5 = vmand %vm3761_vm9, %vm3796_vm15  ;;  %6368 = vmatpush.msrb.mxu1 %v7494_v16 }
 0x54e   : > { %v4476_v31 = vadd.f32 %v4475_v62, %v4354_v35  ;;  %4400 = vmatmul.f32.gmra.mxu0 %v4029_v48  ;;  %4522 = vmatmul.f32.gmra.mxu1 %v4133_v28  ;;  %v5233_v56 = vrot.slane %v5157_v36, 5  ;;  %v5333_v22 = vrot.slane %v5157_v36, 2  ;;  %v11649_v29 = vsel %vm3116_vm14, %v6755_v7, %v6757_v27  ;;  %v4234_v11 = vpop.f32.mrf.mxu3  ;;  %vm4847_vm13 = vmand %vm4777_vm12, %vm4812_vm1 }
 0x54f   : > { %13623 = vst [vmem:[#allocation61_spill] sm:$0xff] %v11649_v29  ;;  %v3653_v1 = vmul.f32 0.1, %v3566_v6  ;;  %5463 = vmatmul.f32.gmra.mxu2 %v5157_v36  ;;  %vm3618_vm8 = vcmp.ge.f32.partialorder %v3566_v6, 0.0  ;;  %v4235_v0 = vadd.f32 %v11285_v54, %v4234_v11  ;;  %v13625_v11 = vld [vmem:[#allocation52_spill] sm:$0xff] }
 0x550   : > { %v4704_v28 = vadd.f32 %v13624_v32, %v4476_v31  ;;  %v11659_v62 = vsel %vm5219_vm10, %v5231_v26, %v5233_v56  ;;  %v11662_v7 = vsel %vm817_vm3, %v5331_v33, %v5333_v22  ;;  %v3727_v32 = vadd.s32 %v11002_v47, %v13625_v11 }
 0x551   : > { %v3688_v15 = vsel %vm3618_vm8, %v3566_v6, %v3653_v1 }
 0x552   : > { %v3935_v25 = vsel %vm11644_vm0, %v3688_v15, 0.0  ;;  %v11666_v35 = vsel %vm4846_vm11, %v4704_v28, 0.0  ;;  %7428 = vmatmul.msk.f32.gmra.mxu3 %vm11644_vm0, %v3688_v15  ;;  %v4743_v28 = vadd.s32 %v11287_v8, %v13566_v34  ;;  %vm3762_vm0 = vcmp.ge.s32.totalorder %v3727_v32, 0 }
 0x553   : > { %v4356_v41 = vpop.f32.mrf.mxu0  ;;  %v4478_v48 = vpop.f32.mrf.mxu1  ;;  %v4030_v36 = vrot.slane %v3935_v25, 1  ;;  %v4134_v31 = vrot.slane %v3935_v25, 2  ;;  %vm5088_vm4 = vcmp.ge.f32.partialorder %v11666_v35, 0.0  ;;  %v5123_v26 = vmul.f32 0.1, %v11666_v35 }
 0x554   : > { %v4357_v33 = vadd.f32 %v4356_v41, %v4235_v0  ;;  %v3568_v6 = vpop.f32.mrf.mxu2  ;;  %v6759_v1 = vrot.slane %v11666_v35, 6  ;;  %vm3797_vm8 = vcmp.lt.s32.totalorder %v3727_v32, 1000  ;;  %vm4778_vm11 = vcmp.ge.s32.totalorder %v4743_v28, 0  ;;  %v7454_v32 = vld [vmem:[%s13143_s1 + $0x388] sm:$0xff] }
 0x555   : > { %v3569_v39 = vadd.f32 %v3568_v6, %v11149_v24  ;;  %v4031_v25 = vsel %vm709_vm2, %v4028_v5, %v4030_v36  ;;  %v4135_v29 = vsel %vm817_vm3, %v4132_v60, %v4134_v31  ;;  %v5158_v0 = vsel %vm5088_vm4, %v11666_v35, %v5123_v26  ;;  %v13629_v60 = vld [vmem:[#allocation66_spill] sm:$0xff]  ;;  %vm11722_vm12 = vmand %vm3762_vm0, %vm3797_vm8  ;;  %5559 = vmatpush.msra.mxu3 %v7454_v32 }
 0x556   : > { %v4479_v41 = vadd.f32 %v4478_v48, %v4357_v33  ;;  %4403 = vmatmul.f32.gmra.mxu0 %v4031_v25  ;;  %4525 = vmatmul.f32.gmra.mxu1 %v4135_v29  ;;  %v5235_v4 = vrot.slane %v5158_v0, 5  ;;  %v5335_v15 = vrot.slane %v5158_v0, 2  ;;  %v11688_v34 = vsel %vm3116_vm14, %v6757_v27, %v6759_v1  ;;  %v4237_v5 = vpop.f32.mrf.mxu3 }
 0x557   : > { %13628 = vst [vmem:[#allocation64_spill] sm:$0xff] %v11688_v34  ;;  %v3654_v24 = vmul.f32 0.1, %v3569_v39  ;;  %5466 = vmatmul.f32.gmra.mxu2 %v5158_v0  ;;  %vm3619_vm6 = vcmp.ge.f32.partialorder %v3569_v39, 0.0  ;;  %v4238_v35 = vadd.f32 %v11285_v54, %v4237_v5  ;;  %vm4813_vm9 = vcmp.lt.s32.totalorder %v4743_v28, 1000  ;;  %v13630_v5 = vld [vmem:[#allocation55_spill] sm:$0xff] }
 0x558   : > { %v4705_v29 = vadd.f32 %v13629_v60, %v4479_v41  ;;  %v11698_v48 = vsel %vm5219_vm10, %v5233_v56, %v5235_v4  ;;  %v11701_v27 = vsel %vm817_vm3, %v5333_v22, %v5335_v15  ;;  %v3728_v60 = vadd.s32 %v11002_v47, %v13630_v5  ;;  %vm4848_vm4 = vmand %vm4778_vm11, %vm4813_vm9 }
 0x559   : > { %v3689_v26 = vsel %vm3619_vm6, %v3569_v39, %v3654_v24 }
 0x55a   : > { %v3936_v45 = vsel %vm11683_vm5, %v3689_v26, 0.0  ;;  %v11705_v33 = vsel %vm4847_vm13, %v4705_v29, 0.0  ;;  %7429 = vmatmul.msk.f32.gmra.mxu3 %vm11683_vm5, %v3689_v26  ;;  %v4744_v29 = vadd.s32 %v11287_v8, %v13568_v30  ;;  %vm3763_vm5 = vcmp.ge.s32.totalorder %v3728_v60, 0 }
 0x55b   : > { %v4359_v6 = vpop.f32.mrf.mxu0  ;;  %v4481_v25 = vpop.f32.mrf.mxu1  ;;  %v4032_v0 = vrot.slane %v3936_v45, 1  ;;  %v4136_v41 = vrot.slane %v3936_v45, 2  ;;  %vm5089_vm15 = vcmp.ge.f32.partialorder %v11705_v33, 0.0  ;;  %v5124_v56 = vmul.f32 0.1, %v11705_v33 }
 0x55c   : > { %v4360_v22 = vadd.f32 %v4359_v6, %v4238_v35  ;;  %v3571_v39 = vpop.f32.mrf.mxu2  ;;  %v6761_v24 = vrot.slane %v11705_v33, 6  ;;  %vm3798_vm6 = vcmp.lt.s32.totalorder %v3728_v60, 1000  ;;  %vm4779_vm13 = vcmp.ge.s32.totalorder %v4744_v29, 0  ;;  %v7470_v60 = vld [vmem:[%s13143_s1 + $0x408] sm:$0xff] }
 0x55d   : > { %v3572_v16 = vadd.f32 %v3571_v39, %v11165_v57  ;;  %v4033_v45 = vsel %vm709_vm2, %v4030_v36, %v4032_v0  ;;  %v4137_v34 = vsel %vm817_vm3, %v4134_v31, %v4136_v41  ;;  %v5159_v35 = vsel %vm5089_vm15, %v11705_v33, %v5124_v56  ;;  %v13634_v31 = vld [vmem:[#allocation27_spill] sm:$0xff]  ;;  %vm11761_vm11 = vmand %vm3763_vm5, %vm3798_vm6  ;;  %5678 = vmatpush.msra.mxu0 %v7470_v60 }
 0x55e   : > { %v4482_v6 = vadd.f32 %v4481_v25, %v4360_v22  ;;  %4406 = vmatmul.f32.gmra.mxu0 %v4033_v45  ;;  %4528 = vmatmul.f32.gmra.mxu1 %v4137_v34  ;;  %v5237_v11 = vrot.slane %v5159_v35, 5  ;;  %v5337_v26 = vrot.slane %v5159_v35, 2  ;;  %v11727_v30 = vsel %vm3116_vm14, %v6759_v1, %v6761_v24  ;;  %v4240_v36 = vpop.f32.mrf.mxu3 }
 0x55f   : > { %13633 = vst [vmem:[#allocation8_spill] sm:$0xff] %v11727_v30  ;;  %v3655_v57 = vmul.f32 0.1, %v3572_v16  ;;  %5469 = vmatmul.f32.gmra.mxu2 %v5159_v35  ;;  %vm3620_vm1 = vcmp.ge.f32.partialorder %v3572_v16, 0.0  ;;  %v4241_v33 = vadd.f32 %v11285_v54, %v4240_v36  ;;  %vm4814_vm0 = vcmp.lt.s32.totalorder %v4744_v29, 1000  ;;  %v13635_v36 = vld [vmem:[#allocation58_spill] sm:$0xff] }
 0x560   : > { %v4706_v34 = vadd.f32 %v13634_v31, %v4482_v6  ;;  %v11737_v25 = vsel %vm5219_vm10, %v5235_v4, %v5237_v11  ;;  %v11740_v1 = vsel %vm817_vm3, %v5335_v15, %v5337_v26  ;;  %v3729_v31 = vadd.s32 %v11002_v47, %v13635_v36  ;;  %vm4849_vm15 = vmand %vm4779_vm13, %vm4814_vm0 }
 0x561   : > { %v3690_v56 = vsel %vm3620_vm1, %v3572_v16, %v3655_v57 }
 0x562   : > { %v3937_v28 = vsel %vm11722_vm12, %v3690_v56, 0.0  ;;  %v11744_v22 = vsel %vm4848_vm4, %v4706_v34, 0.0  ;;  %7430 = vmatmul.msk.f32.gmra.mxu3 %vm11722_vm12, %v3690_v56  ;;  %v4745_v34 = vadd.s32 %v11287_v8, %v13570_v14  ;;  %vm3764_vm12 = vcmp.ge.s32.totalorder %v3729_v31, 0 }
 0x563   : > { %v4362_v39 = vpop.f32.mrf.mxu0  ;;  %v4484_v45 = vpop.f32.mrf.mxu1  ;;  %v4034_v35 = vrot.slane %v3937_v28, 1  ;;  %v4138_v6 = vrot.slane %v3937_v28, 2  ;;  %vm5090_vm8 = vcmp.ge.f32.partialorder %v11744_v22, 0.0  ;;  %v5125_v4 = vmul.f32 0.1, %v11744_v22 }
 0x564   : > { %v4363_v15 = vadd.f32 %v4362_v39, %v4241_v33  ;;  %v3574_v16 = vpop.f32.mrf.mxu2  ;;  %v6763_v57 = vrot.slane %v11744_v22, 6  ;;  %vm3799_vm1 = vcmp.lt.s32.totalorder %v3729_v31, 1000  ;;  %vm4780_vm4 = vcmp.ge.s32.totalorder %v4745_v34, 0  ;;  %v11822_v31 = vld [vmem:[%s13146_s4 + $0x1] ss:$0 sm:$0xff] }
 0x565   : > { %v3575_v32 = vadd.f32 %v3574_v16, %v11178_v38  ;;  %v4035_v28 = vsel %vm709_vm2, %v4032_v0, %v4034_v35  ;;  %v4139_v30 = vsel %vm817_vm3, %v4136_v41, %v4138_v6  ;;  %v5160_v33 = vsel %vm5090_vm8, %v11744_v22, %v5125_v4  ;;  %v13639_v41 = vld [vmem:[#allocation29_spill] sm:$0xff]  ;;  %vm11808_vm13 = vmand %vm3764_vm12, %vm3799_vm1 }
 0x566   : > { %v4485_v39 = vadd.f32 %v4484_v45, %v4363_v15  ;;  %4409 = vmatmul.f32.gmra.mxu0 %v4035_v28  ;;  %4531 = vmatmul.f32.gmra.mxu1 %v4139_v30  ;;  %v5239_v5 = vrot.slane %v5160_v33, 5  ;;  %v5339_v56 = vrot.slane %v5160_v33, 2  ;;  %v11766_v14 = vsel %vm3116_vm14, %v6761_v24, %v6763_v57  ;;  %v4243_v0 = vpop.f32.mrf.mxu3 }
 0x567   : > { %13638 = vst [vmem:[#allocation9_spill] sm:$0xff] %v11766_v14  ;;  %v3656_v38 = vmul.f32 0.1, %v3575_v32  ;;  %5472 = vmatmul.f32.gmra.mxu2 %v5160_v33  ;;  %vm3621_vm9 = vcmp.ge.f32.partialorder %v3575_v32, 0.0  ;;  %v4244_v22 = vadd.f32 %v11285_v54, %v4243_v0  ;;  %vm4815_vm5 = vcmp.lt.s32.totalorder %v4745_v34, 1000 }
 0x568   : > { %v4707_v30 = vadd.f32 %v13639_v41, %v4485_v39  ;;  %v11776_v45 = vsel %vm5219_vm10, %v5237_v11, %v5239_v5  ;;  %v11779_v24 = vsel %vm817_vm3, %v5337_v26, %v5339_v56  ;;  %v4746_v41 = vadd.s32 %v11287_v8, %v13572_v2  ;;  %vm4850_vm8 = vmand %vm4780_vm4, %vm4815_vm5 }
 0x569   : > { %v3691_v4 = vsel %vm3621_vm9, %v3575_v32, %v3656_v38  ;;  %v13640_v38 = vld [vmem:[#allocation62_spill] sm:$0xff] }
 0x56a   : > { %v11783_v29 = vsel %vm11761_vm11, %v3691_v4, 0.0  ;;  %v11785_v15 = vsel %vm4849_vm15, %v4707_v30, 0.0  ;;  %7431 = vmatmul.msk.f32.gmra.mxu3 %vm11761_vm11, %v3691_v4  ;;  %v3730_v0 = vadd.s32 %v11002_v47, %v13640_v38  ;;  %vm4781_vm15 = vcmp.ge.s32.totalorder %v4746_v41, 0 }
 0x56b   : > { %v4365_v54 = vpop.f32.mrf.mxu0  ;;  %v4487_v16 = vpop.f32.mrf.mxu1  ;;  %v4036_v11 = vrot.slane %v11783_v29, 1  ;;  %v4140_v28 = vrot.slane %v11783_v29, 2  ;;  %vm5091_vm6 = vcmp.ge.f32.partialorder %v11785_v15, 0.0  ;;  %v5126_v26 = vmul.f32 0.1, %v11785_v15 }
 0x56c   : > { %v4366_v32 = vadd.f32 %v4365_v54, %v4244_v22  ;;  %v3577_v33 = vpop.f32.mrf.mxu2  ;;  %v6765_v39 = vrot.slane %v11785_v15, 6  ;;  %vm3765_vm11 = vcmp.ge.s32.totalorder %v3730_v0, 0  ;;  %vm3800_vm9 = vcmp.lt.s32.totalorder %v3730_v0, 1000  ;;  %v7469_v0 = vld [vmem:[%s13143_s1 + $0x400] sm:$0xff] }
 0x56d   : > { %v3578_v30 = vadd.f32 %v3577_v33, %v11191_v10  ;;  %v4037_v60 = vsel %vm709_vm2, %v4034_v35, %v4036_v11  ;;  %v4141_v29 = vsel %vm817_vm3, %v4138_v6, %v4140_v28  ;;  %v11802_v22 = vsel %vm5091_vm6, %v11785_v15, %v5126_v26  ;;  %v13644_v15 = vld [vmem:[#allocation32_spill] sm:$0xff]  ;;  %vm11856_vm4 = vmand %vm3765_vm11, %vm3800_vm9  ;;  %5679 = vmatpush.msra.mxu0 %v7469_v0 }
 0x56e   : > { %v4488_v54 = vadd.f32 %v4487_v16, %v4366_v32  ;;  %4412 = vmatmul.f32.gmra.mxu0 %v4037_v60  ;;  %4534 = vmatmul.f32.gmra.mxu1 %v4141_v29  ;;  %v5241_v36 = vrot.slane %v11802_v22, 5  ;;  %v5341_v4 = vrot.slane %v11802_v22, 2  ;;  %v11813_v10 = vsel %vm3116_vm14, %v6763_v57, %v6765_v39  ;;  %v4246_v6 = vpop.f32.mrf.mxu3  ;;  %v7493_v57 = vld [vmem:[%s13145_s3 + $0x340] sm:$0xff] }
 0x56f   : > { %13643 = vst [vmem:[#allocation10_spill] sm:$0xff] %v11813_v10  ;;  %v3657_v35 = vmul.f32 0.1, %v3578_v30  ;;  %5475 = vmatmul.f32.gmra.mxu2 %v11802_v22  ;;  %vm3622_vm0 = vcmp.ge.f32.partialorder %v3578_v30, 0.0  ;;  %v4247_v26 = vadd.f32 %v11822_v31, %v4246_v6  ;;  %v7453_v32 = vld [vmem:[%s13143_s1 + $0x380] sm:$0xff]  ;;  %6369 = vmatpush.msrb.mxu1 %v7493_v57  ;;  %vm4816_vm12 = vcmp.lt.s32.totalorder %v4746_v41, 1000 }
 0x570   : > { %v4708_v16 = vadd.f32 %v13644_v15, %v4488_v54  ;;  %v11832_v34 = vsel %vm5219_vm10, %v5239_v5, %v5241_v36  ;;  %v11835_v33 = vsel %vm817_vm3, %v5339_v56, %v5341_v4  ;;  %5560 = vmatpush.msra.mxu3 %v7453_v32  ;;  %v13645_v32 = vld [vmem:[#allocation63_spill] sm:$0xff]  ;;  %v4747_v10 = vadd.s32 %v11287_v8, %v13574_v44  ;;  %vm4851_vm6 = vmand %vm4781_vm15, %vm4816_vm12 }
 0x571   : > { %v3692_v60 = vsel %vm3622_vm0, %v3578_v30, %v3657_v35 }
 0x572   : > { %v3939_v29 = vsel %vm11808_vm13, %v3692_v60, 0.0  ;;  %v11839_v22 = vsel %vm4850_vm8, %v4708_v16, 0.0  ;;  %7432 = vmatmul.msk.f32.gmra.mxu3 %vm11808_vm13, %v3692_v60  ;;  %v3731_v16 = vadd.s32 %v11002_v47, %v13645_v32  ;;  %vm4782_vm8 = vcmp.ge.s32.totalorder %v4747_v10, 0 }
 0x573   : > { %v4368_v54 = vpop.f32.mrf.mxu0  ;;  %v4490_v6 = vpop.f32.mrf.mxu1  ;;  %v4038_v15 = vrot.slane %v3939_v29, 1  ;;  %v4142_v5 = vrot.slane %v3939_v29, 2  ;;  %vm5092_vm1 = vcmp.ge.f32.partialorder %v11839_v22, 0.0  ;;  %v5127_v56 = vmul.f32 0.1, %v11839_v22 }
 0x574   : > { %v4369_v30 = vadd.f32 %v4368_v54, %v4247_v26  ;;  %v3580_v35 = vpop.f32.mrf.mxu2  ;;  %v6767_v57 = vrot.slane %v11839_v22, 6  ;;  %vm3766_vm13 = vcmp.ge.s32.totalorder %v3731_v16, 0  ;;  %vm3801_vm0 = vcmp.lt.s32.totalorder %v3731_v16, 1000  ;;  %v7492_v16 = vld [vmem:[%s13145_s3 + $0x338] sm:$0xff] }
 0x575   : > { %v3581_v2 = vadd.f32 %v3580_v35, %v11212_v9  ;;  %v4039_v29 = vsel %vm709_vm2, %v4036_v11, %v4038_v15  ;;  %v4143_v38 = vsel %vm817_vm3, %v4140_v28, %v4142_v5  ;;  %v5162_v26 = vsel %vm5092_vm1, %v11839_v22, %v5127_v56  ;;  %v13649_v28 = vld [vmem:[#allocation11_spill] sm:$0xff]  ;;  %vm11895_vm15 = vmand %vm3766_vm13, %vm3801_vm0  ;;  %6370 = vmatpush.msrb.mxu1 %v7492_v16 }
 0x576   : > { %v4491_v54 = vadd.f32 %v4490_v6, %v4369_v30  ;;  %4415 = vmatmul.f32.gmra.mxu0 %v4039_v29  ;;  %4537 = vmatmul.f32.gmra.mxu1 %v4143_v38  ;;  %v5243_v14 = vrot.slane %v5162_v26, 5  ;;  %v5343_v60 = vrot.slane %v5162_v26, 2  ;;  %v11861_v44 = vsel %vm3116_vm14, %v6765_v39, %v6767_v57  ;;  %v4249_v11 = vpop.f32.mrf.mxu3 }
 0x577   : > { %13648 = vst [vmem:[#allocation67_spill] sm:$0xff] %v11861_v44  ;;  %v3658_v9 = vmul.f32 0.1, %v3581_v2  ;;  %5478 = vmatmul.f32.gmra.mxu2 %v5162_v26  ;;  %vm3623_vm5 = vcmp.ge.f32.partialorder %v3581_v2, 0.0  ;;  %v4250_v22 = vadd.f32 %v11822_v31, %v4249_v11  ;;  %vm4817_vm11 = vcmp.lt.s32.totalorder %v4747_v10, 1000  ;;  %v13650_v11 = vld [vmem:[#allocation65_spill] sm:$0xff] }
 0x578   : > { %v4709_v38 = vadd.f32 %v13649_v28, %v4491_v54  ;;  %v11871_v6 = vsel %vm5219_vm10, %v5241_v36, %v5243_v14  ;;  %v11874_v39 = vsel %vm817_vm3, %v5341_v4, %v5343_v60  ;;  %v3732_v28 = vadd.s32 %v11002_v47, %v13650_v11  ;;  %vm4852_vm1 = vmand %vm4782_vm8, %vm4817_vm11 }
 0x579   : > { %v3693_v56 = vsel %vm3623_vm5, %v3581_v2, %v3658_v9 }
 0x57a   : > { %v3940_v41 = vsel %vm11856_vm4, %v3693_v56, 0.0  ;;  %v11878_v30 = vsel %vm4851_vm6, %v4709_v38, 0.0  ;;  %7433 = vmatmul.msk.f32.gmra.mxu3 %vm11856_vm4, %v3693_v56  ;;  %v4748_v38 = vadd.s32 %v11287_v8, %v13576_v63  ;;  %vm3767_vm4 = vcmp.ge.s32.totalorder %v3732_v28, 0 }
 0x57b   : > { %v4371_v35 = vpop.f32.mrf.mxu0  ;;  %v4493_v29 = vpop.f32.mrf.mxu1  ;;  %v4040_v26 = vrot.slane %v3940_v41, 1  ;;  %v4144_v54 = vrot.slane %v3940_v41, 2  ;;  %vm5093_vm9 = vcmp.ge.f32.partialorder %v11878_v30, 0.0  ;;  %v5128_v36 = vmul.f32 0.1, %v11878_v30 }
 0x57c   : > { %v4372_v4 = vadd.f32 %v4371_v35, %v4250_v22  ;;  %v3583_v2 = vpop.f32.mrf.mxu2  ;;  %v6769_v9 = vrot.slane %v11878_v30, 6  ;;  %vm3802_vm5 = vcmp.lt.s32.totalorder %v3732_v28, 1000  ;;  %vm4783_vm6 = vcmp.ge.s32.totalorder %v4748_v38, 0 }
 0x57d   : > { %v3584_v0 = vadd.f32 %v3583_v2, %v11237_v42  ;;  %v4041_v41 = vsel %vm709_vm2, %v4038_v15, %v4040_v26  ;;  %v4145_v44 = vsel %vm817_vm3, %v4142_v5, %v4144_v54  ;;  %v5163_v22 = vsel %vm5093_vm9, %v11878_v30, %v5128_v36  ;;  %v13654_v5 = vld [vmem:[#allocation35_spill] sm:$0xff]  ;;  %vm11932_vm8 = vmand %vm3767_vm4, %vm3802_vm5 }
 0x57e   : > { %v4494_v35 = vadd.f32 %v4493_v29, %v4372_v4  ;;  %4418 = vmatmul.f32.gmra.mxu0 %v4041_v41  ;;  %4540 = vmatmul.f32.gmra.mxu1 %v4145_v44  ;;  %v5245_v32 = vrot.slane %v5163_v22, 5  ;;  %v5345_v56 = vrot.slane %v5163_v22, 2  ;;  %v11900_v63 = vsel %vm3116_vm14, %v6767_v57, %v6769_v9  ;;  %v4252_v15 = vpop.f32.mrf.mxu3 }
 0x57f   : > { %13653 = vst [vmem:[#allocation71_spill] sm:$0xff] %v11900_v63  ;;  %v3659_v42 = vmul.f32 0.1, %v3584_v0  ;;  %5481 = vmatmul.f32.gmra.mxu2 %v5163_v22  ;;  %vm3624_vm12 = vcmp.ge.f32.partialorder %v3584_v0, 0.0  ;;  %v4253_v30 = vadd.f32 %v11822_v31, %v4252_v15  ;;  %vm4818_vm0 = vcmp.lt.s32.totalorder %v4748_v38, 1000 }
 0x580   : > { %v4710_v44 = vadd.f32 %v13654_v5, %v4494_v35  ;;  %v11910_v29 = vsel %vm5219_vm10, %v5243_v14, %v5245_v32  ;;  %v11913_v57 = vsel %vm817_vm3, %v5343_v60, %v5345_v56  ;;  %vm4853_vm9 = vmand %vm4783_vm6, %vm4818_vm0 }
 0x581   : > { %v3694_v36 = vsel %vm3624_vm12, %v3584_v0, %v3659_v42  ;;  %v3733_v42 = vadd.s32 %v11002_v47, %v10073_v17 }
 0x582   : > { %v3941_v10 = vsel %vm11895_vm15, %v3694_v36, 0.0  ;;  %v11917_v4 = vsel %vm4852_vm1, %v4710_v44, 0.0  ;;  %7434 = vmatmul.msk.f32.gmra.mxu3 %vm11895_vm15, %v3694_v36  ;;  %v4751_v36 = vadd.s32 %v11287_v8, %v13581_v58 }
 0x583   : > { %v4374_v2 = vpop.f32.mrf.mxu0  ;;  %v4496_v41 = vpop.f32.mrf.mxu1  ;;  %v4042_v22 = vrot.slane %v3941_v10, 1  ;;  %v4146_v35 = vrot.slane %v3941_v10, 2  ;;  %vm5094_vm13 = vcmp.ge.f32.partialorder %v11917_v4, 0.0  ;;  %v5129_v14 = vmul.f32 0.1, %v11917_v4 }
 0x584   : > { %v4375_v60 = vadd.f32 %v4374_v2, %v4253_v30  ;;  %v3586_v15 = vpop.f32.mrf.mxu2  ;;  %v6771_v0 = vrot.slane %v11917_v4, 6  ;;  %vm3768_vm15 = vcmp.ge.s32.totalorder %v3733_v42, 0  ;;  %vm3803_vm12 = vcmp.lt.s32.totalorder %v3733_v42, 1000 }
 0x585   : > { %v3587_v5 = vadd.f32 %v3586_v15, %v11263_v50  ;;  %v4043_v44 = vsel %vm709_vm2, %v4040_v26, %v4042_v22  ;;  %v4147_v16 = vsel %vm817_vm3, %v4144_v54, %v4146_v35  ;;  %v5164_v10 = vsel %vm5094_vm13, %v11917_v4, %v5129_v14  ;;  %v13658_v4 = vld [vmem:[#allocation68_spill] sm:$0xff]  ;;  %vm11960_vm6 = vmand %vm3768_vm15, %vm3803_vm12 }
 0x586   : > { %v4497_v63 = vadd.f32 %v4496_v41, %v4375_v60  ;;  %4421 = vmatmul.f32.gmra.mxu0 %v4043_v44  ;;  %4543 = vmatmul.f32.gmra.mxu1 %v4147_v16  ;;  %v5247_v30 = vrot.slane %v5164_v10, 5  ;;  %v5347_v11 = vrot.slane %v5164_v10, 2  ;;  %v11937_v47 = vsel %vm3116_vm14, %v6769_v9, %v6771_v0  ;;  %v4255_v26 = vpop.f32.mrf.mxu3 }
 0x587   : > { %13657 = vst [vmem:[#allocation73_spill] sm:$0xff] %v11937_v47  ;;  %v3660_v50 = vmul.f32 0.1, %v3587_v5  ;;  %5484 = vmatmul.f32.gmra.mxu2 %v5164_v10  ;;  %vm3625_vm11 = vcmp.ge.f32.partialorder %v3587_v5, 0.0  ;;  %v4749_v54 = vadd.s32 %v11287_v8, %v13577_v21  ;;  %v4256_v28 = vadd.f32 %v11822_v31, %v4255_v26 }
 0x588   : > { %v4711_v2 = vadd.f32 %v13658_v4, %v4497_v63  ;;  %v11946_v41 = vsel %vm5219_vm10, %v5245_v32, %v5247_v30  ;;  %v11949_v9 = vsel %vm817_vm3, %v5345_v56, %v5347_v11 }
 0x589   : > { %v3695_v14 = vsel %vm3625_vm11, %v3587_v5, %v3660_v50  ;;  %vm4784_vm4 = vcmp.ge.s32.totalorder %v4749_v54, 0  ;;  %vm4819_vm5 = vcmp.lt.s32.totalorder %v4749_v54, 1000 }
 0x58a   : > { %v3942_v60 = vsel %vm11932_vm8, %v3695_v14, 0.0  ;;  %v4958_v15 = vsel %vm4853_vm9, %v4711_v2, 0.0  ;;  %7435 = vmatmul.msk.f32.gmra.mxu3 %vm11932_vm8, %v3695_v14  ;;  %vm4854_vm0 = vmand %vm4784_vm4, %vm4819_vm5  ;;  %v13662_v14 = vld [vmem:[#allocation69_spill] sm:$0xff]  ;;  %vm4821_vm4 = vcmp.lt.s32.totalorder %v4751_v36, 1000 }
 0x58b   : > { %v4377_v38 = vpop.f32.mrf.mxu0  ;;  %v4499_v44 = vpop.f32.mrf.mxu1  ;;  %v4044_v16 = vrot.slane %v3942_v60, 1  ;;  %v4148_v10 = vrot.slane %v3942_v60, 2  ;;  %vm5095_vm1 = vcmp.ge.f32.partialorder %v4958_v15, 0.0  ;;  %v5130_v63 = vmul.f32 0.1, %v4958_v15 }
 0x58c   : > { %v4378_v26 = vadd.f32 %v4377_v38, %v4256_v28  ;;  %v3589_v4 = vpop.f32.mrf.mxu2  ;;  %v6773_v32 = vrot.slane %v4958_v15, 6  ;;  %v7491_v38 = vld [vmem:[%s13145_s3 + $0x330] sm:$0xff] }
 0x58d   : > { %v3590_v56 = vadd.f32 %v3589_v4, %v11276_v49  ;;  %v4045_v5 = vsel %vm709_vm2, %v4042_v22, %v4044_v16  ;;  %v4149_v50 = vsel %vm817_vm3, %v4146_v35, %v4148_v10  ;;  %v5165_v2 = vsel %vm5095_vm1, %v4958_v15, %v5130_v63  ;;  %6371 = vmatpush.msrb.mxu1 %v7491_v38 }
 0x58e   : > { %v4500_v47 = vadd.f32 %v4499_v44, %v4378_v26  ;;  %4424 = vmatmul.f32.gmra.mxu0 %v4045_v5  ;;  %4546 = vmatmul.f32.gmra.mxu1 %v4149_v50  ;;  %v5249_v60 = vrot.slane %v5165_v2, 5  ;;  %v5349_v21 = vrot.slane %v5165_v2, 2  ;;  %v11965_v28 = vsel %vm3116_vm14, %v6771_v0, %v6773_v32  ;;  %v4258_v22 = vpop.f32.mrf.mxu3 }
 0x58f   : > { %13661 = vst [vmem:[#allocation75_spill] sm:$0xff] %v11965_v28  ;;  %v3661_v49 = vmul.f32 0.1, %v3590_v56  ;;  %5487 = vmatmul.f32.gmra.mxu2 %v5165_v2  ;;  %vm3626_vm13 = vcmp.ge.f32.partialorder %v3590_v56, 0.0  ;;  %v4750_v35 = vadd.s32 %v11287_v8, %v13578_v59  ;;  %v4259_v42 = vadd.f32 %v11822_v31, %v4258_v22 }
 0x590   : > { %v4712_v15 = vadd.f32 %v13662_v14, %v4500_v47  ;;  %v11977_v0 = vsel %vm5219_vm10, %v5247_v30, %v5249_v60  ;;  %v11980_v44 = vsel %vm817_vm3, %v5347_v11, %v5349_v21  ;;  %vm4786_vm1 = vcmp.ge.s32.totalorder %v4751_v36, 0 }
 0x591   : > { %v3696_v63 = vsel %vm3626_vm13, %v3590_v56, %v3661_v49  ;;  %vm4785_vm11 = vcmp.ge.s32.totalorder %v4750_v35, 0  ;;  %vm4820_vm9 = vcmp.lt.s32.totalorder %v4750_v35, 1000  ;;  %v13664_v35 = vld [vmem:[#allocation70_spill] sm:$0xff]  ;;  %vm4856_vm5 = vmand %vm4786_vm1, %vm4821_vm4 }
 0x592   : > { %v3943_v54 = vsel %vm11960_vm6, %v3696_v63, 0.0  ;;  %v4959_v26 = vsel %vm4854_vm0, %v4712_v15, 0.0  ;;  %7436 = vmatmul.msk.f32.gmra.mxu3 %vm11960_vm6, %v3696_v63  ;;  %vm4855_vm15 = vmand %vm4785_vm11, %vm4820_vm9 }
 0x593   : > { %v4380_v4 = vpop.f32.mrf.mxu0  ;;  %v4502_v47 = vpop.f32.mrf.mxu1  ;;  %v4046_v5 = vrot.slane %v3943_v54, 1  ;;  %v4150_v50 = vrot.slane %v3943_v54, 2  ;;  %vm5096_vm8 = vcmp.ge.f32.partialorder %v4959_v26, 0.0  ;;  %v5131_v2 = vmul.f32 0.1, %v4959_v26 }
 0x594   : > { %v4381_v22 = vadd.f32 %v4380_v4, %v4259_v42  ;;  %v6775_v30 = vrot.slane %v4959_v26, 6 }
 0x595   : > { %v4047_v11 = vsel %vm709_vm2, %v4044_v16, %v4046_v5  ;;  %v4151_v56 = vsel %vm817_vm3, %v4148_v10, %v4150_v50  ;;  %v5166_v49 = vsel %vm5096_vm8, %v4959_v26, %v5131_v2 }
 0x596   : > { %v4503_v14 = vadd.f32 %v4502_v47, %v4381_v22  ;;  %4427 = vmatmul.f32.gmra.mxu0 %v4047_v11  ;;  %4549 = vmatmul.f32.gmra.mxu1 %v4151_v56  ;;  %v5251_v15 = vrot.slane %v5166_v49, 5  ;;  %v5351_v38 = vrot.slane %v5166_v49, 2  ;;  %v11989_v54 = vsel %vm3116_vm14, %v6773_v32, %v6775_v30  ;;  %v4261_v42 = vpop.f32.mrf.mxu3 }
 0x597   : > { %13663 = vst [vmem:[#allocation77_spill] sm:$0xff] %v11989_v54  ;;  %5490 = vmatmul.f32.gmra.mxu2 %v5166_v49  ;;  %v4262_v16 = vadd.f32 %v11822_v31, %v4261_v42  ;;  %v4754_v54 = vadd.s32 %v11287_v8, %v13590_v20  ;;  %v13672_v20 = vld [vmem:[#allocation39_spill] sm:$0xff] }
 0x598   : > { %v4713_v63 = vadd.f32 %v13664_v35, %v4503_v14  ;;  %v11996_v10 = vsel %vm5219_vm10, %v5249_v60, %v5251_v15  ;;  %v11999_v26 = vsel %vm817_vm3, %v5349_v21, %v5351_v38 }
 0x599   : > { %vm4789_vm4 = vcmp.ge.s32.totalorder %v4754_v54, 0 }
 0x59a   : > { %v12001_v4 = vpop.f32.mrf.mxu2  ;;  %v4960_v32 = vsel %vm4855_vm15, %v4713_v63, 0.0  ;;  %5561 = vmatmul.f32.vlgmr.msra.gmra.mxu3 %v11397_v40  ;;  %v4752_v63 = vadd.s32 %v11287_v8, %v13582_v52 }
 0x59b   : > { %v4383_v47 = vpop.f32.mrf.mxu0  ;;  %v4505_v2 = vpop.f32.mrf.mxu1  ;;  %vm5097_vm12 = vcmp.ge.f32.partialorder %v4960_v32, 0.0  ;;  %v5132_v22 = vmul.f32 0.1, %v4960_v32  ;;  %v6777_v11 = vrot.slane %v4960_v32, 6 }
 0x59c   : > { %v4384_v56 = vadd.f32 %v4383_v47, %v4262_v16  ;;  %v13666_v16 = vld [vmem:[#allocation72_spill] sm:$0xff]  ;;  %vm4787_vm13 = vcmp.ge.s32.totalorder %v4752_v63, 0  ;;  %vm4822_vm0 = vcmp.lt.s32.totalorder %v4752_v63, 1000 }
 0x59d   : > { %v5167_v49 = vsel %vm5097_vm12, %v4960_v32, %v5132_v22  ;;  %v12005_v60 = vsel %vm3116_vm14, %v6775_v30, %v6777_v11  ;;  %v7490_v30 = vld [vmem:[%s13145_s3 + $0x328] sm:$0xff]  ;;  %vm4857_vm8 = vmand %vm4787_vm13, %vm4822_vm0 }
 0x59e   : > { %13665 = vst [vmem:[#allocation79_spill] sm:$0xff] %v12005_v60  ;;  %v4506_v14 = vadd.f32 %v4505_v2, %v4384_v56  ;;  %4430 = vmatmul.f32.gmra.mxu0 %v4046_v5  ;;  %4552 = vmatmul.f32.gmra.mxu1 %v4150_v50  ;;  %v5253_v21 = vrot.slane %v5167_v49, 5  ;;  %v5353_v42 = vrot.slane %v5167_v49, 2  ;;  %v4264_v35 = vpop.f32.mrf.mxu3  ;;  %v4753_v60 = vadd.s32 %v11287_v8, %v13586_v18 }
 0x59f   : > { %5493 = vmatmul.f32.gmra.mxu2 %v5167_v49  ;;  %v4265_v40 = vadd.f32 %v11822_v31, %v4264_v35  ;;  %6372 = vmatpush.msrb.mxu1 %v7490_v30 }
 0x5a0   : > { %v4714_v47 = vadd.f32 %v13666_v16, %v4506_v14  ;;  %v12015_v36 = vsel %vm5219_vm10, %v5251_v15, %v5253_v21  ;;  %v12018_v5 = vsel %vm817_vm3, %v5351_v38, %v5353_v42  ;;  %vm4788_vm9 = vcmp.ge.s32.totalorder %v4753_v60, 0 }
 0x5a1   : > { %vm4823_vm15 = vcmp.lt.s32.totalorder %v4753_v60, 1000 }
 0x5a2   : > { %v12020_v50 = vpop.f32.mrf.mxu2  ;;  %v4961_v32 = vsel %vm4856_vm5, %v4714_v47, 0.0  ;;  %5564 = vmatmul.f32.gmra.mxu3 %v11446_v13  ;;  %vm4858_vm12 = vmand %vm4788_vm9, %vm4823_vm15  ;;  %vm4824_vm5 = vcmp.lt.s32.totalorder %v4754_v54, 1000 }
 0x5a3   : > { %v4386_v2 = vpop.f32.mrf.mxu0  ;;  %v4508_v22 = vpop.f32.mrf.mxu1  ;;  %vm5098_vm6 = vcmp.ge.f32.partialorder %v4961_v32, 0.0  ;;  %v5133_v56 = vmul.f32 0.1, %v4961_v32  ;;  %v6779_v49 = vrot.slane %v4961_v32, 6 }
 0x5a4   : > { %v4387_v14 = vadd.f32 %v4386_v2, %v4265_v40  ;;  %v13668_v40 = vld [vmem:[#allocation74_spill] sm:$0xff] }
 0x5a5   : > { %v5168_v35 = vsel %vm5098_vm6, %v4961_v32, %v5133_v56  ;;  %v12024_v15 = vsel %vm3116_vm14, %v6777_v11, %v6779_v49  ;;  %vm4859_vm6 = vmand %vm4789_vm4, %vm4824_vm5 }
 0x5a6   : > { %13667 = vst [vmem:[#allocation81_spill] sm:$0xff] %v12024_v15  ;;  %v4509_v38 = vadd.f32 %v4508_v22, %v4387_v14  ;;  %v5255_v16 = vrot.slane %v5168_v35, 5  ;;  %v5355_v30 = vrot.slane %v5168_v35, 2  ;;  %5680 = vmatmul.f32.vlgmr.msra.gmra.mxu0 %v11449_v53  ;;  %v4267_v47 = vpop.f32.mrf.mxu3 }
 0x5a7   : > { %5496 = vmatmul.f32.gmra.mxu2 %v5168_v35  ;;  %v4268_v13 = vadd.f32 %v11822_v31, %v4267_v47 }
 0x5a8   : > { %v4715_v2 = vadd.f32 %v13668_v40, %v4509_v38  ;;  %v12032_v63 = vsel %vm5219_vm10, %v5253_v21, %v5255_v16  ;;  %v12035_v11 = vsel %vm817_vm3, %v5353_v42, %v5355_v30 }
 0x5aa   : > { %v12037_v32 = vpop.f32.mrf.mxu2  ;;  %v4962_v22 = vsel %vm4857_vm8, %v4715_v2, 0.0  ;;  %5567 = vmatmul.f32.gmra.mxu3 %v11489_v19 }
 0x5ab   : > { %v4389_v53 = vpop.f32.mrf.mxu0  ;;  %v4511_v56 = vpop.f32.mrf.mxu1  ;;  %vm5099_vm11 = vcmp.ge.f32.partialorder %v4962_v22, 0.0  ;;  %v5134_v14 = vmul.f32 0.1, %v4962_v22  ;;  %v6781_v35 = vrot.slane %v4962_v22, 6 }
 0x5ac   : > { %v4390_v15 = vadd.f32 %v4389_v53, %v4268_v13  ;;  %v13670_v13 = vld [vmem:[#allocation76_spill] sm:$0xff] }
 0x5ad   : > { %v5169_v38 = vsel %vm5099_vm11, %v4962_v22, %v5134_v14  ;;  %v12041_v21 = vsel %vm3116_vm14, %v6779_v49, %v6781_v35 }
 0x5ae   : > { %13669 = vst [vmem:[#allocation83_spill] sm:$0xff] %v12041_v21  ;;  %v4512_v47 = vadd.f32 %v4511_v56, %v4390_v15  ;;  %v5257_v42 = vrot.slane %v5169_v38, 5  ;;  %v5357_v40 = vrot.slane %v5169_v38, 2  ;;  %5683 = vmatmul.f32.gmra.mxu0 %v11492_v43  ;;  %v4270_v2 = vpop.f32.mrf.mxu3 }
 0x5af   : > { %5499 = vmatmul.f32.gmra.mxu2 %v5169_v38  ;;  %v4271_v19 = vadd.f32 %v11822_v31, %v4270_v2 }
 0x5b0   : > { %v4716_v53 = vadd.f32 %v13670_v13, %v4512_v47  ;;  %v12049_v60 = vsel %vm5219_vm10, %v5255_v16, %v5257_v42  ;;  %v12052_v49 = vsel %vm817_vm3, %v5355_v30, %v5357_v40  ;;  %v7489_v47 = vld [vmem:[%s13145_s3 + $0x320] sm:$0xff] }
 0x5b1   : > { %6373 = vmatpush.msrb.mxu1 %v7489_v47 }
 0x5b2   : > { %v12054_v15 = vpop.f32.mrf.mxu2  ;;  %v4963_v22 = vsel %vm4858_vm12, %v4716_v53, 0.0  ;;  %5570 = vmatmul.f32.gmra.mxu3 %v11535_v61 }
 0x5b3   : > { %v4392_v43 = vpop.f32.mrf.mxu0  ;;  %v4514_v56 = vpop.f32.mrf.mxu1  ;;  %vm5100_vm1 = vcmp.ge.f32.partialorder %v4963_v22, 0.0  ;;  %v5135_v14 = vmul.f32 0.1, %v4963_v22  ;;  %v6783_v38 = vrot.slane %v4963_v22, 6 }
 0x5b4   : > { %v4393_v13 = vadd.f32 %v4392_v43, %v4271_v19  ;;  %v4755_v19 = vadd.s32 %v11287_v8, %v13672_v20  ;;  %v13673_v43 = vld [vmem:[#allocation78_spill] sm:$0xff]  ;;  %v4756_v20 = vadd.s32 %v11287_v8, %v13600_v51  ;;  %v4757_v51 = vadd.s32 %v11287_v8, %v13605_v12  ;;  %v13679_v12 = vld [vmem:[#allocation43_spill] sm:$0xff] }
 0x5b5   : > { %v5170_v16 = vsel %vm5100_vm1, %v4963_v22, %v5135_v14  ;;  %v12061_v30 = vsel %vm3116_vm14, %v6781_v35, %v6783_v38 }
 0x5b6   : > { %13671 = vst [vmem:[#allocation85_spill] sm:$0xff] %v12061_v30  ;;  %v4515_v2 = vadd.f32 %v4514_v56, %v4393_v13  ;;  %v5259_v53 = vrot.slane %v5170_v16, 5  ;;  %v5359_v21 = vrot.slane %v5170_v16, 2  ;;  %5686 = vmatmul.f32.gmra.mxu0 %v11538_v3  ;;  %v4273_v28 = vpop.f32.mrf.mxu3  ;;  %vm4790_vm0 = vcmp.ge.s32.totalorder %v4755_v19, 0 }
 0x5b7   : > { %5502 = vmatmul.f32.gmra.mxu2 %v5170_v16  ;;  %v4274_v54 = vadd.f32 %v11822_v31, %v4273_v28  ;;  %vm4825_vm8 = vcmp.lt.s32.totalorder %v4755_v19, 1000  ;;  %vm4791_vm15 = vcmp.ge.s32.totalorder %v4756_v20, 0  ;;  %vm4826_vm12 = vcmp.lt.s32.totalorder %v4756_v20, 1000  ;;  %v7488_v20 = vld [vmem:[%s13145_s3 + $0x318] sm:$0xff] }
 0x5b8   : > { %v4717_v61 = vadd.f32 %v13673_v43, %v4515_v2  ;;  %v12069_v22 = vsel %vm5219_vm10, %v5257_v42, %v5259_v53  ;;  %v12072_v35 = vsel %vm817_vm3, %v5357_v40, %v5359_v21  ;;  %vm4860_vm11 = vmand %vm4790_vm0, %vm4825_vm8  ;;  %6374 = vmatpush.msrb.mxu1 %v7488_v20  ;;  %vm4792_vm5 = vcmp.ge.s32.totalorder %v4757_v51, 0 }
 0x5b9   : > { %vm4861_vm1 = vmand %vm4791_vm15, %vm4826_vm12 }
 0x5ba   : > { %v12074_v56 = vpop.f32.mrf.mxu2  ;;  %v4964_v14 = vsel %vm4859_vm6, %v4717_v61, 0.0  ;;  %5573 = vmatmul.f32.gmra.mxu3 %v11574_v37  ;;  %vm4827_vm6 = vcmp.lt.s32.totalorder %v4757_v51, 1000 }
 0x5bb   : > { %v4395_v3 = vpop.f32.mrf.mxu0  ;;  %v4517_v47 = vpop.f32.mrf.mxu1  ;;  %vm5101_vm13 = vcmp.ge.f32.partialorder %v4964_v14, 0.0  ;;  %v5136_v13 = vmul.f32 0.1, %v4964_v14  ;;  %v6785_v16 = vrot.slane %v4964_v14, 6 }
 0x5bc   : > { %v4396_v30 = vadd.f32 %v4395_v3, %v4274_v54  ;;  %v13675_v54 = vld [vmem:[#allocation80_spill] sm:$0xff] }
 0x5bd   : > { %v5171_v28 = vsel %vm5101_vm13, %v4964_v14, %v5136_v13  ;;  %v12078_v42 = vsel %vm3116_vm14, %v6783_v38, %v6785_v16  ;;  %vm4862_vm13 = vmand %vm4792_vm5, %vm4827_vm6 }
 0x5be   : > { %13674 = vst [vmem:[#allocation87_spill] sm:$0xff] %v12078_v42  ;;  %v4518_v2 = vadd.f32 %v4517_v47, %v4396_v30  ;;  %v5261_v40 = vrot.slane %v5171_v28, 5  ;;  %v5361_v43 = vrot.slane %v5171_v28, 2  ;;  %5689 = vmatmul.f32.gmra.mxu0 %v11577_v55  ;;  %v4276_v61 = vpop.f32.mrf.mxu3 }
 0x5bf   : > { %5505 = vmatmul.f32.gmra.mxu2 %v5171_v28  ;;  %v4277_v37 = vadd.f32 %v11822_v31, %v4276_v61 }
 0x5c0   : > { %v4718_v3 = vadd.f32 %v13675_v54, %v4518_v2  ;;  %v12086_v19 = vsel %vm5219_vm10, %v5259_v53, %v5261_v40  ;;  %v12089_v38 = vsel %vm817_vm3, %v5359_v21, %v5361_v43 }
 0x5c2   : > { %v4965_v30 = vsel %vm4860_vm11, %v4718_v3, 0.0  ;;  %v12091_v28 = vpop.f32.mrf.mxu2  ;;  %5576 = vmatmul.f32.gmra.mxu3 %v11620_v23 }
 0x5c3   : > { %v4398_v14 = vpop.f32.mrf.mxu0  ;;  %v4520_v47 = vpop.f32.mrf.mxu1  ;;  %vm5102_vm9 = vcmp.ge.f32.partialorder %v4965_v30, 0.0  ;;  %v5137_v55 = vmul.f32 0.1, %v4965_v30  ;;  %v6787_v13 = vrot.slane %v4965_v30, 6 }
 0x5c4   : > { %v4399_v42 = vadd.f32 %v4398_v14, %v4277_v37  ;;  %v13677_v37 = vld [vmem:[#allocation82_spill] sm:$0xff] }
 0x5c5   : > { %v5172_v2 = vsel %vm5102_vm9, %v4965_v30, %v5137_v55  ;;  %v12095_v53 = vsel %vm3116_vm14, %v6785_v16, %v6787_v13 }
 0x5c6   : > { %13676 = vst [vmem:[#allocation89_spill] sm:$0xff] %v12095_v53  ;;  %v4521_v61 = vadd.f32 %v4520_v47, %v4399_v42  ;;  %v5263_v21 = vrot.slane %v5172_v2, 5  ;;  %v5363_v54 = vrot.slane %v5172_v2, 2  ;;  %5692 = vmatmul.f32.gmra.mxu0 %v11623_v46  ;;  %v4279_v3 = vpop.f32.mrf.mxu3 }
 0x5c7   : > { %5508 = vmatmul.f32.gmra.mxu2 %v5172_v2  ;;  %v4280_v23 = vadd.f32 %v11822_v31, %v4279_v3 }
 0x5c8   : > { %v4719_v14 = vadd.f32 %v13677_v37, %v4521_v61  ;;  %v12106_v16 = vsel %vm5219_vm10, %v5261_v40, %v5263_v21  ;;  %v12109_v42 = vsel %vm817_vm3, %v5361_v43, %v5363_v54 }
 0x5ca   : > { %v4966_v46 = vsel %vm4861_vm1, %v4719_v14, 0.0  ;;  %5579 = vmatmul.f32.gmra.mxu3 %v11659_v62  ;;  %v12115_v40 = vpop.f32.mrf.mxu2  ;;  %v13680_v62 = vld [vmem:[#allocation84_spill] sm:$0xff] }
 0x5cb   : > { %v4401_v30 = vpop.f32.mrf.mxu0  ;;  %v4523_v47 = vpop.f32.mrf.mxu1  ;;  %vm5103_vm4 = vcmp.ge.f32.partialorder %v4966_v46, 0.0  ;;  %v5138_v55 = vmul.f32 0.1, %v4966_v46  ;;  %v6789_v2 = vrot.slane %v4966_v46, 6 }
 0x5cc   : > { %v4402_v61 = vadd.f32 %v4401_v30, %v4280_v23  ;;  %v4758_v23 = vadd.s32 %v11287_v8, %v13679_v12 }
 0x5cd   : > { %v5173_v3 = vsel %vm5103_vm4, %v4966_v46, %v5138_v55  ;;  %v12113_v37 = vsel %vm3116_vm14, %v6787_v13, %v6789_v2 }
 0x5ce   : > { %13678 = vst [vmem:[#allocation91_spill] sm:$0xff] %v12113_v37  ;;  %v4524_v43 = vadd.f32 %v4523_v47, %v4402_v61  ;;  %v5265_v53 = vrot.slane %v5173_v3, 5  ;;  %v5365_v20 = vrot.slane %v5173_v3, 2  ;;  %5695 = vmatmul.f32.gmra.mxu0 %v11662_v7  ;;  %v4282_v14 = vpop.f32.mrf.mxu3  ;;  %vm4793_vm8 = vcmp.ge.s32.totalorder %v4758_v23, 0 }
 0x5cf   : > { %5511 = vmatmul.f32.gmra.mxu2 %v5173_v3  ;;  %v4283_v51 = vadd.f32 %v11822_v31, %v4282_v14  ;;  %vm4828_vm11 = vcmp.lt.s32.totalorder %v4758_v23, 1000 }
 0x5d0   : > { %v4720_v30 = vadd.f32 %v13680_v62, %v4524_v43  ;;  %v12123_v13 = vsel %vm5219_vm10, %v5263_v21, %v5265_v53  ;;  %v12126_v46 = vsel %vm817_vm3, %v5363_v54, %v5365_v20  ;;  %vm4863_vm9 = vmand %vm4793_vm8, %vm4828_vm11 }
 0x5d2   : > { %v4967_v47 = vsel %vm4862_vm13, %v4720_v30, 0.0  ;;  %5582 = vmatmul.f32.gmra.mxu3 %v11698_v48  ;;  %v13682_v30 = vld [vmem:[#allocation46_spill] sm:$0xff] }
 0x5d3   : > { %v4404_v55 = vpop.f32.mrf.mxu0  ;;  %v4526_v61 = vpop.f32.mrf.mxu1  ;;  %vm5104_vm0 = vcmp.ge.f32.partialorder %v4967_v47, 0.0  ;;  %v5139_v7 = vmul.f32 0.1, %v4967_v47  ;;  %v6791_v3 = vrot.slane %v4967_v47, 6  ;;  %v4759_v18 = vadd.s32 %v11287_v8, %v13682_v30  ;;  %v13683_v48 = vld [vmem:[#allocation86_spill] sm:$0xff] }
 0x5d4   : > { %v4405_v37 = vadd.f32 %v4404_v55, %v4283_v51  ;;  %v12135_v51 = vpop.f32.mrf.mxu2 }
 0x5d5   : > { %v5174_v43 = vsel %vm5104_vm0, %v4967_v47, %v5139_v7  ;;  %v12130_v14 = vsel %vm3116_vm14, %v6789_v2, %v6791_v3  ;;  %v7487_v2 = vld [vmem:[%s13145_s3 + $0x310] sm:$0xff]  ;;  %vm4794_vm12 = vcmp.ge.s32.totalorder %v4759_v18, 0  ;;  %vm4829_vm1 = vcmp.lt.s32.totalorder %v4759_v18, 1000 }
 0x5d6   : > { %13681 = vst [vmem:[#allocation93_spill] sm:$0xff] %v12130_v14  ;;  %v4527_v21 = vadd.f32 %v4526_v61, %v4405_v37  ;;  %v5267_v62 = vrot.slane %v5174_v43, 5  ;;  %v5367_v12 = vrot.slane %v5174_v43, 2  ;;  %5698 = vmatmul.f32.gmra.mxu0 %v11701_v27  ;;  %v4285_v54 = vpop.f32.mrf.mxu3  ;;  %6375 = vmatpush.msrb.mxu1 %v7487_v2  ;;  %vm4864_vm4 = vmand %vm4794_vm12, %vm4829_vm1  ;;  %v13685_v2 = vld [vmem:[#allocation49_spill] sm:$0xff] }
 0x5d7   : > { %5514 = vmatmul.f32.gmra.mxu2 %v5174_v43  ;;  %v4286_v23 = vadd.f32 %v11822_v31, %v4285_v54  ;;  %v4760_v52 = vadd.s32 %v11287_v8, %v13685_v2  ;;  %v13688_v2 = vld [vmem:[#allocation52_spill] sm:$0xff] }
 0x5d8   : > { %v4721_v55 = vadd.f32 %v13683_v48, %v4527_v21  ;;  %v12143_v37 = vsel %vm5219_vm10, %v5265_v53, %v5267_v62  ;;  %v12146_v27 = vsel %vm817_vm3, %v5365_v20, %v5367_v12  ;;  %v4761_v58 = vadd.s32 %v11287_v8, %v13688_v2  ;;  %v13691_v2 = vld [vmem:[#allocation55_spill] sm:$0xff] }
 0x5d9   : > { %vm4795_vm6 = vcmp.ge.s32.totalorder %v4760_v52, 0  ;;  %vm4830_vm13 = vcmp.lt.s32.totalorder %v4760_v52, 1000  ;;  %v7486_v52 = vld [vmem:[%s13145_s3 + $0x308] sm:$0xff]  ;;  %v4762_v59 = vadd.s32 %v11287_v8, %v13691_v2 }
 0x5da   : > { %v4968_v47 = vsel %vm4863_vm9, %v4721_v55, 0.0  ;;  %5585 = vmatmul.f32.gmra.mxu3 %v11737_v25  ;;  %vm4865_vm0 = vmand %vm4795_vm6, %vm4830_vm13  ;;  %6376 = vmatpush.msrb.mxu1 %v7486_v52  ;;  %vm4796_vm11 = vcmp.ge.s32.totalorder %v4761_v58, 0  ;;  %vm4831_vm9 = vcmp.lt.s32.totalorder %v4761_v58, 1000 }
 0x5db   : > { %v4407_v61 = vpop.f32.mrf.mxu0  ;;  %v4529_v7 = vpop.f32.mrf.mxu1  ;;  %vm5105_vm15 = vcmp.ge.f32.partialorder %v4968_v47, 0.0  ;;  %v5140_v43 = vmul.f32 0.1, %v4968_v47  ;;  %v6793_v14 = vrot.slane %v4968_v47, 6  ;;  %vm4797_vm1 = vcmp.ge.s32.totalorder %v4762_v59, 0 }
 0x5dc   : > { %v4408_v21 = vadd.f32 %v4407_v61, %v4286_v23  ;;  %v13686_v23 = vld [vmem:[#allocation88_spill] sm:$0xff] }
 0x5dd   : > { %v5175_v54 = vsel %vm5105_vm15, %v4968_v47, %v5140_v43  ;;  %v12150_v48 = vsel %vm3116_vm14, %v6791_v3, %v6793_v14  ;;  %v12163_v47 = vpop.f32.mrf.mxu2  ;;  %vm4866_vm15 = vmand %vm4796_vm11, %vm4831_vm9 }
 0x5de   : > { %13684 = vst [vmem:[#allocation95_spill] sm:$0xff] %v12150_v48  ;;  %v4530_v53 = vadd.f32 %v4529_v7, %v4408_v21  ;;  %v5269_v30 = vrot.slane %v5175_v54, 5  ;;  %v5369_v20 = vrot.slane %v5175_v54, 2  ;;  %5701 = vmatmul.f32.gmra.mxu0 %v11740_v1  ;;  %v4288_v55 = vpop.f32.mrf.mxu3 }
 0x5df   : > { %5517 = vmatmul.f32.gmra.mxu2 %v5175_v54  ;;  %v4289_v25 = vadd.f32 %v11822_v31, %v4288_v55 }
 0x5e0   : > { %v4722_v61 = vadd.f32 %v13686_v23, %v4530_v53  ;;  %v12158_v18 = vsel %vm5219_vm10, %v5267_v62, %v5269_v30  ;;  %v12161_v3 = vsel %vm817_vm3, %v5367_v12, %v5369_v20 }
 0x5e2   : > { %v4969_v7 = vsel %vm4864_vm4, %v4722_v61, 0.0  ;;  %5588 = vmatmul.f32.gmra.mxu3 %v11776_v45  ;;  %vm4832_vm4 = vcmp.lt.s32.totalorder %v4762_v59, 1000 }
 0x5e3   : > { %v4410_v1 = vpop.f32.mrf.mxu0  ;;  %v4532_v43 = vpop.f32.mrf.mxu1  ;;  %vm5106_vm5 = vcmp.ge.f32.partialorder %v4969_v7, 0.0  ;;  %v5141_v21 = vmul.f32 0.1, %v4969_v7  ;;  %v6795_v54 = vrot.slane %v4969_v7, 6 }
 0x5e4   : > { %v4411_v48 = vadd.f32 %v4410_v1, %v4289_v25  ;;  %v13689_v25 = vld [vmem:[#allocation90_spill] sm:$0xff] }
 0x5e5   : > { %v5176_v53 = vsel %vm5106_vm5, %v4969_v7, %v5141_v21  ;;  %v12167_v62 = vsel %vm3116_vm14, %v6793_v14, %v6795_v54  ;;  %vm4867_vm5 = vmand %vm4797_vm1, %vm4832_vm4 }
 0x5e6   : > { %13687 = vst [vmem:[#allocation97_spill] sm:$0xff] %v12167_v62  ;;  %v4533_v55 = vadd.f32 %v4532_v43, %v4411_v48  ;;  %v5271_v12 = vrot.slane %v5176_v53, 5  ;;  %v5371_v23 = vrot.slane %v5176_v53, 2  ;;  %5704 = vmatmul.f32.gmra.mxu0 %v11779_v24  ;;  %v4291_v61 = vpop.f32.mrf.mxu3 }
 0x5e7   : > { %5520 = vmatmul.f32.gmra.mxu2 %v5176_v53  ;;  %v4292_v45 = vadd.f32 %v11822_v31, %v4291_v61 }
 0x5e8   : > { %v4723_v1 = vadd.f32 %v13689_v25, %v4533_v55  ;;  %v12178_v14 = vsel %vm5219_vm10, %v5269_v30, %v5271_v12  ;;  %v12181_v48 = vsel %vm817_vm3, %v5369_v20, %v5371_v23  ;;  %v12183_v55 = vpop.f32.mrf.mxu2 }
 0x5ea   : > { %v4970_v24 = vsel %vm4865_vm0, %v4723_v1, 0.0  ;;  %5591 = vmatmul.f32.gmra.mxu3 %v11832_v34 }
 0x5eb   : > { %v4413_v7 = vpop.f32.mrf.mxu0  ;;  %v4535_v43 = vpop.f32.mrf.mxu1  ;;  %vm5107_vm8 = vcmp.ge.f32.partialorder %v4970_v24, 0.0  ;;  %v5142_v21 = vmul.f32 0.1, %v4970_v24  ;;  %v6797_v53 = vrot.slane %v4970_v24, 6 }
 0x5ec   : > { %v4414_v61 = vadd.f32 %v4413_v7, %v4292_v45  ;;  %v13692_v45 = vld [vmem:[#allocation92_spill] sm:$0xff] }
 0x5ed   : > { %v5177_v25 = vsel %vm5107_vm8, %v4970_v24, %v5142_v21  ;;  %v12187_v30 = vsel %vm3116_vm14, %v6795_v54, %v6797_v53 }
 0x5ee   : > { %13690 = vst [vmem:[#allocation42_spill] sm:$0xff] %v12187_v30  ;;  %v4536_v20 = vadd.f32 %v4535_v43, %v4414_v61  ;;  %v5273_v62 = vrot.slane %v5177_v25, 5  ;;  %v5373_v52 = vrot.slane %v5177_v25, 2  ;;  %5707 = vmatmul.f32.gmra.mxu0 %v11835_v33  ;;  %v4294_v1 = vpop.f32.mrf.mxu3 }
 0x5ef   : > { %5523 = vmatmul.f32.gmra.mxu2 %v5177_v25  ;;  %v4295_v34 = vadd.f32 %v11822_v31, %v4294_v1 }
 0x5f0   : > { %v4724_v7 = vadd.f32 %v13692_v45, %v4536_v20  ;;  %v12195_v58 = vsel %vm5219_vm10, %v5271_v12, %v5273_v62  ;;  %v12198_v54 = vsel %vm817_vm3, %v5371_v23, %v5373_v52  ;;  %v12204_v12 = vpop.f32.mrf.mxu2 }
 0x5f2   : > { %v4971_v24 = vsel %vm4866_vm15, %v4724_v7, 0.0  ;;  %5594 = vmatmul.f32.gmra.mxu3 %v11871_v6  ;;  %v7532_v7 = vld [vmem:[%s13145_s3 + $0x478] sm:$0xff] }
 0x5f3   : > { %v4416_v43 = vpop.f32.mrf.mxu0  ;;  %v4538_v21 = vpop.f32.mrf.mxu1  ;;  %vm5108_vm12 = vcmp.ge.f32.partialorder %v4971_v24, 0.0  ;;  %v5143_v33 = vmul.f32 0.1, %v4971_v24  ;;  %v6799_v61 = vrot.slane %v4971_v24, 6  ;;  %v13694_v6 = vld [vmem:[#allocation58_spill] sm:$0xff]  ;;  %6594 = vmatpush.msra.mxu2 %v7532_v7 }
 0x5f4   : > { %v4417_v25 = vadd.f32 %v4416_v43, %v4295_v34  ;;  %v4763_v59 = vadd.s32 %v11287_v8, %v13694_v6 }
 0x5f5   : > { %v5178_v20 = vsel %vm5108_vm12, %v4971_v24, %v5143_v33  ;;  %v12202_v1 = vsel %vm3116_vm14, %v6797_v53, %v6799_v61  ;;  %v13695_v24 = vld [vmem:[#allocation94_spill] sm:$0xff] }
 0x5f6   : > { %13693 = vst [vmem:[#allocation44_spill] sm:$0xff] %v12202_v1  ;;  %v4539_v45 = vadd.f32 %v4538_v21, %v4417_v25  ;;  %v5275_v23 = vrot.slane %v5178_v20, 5  ;;  %v5375_v30 = vrot.slane %v5178_v20, 2  ;;  %5710 = vmatmul.f32.gmra.mxu0 %v11874_v39  ;;  %v4297_v34 = vpop.f32.mrf.mxu3  ;;  %v7485_v21 = vld [vmem:[%s13145_s3 + $0x300] sm:$0xff]  ;;  %v7531_v39 = vld [vmem:[%s13145_s3 + $0x470] sm:$0xff]  ;;  %vm4798_vm13 = vcmp.ge.s32.totalorder %v4763_v59, 0 }
 0x5f7   : > { %5526 = vmatmul.f32.gmra.mxu2 %v5178_v20  ;;  %v4298_v43 = vadd.f32 %v11822_v31, %v4297_v34  ;;  %6377 = vmatpush.msrb.mxu1 %v7485_v21  ;;  %v7530_v31 = vld [vmem:[%s13145_s3 + $0x468] sm:$0xff]  ;;  %vm4833_vm0 = vcmp.lt.s32.totalorder %v4763_v59, 1000 }
 0x5f8   : > { %v4725_v53 = vadd.f32 %v13695_v24, %v4539_v45  ;;  %v12221_v33 = vsel %vm5219_vm10, %v5273_v62, %v5275_v23  ;;  %v12224_v25 = vsel %vm817_vm3, %v5373_v52, %v5375_v30  ;;  %6595 = vmatpush.msra.mxu2 %v7531_v39  ;;  %v7529_v62 = vld [vmem:[%s13145_s3 + $0x460] sm:$0xff]  ;;  %vm4868_vm8 = vmand %vm4798_vm13, %vm4833_vm0 }
 0x5fa   : > { %v4972_v20 = vsel %vm4867_vm5, %v4725_v53, 0.0  ;;  %5597 = vmatmul.f32.gmra.mxu3 %v11910_v29  ;;  %6596 = vmatpush.msra.mxu2 %v7530_v31  ;;  %v7528_v29 = vld [vmem:[%s13145_s3 + $0x458] sm:$0xff] }
 0x5fb   : > { %v4419_v45 = vpop.f32.mrf.mxu0  ;;  %v4541_v7 = vpop.f32.mrf.mxu1  ;;  %vm5109_vm6 = vcmp.ge.f32.partialorder %v4972_v20, 0.0  ;;  %v5144_v34 = vmul.f32 0.1, %v4972_v20  ;;  %v6801_v24 = vrot.slane %v4972_v20, 6 }
 0x5fc   : > { %v4420_v1 = vadd.f32 %v4419_v45, %v4298_v43  ;;  %6597 = vmatpush.msra.mxu2 %v7529_v62  ;;  %v13697_v43 = vld [vmem:[#allocation62_spill] sm:$0xff] }
 0x5fd   : > { %v5179_v52 = vsel %vm5109_vm6, %v4972_v20, %v5144_v34  ;;  %v12234_v53 = vsel %vm3116_vm14, %v6799_v61, %v6801_v24  ;;  %v4764_v31 = vadd.s32 %v11287_v8, %v13697_v43  ;;  %v12242_v20 = vpop.f32.mrf.mxu2  ;;  %v13698_v61 = vld [vmem:[#allocation96_spill] sm:$0xff] }
 0x5fe   : > { %13696 = vst [vmem:[#allocation47_spill] sm:$0xff] %v12234_v53  ;;  %v4542_v21 = vadd.f32 %v4541_v7, %v4420_v1  ;;  %v5277_v39 = vrot.slane %v5179_v52, 5  ;;  %v5377_v6 = vrot.slane %v5179_v52, 2  ;;  %5713 = vmatmul.f32.gmra.mxu0 %v11913_v57  ;;  %v4300_v59 = vpop.f32.mrf.mxu3  ;;  %v12248_v1 = vld [vmem:[%s13146_s4 + $0x1] ss:$0 sm:$0xff]  ;;  %6598 = vmatpush.msra.mxu2 %v7528_v29  ;;  %v7527_v7 = vld [vmem:[%s13145_s3 + $0x450] sm:$0xff] }
 0x5ff   : > { %5529 = vmatmul.f32.gmra.mxu2 %v5179_v52  ;;  %v4301_v57 = vadd.f32 %v12248_v1, %v4300_v59  ;;  %vm4799_vm9 = vcmp.ge.s32.totalorder %v4764_v31, 0  ;;  %vm4834_vm15 = vcmp.lt.s32.totalorder %v4764_v31, 1000 }
 0x600   : > { %v4726_v45 = vadd.f32 %v13698_v61, %v4542_v21  ;;  %v12255_v34 = vsel %vm5219_vm10, %v5275_v23, %v5277_v39  ;;  %v12258_v62 = vsel %vm817_vm3, %v5375_v30, %v5377_v6  ;;  %6599 = vmatpush.msra.mxu2 %v7527_v7  ;;  %v7526_v21 = vld [vmem:[%s13145_s3 + $0x448] sm:$0xff]  ;;  %v7525_v30 = vld [vmem:[%s13145_s3 + $0x440] sm:$0xff]  ;;  %vm4869_vm12 = vmand %vm4799_vm9, %vm4834_vm15 }
 0x601   : > { %13699 = vst [vmem:[#allocation50_spill] sm:$0xff] %v12258_v62 }
 0x602   : > { %v4973_v52 = vsel %vm4868_vm8, %v4726_v45, 0.0  ;;  %5600 = vmatmul.f32.gmra.mxu3 %v11946_v41  ;;  %6600 = vmatpush.msra.mxu2 %v7526_v21  ;;  %v7524_v41 = vld [vmem:[%s13145_s3 + $0x438] sm:$0xff] }
 0x603   : > { %v4422_v61 = vpop.f32.mrf.mxu0  ;;  %v4544_v53 = vpop.f32.mrf.mxu1  ;;  %vm5110_vm11 = vcmp.ge.f32.partialorder %v4973_v52, 0.0  ;;  %v5145_v29 = vmul.f32 0.1, %v4973_v52  ;;  %v6803_v59 = vrot.slane %v4973_v52, 6 }
 0x604   : > { %v4423_v43 = vadd.f32 %v4422_v61, %v4301_v57  ;;  %6601 = vmatpush.msra.mxu2 %v7525_v30  ;;  %v13701_v57 = vld [vmem:[#allocation98_spill] sm:$0xff]  ;;  %v13702_v61 = vld [vmem:[#allocation63_spill] sm:$0xff] }
 0x605   : > { %v5180_v23 = vsel %vm5110_vm11, %v4973_v52, %v5145_v29  ;;  %v12268_v45 = vsel %vm3116_vm14, %v6801_v24, %v6803_v59  ;;  %v4765_v24 = vadd.s32 %v11287_v8, %v13702_v61  ;;  %v12287_v29 = vpop.f32.mrf.mxu2 }
 0x606   : > { %13700 = vst [vmem:[#allocation53_spill] sm:$0xff] %v12268_v45  ;;  %v4545_v7 = vadd.f32 %v4544_v53, %v4423_v43  ;;  %v5279_v2 = vrot.slane %v5180_v23, 5  ;;  %v5379_v62 = vrot.slane %v5180_v23, 2  ;;  %5716 = vmatmul.f32.gmra.mxu0 %v11949_v9  ;;  %v4303_v31 = vpop.f32.mrf.mxu3  ;;  %6602 = vmatpush.msra.mxu2 %v7524_v41  ;;  %v7523_v9 = vld [vmem:[%s13145_s3 + $0x430] sm:$0xff] }
 0x607   : > { %5532 = vmatmul.f32.gmra.mxu2 %v5180_v23  ;;  %v4304_v52 = vadd.f32 %v12248_v1, %v4303_v31  ;;  %v7522_v23 = vld [vmem:[%s13145_s3 + $0x428] sm:$0xff]  ;;  %vm4800_vm4 = vcmp.ge.s32.totalorder %v4765_v24, 0  ;;  %vm4835_vm5 = vcmp.lt.s32.totalorder %v4765_v24, 1000 }
 0x608   : > { %v4727_v21 = vadd.f32 %v13701_v57, %v4545_v7  ;;  %v12282_v53 = vsel %vm5219_vm10, %v5277_v39, %v5279_v2  ;;  %v12285_v43 = vsel %vm817_vm3, %v5377_v6, %v5379_v62  ;;  %6603 = vmatpush.msra.mxu2 %v7523_v9  ;;  %v7516_v39 = vld [vmem:[%s13145_s3 + $0x3f8] sm:$0xff]  ;;  %vm4870_vm6 = vmand %vm4800_vm4, %vm4835_vm5  ;;  %v13706_v24 = vld [vmem:[#allocation100_spill] sm:$0xff] }
 0x609   : > { %13703 = vst [vmem:[#allocation56_spill] sm:$0xff] %v12282_v53  ;;  %6478 = vmatpush.msra.mxu1 %v7516_v39 }
 0x60a   : > { %13704 = vst [vmem:[#allocation59_spill] sm:$0xff] %v12285_v43  ;;  %v4974_v30 = vsel %vm4869_vm12, %v4727_v21, 0.0  ;;  %5603 = vmatmul.f32.gmra.mxu3 %v11977_v0  ;;  %6604 = vmatpush.msra.mxu2 %v7522_v23  ;;  %v7521_v21 = vld [vmem:[%s13145_s3 + $0x420] sm:$0xff]  ;;  %v7520_v0 = vld [vmem:[%s13145_s3 + $0x418] sm:$0xff] }
 0x60b   : > { %v4425_v7 = vpop.f32.mrf.mxu0  ;;  %v4547_v41 = vpop.f32.mrf.mxu1  ;;  %vm5111_vm1 = vcmp.ge.f32.partialorder %v4974_v30, 0.0  ;;  %v5146_v31 = vmul.f32 0.1, %v4974_v30  ;;  %v6805_v57 = vrot.slane %v4974_v30, 6 }
 0x60c   : > { %v4426_v45 = vadd.f32 %v4425_v7, %v4304_v52  ;;  %v13707_v7 = vld [vmem:[#allocation65_spill] sm:$0xff]  ;;  %6605 = vmatpush.msra.mxu2 %v7521_v21  ;;  %v7518_v21 = vld [vmem:[%s13145_s3 + $0x408] sm:$0xff] }
 0x60d   : > { %v5181_v6 = vsel %vm5111_vm1, %v4974_v30, %v5146_v31  ;;  %v12300_v9 = vsel %vm3116_vm14, %v6803_v59, %v6805_v57  ;;  %v4766_v59 = vadd.s32 %v11287_v8, %v13707_v7 }
 0x60e   : > { %13705 = vst [vmem:[#allocation23_spill] sm:$0xff] %v12300_v9  ;;  %v4548_v61 = vadd.f32 %v4547_v41, %v4426_v45  ;;  %v5281_v43 = vrot.slane %v5181_v6, 5  ;;  %v5381_v53 = vrot.slane %v5181_v6, 2  ;;  %5719 = vmatmul.f32.gmra.mxu0 %v11980_v44  ;;  %v4306_v52 = vpop.f32.mrf.mxu3  ;;  %v7519_v45 = vld [vmem:[%s13145_s3 + $0x410] sm:$0xff]  ;;  %6606 = vmatpush.msra.mxu2 %v7520_v0  ;;  %v7517_v0 = vld [vmem:[%s13145_s3 + $0x400] sm:$0xff] }
 0x60f   : > { %5535 = vmatmul.f32.gmra.mxu2 %v5181_v6  ;;  %v4307_v23 = vadd.f32 %v12248_v1, %v4306_v52  ;;  %v13710_v6 = vld [vmem:[#allocation101_spill] sm:$0xff]  ;;  %vm4801_vm0 = vcmp.ge.s32.totalorder %v4766_v59, 0  ;;  %vm4836_vm8 = vcmp.lt.s32.totalorder %v4766_v59, 1000 }
 0x610   : > { %v4728_v30 = vadd.f32 %v13706_v24, %v4548_v61  ;;  %v12314_v44 = vsel %vm5219_vm10, %v5279_v2, %v5281_v43  ;;  %v12317_v41 = vsel %vm817_vm3, %v5379_v62, %v5381_v53  ;;  %v4659_v52 = vrot.slane %v13710_v6, 4  ;;  %6607 = vmatpush.msra.mxu2 %v7519_v45  ;;  %v12324_v2 = vpop.f32.mrf.mxu2  ;;  %vm4871_vm11 = vmand %vm4801_vm0, %vm4836_vm8 }
 0x611   : > { %13708 = vst [vmem:[#allocation7_spill] sm:$0xff] %v12314_v44 }
 0x612   : > { %13709 = vst [vmem:[#allocation66_spill] sm:$0xff] %v12317_v41  ;;  %v4975_v31 = vsel %vm4870_vm6, %v4728_v30, 0.0  ;;  %5606 = vmatmul.f32.gmra.mxu3 %v11996_v10  ;;  %6608 = vmatpush.msra.mxu2 %v7518_v21  ;;  %v13712_v10 = vld [vmem:[#allocation99_spill] sm:$0xff] }
 0x613   : > { %v4428_v39 = vpop.f32.mrf.mxu0  ;;  %v4550_v61 = vpop.f32.mrf.mxu1  ;;  %vm5112_vm13 = vcmp.ge.f32.partialorder %v4975_v31, 0.0  ;;  %v5147_v24 = vmul.f32 0.1, %v4975_v31  ;;  %v6807_v9 = vrot.slane %v4975_v31, 6 }
 0x614   : > { %v4429_v7 = vadd.f32 %v4428_v39, %v4307_v23  ;;  %v13713_v23 = vrot.slane %v13712_v10, 4  ;;  %6609 = vmatpush.msra.mxu2 %v7517_v0 }
 0x615   : > { %v5182_v62 = vsel %vm5112_vm13, %v4975_v31, %v5147_v24  ;;  %v12330_v30 = vsel %vm3116_vm14, %v6805_v57, %v6807_v9  ;;  %v4767_v57 = vadd.s32 %v11287_v8, %v10073_v17  ;;  %v7515_v17 = vld [vmem:[%s13145_s3 + $0x3f0] sm:$0xff] }
 0x616   : > { %13711 = vst [vmem:[#allocation27_spill] sm:$0xff] %v12330_v30  ;;  %v4551_v6 = vadd.f32 %v4550_v61, %v4429_v7  ;;  %v5283_v41 = vrot.slane %v5182_v62, 5  ;;  %v5383_v44 = vrot.slane %v5182_v62, 2  ;;  %5722 = vmatmul.f32.gmra.mxu0 %v11999_v26  ;;  %v4660_v45 = vsel %vm4591_vm7, %v13713_v23, %v4659_v52  ;;  %v4309_v31 = vpop.f32.mrf.mxu3  ;;  %v12350_v61 = vld [vmem:[%s13144_s2 + $0x2] ss:$0 sm:$0xff]  ;;  %6479 = vmatpush.msra.mxu1 %v7515_v17 }
 0x617   : > { %5538 = vmatmul.f32.gmra.mxu2 %v5182_v62  ;;  %v4310_v24 = vadd.f32 %v12248_v1, %v4309_v31  ;;  %vm4802_vm9 = vcmp.ge.s32.totalorder %v4767_v57, 0  ;;  %vm4837_vm15 = vcmp.lt.s32.totalorder %v4767_v57, 1000  ;;  %v5444_v10 = vadd.f32 %v12350_v61, %v12001_v4 }
 0x618   : > { %v4729_v39 = vadd.f32 %v4660_v45, %v4551_v6  ;;  %v12342_v7 = vsel %vm5219_vm10, %v5281_v43, %v5283_v41  ;;  %v12345_v26 = vsel %vm817_vm3, %v5381_v53, %v5383_v44  ;;  %v12356_v53 = vstv %s5885_s25  ;;  %vm4872_vm12 = vmand %vm4802_vm9, %vm4837_vm15 }
 0x61a   : > { %v4976_v59 = vsel %vm4871_vm11, %v4729_v39, 0.0  ;;  %5609 = vmatmul.f32.gmra.mxu3 %v12015_v36  ;;  %v12368_v36 = vpop.f32.mrf.mxu2 }
 0x61b   : > { %v4431_v21 = vpop.f32.mrf.mxu0  ;;  %vm5113_vm7 = vcmp.ge.f32.partialorder %v4976_v59, 0.0  ;;  %v5148_v1 = vmul.f32 0.1, %v4976_v59  ;;  %v6809_v62 = vrot.slane %v4976_v59, 6  ;;  %v4553_v43 = vpop.f32.mrf.mxu1 }
 0x61c   : > { %v4432_v8 = vadd.f32 %v4431_v21, %v4310_v24  ;;  %v13715_v24 = vld [vmem:[#allocation12_spill] sm:$0xff] }
 0x61d   : > { %v12358_v0 = vsel %vm5113_vm7, %v4976_v59, %v5148_v1  ;;  %v12361_v6 = vsel %vm3116_vm14, %v6807_v9, %v6809_v62  ;;  %v5887_v9 = vadd.s32 %v12356_v53, %v13715_v24 }
 0x61e   : > { %13714 = vst [vmem:[#allocation29_spill] sm:$0xff] %v12361_v6  ;;  %v4554_v23 = vadd.f32 %v4553_v43, %v4432_v8  ;;  %v13257_v45 = vrot.slane %v12358_v0, 5  ;;  %v5385_v31 = vrot.slane %v12358_v0, 2  ;;  %5725 = vmatmul.f32.gmra.mxu0 %v12018_v5  ;;  %v5562_v39 = vpop.f32.mrf.mxu3 }
 0x61f   : > { %5541 = vmatmul.f32.gmra.mxu2 %v12358_v0  ;;  %v5563_v59 = vadd.f32 %v5562_v39, %v5444_v10  ;;  %vm5921_vm1 = vcmp.ge.s32.totalorder %v5887_v9, 0  ;;  %vm5955_vm4 = vcmp.lt.s32.totalorder %v5887_v9, 1000 }
 0x620   : > { %v4730_v57 = vadd.f32 %v4659_v52, %v4554_v23  ;;  %v12376_v4 = vsel %vm5219_vm10, %v5283_v41, %v13257_v45  ;;  %v12379_v21 = vsel %vm817_vm3, %v5383_v44, %v5385_v31  ;;  %v5447_v52 = vadd.f32 %v12350_v61, %v12020_v50  ;;  %vm12386_vm10 = vmand %vm5921_vm1, %vm5955_vm4  ;;  %v13718_v23 = vld [vmem:[#allocation13_spill] sm:$0xff] }
 0x621   : > { %v5888_v39 = vadd.s32 %v12356_v53, %v13718_v23 }
 0x622   : > { %v4977_v5 = vsel %vm4872_vm12, %v4730_v57, 0.0  ;;  %5612 = vmatmul.f32.gmra.mxu3 %v12032_v63  ;;  %v12394_v57 = vpop.f32.mrf.mxu2 }
 0x623   : > { %vm5114_vm14 = vcmp.ge.f32.partialorder %v4977_v5, 0.0  ;;  %v5149_v1 = vmul.f32 0.1, %v4977_v5  ;;  %v5681_v62 = vpop.f32.mrf.mxu0  ;;  %vm5922_vm6 = vcmp.ge.s32.totalorder %v5888_v39, 0  ;;  %vm5956_vm13 = vcmp.lt.s32.totalorder %v5888_v39, 1000 }
 0x624   : > { %v5682_v17 = vadd.f32 %v5681_v62, %v5563_v59  ;;  %vm5990_vm8 = vmand %vm5922_vm6, %vm5956_vm13 }
 0x625   : > { %v12382_v8 = vsel %vm5114_vm14, %v4977_v5, %v5149_v1  ;;  %v5450_v1 = vadd.f32 %v12350_v61, %v12037_v32 }
 0x626   : > { %vm5783_vm5 = vcmp.ge.f32.partialorder %v5682_v17, 0.0  ;;  %v5817_v41 = vmul.f32 0.1, %v5682_v17  ;;  %5728 = vmatmul.f32.gmra.mxu0 %v12035_v11  ;;  %v13256_v44 = vrot.slane %v12382_v8, 2  ;;  %v5565_v10 = vpop.f32.mrf.mxu3  ;;  %v7514_v11 = vld [vmem:[%s13145_s3 + $0x3e8] sm:$0xff] }
 0x627   : > { %v5566_v9 = vadd.f32 %v5565_v10, %v5447_v52  ;;  %6480 = vmatpush.msra.mxu1 %v7514_v11  ;;  %v13719_v52 = vld [vmem:[#allocation14_spill] sm:$0xff] }
 0x628   : > { %v5851_v63 = vsel %vm5783_vm5, %v5682_v17, %v5817_v41  ;;  %v12401_v50 = vsel %vm817_vm3, %v5385_v31, %v13256_v44  ;;  %v5889_v41 = vadd.s32 %v12356_v53, %v13719_v52 }
 0x629   : > { %7535 = vmatmul.msk.f32.vlgmr.msrb.gmra.mxu1 %vm12386_vm10, %v5851_v63  ;;  %v6091_v31 = vsel %vm12386_vm10, %v5851_v63, 0.0 }
 0x62a   : > { %5615 = vmatmul.f32.gmra.mxu3 %v12049_v60  ;;  %v6159_v60 = vrot.slane %v6091_v31, 1  ;;  %v12414_v44 = vpop.f32.mrf.mxu2  ;;  %vm5923_vm11 = vcmp.ge.s32.totalorder %v5889_v41, 0  ;;  %vm5957_vm7 = vcmp.lt.s32.totalorder %v5889_v41, 1000 }
 0x62b   : > { %v5684_v59 = vpop.f32.mrf.mxu0  ;;  %vm5991_vm15 = vmand %vm5923_vm11, %vm5957_vm7 }
 0x62c   : > { %v5685_v5 = vadd.f32 %v5684_v59, %v5566_v9  ;;  %v6259_v59 = vrot.slane %v6091_v31, 2  ;;  %v13720_v31 = vld [vmem:[#allocation15_spill] sm:$0xff] }
 0x62e   : > { %v5818_v62 = vmul.f32 0.1, %v5685_v5  ;;  %5731 = vmatmul.f32.gmra.mxu0 %v12052_v49  ;;  %vm5784_vm0 = vcmp.ge.f32.partialorder %v5685_v5, 0.0  ;;  %v5568_v17 = vpop.f32.mrf.mxu3 }
 0x62f   : > { %v5569_v10 = vadd.f32 %v5568_v17, %v5450_v1  ;;  %v5890_v17 = vadd.s32 %v12356_v53, %v13720_v31 }
 0x630   : > { %v5852_v39 = vsel %vm5784_vm0, %v5685_v5, %v5818_v62  ;;  %v5453_v5 = vadd.f32 %v12350_v61, %v12054_v15 }
 0x631   : > { %v6092_v9 = vsel %vm5990_vm8, %v5852_v39, 0.0  ;;  %7536 = vmatmul.msk.f32.gmra.mxu1 %vm5990_vm8, %v5852_v39  ;;  %vm5924_vm12 = vcmp.ge.s32.totalorder %v5890_v17, 0  ;;  %vm5958_vm14 = vcmp.lt.s32.totalorder %v5890_v17, 1000 }
 0x632   : > { %v6160_v11 = vrot.slane %v6092_v9, 1  ;;  %v6260_v32 = vrot.slane %v6092_v9, 2  ;;  %5618 = vmatmul.f32.gmra.mxu3 %v12069_v22  ;;  %vm5992_vm4 = vmand %vm5924_vm12, %vm5958_vm14 }
 0x633   : > { %v5687_v49 = vpop.f32.mrf.mxu0 }
 0x634   : > { %v5688_v45 = vadd.f32 %v5687_v49, %v5569_v10  ;;  %v6261_v43 = vsel %vm817_vm3, %v6259_v59, %v6260_v32  ;;  %v12419_v63 = vsel %vm709_vm2, %v6159_v60, %v6160_v11  ;;  %v12431_v49 = vpop.f32.mrf.mxu2 }
 0x635   : > { %6610 = vmatmul.f32.vlgmr.msra.gmra.mxu2 %v6261_v43 }
 0x636   : > { %v5819_v1 = vmul.f32 0.1, %v5688_v45  ;;  %5734 = vmatmul.f32.gmra.mxu0 %v12072_v35  ;;  %vm5785_vm9 = vcmp.ge.f32.partialorder %v5688_v45, 0.0  ;;  %v5571_v62 = vpop.f32.mrf.mxu3 }
 0x637   : > { %v5572_v41 = vadd.f32 %v5571_v62, %v5453_v5 }
 0x638   : > { %v5853_v22 = vsel %vm5785_vm9, %v5688_v45, %v5819_v1  ;;  %v5456_v45 = vadd.f32 %v12350_v61, %v12074_v56 }
 0x639   : > { %v6093_v10 = vsel %vm5991_vm15, %v5853_v22, 0.0  ;;  %7537 = vmatmul.msk.f32.gmra.mxu1 %vm5991_vm15, %v5853_v22 }
 0x63a   : > { %v6162_v39 = vrot.slane %v6093_v10, 1  ;;  %v6262_v9 = vrot.slane %v6093_v10, 2  ;;  %5621 = vmatmul.f32.gmra.mxu3 %v12086_v19  ;;  %v7513_v19 = vld [vmem:[%s13145_s3 + $0x3e0] sm:$0xff] }
 0x63b   : > { %v5690_v60 = vpop.f32.mrf.mxu0  ;;  %6481 = vmatpush.msra.mxu1 %v7513_v19  ;;  %v13722_v19 = vld [vmem:[#allocation17_spill] sm:$0xff] }
 0x63c   : > { %v5691_v59 = vadd.f32 %v5690_v60, %v5572_v41  ;;  %v6263_v15 = vsel %vm817_vm3, %v6260_v32, %v6262_v9  ;;  %v12429_v35 = vsel %vm709_vm2, %v6160_v11, %v6162_v39  ;;  %v13721_v32 = vld [vmem:[#allocation16_spill] sm:$0xff] }
 0x63d   : > { %6613 = vmatmul.f32.gmra.mxu2 %v6263_v15  ;;  %v5891_v11 = vadd.s32 %v12356_v53, %v13721_v32  ;;  %v5459_v15 = vadd.f32 %v12350_v61, %v12091_v28 }
 0x63e   : > { %v5820_v43 = vmul.f32 0.1, %v5691_v59  ;;  %5737 = vmatmul.f32.gmra.mxu0 %v12089_v38  ;;  %vm5786_vm1 = vcmp.ge.f32.partialorder %v5691_v59, 0.0  ;;  %v5574_v5 = vpop.f32.mrf.mxu3 }
 0x63f   : > { %v5575_v1 = vadd.f32 %v5574_v5, %v5456_v45  ;;  %vm5925_vm5 = vcmp.ge.s32.totalorder %v5891_v11, 0  ;;  %vm5959_vm10 = vcmp.lt.s32.totalorder %v5891_v11, 1000  ;;  %v12449_v45 = vpop.f32.mrf.mxu2 }
 0x640   : > { %v5854_v62 = vsel %vm5786_vm1, %v5691_v59, %v5820_v43  ;;  %vm5993_vm13 = vmand %vm5925_vm5, %vm5959_vm10 }
 0x641   : > { %v6094_v17 = vsel %vm5992_vm4, %v5854_v62, 0.0  ;;  %7538 = vmatmul.msk.f32.gmra.mxu1 %vm5992_vm4, %v5854_v62 }
 0x642   : > { %v6164_v41 = vrot.slane %v6094_v17, 1  ;;  %v6264_v56 = vrot.slane %v6094_v17, 2  ;;  %5624 = vmatmul.f32.gmra.mxu3 %v12106_v16  ;;  %v5892_v16 = vadd.s32 %v12356_v53, %v13722_v19 }
 0x643   : > { %v5693_v22 = vpop.f32.mrf.mxu0 }
 0x644   : > { %v5694_v38 = vadd.f32 %v5693_v22, %v5575_v1  ;;  %v6265_v10 = vsel %vm817_vm3, %v6262_v9, %v6264_v56  ;;  %v12444_v60 = vsel %vm709_vm2, %v6162_v39, %v6164_v41  ;;  %vm5926_vm0 = vcmp.ge.s32.totalorder %v5892_v16, 0 }
 0x645   : > { %6616 = vmatmul.f32.gmra.mxu2 %v6265_v10  ;;  %vm5960_vm8 = vcmp.lt.s32.totalorder %v5892_v16, 1000  ;;  %v5462_v22 = vadd.f32 %v12350_v61, %v12115_v40  ;;  %v7512_v10 = vld [vmem:[%s13145_s3 + $0x3d8] sm:$0xff] }
 0x646   : > { %v5821_v59 = vmul.f32 0.1, %v5694_v38  ;;  %5740 = vmatmul.f32.gmra.mxu0 %v12109_v42  ;;  %vm5787_vm6 = vcmp.ge.f32.partialorder %v5694_v38, 0.0  ;;  %v5577_v43 = vpop.f32.mrf.mxu3  ;;  %vm5994_vm7 = vmand %vm5926_vm0, %vm5960_vm8  ;;  %6482 = vmatpush.msra.mxu1 %v7512_v10 }
 0x647   : > { %v5578_v5 = vadd.f32 %v5577_v43, %v5459_v15  ;;  %v12466_v43 = vpop.f32.mrf.mxu2 }
 0x648   : > { %v5855_v9 = vsel %vm5787_vm6, %v5694_v38, %v5821_v59 }
 0x649   : > { %v6095_v11 = vsel %vm5993_vm13, %v5855_v9, 0.0  ;;  %7539 = vmatmul.msk.f32.gmra.mxu1 %vm5993_vm13, %v5855_v9 }
 0x64a   : > { %v6166_v39 = vrot.slane %v6095_v11, 1  ;;  %v6266_v1 = vrot.slane %v6095_v11, 2  ;;  %5627 = vmatmul.f32.gmra.mxu3 %v12123_v13  ;;  %v13723_v13 = vld [vmem:[#allocation18_spill] sm:$0xff] }
 0x64b   : > { %v5696_v62 = vpop.f32.mrf.mxu0 }
 0x64c   : > { %v5697_v28 = vadd.f32 %v5696_v62, %v5578_v5  ;;  %v6267_v42 = vsel %vm817_vm3, %v6264_v56, %v6266_v1  ;;  %v12456_v17 = vsel %vm709_vm2, %v6164_v41, %v6166_v39  ;;  %v5893_v56 = vadd.s32 %v12356_v53, %v13723_v13 }
 0x64d   : > { %6619 = vmatmul.f32.gmra.mxu2 %v6267_v42 }
 0x64e   : > { %v5822_v38 = vmul.f32 0.1, %v5697_v28  ;;  %5743 = vmatmul.f32.gmra.mxu0 %v12126_v46  ;;  %vm5788_vm11 = vcmp.ge.f32.partialorder %v5697_v28, 0.0  ;;  %v5580_v15 = vpop.f32.mrf.mxu3  ;;  %vm5927_vm9 = vcmp.ge.s32.totalorder %v5893_v56, 0  ;;  %vm5961_vm15 = vcmp.lt.s32.totalorder %v5893_v56, 1000 }
 0x64f   : > { %v5581_v41 = vadd.f32 %v5580_v15, %v5462_v22  ;;  %vm5995_vm14 = vmand %vm5927_vm9, %vm5961_vm15 }
 0x650   : > { %v5856_v59 = vsel %vm5788_vm11, %v5697_v28, %v5822_v38  ;;  %v5465_v28 = vadd.f32 %v12350_v61, %v12135_v51  ;;  %v13724_v38 = vld [vmem:[#allocation19_spill] sm:$0xff] }
 0x651   : > { %v6096_v16 = vsel %vm5994_vm7, %v5856_v59, 0.0  ;;  %7540 = vmatmul.msk.f32.gmra.mxu1 %vm5994_vm7, %v5856_v59  ;;  %v5894_v10 = vadd.s32 %v12356_v53, %v13724_v38 }
 0x652   : > { %v6168_v40 = vrot.slane %v6096_v16, 1  ;;  %v6268_v5 = vrot.slane %v6096_v16, 2  ;;  %5630 = vmatmul.f32.gmra.mxu3 %v12143_v37 }
 0x653   : > { %v5699_v46 = vpop.f32.mrf.mxu0  ;;  %vm5928_vm1 = vcmp.ge.s32.totalorder %v5894_v10, 0  ;;  %vm5962_vm4 = vcmp.lt.s32.totalorder %v5894_v10, 1000 }
 0x654   : > { %v5700_v9 = vadd.f32 %v5699_v46, %v5581_v41  ;;  %v6269_v11 = vsel %vm817_vm3, %v6266_v1, %v6268_v5  ;;  %v12471_v62 = vsel %vm709_vm2, %v6166_v39, %v6168_v40  ;;  %v12478_v41 = vpop.f32.mrf.mxu2  ;;  %v5468_v46 = vadd.f32 %v12350_v61, %v12163_v47  ;;  %vm5996_vm10 = vmand %vm5928_vm1, %vm5962_vm4 }
 0x655   : > { %6622 = vmatmul.f32.gmra.mxu2 %v6269_v11  ;;  %v7511_v11 = vld [vmem:[%s13145_s3 + $0x3d0] sm:$0xff] }
 0x656   : > { %v5823_v42 = vmul.f32 0.1, %v5700_v9  ;;  %5746 = vmatmul.f32.gmra.mxu0 %v12146_v27  ;;  %vm5789_vm12 = vcmp.ge.f32.partialorder %v5700_v9, 0.0  ;;  %v5583_v22 = vpop.f32.mrf.mxu3  ;;  %6483 = vmatpush.msra.mxu1 %v7511_v11 }
 0x657   : > { %v5584_v15 = vadd.f32 %v5583_v22, %v5465_v28 }
 0x658   : > { %v5857_v37 = vsel %vm5789_vm12, %v5700_v9, %v5823_v42 }
 0x659   : > { %v6097_v56 = vsel %vm5995_vm14, %v5857_v37, 0.0  ;;  %7541 = vmatmul.msk.f32.gmra.mxu1 %vm5995_vm14, %v5857_v37 }
 0x65a   : > { %v6170_v1 = vrot.slane %v6097_v56, 1  ;;  %v6270_v39 = vrot.slane %v6097_v56, 2  ;;  %5633 = vmatmul.f32.gmra.mxu3 %v12158_v18  ;;  %v13725_v18 = vld [vmem:[#allocation20_spill] sm:$0xff] }
 0x65b   : > { %v5702_v59 = vpop.f32.mrf.mxu0 }
 0x65c   : > { %v5703_v51 = vadd.f32 %v5702_v59, %v5584_v15  ;;  %v6271_v27 = vsel %vm817_vm3, %v6268_v5, %v6270_v39  ;;  %v12483_v16 = vsel %vm709_vm2, %v6168_v40, %v6170_v1  ;;  %v5895_v5 = vadd.s32 %v12356_v53, %v13725_v18  ;;  %v12498_v59 = vpop.f32.mrf.mxu2 }
 0x65d   : > { %6625 = vmatmul.f32.gmra.mxu2 %v6271_v27 }
 0x65e   : > { %v5824_v9 = vmul.f32 0.1, %v5703_v51  ;;  %5749 = vmatmul.f32.gmra.mxu0 %v12161_v3  ;;  %vm5790_vm5 = vcmp.ge.f32.partialorder %v5703_v51, 0.0  ;;  %v5586_v28 = vpop.f32.mrf.mxu3  ;;  %vm5929_vm6 = vcmp.ge.s32.totalorder %v5895_v5, 0  ;;  %vm5963_vm13 = vcmp.lt.s32.totalorder %v5895_v5, 1000 }
 0x65f   : > { %v5587_v40 = vadd.f32 %v5586_v28, %v5468_v46  ;;  %vm5997_vm8 = vmand %vm5929_vm6, %vm5963_vm13 }
 0x660   : > { %v5858_v42 = vsel %vm5790_vm5, %v5703_v51, %v5824_v9  ;;  %v5471_v51 = vadd.f32 %v12350_v61, %v12183_v55  ;;  %v13726_v9 = vld [vmem:[#allocation21_spill] sm:$0xff] }
 0x661   : > { %v6098_v22 = vsel %vm5996_vm10, %v5858_v42, 0.0  ;;  %7542 = vmatmul.msk.f32.gmra.mxu1 %vm5996_vm10, %v5858_v42 }
 0x662   : > { %v6172_v10 = vrot.slane %v6098_v22, 1  ;;  %v6272_v47 = vrot.slane %v6098_v22, 2  ;;  %5636 = vmatmul.f32.gmra.mxu3 %v12178_v14  ;;  %v5896_v14 = vadd.s32 %v12356_v53, %v13726_v9  ;;  %v5474_v22 = vadd.f32 %v12350_v61, %v12204_v12 }
 0x663   : > { %v5705_v15 = vpop.f32.mrf.mxu0 }
 0x664   : > { %v5706_v3 = vadd.f32 %v5705_v15, %v5587_v40  ;;  %v6273_v37 = vsel %vm817_vm3, %v6270_v39, %v6272_v47  ;;  %v12496_v56 = vsel %vm709_vm2, %v6170_v1, %v6172_v10  ;;  %vm5930_vm11 = vcmp.ge.s32.totalorder %v5896_v14, 0 }
 0x665   : > { %6628 = vmatmul.f32.gmra.mxu2 %v6273_v37  ;;  %vm5964_vm7 = vcmp.lt.s32.totalorder %v5896_v14, 1000  ;;  %v12516_v37 = vpop.f32.mrf.mxu2 }
 0x666   : > { %v5825_v27 = vmul.f32 0.1, %v5706_v3  ;;  %5752 = vmatmul.f32.gmra.mxu0 %v12181_v48  ;;  %vm5791_vm0 = vcmp.ge.f32.partialorder %v5706_v3, 0.0  ;;  %v5589_v46 = vpop.f32.mrf.mxu3  ;;  %vm5998_vm15 = vmand %vm5930_vm11, %vm5964_vm7 }
 0x667   : > { %v5590_v11 = vadd.f32 %v5589_v46, %v5471_v51 }
 0x668   : > { %v5859_v39 = vsel %vm5791_vm0, %v5706_v3, %v5825_v27  ;;  %v7510_v3 = vld [vmem:[%s13145_s3 + $0x3c8] sm:$0xff] }
 0x669   : > { %v6099_v28 = vsel %vm5997_vm8, %v5859_v39, 0.0  ;;  %7543 = vmatmul.msk.f32.gmra.mxu1 %vm5997_vm8, %v5859_v39 }
 0x66a   : > { %v6174_v1 = vrot.slane %v6099_v28, 1  ;;  %v6274_v5 = vrot.slane %v6099_v28, 2  ;;  %5639 = vmatmul.f32.gmra.mxu3 %v12195_v58  ;;  %6484 = vmatpush.msra.mxu1 %v7510_v3 }
 0x66b   : > { %v5708_v40 = vpop.f32.mrf.mxu0 }
 0x66c   : > { %v5709_v42 = vadd.f32 %v5708_v40, %v5590_v11  ;;  %v6275_v48 = vsel %vm817_vm3, %v6272_v47, %v6274_v5  ;;  %v12508_v55 = vsel %vm709_vm2, %v6172_v10, %v6174_v1  ;;  %v13727_v47 = vld [vmem:[#allocation22_spill] sm:$0xff]  ;;  %v5477_v40 = vadd.f32 %v12350_v61, %v12242_v20 }
 0x66d   : > { %6631 = vmatmul.f32.gmra.mxu2 %v6275_v48  ;;  %v5897_v10 = vadd.s32 %v12356_v53, %v13727_v47 }
 0x66e   : > { %v5826_v15 = vmul.f32 0.1, %v5709_v42  ;;  %5755 = vmatmul.f32.gmra.mxu0 %v12198_v54  ;;  %vm5792_vm9 = vcmp.ge.f32.partialorder %v5709_v42, 0.0  ;;  %v5592_v58 = vpop.f32.mrf.mxu3 }
 0x66f   : > { %v5593_v51 = vadd.f32 %v5592_v58, %v5474_v22  ;;  %vm5931_vm12 = vcmp.ge.s32.totalorder %v5897_v10, 0  ;;  %vm5965_vm14 = vcmp.lt.s32.totalorder %v5897_v10, 1000  ;;  %v13728_v22 = vld [vmem:[#allocation24_spill] sm:$0xff]  ;;  %v12530_v58 = vpop.f32.mrf.mxu2 }
 0x670   : > { %v5860_v27 = vsel %vm5792_vm9, %v5709_v42, %v5826_v15  ;;  %vm5999_vm4 = vmand %vm5931_vm12, %vm5965_vm14  ;;  %v5898_v15 = vadd.s32 %v12356_v53, %v13728_v22 }
 0x671   : > { %v6100_v46 = vsel %vm5998_vm15, %v5860_v27, 0.0  ;;  %7544 = vmatmul.msk.f32.gmra.mxu1 %vm5998_vm15, %v5860_v27 }
 0x672   : > { %v6176_v12 = vrot.slane %v6100_v46, 1  ;;  %v6276_v14 = vrot.slane %v6100_v46, 2  ;;  %5642 = vmatmul.f32.gmra.mxu3 %v12221_v33  ;;  %vm5932_vm5 = vcmp.ge.s32.totalorder %v5898_v15, 0  ;;  %vm5966_vm10 = vcmp.lt.s32.totalorder %v5898_v15, 1000 }
 0x673   : > { %v5711_v54 = vpop.f32.mrf.mxu0  ;;  %v5480_v46 = vadd.f32 %v12350_v61, %v12287_v29  ;;  %vm6000_vm13 = vmand %vm5932_vm5, %vm5966_vm10 }
 0x674   : > { %v5712_v11 = vadd.f32 %v5711_v54, %v5593_v51  ;;  %v6277_v39 = vsel %vm817_vm3, %v6274_v5, %v6276_v14  ;;  %v12523_v28 = vsel %vm709_vm2, %v6174_v1, %v6176_v12 }
 0x675   : > { %6634 = vmatmul.f32.gmra.mxu2 %v6277_v39  ;;  %v7509_v39 = vld [vmem:[%s13145_s3 + $0x3c0] sm:$0xff] }
 0x676   : > { %vm5793_vm1 = vcmp.ge.f32.partialorder %v5712_v11, 0.0  ;;  %v5827_v42 = vmul.f32 0.1, %v5712_v11  ;;  %5758 = vmatmul.f32.gmra.mxu0 %v12224_v25  ;;  %v5595_v48 = vpop.f32.mrf.mxu3  ;;  %6485 = vmatpush.msra.mxu1 %v7509_v39 }
 0x677   : > { %v5596_v3 = vadd.f32 %v5595_v48, %v5477_v40 }
 0x678   : > { %v5861_v33 = vsel %vm5793_vm1, %v5712_v11, %v5827_v42  ;;  %v13729_v11 = vld [vmem:[#allocation50_spill] sm:$0xff] }
 0x679   : > { %v6101_v5 = vsel %vm5999_vm4, %v5861_v33, 0.0  ;;  %7545 = vmatmul.msk.f32.gmra.mxu1 %vm5999_vm4, %v5861_v33 }
 0x67a   : > { %v6178_v1 = vrot.slane %v6101_v5, 1  ;;  %v6278_v10 = vrot.slane %v6101_v5, 2  ;;  %5645 = vmatmul.f32.gmra.mxu3 %v12255_v34  ;;  %v13730_v34 = vld [vmem:[#allocation25_spill] sm:$0xff] }
 0x67b   : > { %v5714_v51 = vpop.f32.mrf.mxu0 }
 0x67c   : > { %v5715_v20 = vadd.f32 %v5714_v51, %v5596_v3  ;;  %v6279_v25 = vsel %vm817_vm3, %v6276_v14, %v6278_v10  ;;  %v12535_v27 = vsel %vm709_vm2, %v6176_v12, %v6178_v1  ;;  %v5899_v14 = vadd.s32 %v12356_v53, %v13730_v34  ;;  %v12545_v3 = vpop.f32.mrf.mxu2  ;;  %v13731_v51 = vld [vmem:[#allocation56_spill] sm:$0xff] }
 0x67d   : > { %6637 = vmatmul.f32.gmra.mxu2 %v6279_v25 }
 0x67e   : > { %vm5794_vm6 = vcmp.ge.f32.partialorder %v5715_v20, 0.0  ;;  %v5828_v54 = vmul.f32 0.1, %v5715_v20  ;;  %5761 = vmatmul.f32.gmra.mxu0 %v13729_v11  ;;  %v5598_v40 = vpop.f32.mrf.mxu3  ;;  %vm5933_vm0 = vcmp.ge.s32.totalorder %v5899_v14, 0  ;;  %vm5967_vm8 = vcmp.lt.s32.totalorder %v5899_v14, 1000 }
 0x67f   : > { %v5599_v12 = vadd.f32 %v5598_v40, %v5480_v46  ;;  %vm6001_vm7 = vmand %vm5933_vm0, %vm5967_vm8  ;;  %v13733_v40 = vld [vmem:[#allocation26_spill] sm:$0xff] }
 0x680   : > { %v5862_v42 = vsel %vm5794_vm6, %v5715_v20, %v5828_v54  ;;  %v5483_v20 = vadd.f32 %v12350_v61, %v12324_v2  ;;  %v13732_v54 = vld [vmem:[#allocation59_spill] sm:$0xff]  ;;  %v5900_v14 = vadd.s32 %v12356_v53, %v13733_v40 }
 0x681   : > { %v6102_v48 = vsel %vm6000_vm13, %v5862_v42, 0.0  ;;  %7546 = vmatmul.msk.f32.gmra.mxu1 %vm6000_vm13, %v5862_v42  ;;  %v13734_v2 = vld [vmem:[#allocation7_spill] sm:$0xff] }
 0x682   : > { %v6180_v15 = vrot.slane %v6102_v48, 1  ;;  %v6280_v29 = vrot.slane %v6102_v48, 2  ;;  %5648 = vmatmul.f32.gmra.mxu3 %v13731_v51  ;;  %vm5934_vm9 = vcmp.ge.s32.totalorder %v5900_v14, 0  ;;  %vm5968_vm15 = vcmp.lt.s32.totalorder %v5900_v14, 1000 }
 0x683   : > { %v5717_v33 = vpop.f32.mrf.mxu0  ;;  %vm6002_vm14 = vmand %vm5934_vm9, %vm5968_vm15 }
 0x684   : > { %v5718_v5 = vadd.f32 %v5717_v33, %v5599_v12  ;;  %v6281_v25 = vsel %vm817_vm3, %v6278_v10, %v6280_v29  ;;  %v12550_v11 = vsel %vm709_vm2, %v6178_v1, %v6180_v15  ;;  %v12562_v6 = vpop.f32.mrf.mxu2 }
 0x685   : > { %6640 = vmatmul.f32.gmra.mxu2 %v6281_v25 }
 0x686   : > { %vm5795_vm11 = vcmp.ge.f32.partialorder %v5718_v5, 0.0  ;;  %v5829_v46 = vmul.f32 0.1, %v5718_v5  ;;  %5764 = vmatmul.f32.gmra.mxu0 %v13732_v54  ;;  %v5601_v39 = vpop.f32.mrf.mxu3 }
 0x687   : > { %v5602_v12 = vadd.f32 %v5601_v39, %v5483_v20  ;;  %v7508_v39 = vld [vmem:[%s13145_s3 + $0x3b8] sm:$0xff] }
 0x688   : > { %v5863_v42 = vsel %vm5795_vm11, %v5718_v5, %v5829_v46  ;;  %v5486_v5 = vadd.f32 %v12350_v61, %v12368_v36  ;;  %v13735_v46 = vld [vmem:[#allocation66_spill] sm:$0xff]  ;;  %6486 = vmatpush.msra.mxu1 %v7508_v39 }
 0x689   : > { %v6103_v48 = vsel %vm6001_vm7, %v5863_v42, 0.0  ;;  %7547 = vmatmul.msk.f32.gmra.mxu1 %vm6001_vm7, %v5863_v42 }
 0x68a   : > { %v6182_v10 = vrot.slane %v6103_v48, 1  ;;  %v6282_v1 = vrot.slane %v6103_v48, 2  ;;  %5651 = vmatmul.f32.gmra.mxu3 %v13734_v2 }
 0x68b   : > { %v5720_v33 = vpop.f32.mrf.mxu0 }
 0x68c   : > { %v5721_v51 = vadd.f32 %v5720_v33, %v5602_v12  ;;  %v6283_v25 = vsel %vm817_vm3, %v6280_v29, %v6282_v1  ;;  %v12560_v54 = vsel %vm709_vm2, %v6180_v15, %v6182_v10  ;;  %v13736_v29 = vld [vmem:[#allocation28_spill] sm:$0xff] }
 0x68d   : > { %6643 = vmatmul.f32.gmra.mxu2 %v6283_v25  ;;  %v5901_v15 = vadd.s32 %v12356_v53, %v13736_v29  ;;  %v5504_v29 = vadd.f32 %v12350_v61, %v12478_v41 }
 0x68e   : > { %vm5796_vm12 = vcmp.ge.f32.partialorder %v5721_v51, 0.0  ;;  %v5830_v20 = vmul.f32 0.1, %v5721_v51  ;;  %5767 = vmatmul.f32.gmra.mxu0 %v13735_v46  ;;  %v5604_v14 = vpop.f32.mrf.mxu3 }
 0x68f   : > { %v5605_v12 = vadd.f32 %v5604_v14, %v5486_v5  ;;  %vm5935_vm1 = vcmp.ge.s32.totalorder %v5901_v15, 0  ;;  %vm5969_vm4 = vcmp.lt.s32.totalorder %v5901_v15, 1000  ;;  %v5489_v5 = vadd.f32 %v12350_v61, %v12394_v57  ;;  %v13737_v14 = vld [vmem:[#allocation30_spill] sm:$0xff] }
 0x690   : > { %v5864_v42 = vsel %vm5796_vm12, %v5721_v51, %v5830_v20  ;;  %vm6003_vm10 = vmand %vm5935_vm1, %vm5969_vm4  ;;  %v12580_v20 = vpop.f32.mrf.mxu2 }
 0x691   : > { %v6104_v48 = vsel %vm6002_vm14, %v5864_v42, 0.0  ;;  %7548 = vmatmul.msk.f32.gmra.mxu1 %vm6002_vm14, %v5864_v42 }
 0x692   : > { %v6184_v33 = vrot.slane %v6104_v48, 1  ;;  %v6284_v36 = vrot.slane %v6104_v48, 2  ;;  %5654 = vmatmul.f32.gmra.mxu3 %v12342_v7  ;;  %v5902_v7 = vadd.s32 %v12356_v53, %v13737_v14 }
 0x693   : > { %v5723_v2 = vpop.f32.mrf.mxu0 }
 0x694   : > { %v5724_v25 = vadd.f32 %v5723_v2, %v5605_v12  ;;  %v6285_v46 = vsel %vm817_vm3, %v6282_v1, %v6284_v36  ;;  %v12575_v30 = vsel %vm709_vm2, %v6182_v10, %v6184_v33  ;;  %vm5936_vm6 = vcmp.ge.s32.totalorder %v5902_v7, 0 }
 0x695   : > { %6646 = vmatmul.f32.gmra.mxu2 %v6285_v46  ;;  %vm5970_vm13 = vcmp.lt.s32.totalorder %v5902_v7, 1000  ;;  %v5492_v46 = vadd.f32 %v12350_v61, %v12414_v44 }
 0x696   : > { %vm5797_vm5 = vcmp.ge.f32.partialorder %v5724_v25, 0.0  ;;  %v5831_v51 = vmul.f32 0.1, %v5724_v25  ;;  %5770 = vmatmul.f32.gmra.mxu0 %v12345_v26  ;;  %v5607_v39 = vpop.f32.mrf.mxu3  ;;  %vm6004_vm8 = vmand %vm5936_vm6, %vm5970_vm13 }
 0x697   : > { %v5608_v15 = vadd.f32 %v5607_v39, %v5489_v5 }
 0x698   : > { %v5865_v1 = vsel %vm5797_vm5, %v5724_v25, %v5831_v51  ;;  %v13738_v51 = vld [vmem:[#allocation31_spill] sm:$0xff]  ;;  %v12597_v7 = vpop.f32.mrf.mxu2 }
 0x699   : > { %v6105_v12 = vsel %vm6003_vm10, %v5865_v1, 0.0  ;;  %7549 = vmatmul.msk.f32.gmra.mxu1 %vm6003_vm10, %v5865_v1  ;;  %v5903_v39 = vadd.s32 %v12356_v53, %v13738_v51 }
 0x69a   : > { %v6186_v10 = vrot.slane %v6105_v12, 1  ;;  %v6286_v42 = vrot.slane %v6105_v12, 2  ;;  %5657 = vmatmul.f32.gmra.mxu3 %v12376_v4  ;;  %v7507_v4 = vld [vmem:[%s13145_s3 + $0x3b0] sm:$0xff] }
 0x69b   : > { %v5726_v48 = vpop.f32.mrf.mxu0  ;;  %6487 = vmatpush.msra.mxu1 %v7507_v4  ;;  %vm5937_vm11 = vcmp.ge.s32.totalorder %v5903_v39, 0  ;;  %vm5971_vm7 = vcmp.lt.s32.totalorder %v5903_v39, 1000  ;;  %v13740_v39 = vld [vmem:[#allocation33_spill] sm:$0xff] }
 0x69c   : > { %v5727_v57 = vadd.f32 %v5726_v48, %v5608_v15  ;;  %v6287_v26 = vsel %vm817_vm3, %v6284_v36, %v6286_v42  ;;  %v12587_v2 = vsel %vm709_vm2, %v6184_v33, %v6186_v10  ;;  %v13739_v48 = vrot.slane %v12358_v0, 5  ;;  %vm6005_vm15 = vmand %vm5937_vm11, %vm5971_vm7 }
 0x69d   : > { %6649 = vmatmul.f32.gmra.mxu2 %v6287_v26  ;;  %v5904_v0 = vadd.s32 %v12356_v53, %v13740_v39 }
 0x69e   : > { %vm5798_vm0 = vcmp.ge.f32.partialorder %v5727_v57, 0.0  ;;  %v5832_v25 = vmul.f32 0.1, %v5727_v57  ;;  %5773 = vmatmul.f32.gmra.mxu0 %v12379_v21  ;;  %v5610_v5 = vpop.f32.mrf.mxu3 }
 0x69f   : > { %v5611_v36 = vadd.f32 %v5610_v5, %v5492_v46  ;;  %vm5938_vm12 = vcmp.ge.s32.totalorder %v5904_v0, 0  ;;  %vm5972_vm14 = vcmp.lt.s32.totalorder %v5904_v0, 1000  ;;  %v13742_v0 = vld [vmem:[#allocation34_spill] sm:$0xff] }
 0x6a0   : > { %v5866_v33 = vsel %vm5798_vm0, %v5727_v57, %v5832_v25  ;;  %v5495_v57 = vadd.f32 %v12350_v61, %v12431_v49  ;;  %vm6006_vm4 = vmand %vm5938_vm12, %vm5972_vm14 }
 0x6a1   : > { %v6106_v15 = vsel %vm6004_vm8, %v5866_v33, 0.0  ;;  %7550 = vmatmul.msk.f32.gmra.mxu1 %vm6004_vm8, %v5866_v33 }
 0x6a2   : > { %v6188_v44 = vrot.slane %v6106_v15, 1  ;;  %v6288_v1 = vrot.slane %v6106_v15, 2  ;;  %5660 = vmatmul.f32.gmra.mxu3 %v13739_v48  ;;  %v12612_v15 = vpop.f32.mrf.mxu2 }
 0x6a3   : > { %v5729_v12 = vpop.f32.mrf.mxu0 }
 0x6a4   : > { %v5730_v21 = vadd.f32 %v5729_v12, %v5611_v36  ;;  %v6289_v26 = vsel %vm817_vm3, %v6286_v42, %v6288_v1  ;;  %v12603_v51 = vsel %vm709_vm2, %v6186_v10, %v6188_v44 }
 0x6a5   : > { %6652 = vmatmul.f32.gmra.mxu2 %v6289_v26  ;;  %v5498_v26 = vadd.f32 %v12350_v61, %v12449_v45 }
 0x6a6   : > { %vm5799_vm9 = vcmp.ge.f32.partialorder %v5730_v21, 0.0  ;;  %v5833_v46 = vmul.f32 0.1, %v5730_v21  ;;  %5776 = vmatmul.f32.gmra.mxu0 %v12401_v50  ;;  %v12608_v25 = vpop.f32.mrf.mxu1  ;;  %v5613_v5 = vpop.f32.mrf.mxu3 }
 0x6a7   : > { %v5614_v4 = vadd.f32 %v5613_v5, %v5495_v57  ;;  %v13741_v57 = vrot.slane %v12382_v8, 2 }
 0x6a8   : > { %v5867_v42 = vsel %vm5799_vm9, %v5730_v21, %v5833_v46 }
 0x6a9   : > { %v6107_v36 = vsel %vm6005_vm15, %v5867_v42, 0.0  ;;  %7551 = vmatmul.msk.f32.gmra.mxu1 %vm6005_vm15, %v5867_v42 }
 0x6aa   : > { %v6190_v10 = vrot.slane %v6107_v36, 1  ;;  %v6290_v33 = vrot.slane %v6107_v36, 2 }
 0x6ab   : > { %v5732_v49 = vpop.f32.mrf.mxu0 }
 0x6ac   : > { %v5733_v12 = vadd.f32 %v5732_v49, %v5614_v4  ;;  %v6291_v50 = vsel %vm817_vm3, %v6288_v1, %v6290_v33  ;;  %v12616_v48 = vsel %vm709_vm2, %v6188_v44, %v6190_v10  ;;  %v5905_v4 = vadd.s32 %v12356_v53, %v13742_v0  ;;  %v7506_v44 = vld [vmem:[%s13145_s3 + $0x3a8] sm:$0xff]  ;;  %v12633_v0 = vpop.f32.mrf.mxu2 }
 0x6ad   : > { %6655 = vmatmul.f32.gmra.mxu2 %v6291_v50  ;;  %6488 = vmatpush.msra.mxu1 %v7506_v44  ;;  %v13743_v44 = vld [vmem:[#allocation36_spill] sm:$0xff] }
 0x6ae   : > { %vm5800_vm1 = vcmp.ge.f32.partialorder %v5733_v12, 0.0  ;;  %v5834_v21 = vmul.f32 0.1, %v5733_v12  ;;  %5779 = vmatmul.f32.gmra.mxu0 %v13741_v57  ;;  %v12622_v46 = vpop.f32.mrf.mxu1  ;;  %v5616_v5 = vpop.f32.mrf.mxu3  ;;  %vm5939_vm5 = vcmp.ge.s32.totalorder %v5905_v4, 0  ;;  %vm5973_vm10 = vcmp.lt.s32.totalorder %v5905_v4, 1000 }
 0x6af   : > { %v5617_v1 = vadd.f32 %v5616_v5, %v5498_v26  ;;  %vm6007_vm13 = vmand %vm5939_vm5, %vm5973_vm10  ;;  %v5906_v4 = vadd.s32 %v12356_v53, %v13743_v44 }
 0x6b0   : > { %v5868_v42 = vsel %vm5800_vm1, %v5733_v12, %v5834_v21  ;;  %v5501_v12 = vadd.f32 %v12350_v61, %v12466_v43 }
 0x6b1   : > { %v6108_v45 = vsel %vm6006_vm4, %v5868_v42, 0.0  ;;  %7552 = vmatmul.msk.f32.gmra.mxu1 %vm6006_vm4, %v5868_v42  ;;  %vm5940_vm0 = vcmp.ge.s32.totalorder %v5906_v4, 0  ;;  %vm5974_vm8 = vcmp.lt.s32.totalorder %v5906_v4, 1000 }
 0x6b2   : > { %v6192_v36 = vrot.slane %v6108_v45, 1  ;;  %v6292_v49 = vrot.slane %v6108_v45, 2  ;;  %vm6008_vm7 = vmand %vm5940_vm0, %vm5974_vm8 }
 0x6b3   : > { %v5735_v8 = vpop.f32.mrf.mxu0 }
 0x6b4   : > { %v5736_v50 = vadd.f32 %v5735_v8, %v5617_v1  ;;  %v6293_v57 = vsel %vm817_vm3, %v6290_v33, %v6292_v49  ;;  %v12631_v39 = vsel %vm709_vm2, %v6190_v10, %v6192_v36 }
 0x6b5   : > { %6658 = vmatmul.f32.gmra.mxu2 %v6293_v57 }
 0x6b6   : > { %vm5801_vm6 = vcmp.ge.f32.partialorder %v5736_v50, 0.0  ;;  %v5835_v26 = vmul.f32 0.1, %v5736_v50  ;;  %v12637_v21 = vpop.f32.mrf.mxu1  ;;  %v5619_v5 = vpop.f32.mrf.mxu3 }
 0x6b7   : > { %v5620_v1 = vadd.f32 %v5619_v5, %v5501_v12 }
 0x6b8   : > { %v5869_v33 = vsel %vm5801_vm6, %v5736_v50, %v5835_v26  ;;  %v12649_v26 = vpop.f32.mrf.mxu2 }
 0x6b9   : > { %v6109_v42 = vsel %vm6007_vm13, %v5869_v33, 0.0  ;;  %7553 = vmatmul.msk.f32.gmra.mxu1 %vm6007_vm13, %v5869_v33  ;;  %v13744_v33 = vld [vmem:[#allocation37_spill] sm:$0xff] }
 0x6ba   : > { %v6194_v10 = vrot.slane %v6109_v42, 1  ;;  %v6294_v45 = vrot.slane %v6109_v42, 2  ;;  %v5907_v4 = vadd.s32 %v12356_v53, %v13744_v33  ;;  %v5507_v33 = vadd.f32 %v12350_v61, %v12498_v59 }
 0x6bb   : > { %v5738_v8 = vpop.f32.mrf.mxu0 }
 0x6bc   : > { %v5739_v57 = vadd.f32 %v5738_v8, %v5620_v1  ;;  %v6295_v43 = vsel %vm817_vm3, %v6292_v49, %v6294_v45  ;;  %v12643_v14 = vsel %vm709_vm2, %v6192_v36, %v6194_v10  ;;  %v7505_v36 = vld [vmem:[%s13145_s3 + $0x3a0] sm:$0xff]  ;;  %vm5941_vm9 = vcmp.ge.s32.totalorder %v5907_v4, 0 }
 0x6bd   : > { %6661 = vmatmul.f32.gmra.mxu2 %v6295_v43  ;;  %6489 = vmatpush.msra.mxu1 %v7505_v36  ;;  %vm5975_vm15 = vcmp.lt.s32.totalorder %v5907_v4, 1000 }
 0x6be   : > { %vm5802_vm11 = vcmp.ge.f32.partialorder %v5739_v57, 0.0  ;;  %v5836_v12 = vmul.f32 0.1, %v5739_v57  ;;  %v12647_v50 = vpop.f32.mrf.mxu1  ;;  %v5622_v5 = vpop.f32.mrf.mxu3  ;;  %vm6009_vm14 = vmand %vm5941_vm9, %vm5975_vm15 }
 0x6bf   : > { %v5623_v49 = vadd.f32 %v5622_v5, %v5504_v29  ;;  %v13745_v5 = vld [vmem:[#allocation38_spill] sm:$0xff] }
 0x6c0   : > { %v5870_v1 = vsel %vm5802_vm11, %v5739_v57, %v5836_v12  ;;  %v5908_v36 = vadd.s32 %v12356_v53, %v13745_v5 }
 0x6c1   : > { %v6110_v42 = vsel %vm6008_vm7, %v5870_v1, 0.0  ;;  %7554 = vmatmul.msk.f32.gmra.mxu1 %vm6008_vm7, %v5870_v1  ;;  %v12666_v1 = vpop.f32.mrf.mxu2 }
 0x6c2   : > { %v6196_v41 = vrot.slane %v6110_v42, 1  ;;  %v6296_v8 = vrot.slane %v6110_v42, 2  ;;  %vm5942_vm1 = vcmp.ge.s32.totalorder %v5908_v36, 0  ;;  %vm5976_vm4 = vcmp.lt.s32.totalorder %v5908_v36, 1000 }
 0x6c3   : > { %v5741_v43 = vpop.f32.mrf.mxu0  ;;  %vm6010_vm10 = vmand %vm5942_vm1, %vm5976_vm4 }
 0x6c4   : > { %v5742_v44 = vadd.f32 %v5741_v43, %v5623_v49  ;;  %v6297_v40 = vsel %vm817_vm3, %v6294_v45, %v6296_v8  ;;  %v12658_v34 = vsel %vm709_vm2, %v6194_v10, %v6196_v41 }
 0x6c5   : > { %6664 = vmatmul.f32.gmra.mxu2 %v6297_v40 }
 0x6c6   : > { %vm5803_vm12 = vcmp.ge.f32.partialorder %v5742_v44, 0.0  ;;  %v5837_v29 = vmul.f32 0.1, %v5742_v44  ;;  %v12662_v57 = vpop.f32.mrf.mxu1  ;;  %v5625_v12 = vpop.f32.mrf.mxu3 }
 0x6c7   : > { %v5626_v4 = vadd.f32 %v5625_v12, %v5507_v33 }
 0x6c8   : > { %v5871_v49 = vsel %vm5803_vm12, %v5742_v44, %v5837_v29  ;;  %v12675_v44 = vld [vmem:[%s13144_s2 + $0x2] ss:$0 sm:$0xff] }
 0x6c9   : > { %v6111_v45 = vsel %vm6009_vm14, %v5871_v49, 0.0  ;;  %7555 = vmatmul.msk.f32.gmra.mxu1 %vm6009_vm14, %v5871_v49  ;;  %v5510_v33 = vadd.f32 %v12675_v44, %v12516_v37  ;;  %v12686_v5 = vpop.f32.mrf.mxu2 }
 0x6ca   : > { %v6198_v10 = vrot.slane %v6111_v45, 1  ;;  %v6298_v40 = vrot.slane %v6111_v45, 2 }
 0x6cb   : > { %v5744_v42 = vpop.f32.mrf.mxu0 }
 0x6cc   : > { %v5745_v61 = vadd.f32 %v5744_v42, %v5626_v4  ;;  %v6299_v59 = vsel %vm817_vm3, %v6296_v8, %v6298_v40  ;;  %v12670_v43 = vsel %vm709_vm2, %v6196_v41, %v6198_v10  ;;  %v13746_v4 = vld [vmem:[#allocation39_spill] sm:$0xff]  ;;  %v7504_v41 = vld [vmem:[%s13145_s3 + $0x398] sm:$0xff] }
 0x6cd   : > { %6667 = vmatmul.f32.gmra.mxu2 %v6299_v59  ;;  %v5909_v8 = vadd.s32 %v12356_v53, %v13746_v4  ;;  %6490 = vmatpush.msra.mxu1 %v7504_v41  ;;  %v13748_v41 = vld [vmem:[#allocation40_spill] sm:$0xff] }
 0x6ce   : > { %vm5804_vm5 = vcmp.ge.f32.partialorder %v5745_v61, 0.0  ;;  %v5838_v29 = vmul.f32 0.1, %v5745_v61  ;;  %v12679_v12 = vpop.f32.mrf.mxu1  ;;  %v5628_v36 = vpop.f32.mrf.mxu3 }
 0x6cf   : > { %v5629_v49 = vadd.f32 %v5628_v36, %v5510_v33  ;;  %vm5943_vm6 = vcmp.ge.s32.totalorder %v5909_v8, 0  ;;  %vm5977_vm13 = vcmp.lt.s32.totalorder %v5909_v8, 1000 }
 0x6d0   : > { %v5872_v45 = vsel %vm5804_vm5, %v5745_v61, %v5838_v29  ;;  %v5513_v61 = vadd.f32 %v12675_v44, %v12530_v58  ;;  %vm6011_vm8 = vmand %vm5943_vm6, %vm5977_vm13 }
 0x6d1   : > { %v6112_v42 = vsel %vm6010_vm10, %v5872_v45, 0.0  ;;  %7556 = vmatmul.msk.f32.gmra.mxu1 %vm6010_vm10, %v5872_v45  ;;  %v5910_v45 = vadd.s32 %v12356_v53, %v13748_v41  ;;  %v12702_v38 = vpop.f32.mrf.mxu2 }
 0x6d2   : > { %v6200_v59 = vrot.slane %v6112_v42, 1  ;;  %v6300_v37 = vrot.slane %v6112_v42, 2 }
 0x6d3   : > { %v5747_v22 = vpop.f32.mrf.mxu0  ;;  %vm5944_vm11 = vcmp.ge.s32.totalorder %v5910_v45, 0  ;;  %vm5978_vm7 = vcmp.lt.s32.totalorder %v5910_v45, 1000 }
 0x6d4   : > { %v5748_v47 = vadd.f32 %v5747_v22, %v5629_v49  ;;  %v6301_v9 = vsel %vm817_vm3, %v6298_v40, %v6300_v37  ;;  %v12690_v4 = vsel %vm709_vm2, %v6198_v10, %v6200_v59  ;;  %vm6012_vm15 = vmand %vm5944_vm11, %vm5978_vm7 }
 0x6d5   : > { %6670 = vmatmul.f32.gmra.mxu2 %v6301_v9 }
 0x6d6   : > { %vm5805_vm0 = vcmp.ge.f32.partialorder %v5748_v47, 0.0  ;;  %v5839_v33 = vmul.f32 0.1, %v5748_v47  ;;  %v12694_v29 = vpop.f32.mrf.mxu1  ;;  %v5631_v36 = vpop.f32.mrf.mxu3 }
 0x6d7   : > { %13747 = vst [vmem:[#allocation32_spill] sm:$0xff] %v12694_v29  ;;  %v5632_v8 = vadd.f32 %v5631_v36, %v5513_v61  ;;  %v5516_v61 = vadd.f32 %v12675_v44, %v12545_v3 }
 0x6d8   : > { %v5873_v22 = vsel %vm5805_vm0, %v5748_v47, %v5839_v33 }
 0x6d9   : > { %v6113_v49 = vsel %vm6011_vm8, %v5873_v22, 0.0  ;;  %7557 = vmatmul.msk.f32.gmra.mxu1 %vm6011_vm8, %v5873_v22  ;;  %v13750_v22 = vld [vmem:[#allocation41_spill] sm:$0xff] }
 0x6da   : > { %v6202_v40 = vrot.slane %v6113_v49, 1  ;;  %v6302_v10 = vrot.slane %v6113_v49, 2  ;;  %v5911_v45 = vadd.s32 %v12356_v53, %v13750_v22 }
 0x6db   : > { %v5750_v42 = vpop.f32.mrf.mxu0 }
 0x6dc   : > { %v5751_v9 = vadd.f32 %v5750_v42, %v5632_v8  ;;  %v6303_v58 = vsel %vm817_vm3, %v6300_v37, %v6302_v10  ;;  %v12700_v18 = vsel %vm709_vm2, %v6200_v59, %v6202_v40  ;;  %v7503_v59 = vld [vmem:[%s13145_s3 + $0x390] sm:$0xff]  ;;  %vm5945_vm12 = vcmp.ge.s32.totalorder %v5911_v45, 0 }
 0x6dd   : > { %6673 = vmatmul.f32.gmra.mxu2 %v6303_v58  ;;  %6491 = vmatpush.msra.mxu1 %v7503_v59  ;;  %vm5979_vm14 = vcmp.lt.s32.totalorder %v5911_v45, 1000  ;;  %v13753_v59 = vld [vmem:[#allocation43_spill] sm:$0xff] }
 0x6de   : > { %vm5806_vm9 = vcmp.ge.f32.partialorder %v5751_v9, 0.0  ;;  %v5840_v47 = vmul.f32 0.1, %v5751_v9  ;;  %v12706_v33 = vpop.f32.mrf.mxu1  ;;  %v5634_v36 = vpop.f32.mrf.mxu3  ;;  %vm6013_vm4 = vmand %vm5945_vm12, %vm5979_vm14  ;;  %v5912_v45 = vadd.s32 %v12356_v53, %v13753_v59 }
 0x6df   : > { %13749 = vst [vmem:[#allocation11_spill] sm:$0xff] %v12706_v33  ;;  %v5635_v8 = vadd.f32 %v5634_v36, %v5516_v61  ;;  %v12717_v61 = vpop.f32.mrf.mxu2 }
 0x6e0   : > { %v5874_v37 = vsel %vm5806_vm9, %v5751_v9, %v5840_v47  ;;  %v5519_v9 = vadd.f32 %v12675_v44, %v12562_v6  ;;  %vm5946_vm5 = vcmp.ge.s32.totalorder %v5912_v45, 0  ;;  %vm5980_vm10 = vcmp.lt.s32.totalorder %v5912_v45, 1000 }
 0x6e1   : > { %v6114_v49 = vsel %vm6012_vm15, %v5874_v37, 0.0  ;;  %7558 = vmatmul.msk.f32.gmra.mxu1 %vm6012_vm15, %v5874_v37  ;;  %vm6014_vm13 = vmand %vm5946_vm5, %vm5980_vm10 }
 0x6e2   : > { %v6204_v42 = vrot.slane %v6114_v49, 1  ;;  %v6304_v58 = vrot.slane %v6114_v49, 2 }
 0x6e3   : > { %v5753_v3 = vpop.f32.mrf.mxu0 }
 0x6e4   : > { %v5754_v41 = vadd.f32 %v5753_v3, %v5635_v8  ;;  %v6305_v33 = vsel %vm817_vm3, %v6302_v10, %v6304_v58  ;;  %v12715_v29 = vsel %vm709_vm2, %v6202_v40, %v6204_v42 }
 0x6e5   : > { %13751 = vst [vmem:[#allocation35_spill] sm:$0xff] %v12715_v29  ;;  %6676 = vmatmul.f32.gmra.mxu2 %v6305_v33 }
 0x6e6   : > { %vm5807_vm1 = vcmp.ge.f32.partialorder %v5754_v41, 0.0  ;;  %v5841_v47 = vmul.f32 0.1, %v5754_v41  ;;  %v12721_v36 = vpop.f32.mrf.mxu1  ;;  %v5637_v37 = vpop.f32.mrf.mxu3 }
 0x6e7   : > { %13752 = vst [vmem:[#allocation68_spill] sm:$0xff] %v12721_v36  ;;  %v5638_v8 = vadd.f32 %v5637_v37, %v5519_v9  ;;  %v5522_v36 = vadd.f32 %v12675_v44, %v12580_v20 }
 0x6e8   : > { %v5875_v10 = vsel %vm5807_vm1, %v5754_v41, %v5841_v47  ;;  %v12733_v47 = vpop.f32.mrf.mxu2 }
 0x6e9   : > { %v6115_v49 = vsel %vm6013_vm4, %v5875_v10, 0.0  ;;  %7559 = vmatmul.msk.f32.gmra.mxu1 %vm6013_vm4, %v5875_v10  ;;  %v13756_v10 = vld [vmem:[#allocation46_spill] sm:$0xff] }
 0x6ea   : > { %v6206_v40 = vrot.slane %v6115_v49, 1  ;;  %v6306_v3 = vrot.slane %v6115_v49, 2 }
 0x6eb   : > { %v5756_v22 = vpop.f32.mrf.mxu0 }
 0x6ec   : > { %v5757_v33 = vadd.f32 %v5756_v22, %v5638_v8  ;;  %v6307_v6 = vsel %vm817_vm3, %v6304_v58, %v6306_v3  ;;  %v12727_v29 = vsel %vm709_vm2, %v6204_v42, %v6206_v40  ;;  %v5913_v22 = vadd.s32 %v12356_v53, %v13756_v10  ;;  %v7502_v42 = vld [vmem:[%s13145_s3 + $0x388] sm:$0xff] }
 0x6ed   : > { %13754 = vst [vmem:[#allocation69_spill] sm:$0xff] %v12727_v29  ;;  %6679 = vmatmul.f32.gmra.mxu2 %v6307_v6  ;;  %6492 = vmatpush.msra.mxu1 %v7502_v42 }
 0x6ee   : > { %vm5808_vm6 = vcmp.ge.f32.partialorder %v5757_v33, 0.0  ;;  %v5842_v9 = vmul.f32 0.1, %v5757_v33  ;;  %v12731_v41 = vpop.f32.mrf.mxu1  ;;  %v5640_v37 = vpop.f32.mrf.mxu3  ;;  %vm5947_vm0 = vcmp.ge.s32.totalorder %v5913_v22, 0  ;;  %vm5981_vm8 = vcmp.lt.s32.totalorder %v5913_v22, 1000 }
 0x6ef   : > { %13755 = vst [vmem:[#allocation70_spill] sm:$0xff] %v12731_v41  ;;  %v5641_v45 = vadd.f32 %v5640_v37, %v5522_v36  ;;  %v5525_v36 = vadd.f32 %v12675_v44, %v12597_v7  ;;  %vm6015_vm7 = vmand %vm5947_vm0, %vm5981_vm8 }
 0x6f0   : > { %v5876_v58 = vsel %vm5808_vm6, %v5757_v33, %v5842_v9 }
 0x6f1   : > { %v6116_v8 = vsel %vm6014_vm13, %v5876_v58, 0.0  ;;  %7560 = vmatmul.msk.f32.gmra.mxu1 %vm6014_vm13, %v5876_v58  ;;  %v13758_v58 = vld [vmem:[#allocation49_spill] sm:$0xff] }
 0x6f2   : > { %v6208_v20 = vrot.slane %v6116_v8, 1  ;;  %v6308_v49 = vrot.slane %v6116_v8, 2  ;;  %v5914_v42 = vadd.s32 %v12356_v53, %v13758_v58  ;;  %v12750_v8 = vpop.f32.mrf.mxu2 }
 0x6f3   : > { %v5759_v6 = vpop.f32.mrf.mxu0 }
 0x6f4   : > { %v5760_v59 = vadd.f32 %v5759_v6, %v5641_v45  ;;  %v6309_v41 = vsel %vm817_vm3, %v6306_v3, %v6308_v49  ;;  %v12742_v29 = vsel %vm709_vm2, %v6206_v40, %v6208_v20  ;;  %vm5948_vm9 = vcmp.ge.s32.totalorder %v5914_v42, 0 }
 0x6f5   : > { %6682 = vmatmul.f32.gmra.mxu2 %v6309_v41  ;;  %vm5982_vm15 = vcmp.lt.s32.totalorder %v5914_v42, 1000 }
 0x6f6   : > { %vm5809_vm11 = vcmp.ge.f32.partialorder %v5760_v59, 0.0  ;;  %v5843_v33 = vmul.f32 0.1, %v5760_v59  ;;  %v12746_v9 = vpop.f32.mrf.mxu1  ;;  %v5643_v37 = vpop.f32.mrf.mxu3  ;;  %vm6016_vm14 = vmand %vm5948_vm9, %vm5982_vm15 }
 0x6f7   : > { %13757 = vst [vmem:[#allocation72_spill] sm:$0xff] %v12746_v9  ;;  %v5644_v22 = vadd.f32 %v5643_v37, %v5525_v36  ;;  %v5528_v36 = vadd.f32 %v12675_v44, %v12612_v15 }
 0x6f8   : > { %v5877_v45 = vsel %vm5809_vm11, %v5760_v59, %v5843_v33 }
 0x6f9   : > { %v6117_v3 = vsel %vm6015_vm7, %v5877_v45, 0.0  ;;  %7561 = vmatmul.msk.f32.gmra.mxu1 %vm6015_vm7, %v5877_v45  ;;  %v13761_v45 = vld [vmem:[#allocation52_spill] sm:$0xff] }
 0x6fa   : > { %v6210_v40 = vrot.slane %v6117_v3, 1  ;;  %v6310_v41 = vrot.slane %v6117_v3, 2  ;;  %v5915_v3 = vadd.s32 %v12356_v53, %v13761_v45  ;;  %v12765_v15 = vpop.f32.mrf.mxu2 }
 0x6fb   : > { %v5762_v6 = vpop.f32.mrf.mxu0 }
 0x6fc   : > { %v5763_v7 = vadd.f32 %v5762_v6, %v5644_v22  ;;  %v6311_v10 = vsel %vm817_vm3, %v6308_v49, %v6310_v41  ;;  %v12754_v9 = vsel %vm709_vm2, %v6208_v20, %v6210_v40  ;;  %vm5949_vm1 = vcmp.ge.s32.totalorder %v5915_v3, 0 }
 0x6fd   : > { %13759 = vst [vmem:[#allocation74_spill] sm:$0xff] %v12754_v9  ;;  %6685 = vmatmul.f32.gmra.mxu2 %v6311_v10  ;;  %v7501_v10 = vld [vmem:[%s13145_s3 + $0x380] sm:$0xff]  ;;  %vm5983_vm4 = vcmp.lt.s32.totalorder %v5915_v3, 1000 }
 0x6fe   : > { %vm5810_vm12 = vcmp.ge.f32.partialorder %v5763_v7, 0.0  ;;  %v5844_v59 = vmul.f32 0.1, %v5763_v7  ;;  %v12758_v33 = vpop.f32.mrf.mxu1  ;;  %v5646_v37 = vpop.f32.mrf.mxu3  ;;  %6493 = vmatpush.msra.mxu1 %v7501_v10  ;;  %vm6017_vm10 = vmand %vm5949_vm1, %vm5983_vm4 }
 0x6ff   : > { %13760 = vst [vmem:[#allocation76_spill] sm:$0xff] %v12758_v33  ;;  %v5647_v42 = vadd.f32 %v5646_v37, %v5528_v36 }
 0x700   : > { %v5878_v22 = vsel %vm5810_vm12, %v5763_v7, %v5844_v59  ;;  %v5531_v7 = vadd.f32 %v12675_v44, %v12633_v0 }
 0x701   : > { %v6118_v6 = vsel %vm6016_vm14, %v5878_v22, 0.0  ;;  %7562 = vmatmul.msk.f32.gmra.mxu1 %vm6016_vm14, %v5878_v22 }
 0x702   : > { %v6212_v49 = vrot.slane %v6118_v6, 1  ;;  %v6312_v20 = vrot.slane %v6118_v6, 2  ;;  %v13764_v6 = vld [vmem:[#allocation55_spill] sm:$0xff] }
 0x703   : > { %v5765_v58 = vpop.f32.mrf.mxu0  ;;  %v5916_v3 = vadd.s32 %v12356_v53, %v13764_v6 }
 0x704   : > { %v5766_v33 = vadd.f32 %v5765_v58, %v5647_v42  ;;  %v6313_v9 = vsel %vm817_vm3, %v6310_v41, %v6312_v20  ;;  %v12769_v36 = vsel %vm709_vm2, %v6210_v40, %v6212_v49 }
 0x705   : > { %13762 = vst [vmem:[#allocation78_spill] sm:$0xff] %v12769_v36  ;;  %6688 = vmatmul.f32.gmra.mxu2 %v6313_v9  ;;  %vm5950_vm6 = vcmp.ge.s32.totalorder %v5916_v3, 0  ;;  %vm5984_vm13 = vcmp.lt.s32.totalorder %v5916_v3, 1000 }
 0x706   : > { %vm5811_vm5 = vcmp.ge.f32.partialorder %v5766_v33, 0.0  ;;  %v5845_v59 = vmul.f32 0.1, %v5766_v33  ;;  %v12773_v37 = vpop.f32.mrf.mxu1  ;;  %v5649_v22 = vpop.f32.mrf.mxu3  ;;  %vm6018_vm8 = vmand %vm5950_vm6, %vm5984_vm13 }
 0x707   : > { %13763 = vst [vmem:[#allocation80_spill] sm:$0xff] %v12773_v37  ;;  %v5650_v10 = vadd.f32 %v5649_v22, %v5531_v7  ;;  %v12781_v37 = vpop.f32.mrf.mxu2  ;;  %v5534_v7 = vadd.f32 %v12675_v44, %v12649_v26 }
 0x708   : > { %v5879_v58 = vsel %vm5811_vm5, %v5766_v33, %v5845_v59 }
 0x709   : > { %v6119_v42 = vsel %vm6017_vm10, %v5879_v58, 0.0  ;;  %7563 = vmatmul.msk.f32.gmra.mxu1 %vm6017_vm10, %v5879_v58  ;;  %v13767_v58 = vld [vmem:[#allocation58_spill] sm:$0xff] }
 0x70a   : > { %v6214_v41 = vrot.slane %v6119_v42, 1  ;;  %v6314_v40 = vrot.slane %v6119_v42, 2 }
 0x70b   : > { %v5768_v45 = vpop.f32.mrf.mxu0 }
 0x70c   : > { %v5769_v9 = vadd.f32 %v5768_v45, %v5650_v10  ;;  %v6315_v0 = vsel %vm817_vm3, %v6312_v20, %v6314_v40  ;;  %v12779_v36 = vsel %vm709_vm2, %v6212_v49, %v6214_v41  ;;  %v5917_v45 = vadd.s32 %v12356_v53, %v13767_v58 }
 0x70d   : > { %13765 = vst [vmem:[#allocation82_spill] sm:$0xff] %v12779_v36  ;;  %6691 = vmatmul.f32.gmra.mxu2 %v6315_v0 }
 0x70e   : > { %vm5812_vm0 = vcmp.ge.f32.partialorder %v5769_v9, 0.0  ;;  %v5846_v33 = vmul.f32 0.1, %v5769_v9  ;;  %v12785_v59 = vpop.f32.mrf.mxu1  ;;  %v5652_v22 = vpop.f32.mrf.mxu3  ;;  %vm5951_vm11 = vcmp.ge.s32.totalorder %v5917_v45, 0  ;;  %vm5985_vm7 = vcmp.lt.s32.totalorder %v5917_v45, 1000 }
 0x70f   : > { %13766 = vst [vmem:[#allocation84_spill] sm:$0xff] %v12785_v59  ;;  %v5653_v3 = vadd.f32 %v5652_v22, %v5534_v7  ;;  %v5537_v59 = vadd.f32 %v12675_v44, %v12666_v1  ;;  %vm6019_vm15 = vmand %vm5951_vm11, %vm5985_vm7 }
 0x710   : > { %v5880_v20 = vsel %vm5812_vm0, %v5769_v9, %v5846_v33  ;;  %v12797_v33 = vpop.f32.mrf.mxu2 }
 0x711   : > { %v6120_v10 = vsel %vm6018_vm8, %v5880_v20, 0.0  ;;  %7564 = vmatmul.msk.f32.gmra.mxu1 %vm6018_vm8, %v5880_v20  ;;  %v13770_v20 = vld [vmem:[#allocation62_spill] sm:$0xff] }
 0x712   : > { %v6216_v49 = vrot.slane %v6120_v10, 1  ;;  %v6316_v42 = vrot.slane %v6120_v10, 2 }
 0x713   : > { %v5771_v6 = vpop.f32.mrf.mxu0 }
 0x714   : > { %v5772_v0 = vadd.f32 %v5771_v6, %v5653_v3  ;;  %v6317_v26 = vsel %vm817_vm3, %v6314_v40, %v6316_v42  ;;  %v12791_v36 = vsel %vm709_vm2, %v6214_v41, %v6216_v49  ;;  %v5918_v6 = vadd.s32 %v12356_v53, %v13770_v20 }
 0x715   : > { %13768 = vst [vmem:[#allocation86_spill] sm:$0xff] %v12791_v36  ;;  %6694 = vmatmul.f32.gmra.mxu2 %v6317_v26  ;;  %v5540_v36 = vadd.f32 %v12675_v44, %v12686_v5 }
 0x716   : > { %vm5813_vm9 = vcmp.ge.f32.partialorder %v5772_v0, 0.0  ;;  %v5847_v7 = vmul.f32 0.1, %v5772_v0  ;;  %v12795_v9 = vpop.f32.mrf.mxu1  ;;  %v5655_v22 = vpop.f32.mrf.mxu3  ;;  %vm5952_vm12 = vcmp.ge.s32.totalorder %v5918_v6, 0  ;;  %vm5986_vm14 = vcmp.lt.s32.totalorder %v5918_v6, 1000 }
 0x717   : > { %13769 = vst [vmem:[#allocation88_spill] sm:$0xff] %v12795_v9  ;;  %v5656_v45 = vadd.f32 %v5655_v22, %v5537_v59  ;;  %vm6020_vm4 = vmand %vm5952_vm12, %vm5986_vm14  ;;  %v13772_v22 = vld [vmem:[#allocation63_spill] sm:$0xff] }
 0x718   : > { %v5881_v40 = vsel %vm5813_vm9, %v5772_v0, %v5847_v7 }
 0x719   : > { %v6121_v3 = vsel %vm6019_vm15, %v5881_v40, 0.0  ;;  %7565 = vmatmul.msk.f32.gmra.mxu1 %vm6019_vm15, %v5881_v40  ;;  %v5919_v40 = vadd.s32 %v12356_v53, %v13772_v22 }
 0x71a   : > { %v6218_v41 = vrot.slane %v6121_v3, 1  ;;  %v6318_v10 = vrot.slane %v6121_v3, 2  ;;  %v12811_v3 = vpop.f32.mrf.mxu2 }
 0x71b   : > { %v5774_v26 = vpop.f32.mrf.mxu0  ;;  %vm5953_vm5 = vcmp.ge.s32.totalorder %v5919_v40, 0  ;;  %vm5987_vm10 = vcmp.lt.s32.totalorder %v5919_v40, 1000 }
 0x71c   : > { %v5775_v1 = vadd.f32 %v5774_v26, %v5656_v45  ;;  %v6319_v58 = vsel %vm817_vm3, %v6316_v42, %v6318_v10  ;;  %v12803_v9 = vsel %vm709_vm2, %v6216_v49, %v6218_v41  ;;  %vm6021_vm13 = vmand %vm5953_vm5, %vm5987_vm10 }
 0x71d   : > { %6697 = vmatmul.f32.gmra.mxu2 %v6319_v58 }
 0x71e   : > { %vm5814_vm1 = vcmp.ge.f32.partialorder %v5775_v1, 0.0  ;;  %v5848_v59 = vmul.f32 0.1, %v5775_v1  ;;  %v12807_v0 = vpop.f32.mrf.mxu1  ;;  %v5658_v7 = vpop.f32.mrf.mxu3 }
 0x71f   : > { %13771 = vst [vmem:[#allocation90_spill] sm:$0xff] %v12807_v0  ;;  %v5659_v6 = vadd.f32 %v5658_v7, %v5540_v36  ;;  %v5543_v36 = vadd.f32 %v12675_v44, %v12702_v38 }
 0x720   : > { %v5882_v45 = vsel %vm5814_vm1, %v5775_v1, %v5848_v59 }
 0x721   : > { %v6122_v42 = vsel %vm6020_vm4, %v5882_v45, 0.0  ;;  %7566 = vmatmul.msk.f32.gmra.mxu1 %vm6020_vm4, %v5882_v45  ;;  %v13774_v45 = vld [vmem:[#allocation65_spill] sm:$0xff] }
 0x722   : > { %v6220_v49 = vrot.slane %v6122_v42, 1  ;;  %v6320_v58 = vrot.slane %v6122_v42, 2  ;;  %v5920_v42 = vadd.s32 %v12356_v53, %v13774_v45  ;;  %v12823_v22 = vpop.f32.mrf.mxu2 }
 0x723   : > { %v5777_v26 = vpop.f32.mrf.mxu0 }
 0x724   : > { %v5778_v5 = vadd.f32 %v5777_v26, %v5659_v6  ;;  %v6321_v20 = vsel %vm817_vm3, %v6318_v10, %v6320_v58  ;;  %v12815_v0 = vsel %vm709_vm2, %v6218_v41, %v6220_v49  ;;  %vm5954_vm0 = vcmp.ge.s32.totalorder %v5920_v42, 0 }
 0x725   : > { %6700 = vmatmul.f32.gmra.mxu2 %v6321_v20  ;;  %vm5988_vm8 = vcmp.lt.s32.totalorder %v5920_v42, 1000 }
 0x726   : > { %vm5815_vm6 = vcmp.ge.f32.partialorder %v5778_v5, 0.0  ;;  %v5849_v1 = vmul.f32 0.1, %v5778_v5  ;;  %v12819_v59 = vpop.f32.mrf.mxu1  ;;  %v5661_v7 = vpop.f32.mrf.mxu3  ;;  %vm6022_vm7 = vmand %vm5954_vm0, %vm5988_vm8 }
 0x727   : > { %13773 = vst [vmem:[#allocation92_spill] sm:$0xff] %v12819_v59  ;;  %v5662_v40 = vadd.f32 %v5661_v7, %v5543_v36 }
 0x728   : > { %v5883_v6 = vsel %vm5815_vm6, %v5778_v5, %v5849_v1 }
 0x729   : > { %v6123_v26 = vsel %vm6021_vm13, %v5883_v6, 0.0  ;;  %7567 = vmatmul.msk.f32.gmra.mxu1 %vm6021_vm13, %v5883_v6 }
 0x72a   : > { %v6222_v10 = vrot.slane %v6123_v26, 1  ;;  %v6322_v41 = vrot.slane %v6123_v26, 2 }
 0x72b   : > { %v5780_v20 = vpop.f32.mrf.mxu0 }
 0x72c   : > { %v5781_v38 = vadd.f32 %v5780_v20, %v5662_v40  ;;  %v6323_v44 = vsel %vm817_vm3, %v6320_v58, %v6322_v41  ;;  %v12827_v59 = vsel %vm709_vm2, %v6220_v49, %v6222_v10  ;;  %v12836_v58 = vpop.f32.mrf.mxu2 }
 0x72d   : > { %6703 = vmatmul.f32.gmra.mxu2 %v6323_v44  ;;  %v13775_v44 = vld [vmem:[#allocation45_spill] sm:$0xff] }
 0x72e   : > { %vm5816_vm11 = vcmp.ge.f32.partialorder %v5781_v38, 0.0  ;;  %v5850_v53 = vmul.f32 0.1, %v5781_v38  ;;  %v12829_v5 = vpop.f32.mrf.mxu1 }
 0x730   : > { %v5884_v36 = vsel %vm5816_vm11, %v5781_v38, %v5850_v53 }
 0x731   : > { %v6124_v1 = vsel %vm6022_vm7, %v5884_v36, 0.0  ;;  %6494 = vmatmul.f32.vlgmr.msra.gmra.mxu1 %v12419_v63 }
 0x732   : > { %v6324_v7 = vrot.slane %v6124_v1, 2  ;;  %v6224_v45 = vrot.slane %v6124_v1, 1 }
 0x734   : > { %v6325_v42 = vsel %vm817_vm3, %v6322_v41, %v6324_v7  ;;  %v12834_v40 = vsel %vm709_vm2, %v6222_v10, %v6224_v45 }
 0x735   : > { %6706 = vmatmul.f32.gmra.mxu2 %v6325_v42 }
 0x736   : > { %v12838_v49 = vpop.f32.mrf.mxu1 }
 0x739   : > { %6497 = vmatmul.f32.gmra.mxu1 %v12429_v35 }
 0x73e   : > { %v12841_v6 = vpop.f32.mrf.mxu1 }
 0x741   : > { %6500 = vmatmul.f32.gmra.mxu1 %v12444_v60 }
 0x746   : > { %v12844_v26 = vpop.f32.mrf.mxu1 }
 0x749   : > { %6503 = vmatmul.f32.gmra.mxu1 %v12456_v17 }
 0x74e   : > { %v12847_v63 = vpop.f32.mrf.mxu1 }
 0x751   : > { %6506 = vmatmul.f32.gmra.mxu1 %v12471_v62 }
 0x756   : > { %v12850_v10 = vpop.f32.mrf.mxu1 }
 0x759   : > { %6509 = vmatmul.f32.gmra.mxu1 %v12483_v16 }
 0x75e   : > { %v12853_v41 = vpop.f32.mrf.mxu1 }
 0x761   : > { %6512 = vmatmul.f32.gmra.mxu1 %v12496_v56 }
 0x766   : > { %v12856_v35 = vpop.f32.mrf.mxu1 }
 0x769   : > { %6515 = vmatmul.f32.gmra.mxu1 %v12508_v55 }
 0x76e   : > { %v12859_v60 = vpop.f32.mrf.mxu1 }
 0x771   : > { %6518 = vmatmul.f32.gmra.mxu1 %v12523_v28 }
 0x776   : > { %v12862_v17 = vpop.f32.mrf.mxu1 }
 0x779   : > { %6521 = vmatmul.f32.gmra.mxu1 %v12535_v27 }
 0x77e   : > { %v12865_v62 = vpop.f32.mrf.mxu1 }
 0x781   : > { %6524 = vmatmul.f32.gmra.mxu1 %v12550_v11  ;;  %v12883_v11 = vstv %s6877_s17 }
 0x786   : > { %v12868_v16 = vpop.f32.mrf.mxu1 }
 0x789   : > { %6527 = vmatmul.f32.gmra.mxu1 %v12560_v54  ;;  %v12888_v54 = vld [vmem:[%s13146_s4 + $0x2] ss:$0 sm:$0xff] }
 0x78e   : > { %v12871_v56 = vpop.f32.mrf.mxu1 }
 0x791   : > { %6530 = vmatmul.f32.gmra.mxu1 %v12575_v30  ;;  %v6879_v30 = vadd.s32 %v12883_v11, %v13715_v24  ;;  %v6383_v24 = vadd.f32 %v12888_v54, %v12622_v46  ;;  %v6386_v46 = vadd.f32 %v12888_v54, %v12637_v21 }
 0x793   : > { %vm6912_vm2 = vcmp.ge.s32.totalorder %v6879_v30, 0  ;;  %vm6945_vm3 = vcmp.lt.s32.totalorder %v6879_v30, 1000 }
 0x794   : > { %vm6978_vm9 = vmand %vm6912_vm2, %vm6945_vm3 }
 0x796   : > { %v12874_v55 = vpop.f32.mrf.mxu1 }
 0x799   : > { %6533 = vmatmul.f32.gmra.mxu1 %v12587_v2  ;;  %v6380_v2 = vadd.f32 %v12888_v54, %v12608_v25 }
 0x79e   : > { %v12877_v28 = vpop.f32.mrf.mxu1 }
 0x7a1   : > { %6536 = vmatmul.f32.gmra.mxu1 %v12603_v51 }
 0x7a6   : > { %v12881_v27 = vpop.f32.mrf.mxu1 }
 0x7a9   : > { %6539 = vmatmul.f32.gmra.mxu1 %v12616_v48  ;;  %v6880_v48 = vadd.s32 %v12883_v11, %v13718_v23  ;;  %v6881_v23 = vadd.s32 %v12883_v11, %v13719_v52  ;;  %v6389_v52 = vadd.f32 %v12888_v54, %v12647_v50  ;;  %v6392_v50 = vadd.f32 %v12888_v54, %v12662_v57 }
 0x7aa   : > { %v6395_v57 = vadd.f32 %v12888_v54, %v12679_v12 }
 0x7ab   : > { %vm6913_vm15 = vcmp.ge.s32.totalorder %v6880_v48, 0  ;;  %vm6946_vm12 = vcmp.lt.s32.totalorder %v6880_v48, 1000  ;;  %vm6914_vm1 = vcmp.ge.s32.totalorder %v6881_v23, 0  ;;  %vm6947_vm4 = vcmp.lt.s32.totalorder %v6881_v23, 1000 }
 0x7ac   : > { %vm6979_vm14 = vmand %vm6913_vm15, %vm6946_vm12 }
 0x7ad   : > { %vm6980_vm5 = vmand %vm6914_vm1, %vm6947_vm4 }
 0x7ae   : > { %v6495_v51 = vpop.f32.mrf.mxu1 }
 0x7af   : > { %v6496_v20 = vadd.f32 %v6495_v51, %v6380_v2  ;;  %v6882_v51 = vadd.s32 %v12883_v11, %v13720_v31  ;;  %v6883_v31 = vadd.s32 %v12883_v11, %v13721_v32  ;;  %v6884_v32 = vadd.s32 %v12883_v11, %v13722_v19 }
 0x7b0   : > { %v6885_v19 = vadd.s32 %v12883_v11, %v13723_v13  ;;  %v13784_v13 = vld [vmem:[#allocation19_spill] sm:$0xff] }
 0x7b1   : > { %v6612_v38 = vadd.f32 %v12717_v61, %v6496_v20  ;;  %6542 = vmatmul.f32.gmra.mxu1 %v12631_v39  ;;  %v13776_v39 = vld [vmem:[#allocation48_spill] sm:$0xff]  ;;  %vm6915_vm10 = vcmp.ge.s32.totalorder %v6882_v51, 0  ;;  %vm6948_vm6 = vcmp.lt.s32.totalorder %v6882_v51, 1000  ;;  %vm6916_vm0 = vcmp.ge.s32.totalorder %v6883_v31, 0 }
 0x7b2   : > { %vm6981_vm13 = vmand %vm6915_vm10, %vm6948_vm6  ;;  %vm6949_vm8 = vcmp.lt.s32.totalorder %v6883_v31, 1000  ;;  %vm6917_vm7 = vcmp.ge.s32.totalorder %v6884_v32, 0  ;;  %vm6950_vm2 = vcmp.lt.s32.totalorder %v6884_v32, 1000  ;;  %vm6951_vm15 = vcmp.lt.s32.totalorder %v6885_v19, 1000  ;;  %v13787_v31 = vld [vmem:[#allocation64_spill] sm:$0xff] }
 0x7b3   : > { %v6844_v53 = vadd.f32 %v13775_v44, %v6612_v38  ;;  %v13778_v44 = vld [vmem:[#allocation54_spill] sm:$0xff]  ;;  %vm6982_vm11 = vmand %vm6916_vm0, %vm6949_vm8  ;;  %v6886_v51 = vadd.s32 %v12883_v11, %v13784_v13 }
 0x7b4   : > { %vm6983_vm3 = vmand %vm6917_vm7, %vm6950_vm2 }
 0x7b5   : > { %v7077_v36 = vsel %vm6978_vm9, %v6844_v53, 0.0  ;;  %vm6918_vm9 = vcmp.ge.s32.totalorder %v6885_v19, 0  ;;  %vm6952_vm1 = vcmp.lt.s32.totalorder %v6886_v51, 1000 }
 0x7b6   : > { %7110 = vst [vmem:[%s7806_s7 - $0x4] sm:$0xf0] %v7077_v36  ;;  %v6498_v25 = vpop.f32.mrf.mxu1  ;;  %vm6984_vm12 = vmand %vm6918_vm9, %vm6951_vm15 }
 0x7b7   : > { %v6499_v1 = vadd.f32 %v6498_v25, %v6383_v24 }
 0x7b9   : > { %v6615_v61 = vadd.f32 %v12733_v47, %v6499_v1  ;;  %6545 = vmatmul.f32.gmra.mxu1 %v12643_v14  ;;  %v13777_v14 = vld [vmem:[#allocation51_spill] sm:$0xff] }
 0x7bb   : > { %v6845_v7 = vadd.f32 %v13776_v39, %v6615_v61 }
 0x7bd   : > { %v7078_v45 = vsel %vm6979_vm14, %v6845_v7, 0.0  ;;  %vm6919_vm14 = vcmp.ge.s32.totalorder %v6886_v51, 0 }
 0x7be   : > { %7111 = vst [vmem:[%s7806_s7 + $0x4] sm:$0xff] %v7078_v45  ;;  %v6501_v42 = vpop.f32.mrf.mxu1  ;;  %vm6985_vm4 = vmand %vm6919_vm14, %vm6952_vm1 }
 0x7bf   : > { %v6502_v30 = vadd.f32 %v6501_v42, %v6386_v46  ;;  %v13781_v46 = vld [vmem:[#allocation32_spill] sm:$0xff] }
 0x7c0   : > { %v6398_v12 = vadd.f32 %v12888_v54, %v13781_v46 }
 0x7c1   : > { %v6618_v47 = vadd.f32 %v12750_v8, %v6502_v30  ;;  %6548 = vmatmul.f32.gmra.mxu1 %v12658_v34  ;;  %v12921_v34 = vpop.f32.mrf.mxu2 }
 0x7c3   : > { %v6846_v2 = vadd.f32 %v13777_v14, %v6618_v47  ;;  %v13783_v14 = vld [vmem:[#allocation61_spill] sm:$0xff] }
 0x7c5   : > { %v7079_v21 = vsel %vm6980_vm5, %v6846_v2, 0.0 }
 0x7c6   : > { %7112 = vst [vmem:[%s7806_s7 + $0xc] sm:$0xff] %v7079_v21  ;;  %v6504_v20 = vpop.f32.mrf.mxu1 }
 0x7c7   : > { %v6505_v38 = vadd.f32 %v6504_v20, %v6389_v52  ;;  %v13785_v52 = vld [vmem:[#allocation11_spill] sm:$0xff] }
 0x7c8   : > { %v6401_v21 = vadd.f32 %v12888_v54, %v13785_v52 }
 0x7c9   : > { %v6621_v8 = vadd.f32 %v12765_v15, %v6505_v38  ;;  %6551 = vmatmul.f32.gmra.mxu1 %v12670_v43  ;;  %v13779_v15 = vld [vmem:[#allocation57_spill] sm:$0xff]  ;;  %v12934_v1 = vpop.f32.mrf.mxu2 }
 0x7cb   : > { %v6847_v53 = vadd.f32 %v13778_v44, %v6621_v8 }
 0x7cd   : > { %v7080_v48 = vsel %vm6981_vm13, %v6847_v53, 0.0  ;;  %v13786_v53 = vld [vmem:[#allocation69_spill] sm:$0xff] }
 0x7ce   : > { %7113 = vst [vmem:[%s7806_s7 + $0x14] sm:$0xff] %v7080_v48  ;;  %v6507_v24 = vpop.f32.mrf.mxu1  ;;  %v13788_v48 = vld [vmem:[#allocation20_spill] sm:$0xff] }
 0x7cf   : > { %v6508_v36 = vadd.f32 %v6507_v24, %v6392_v50  ;;  %v6887_v24 = vadd.s32 %v12883_v11, %v13788_v48 }
 0x7d1   : > { %v6624_v43 = vadd.f32 %v12781_v37, %v6508_v36  ;;  %6554 = vmatmul.f32.gmra.mxu1 %v12690_v4  ;;  %v13780_v37 = vld [vmem:[#allocation60_spill] sm:$0xff]  ;;  %v12946_v42 = vpop.f32.mrf.mxu2  ;;  %vm6920_vm5 = vcmp.ge.s32.totalorder %v6887_v24, 0  ;;  %vm6953_vm10 = vcmp.lt.s32.totalorder %v6887_v24, 1000 }
 0x7d2   : > { %v13789_v36 = vld [vmem:[#allocation68_spill] sm:$0xff]  ;;  %vm6986_vm6 = vmand %vm6920_vm5, %vm6953_vm10 }
 0x7d3   : > { %v6848_v25 = vadd.f32 %v13779_v15, %v6624_v43  ;;  %v6404_v43 = vadd.f32 %v12888_v54, %v13789_v36 }
 0x7d5   : > { %v7081_v61 = vsel %vm6982_vm11, %v6848_v25, 0.0 }
 0x7d6   : > { %7114 = vst [vmem:[%s7806_s7 + $0x1c] sm:$0xff] %v7081_v61  ;;  %v6510_v39 = vpop.f32.mrf.mxu1  ;;  %v13790_v61 = vld [vmem:[#allocation8_spill] sm:$0xff] }
 0x7d7   : > { %v6511_v7 = vadd.f32 %v6510_v39, %v6395_v57 }
 0x7d9   : > { %v6627_v4 = vadd.f32 %v12797_v33, %v6511_v7  ;;  %6557 = vmatmul.f32.gmra.mxu1 %v12700_v18  ;;  %v13782_v33 = vld [vmem:[#allocation35_spill] sm:$0xff]  ;;  %v12957_v44 = vpop.f32.mrf.mxu2  ;;  %v13791_v7 = vld [vmem:[#allocation21_spill] sm:$0xff] }
 0x7db   : > { %v6849_v23 = vadd.f32 %v13780_v37, %v6627_v4  ;;  %v6888_v4 = vadd.s32 %v12883_v11, %v13791_v7  ;;  %v13792_v37 = vld [vmem:[#allocation70_spill] sm:$0xff] }
 0x7dd   : > { %v7082_v45 = vsel %vm6983_vm3, %v6849_v23, 0.0  ;;  %v6407_v23 = vadd.f32 %v12888_v54, %v13792_v37  ;;  %vm6921_vm13 = vcmp.ge.s32.totalorder %v6888_v4, 0  ;;  %vm6954_vm0 = vcmp.lt.s32.totalorder %v6888_v4, 1000 }
 0x7de   : > { %7115 = vst [vmem:[%s7806_s7 + $0x24] sm:$0xff] %v7082_v45  ;;  %v6513_v30 = vpop.f32.mrf.mxu1  ;;  %vm6987_vm8 = vmand %vm6921_vm13, %vm6954_vm0  ;;  %v13794_v45 = vld [vmem:[#allocation9_spill] sm:$0xff] }
 0x7df   : > { %v6514_v47 = vadd.f32 %v6513_v30, %v6398_v12 }
 0x7e1   : > { %v6630_v18 = vadd.f32 %v12811_v3, %v6514_v47  ;;  %6560 = vmatmul.f32.gmra.mxu1 %v13782_v33  ;;  %v6650_v57 = vpop.f32.mrf.mxu2  ;;  %v13795_v47 = vld [vmem:[#allocation22_spill] sm:$0xff] }
 0x7e3   : > { %v6850_v2 = vadd.f32 %v13783_v14, %v6630_v18  ;;  %v6889_v18 = vadd.s32 %v12883_v11, %v13795_v47  ;;  %v13796_v14 = vld [vmem:[#allocation72_spill] sm:$0xff] }
 0x7e5   : > { %v7083_v20 = vsel %vm6984_vm12, %v6850_v2, 0.0  ;;  %v6410_v2 = vadd.f32 %v12888_v54, %v13796_v14  ;;  %vm6922_vm11 = vcmp.ge.s32.totalorder %v6889_v18, 0  ;;  %vm6955_vm7 = vcmp.lt.s32.totalorder %v6889_v18, 1000 }
 0x7e6   : > { %7116 = vst [vmem:[%s7806_s7 + $0x2c] sm:$0xff] %v7083_v20  ;;  %v6516_v38 = vpop.f32.mrf.mxu1  ;;  %vm6988_vm2 = vmand %vm6922_vm11, %vm6955_vm7  ;;  %v13798_v20 = vld [vmem:[#allocation10_spill] sm:$0xff] }
 0x7e7   : > { %v6517_v8 = vadd.f32 %v6516_v38, %v6401_v21  ;;  %v13797_v21 = vld [vmem:[#allocation78_spill] sm:$0xff] }
 0x7e9   : > { %v6633_v3 = vadd.f32 %v12823_v22, %v6517_v8  ;;  %6563 = vmatmul.f32.gmra.mxu1 %v13786_v53  ;;  %v6653_v33 = vpop.f32.mrf.mxu2  ;;  %v13799_v8 = vld [vmem:[#allocation24_spill] sm:$0xff] }
 0x7ea   : > { %v13800_v53 = vld [vmem:[#allocation76_spill] sm:$0xff] }
 0x7eb   : > { %v6851_v50 = vadd.f32 %v13787_v31, %v6633_v3  ;;  %v6890_v3 = vadd.s32 %v12883_v11, %v13799_v8  ;;  %v6413_v31 = vadd.f32 %v12888_v54, %v13800_v53 }
 0x7ed   : > { %v7084_v15 = vsel %vm6985_vm4, %v6851_v50, 0.0  ;;  %vm6923_vm3 = vcmp.ge.s32.totalorder %v6890_v3, 0  ;;  %vm6956_vm9 = vcmp.lt.s32.totalorder %v6890_v3, 1000 }
 0x7ee   : > { %7117 = vst [vmem:[%s7806_s7 + $0x34] sm:$0xff] %v7084_v15  ;;  %v6519_v25 = vpop.f32.mrf.mxu1  ;;  %vm6989_vm15 = vmand %vm6923_vm3, %vm6956_vm9  ;;  %v13802_v15 = vld [vmem:[#allocation67_spill] sm:$0xff] }
 0x7ef   : > { %v6520_v32 = vadd.f32 %v6519_v25, %v6404_v43  ;;  %v13801_v43 = vld [vmem:[#allocation82_spill] sm:$0xff] }
 0x7f1   : > { %v6636_v22 = vadd.f32 %v12836_v58, %v6520_v32  ;;  %6566 = vmatmul.f32.gmra.mxu1 %v12742_v29  ;;  %v13793_v29 = vld [vmem:[#allocation74_spill] sm:$0xff]  ;;  %v6656_v48 = vpop.f32.mrf.mxu2  ;;  %v13803_v32 = vld [vmem:[#allocation25_spill] sm:$0xff] }
 0x7f3   : > { %v6852_v39 = vadd.f32 %v13790_v61, %v6636_v22  ;;  %v6891_v22 = vadd.s32 %v12883_v11, %v13803_v32  ;;  %v13804_v61 = vld [vmem:[#allocation80_spill] sm:$0xff] }
 0x7f5   : > { %v7085_v19 = vsel %vm6986_vm6, %v6852_v39, 0.0  ;;  %v6416_v39 = vadd.f32 %v12888_v54, %v13804_v61  ;;  %vm6924_vm12 = vcmp.ge.s32.totalorder %v6891_v22, 0  ;;  %vm6957_vm14 = vcmp.lt.s32.totalorder %v6891_v22, 1000  ;;  %v13816_v22 = vld [vmem:[#allocation31_spill] sm:$0xff] }
 0x7f6   : > { %7118 = vst [vmem:[%s7806_s7 + $0x3c] sm:$0xff] %v7085_v19  ;;  %v6522_v46 = vpop.f32.mrf.mxu1  ;;  %v13805_v19 = vld [vmem:[#allocation86_spill] sm:$0xff]  ;;  %vm6990_vm1 = vmand %vm6924_vm12, %vm6957_vm14  ;;  %v6895_v61 = vadd.s32 %v12883_v11, %v13816_v22 }
 0x7f7   : > { %v6523_v12 = vadd.f32 %v6522_v46, %v6407_v23  ;;  %v13806_v46 = vld [vmem:[#allocation71_spill] sm:$0xff] }
 0x7f8   : > { %vm6961_vm3 = vcmp.lt.s32.totalorder %v6895_v61, 1000 }
 0x7f9   : > { %v6639_v58 = vadd.f32 %v12921_v34, %v6523_v12  ;;  %6569 = vmatmul.f32.gmra.mxu1 %v13793_v29  ;;  %v6659_v23 = vpop.f32.mrf.mxu2 }
 0x7fb   : > { %v6853_v30 = vadd.f32 %v13794_v45, %v6639_v58  ;;  %v13807_v58 = vld [vmem:[#allocation26_spill] sm:$0xff]  ;;  %v13808_v45 = vld [vmem:[#allocation84_spill] sm:$0xff] }
 0x7fc   : > { %v6892_v29 = vadd.s32 %v12883_v11, %v13807_v58 }
 0x7fd   : > { %v7086_v13 = vsel %vm6987_vm8, %v6853_v30, 0.0  ;;  %v6419_v30 = vadd.f32 %v12888_v54, %v13808_v45 }
 0x7fe   : > { %7119 = vst [vmem:[%s7806_s7 + $0x44] sm:$0xff] %v7086_v13  ;;  %v6525_v51 = vpop.f32.mrf.mxu1  ;;  %vm6925_vm4 = vcmp.ge.s32.totalorder %v6892_v29, 0  ;;  %vm6958_vm5 = vcmp.lt.s32.totalorder %v6892_v29, 1000  ;;  %v13809_v13 = vld [vmem:[#allocation73_spill] sm:$0xff]  ;;  %v6431_v29 = vadd.f32 %v12888_v54, %v12829_v5 }
 0x7ff   : > { %v6526_v52 = vadd.f32 %v6525_v51, %v6410_v2  ;;  %vm6991_vm10 = vmand %vm6925_vm4, %vm6958_vm5 }
 0x801   : > { %v6642_v34 = vadd.f32 %v12934_v1, %v6526_v52  ;;  %6572 = vmatmul.f32.gmra.mxu1 %v13797_v21  ;;  %v13810_v52 = vld [vmem:[#allocation28_spill] sm:$0xff] }
 0x802   : > { %v13811_v21 = vld [vmem:[#allocation88_spill] sm:$0xff] }
 0x803   : > { %v6854_v38 = vadd.f32 %v13798_v20, %v6642_v34  ;;  %v6893_v34 = vadd.s32 %v12883_v11, %v13810_v52  ;;  %v6422_v20 = vadd.f32 %v12888_v54, %v13811_v21 }
 0x805   : > { %v7087_v50 = vsel %vm6988_vm2, %v6854_v38, 0.0  ;;  %vm6926_vm6 = vcmp.ge.s32.totalorder %v6893_v34, 0  ;;  %vm6959_vm13 = vcmp.lt.s32.totalorder %v6893_v34, 1000  ;;  %vm6928_vm2 = vcmp.ge.s32.totalorder %v6895_v61, 0  ;;  %v13827_v61 = vld [vmem:[#allocation38_spill] sm:$0xff] }
 0x806   : > { %7120 = vst [vmem:[%s7806_s7 + $0x4c] sm:$0xff] %v7087_v50  ;;  %v6528_v24 = vpop.f32.mrf.mxu1  ;;  %vm6992_vm0 = vmand %vm6926_vm6, %vm6959_vm13 }
 0x807   : > { %v6529_v36 = vadd.f32 %v6528_v24, %v6413_v31  ;;  %v13813_v31 = vld [vmem:[#allocation30_spill] sm:$0xff]  ;;  %vm6994_vm9 = vmand %vm6928_vm2, %vm6961_vm3 }
 0x808   : > { %v6894_v50 = vadd.s32 %v12883_v11, %v13813_v31 }
 0x809   : > { %v6645_v1 = vadd.f32 %v12946_v42, %v6529_v36  ;;  %6575 = vmatmul.f32.gmra.mxu1 %v13801_v43  ;;  %v13814_v36 = vld [vmem:[#allocation90_spill] sm:$0xff] }
 0x80a   : > { %vm6927_vm8 = vcmp.ge.s32.totalorder %v6894_v50, 0  ;;  %vm6960_vm11 = vcmp.lt.s32.totalorder %v6894_v50, 1000  ;;  %v13824_v50 = vld [vmem:[#allocation85_spill] sm:$0xff] }
 0x80b   : > { %v6855_v25 = vadd.f32 %v13802_v15, %v6645_v1  ;;  %v6425_v1 = vadd.f32 %v12888_v54, %v13814_v36  ;;  %vm6993_vm7 = vmand %vm6927_vm8, %vm6960_vm11  ;;  %v13825_v36 = vld [vmem:[#allocation37_spill] sm:$0xff] }
 0x80d   : > { %v7088_v7 = vsel %vm6989_vm15, %v6855_v25, 0.0 }
 0x80e   : > { %7121 = vst [vmem:[%s7806_s7 + $0x54] sm:$0xff] %v7088_v7  ;;  %v6531_v4 = vpop.f32.mrf.mxu1 }
 0x80f   : > { %v6532_v37 = vadd.f32 %v6531_v4, %v6416_v39  ;;  %v13817_v39 = vld [vmem:[#allocation92_spill] sm:$0xff] }
 0x810   : > { %v6428_v7 = vadd.f32 %v12888_v54, %v13817_v39  ;;  %v6900_v39 = vadd.s32 %v12883_v11, %v13827_v61 }
 0x811   : > { %v6648_v42 = vadd.f32 %v12957_v44, %v6532_v37  ;;  %6578 = vmatmul.f32.gmra.mxu1 %v13805_v19  ;;  %v6662_v44 = vpop.f32.mrf.mxu2 }
 0x812   : > { %vm6966_vm2 = vcmp.lt.s32.totalorder %v6900_v39, 1000 }
 0x813   : > { %v6856_v12 = vadd.f32 %v13806_v46, %v6648_v42 }
 0x815   : > { %v7089_v47 = vsel %vm6990_vm1, %v6856_v12, 0.0  ;;  %v13819_v12 = vld [vmem:[#allocation33_spill] sm:$0xff] }
 0x816   : > { %7122 = vst [vmem:[%s7806_s7 + $0x5c] sm:$0xff] %v7089_v47  ;;  %v6534_v18 = vpop.f32.mrf.mxu1  ;;  %v6896_v58 = vadd.s32 %v12883_v11, %v13819_v12 }
 0x817   : > { %v6535_v14 = vadd.f32 %v6534_v18, %v6419_v30 }
 0x818   : > { %vm6929_vm15 = vcmp.ge.s32.totalorder %v6896_v58, 0  ;;  %vm6962_vm12 = vcmp.lt.s32.totalorder %v6896_v58, 1000  ;;  %v6446_v58 = vadd.f32 %v12888_v54, %v12850_v10 }
 0x819   : > { %v6651_v2 = vadd.f32 %v6650_v57, %v6535_v14  ;;  %6581 = vmatmul.f32.gmra.mxu1 %v12803_v9  ;;  %v13812_v9 = vld [vmem:[#allocation75_spill] sm:$0xff]  ;;  %v6665_v24 = vpop.f32.mrf.mxu2  ;;  %vm6995_vm14 = vmand %vm6929_vm15, %vm6962_vm12 }
 0x81b   : > { %v6857_v51 = vadd.f32 %v13809_v13, %v6651_v2  ;;  %v13821_v2 = vld [vmem:[#allocation34_spill] sm:$0xff] }
 0x81c   : > { %v6897_v13 = vadd.s32 %v12883_v11, %v13821_v2  ;;  %v6449_v2 = vadd.f32 %v12888_v54, %v12853_v41 }
 0x81d   : > { %v7090_v38 = vsel %vm6991_vm10, %v6857_v51, 0.0  ;;  %v6434_v51 = vadd.f32 %v12888_v54, %v12838_v49 }
 0x81e   : > { %7123 = vst [vmem:[%s7806_s7 + $0x64] sm:$0xff] %v7090_v38  ;;  %v6537_v8 = vpop.f32.mrf.mxu1  ;;  %vm6930_vm1 = vcmp.ge.s32.totalorder %v6897_v13, 0  ;;  %vm6963_vm4 = vcmp.lt.s32.totalorder %v6897_v13, 1000 }
 0x81f   : > { %v6538_v3 = vadd.f32 %v6537_v8, %v6422_v20  ;;  %vm6996_vm5 = vmand %vm6930_vm1, %vm6963_vm4  ;;  %v13823_v8 = vld [vmem:[#allocation36_spill] sm:$0xff] }
 0x821   : > { %v6654_v57 = vadd.f32 %v6653_v33, %v6538_v3  ;;  %6584 = vmatmul.f32.gmra.mxu1 %v12815_v0  ;;  %v13815_v0 = vld [vmem:[#allocation77_spill] sm:$0xff]  ;;  %v6668_v37 = vpop.f32.mrf.mxu2  ;;  %v6898_v3 = vadd.s32 %v12883_v11, %v13823_v8 }
 0x823   : > { %v6858_v53 = vadd.f32 %v13812_v9, %v6654_v57  ;;  %v6437_v57 = vadd.f32 %v12888_v54, %v12841_v6  ;;  %vm6931_vm10 = vcmp.ge.s32.totalorder %v6898_v3, 0  ;;  %vm6964_vm6 = vcmp.lt.s32.totalorder %v6898_v3, 1000 }
 0x824   : > { %vm6997_vm13 = vmand %vm6931_vm10, %vm6964_vm6 }
 0x825   : > { %v7091_v43 = vsel %vm6992_vm0, %v6858_v53, 0.0 }
 0x826   : > { %7124 = vst [vmem:[%s7806_s7 + $0x6c] sm:$0xff] %v7091_v43  ;;  %v6540_v15 = vpop.f32.mrf.mxu1 }
 0x827   : > { %v6541_v25 = vadd.f32 %v6540_v15, %v6425_v1  ;;  %v6899_v1 = vadd.s32 %v12883_v11, %v13825_v36  ;;  %v6440_v15 = vadd.f32 %v12888_v54, %v12844_v26 }
 0x829   : > { %v6657_v33 = vadd.f32 %v6656_v48, %v6541_v25  ;;  %6587 = vmatmul.f32.gmra.mxu1 %v12827_v59  ;;  %v13818_v59 = vld [vmem:[#allocation79_spill] sm:$0xff]  ;;  %v6671_v18 = vpop.f32.mrf.mxu2  ;;  %vm6932_vm0 = vcmp.ge.s32.totalorder %v6899_v1, 0  ;;  %vm6965_vm8 = vcmp.lt.s32.totalorder %v6899_v1, 1000 }
 0x82a   : > { %vm6998_vm11 = vmand %vm6932_vm0, %vm6965_vm8 }
 0x82b   : > { %v6859_v32 = vadd.f32 %v13815_v0, %v6657_v33 }
 0x82d   : > { %v7092_v4 = vsel %vm6993_vm7, %v6859_v32, 0.0  ;;  %v13826_v32 = vld [vmem:[#allocation87_spill] sm:$0xff]  ;;  %vm6933_vm7 = vcmp.ge.s32.totalorder %v6900_v39, 0 }
 0x82e   : > { %7125 = vst [vmem:[%s7806_s7 + $0x74] sm:$0xff] %v7092_v4  ;;  %v6543_v42 = vpop.f32.mrf.mxu1  ;;  %vm6999_vm3 = vmand %vm6933_vm7, %vm6966_vm2 }
 0x82f   : > { %v6544_v19 = vadd.f32 %v6543_v42, %v6428_v7  ;;  %v6443_v7 = vadd.f32 %v12888_v54, %v12847_v63 }
 0x831   : > { %v6660_v48 = vadd.f32 %v6659_v23, %v6544_v19  ;;  %6590 = vmatmul.f32.gmra.mxu1 %v12834_v40  ;;  %v13820_v40 = vld [vmem:[#allocation81_spill] sm:$0xff]  ;;  %v6674_v20 = vpop.f32.mrf.mxu2 }
 0x833   : > { %v6860_v46 = vadd.f32 %v13818_v59, %v6660_v48  ;;  %v13828_v48 = vld [vmem:[#allocation89_spill] sm:$0xff] }
 0x835   : > { %v7093_v45 = vsel %vm6994_vm9, %v6860_v46, 0.0  ;;  %v13829_v46 = vld [vmem:[#allocation39_spill] sm:$0xff] }
 0x836   : > { %7126 = vst [vmem:[%s7806_s7 + $0x7c] sm:$0xff] %v7093_v45  ;;  %v6546_v30 = vpop.f32.mrf.mxu1  ;;  %v6901_v12 = vadd.s32 %v12883_v11, %v13829_v46 }
 0x837   : > { %v6547_v47 = vadd.f32 %v6546_v30, %v6431_v29 }
 0x838   : > { %vm6934_vm9 = vcmp.ge.s32.totalorder %v6901_v12, 0  ;;  %vm6967_vm15 = vcmp.lt.s32.totalorder %v6901_v12, 1000  ;;  %v13840_v12 = vld [vmem:[#allocation44_spill] sm:$0xff] }
 0x839   : > { %v6663_v23 = vadd.f32 %v6662_v44, %v6547_v47  ;;  %v13822_v44 = vld [vmem:[#allocation83_spill] sm:$0xff]  ;;  %v6677_v43 = vpop.f32.mrf.mxu2  ;;  %vm7000_vm12 = vmand %vm6934_vm9, %vm6967_vm15 }
 0x83b   : > { %v6861_v14 = vadd.f32 %v13820_v40, %v6663_v23  ;;  %v13831_v40 = vld [vmem:[#allocation40_spill] sm:$0xff] }
 0x83d   : > { %v7094_v52 = vsel %vm6995_vm14, %v6861_v14, 0.0  ;;  %v6902_v14 = vadd.s32 %v12883_v11, %v13831_v40  ;;  %v13842_v40 = vld [vmem:[#allocation47_spill] sm:$0xff] }
 0x83e   : > { %7127 = vst [vmem:[%s7806_s7 + $0x84] sm:$0xff] %v7094_v52  ;;  %v6549_v5 = vpop.f32.mrf.mxu1 }
 0x83f   : > { %v6550_v34 = vadd.f32 %v6549_v5, %v6434_v51  ;;  %vm6935_vm14 = vcmp.ge.s32.totalorder %v6902_v14, 0  ;;  %vm6968_vm1 = vcmp.lt.s32.totalorder %v6902_v14, 1000 }
 0x840   : > { %vm7001_vm4 = vmand %vm6935_vm14, %vm6968_vm1 }
 0x841   : > { %v6666_v21 = vadd.f32 %v6665_v24, %v6550_v34  ;;  %v13832_v34 = vld [vmem:[#allocation93_spill] sm:$0xff] }
 0x843   : > { %v6862_v38 = vadd.f32 %v13822_v44, %v6666_v21 }
 0x845   : > { %v7095_v9 = vsel %vm6996_vm5, %v6862_v38, 0.0  ;;  %v6452_v38 = vadd.f32 %v12888_v54, %v12856_v35 }
 0x846   : > { %7128 = vst [vmem:[%s7806_s7 + $0x8c] sm:$0xff] %v7095_v9  ;;  %v6552_v49 = vpop.f32.mrf.mxu1  ;;  %v13834_v9 = vld [vmem:[#allocation95_spill] sm:$0xff] }
 0x847   : > { %v6553_v53 = vadd.f32 %v6552_v49, %v6437_v57 }
 0x849   : > { %v6669_v31 = vadd.f32 %v6668_v37, %v6553_v53  ;;  %v6680_v37 = vpop.f32.mrf.mxu2  ;;  %v13835_v53 = vld [vmem:[#allocation43_spill] sm:$0xff] }
 0x84b   : > { %v6863_v24 = vadd.f32 %v13824_v50, %v6669_v31  ;;  %v6904_v31 = vadd.s32 %v12883_v11, %v13835_v53  ;;  %v13847_v53 = vld [vmem:[#allocation62_spill] sm:$0xff] }
 0x84d   : > { %v7096_v25 = vsel %vm6997_vm13, %v6863_v24, 0.0  ;;  %v6455_v24 = vadd.f32 %v12888_v54, %v12859_v60  ;;  %vm6937_vm13 = vcmp.ge.s32.totalorder %v6904_v31, 0  ;;  %vm6970_vm0 = vcmp.lt.s32.totalorder %v6904_v31, 1000 }
 0x84e   : > { %7129 = vst [vmem:[%s7806_s7 + $0x94] sm:$0xff] %v7096_v25  ;;  %v6555_v6 = vpop.f32.mrf.mxu1  ;;  %vm7003_vm8 = vmand %vm6937_vm13, %vm6970_vm0  ;;  %v6910_v31 = vadd.s32 %v12883_v11, %v13847_v53 }
 0x84f   : > { %v6556_v33 = vadd.f32 %v6555_v6, %v6440_v15  ;;  %v13836_v15 = vld [vmem:[#allocation97_spill] sm:$0xff]  ;;  %v13837_v6 = vld [vmem:[#allocation46_spill] sm:$0xff] }
 0x851   : > { %v6672_v0 = vadd.f32 %v6671_v18, %v6556_v33  ;;  %v6683_v30 = vpop.f32.mrf.mxu2  ;;  %v13830_v18 = vld [vmem:[#allocation91_spill] sm:$0xff]  ;;  %v6905_v33 = vadd.s32 %v12883_v11, %v13837_v6 }
 0x853   : > { %v6864_v22 = vadd.f32 %v13826_v32, %v6672_v0  ;;  %v6458_v0 = vadd.f32 %v12888_v54, %v12862_v17  ;;  %vm6971_vm7 = vcmp.lt.s32.totalorder %v6905_v33, 1000 }
 0x855   : > { %v7097_v4 = vsel %vm6998_vm11, %v6864_v22, 0.0  ;;  %vm6938_vm11 = vcmp.ge.s32.totalorder %v6905_v33, 0  ;;  %v6476_v33 = vadd.f32 %v12888_v54, %v12881_v27 }
 0x856   : > { %7130 = vst [vmem:[%s7806_s7 + $0x9c] sm:$0xff] %v7097_v4  ;;  %v6558_v26 = vpop.f32.mrf.mxu1  ;;  %vm7004_vm2 = vmand %vm6938_vm11, %vm6971_vm7  ;;  %vm6976_vm11 = vcmp.lt.s32.totalorder %v6910_v31, 1000 }
 0x857   : > { %v6559_v42 = vadd.f32 %v6558_v26, %v6443_v7  ;;  %v13838_v7 = vld [vmem:[#allocation42_spill] sm:$0xff] }
 0x859   : > { %v6675_v19 = vadd.f32 %v6674_v20, %v6559_v42  ;;  %v6686_v5 = vpop.f32.mrf.mxu2  ;;  %v13833_v20 = vld [vmem:[#allocation41_spill] sm:$0xff]  ;;  %v6461_v42 = vadd.f32 %v12888_v54, %v12865_v62 }
 0x85a   : > { %v6903_v44 = vadd.s32 %v12883_v11, %v13833_v20  ;;  %v13845_v20 = vld [vmem:[#allocation58_spill] sm:$0xff] }
 0x85b   : > { %v6865_v59 = vadd.f32 %v13828_v48, %v6675_v19 }
 0x85c   : > { %vm6936_vm5 = vcmp.ge.s32.totalorder %v6903_v44, 0  ;;  %vm6969_vm10 = vcmp.lt.s32.totalorder %v6903_v44, 1000  ;;  %v6909_v44 = vadd.s32 %v12883_v11, %v13845_v20 }
 0x85d   : > { %v7098_v29 = vsel %vm6999_vm3, %v6865_v59, 0.0  ;;  %vm7002_vm6 = vmand %vm6936_vm5, %vm6969_vm10 }
 0x85e   : > { %7131 = vst [vmem:[%s7806_s7 + $0xa4] sm:$0xff] %v7098_v29  ;;  %v6561_v63 = vpop.f32.mrf.mxu1  ;;  %v13841_v29 = vld [vmem:[#allocation52_spill] sm:$0xff]  ;;  %vm6975_vm13 = vcmp.lt.s32.totalorder %v6909_v44, 1000 }
 0x85f   : > { %v6562_v45 = vadd.f32 %v6561_v63, %v6446_v58  ;;  %v6907_v63 = vadd.s32 %v12883_v11, %v13841_v29 }
 0x861   : > { %v6678_v47 = vadd.f32 %v6677_v43, %v6562_v45  ;;  %v6689_v50 = vpop.f32.mrf.mxu2  ;;  %v6464_v45 = vadd.f32 %v12888_v54, %v12868_v16  ;;  %vm6973_vm14 = vcmp.lt.s32.totalorder %v6907_v63, 1000 }
 0x863   : > { %v6866_v23 = vadd.f32 %v13830_v18, %v6678_v47 }
 0x865   : > { %v7099_v13 = vsel %vm7000_vm12, %v6866_v23, 0.0  ;;  %vm6940_vm12 = vcmp.ge.s32.totalorder %v6907_v63, 0 }
 0x866   : > { %7132 = vst [vmem:[%s7806_s7 + $0xac] sm:$0xff] %v7099_v13  ;;  %v6564_v10 = vpop.f32.mrf.mxu1  ;;  %vm7006_vm1 = vmand %vm6940_vm12, %vm6973_vm14 }
 0x867   : > { %v6565_v51 = vadd.f32 %v6564_v10, %v6449_v2  ;;  %v13843_v2 = vld [vmem:[#allocation55_spill] sm:$0xff]  ;;  %v6467_v10 = vadd.f32 %v12888_v54, %v12871_v56 }
 0x868   : > { %v6908_v13 = vadd.s32 %v12883_v11, %v13843_v2 }
 0x869   : > { %v6681_v52 = vadd.f32 %v6680_v37, %v6565_v51  ;;  %v6692_v22 = vpop.f32.mrf.mxu2  ;;  %v13839_v37 = vld [vmem:[#allocation49_spill] sm:$0xff] }
 0x86a   : > { %v6906_v26 = vadd.s32 %v12883_v11, %v13839_v37  ;;  %vm6974_vm5 = vcmp.lt.s32.totalorder %v6908_v13, 1000 }
 0x86b   : > { %v6867_v21 = vadd.f32 %v13832_v34, %v6681_v52  ;;  %v13844_v34 = vld [vmem:[#allocation53_spill] sm:$0xff] }
 0x86c   : > { %vm6939_vm3 = vcmp.ge.s32.totalorder %v6906_v26, 0  ;;  %vm6972_vm9 = vcmp.lt.s32.totalorder %v6906_v26, 1000 }
 0x86d   : > { %v7100_v8 = vsel %vm7001_vm4, %v6867_v21, 0.0  ;;  %vm7005_vm15 = vmand %vm6939_vm3, %vm6972_vm9  ;;  %vm6941_vm4 = vcmp.ge.s32.totalorder %v6908_v13, 0 }
 0x86e   : > { %7133 = vst [vmem:[%s7806_s7 + $0xb4] sm:$0xff] %v7100_v8  ;;  %v6567_v41 = vpop.f32.mrf.mxu1  ;;  %vm7007_vm10 = vmand %vm6941_vm4, %vm6974_vm5  ;;  %v6470_v8 = vadd.f32 %v12888_v54, %v12874_v55 }
 0x86f   : > { %v6568_v3 = vadd.f32 %v6567_v41, %v6452_v38 }
 0x871   : > { %v6684_v57 = vadd.f32 %v6683_v30, %v6568_v3  ;;  %v6695_v59 = vpop.f32.mrf.mxu2 }
 0x873   : > { %v6868_v49 = vadd.f32 %v13834_v9, %v6684_v57  ;;  %v13846_v9 = vld [vmem:[#allocation23_spill] sm:$0xff] }
 0x875   : > { %v7101_v36 = vsel %vm7002_vm6, %v6868_v49, 0.0  ;;  %vm6942_vm6 = vcmp.ge.s32.totalorder %v6909_v44, 0 }
 0x876   : > { %7134 = vst [vmem:[%s7806_s7 + $0xbc] sm:$0xff] %v7101_v36  ;;  %v6570_v35 = vpop.f32.mrf.mxu1  ;;  %vm7008_vm0 = vmand %vm6942_vm6, %vm6975_vm13 }
 0x877   : > { %v6571_v1 = vadd.f32 %v6570_v35, %v6455_v24 }
 0x879   : > { %v6687_v43 = vadd.f32 %v6686_v5, %v6571_v1  ;;  %v6698_v23 = vpop.f32.mrf.mxu2 }
 0x87b   : > { %v6869_v25 = vadd.f32 %v13836_v15, %v6687_v43  ;;  %v13848_v43 = vld [vmem:[#allocation27_spill] sm:$0xff] }
 0x87d   : > { %v7102_v32 = vsel %vm7003_vm8, %v6869_v25, 0.0  ;;  %vm6943_vm8 = vcmp.ge.s32.totalorder %v6910_v31, 0  ;;  %v13849_v25 = vld [vmem:[#allocation63_spill] sm:$0xff] }
 0x87e   : > { %7135 = vst [vmem:[%s7806_s7 + $0xc4] sm:$0xff] %v7102_v32  ;;  %v6573_v60 = vpop.f32.mrf.mxu1  ;;  %vm7009_vm7 = vmand %vm6943_vm8, %vm6976_vm11  ;;  %v6911_v6 = vadd.s32 %v12883_v11, %v13849_v25 }
 0x87f   : > { %v6574_v61 = vadd.f32 %v6573_v60, %v6458_v0 }
 0x880   : > { %vm6977_vm3 = vcmp.lt.s32.totalorder %v6911_v6, 1000 }
 0x881   : > { %v6690_v39 = vadd.f32 %v6689_v50, %v6574_v61  ;;  %v6701_v38 = vpop.f32.mrf.mxu2  ;;  %v6473_v50 = vadd.f32 %v12888_v54, %v12877_v28  ;;  %v13850_v61 = vld [vmem:[#allocation29_spill] sm:$0xff] }
 0x883   : > { %v6870_v4 = vadd.f32 %v13838_v7, %v6690_v39 }
 0x885   : > { %v7103_v19 = vsel %vm7004_vm2, %v6870_v4, 0.0  ;;  %vm6944_vm2 = vcmp.ge.s32.totalorder %v6911_v6, 0 }
 0x886   : > { %7136 = vst [vmem:[%s7806_s7 + $0xcc] sm:$0xff] %v7103_v19  ;;  %v6576_v17 = vpop.f32.mrf.mxu1  ;;  %vm7010_vm9 = vmand %vm6944_vm2, %vm6977_vm3 }
 0x887   : > { %v6577_v48 = vadd.f32 %v6576_v17, %v6461_v42 }
 0x889   : > { %v6693_v46 = vadd.f32 %v6692_v22, %v6577_v48  ;;  %v6704_v36 = vpop.f32.mrf.mxu2 }
 0x88b   : > { %v6871_v58 = vadd.f32 %v13840_v12, %v6693_v46 }
 0x88d   : > { %v7104_v30 = vsel %vm7005_vm15, %v6871_v58, 0.0 }
 0x88e   : > { %7137 = vst [vmem:[%s7806_s7 + $0xd4] sm:$0xff] %v7104_v30  ;;  %v6579_v62 = vpop.f32.mrf.mxu1 }
 0x88f   : > { %v6580_v47 = vadd.f32 %v6579_v62, %v6464_v45 }
 0x891   : > { %v6696_v18 = vadd.f32 %v6695_v59, %v6580_v47  ;;  %v6707_v22 = vpop.f32.mrf.mxu2 }
 0x893   : > { %v6872_v14 = vadd.f32 %v13842_v40, %v6696_v18 }
 0x895   : > { %v7105_v51 = vsel %vm7006_vm1, %v6872_v14, 0.0 }
 0x896   : > { %7138 = vst [vmem:[%s7806_s7 + $0xdc] sm:$0xff] %v7105_v51  ;;  %v6582_v16 = vpop.f32.mrf.mxu1 }
 0x897   : > { %v6583_v52 = vadd.f32 %v6582_v16, %v6467_v10 }
 0x899   : > { %v6699_v5 = vadd.f32 %v6698_v23, %v6583_v52 }
 0x89b   : > { %v6873_v21 = vadd.f32 %v13844_v34, %v6699_v5 }
 0x89d   : > { %v7106_v41 = vsel %vm7007_vm10, %v6873_v21, 0.0 }
 0x89e   : > { %7139 = vst [vmem:[%s7806_s7 + $0xe4] sm:$0xff] %v7106_v41  ;;  %v6585_v56 = vpop.f32.mrf.mxu1 }
 0x89f   : > { %v6586_v3 = vadd.f32 %v6585_v56, %v6470_v8 }
 0x8a1   : > { %v6702_v57 = vadd.f32 %v6701_v38, %v6586_v3 }
 0x8a3   : > { %v6874_v49 = vadd.f32 %v13846_v9, %v6702_v57 }
 0x8a5   : > { %v7107_v24 = vsel %vm7008_vm0, %v6874_v49, 0.0 }
 0x8a6   : > { %7140 = vst [vmem:[%s7806_s7 + $0xec] sm:$0xff] %v7107_v24  ;;  %v6588_v55 = vpop.f32.mrf.mxu1 }
 0x8a7   : > { %v6589_v35 = vadd.f32 %v6588_v55, %v6473_v50 }
 0x8a9   : > { %v6705_v1 = vadd.f32 %v6704_v36, %v6589_v35 }
 0x8ab   : > { %v6875_v15 = vadd.f32 %v13848_v43, %v6705_v1 }
 0x8ad   : > { %v7108_v0 = vsel %vm7009_vm7, %v6875_v15, 0.0 }
 0x8ae   : > { %7141 = vst [vmem:[%s7806_s7 + $0xf4] sm:$0xff] %v7108_v0  ;;  %v6591_v28 = vpop.f32.mrf.mxu1 }
 0x8af   : > { %v6592_v32 = vadd.f32 %v6591_v28, %v6476_v33 }
 0x8b1   : > { %v6708_v60 = vadd.f32 %v6707_v22, %v6592_v32 }
 0x8b3   : > { %v6876_v39 = vadd.f32 %v13850_v61, %v6708_v60 }
 0x8b5   : > { %v7109_v7 = vsel %vm7010_vm9, %v6876_v39, 0.0 }
 0x8b6   : > { %7142 = vst [vmem:[%s7806_s7 + $0xfc] sm:$0xf] %v7109_v7 }
 0x8b7 PF: > { %s15_s22 = sadd.s32 1, %s7734_s22   ;;  %s13851_s18 = smov %s7726_s20 }
 0x8b8   : > { %p12_p0 = scmp.ge.s32.totalorder %s15_s22, 10   ;;  %s13852_s19 = smov %s7730_s21 }
 0x8b9   : > { %s13853_s20 = smov %s13856_s23  ;;  %s13854_s21 = smov %s13860_s24 }
 0x8ba   :  { %14 = sbr.rel (!%p12_p0) target bundleno = 3 (0x3), region = 132 }
 0x8bf   :  { %7173 = vsyncmov [#allocation3] }
 0x8c2   :  { %s7174_s7 = vpop.sfrf %7173 }
 0x8c3   :  { %p7570_p1 = scmp.ne.s32.totalorder %s7174_s7, 0 }
 0x8c5   :  { %7178 = shalt.err (%p7570_p1)  }
 0x8c6   :  { %7180 = vsyncmov [#allocation3 + $0x1] }
 0x8c9   :  { %s7181_s14 = vpop.sfrf %7180 }
 0x8ca   :  { %p7571_p2 = scmp.ne.s32.totalorder %s7181_s14, 0 }
 0x8cc   :  { %7185 = shalt.err (%p7571_p2)  }

</bundles_post_ra>
